<compile_context>
chip_gen: v7x
topology: tpu7x:2x2x1
jax: 0.10.0
libtpu: 0.0.40
codegen_flags: <defaults>
</compile_context>

<pallas_src>
import jax
import jax.numpy as jnp
from jax.experimental import pallas as pl
from jax.experimental.pallas import tpu as pltpu

# ----------------------------- configuration -------------------------------
B, S, H = 2, 8, 128          # batch, sequence, hidden
T = B * S                    # total tokens
NH, DH = 4, 32               # heads, head dim (NH * DH == H)
INTER = 256                  # FFN intermediate size
VOCAB = 64
MAXPOS = 32
NUM_LABELS = 4
CLS_PAD = 128                # classifier output padded to lane-dense width
NUM_LAYERS = 2
LN_EPS = 1e-12               # HF BERT LayerNorm eps
NEG_INF = float(jnp.finfo(jnp.float32).min)


def _vmem():
    return pl.BlockSpec(memory_space=pltpu.MemorySpace.VMEM)


def _smem():
    return pl.BlockSpec(memory_space=pltpu.MemorySpace.SMEM)


# --------------------------- in-kernel helpers ------------------------------
def _ln(x, g, b):
    mean = jnp.mean(x, axis=-1, keepdims=True)
    c = x - mean
    var = jnp.mean(c * c, axis=-1, keepdims=True)
    return c * jax.lax.rsqrt(var + LN_EPS) * g + b


def _gelu(x):                 # exact (erf) GELU, as in HF BERT
    return 0.5 * x * (1.0 + jax.lax.erf(x * (1.0 / jnp.sqrt(2.0))))


# ------- kernel 1: LayerNorm of both embedding-copy sums (no residual) ------
def _emb_dual_ln_kernel(xo_ref, xf_ref, go_ref, bo_ref, gf_ref, bf_ref,
                        yo_ref, yf_ref):
    yo_ref[...] = _ln(xo_ref[...], go_ref[...], bo_ref[...])
    yf_ref[...] = _ln(xf_ref[...], gf_ref[...], bf_ref[...])


def embeddings_dual_ln(xo, xf, go, bo, gf, bf):
    return pl.pallas_call(
        _emb_dual_ln_kernel,
        out_shape=(jax.ShapeDtypeStruct((T, H), jnp.float32),
                   jax.ShapeDtypeStruct((T, H), jnp.float32)),
        in_specs=[_vmem()] * 6,
        out_specs=(_vmem(), _vmem()),
    )(xo, xf, go, bo, gf, bf)


# ------- kernel 2: one fused encoder layer for BOTH copies + alpha blend -----
def _layer_pair_kernel(alpha_ref, xo_ref, xf_ref, mask_ref,
                       wqkv_ref, bqkv_ref, wo_ref, bo_ref,
                       ln1g_ref, ln1b_ref, wi_ref, bi_ref,
                       wd_ref, bd_ref, ln2g_ref, ln2b_ref,
                       o_ref, qkv_scr, ctx_scr):
    scale = 1.0 / (DH ** 0.5)
    mask = mask_ref[...]                                   # (T, T) additive
    x_in = (xo_ref[...], xf_ref[...])
    outs = []
    for c in range(2):                                     # 0 = opti, 1 = frozen
        x = x_in[c]                                        # (T, H)
        # Fused QKV projection: one [T,H] @ [H,3H] MXU push.
        qkv_scr[...] = (jnp.dot(x, wqkv_ref[c],
                                preferred_element_type=jnp.float32)
                        + bqkv_ref[c])
        # Single-shot masked attention; heads unrolled (NH=4), the context is
        # written lane-dense straight into a [T, H] scratch (no head
        # transposes, no per-head grid).
        for h in range(NH):
            q = qkv_scr[:, h * DH:(h + 1) * DH]
            k = qkv_scr[:, H + h * DH:H + (h + 1) * DH]
            v = qkv_scr[:, 2 * H + h * DH:2 * H + (h + 1) * DH]
            s = jnp.dot(q, k.T, preferred_element_type=jnp.float32) * scale
            s = s + mask
            s = s - jnp.max(s, axis=-1, keepdims=True)
            p = jnp.exp(s)
            p = p / jnp.sum(p, axis=-1, keepdims=True)
            ctx_scr[:, h * DH:(h + 1) * DH] = jnp.dot(
                p, v, preferred_element_type=jnp.float32)
        # O-projection + residual + LN1 as a fused epilogue.
        attn_out = (jnp.dot(ctx_scr[...], wo_ref[c],
                            preferred_element_type=jnp.float32) + bo_ref[c])
        x1 = _ln(attn_out + x, ln1g_ref[c], ln1b_ref[c])
        # FFN: intermediate + exact GELU, down-proj + residual + LN2.
        inter = _gelu(jnp.dot(x1, wi_ref[c],
                              preferred_element_type=jnp.float32) + bi_ref[c])
        ffn = (jnp.dot(inter, wd_ref[c],
                       preferred_element_type=jnp.float32) + bd_ref[c])
        outs.append(_ln(ffn + x1, ln2g_ref[c], ln2b_ref[c]))
    # sigmoid(alpha) blend epilogue (opti vs frozen).
    a = jax.nn.sigmoid(alpha_ref[0])
    o_ref[...] = a * outs[0] + (1.0 - a) * outs[1]


def bert_layer_pair(alpha, x_opti, x_frozen, mask_tt, lp):
    return pl.pallas_call(
        _layer_pair_kernel,
        out_shape=jax.ShapeDtypeStruct((T, H), jnp.float32),
        in_specs=[_smem()] + [_vmem()] * 15,
        out_specs=_vmem(),
        scratch_shapes=[pltpu.VMEM((T, 3 * H), jnp.float32),
                        pltpu.VMEM((T, H), jnp.float32)],
    )(alpha, x_opti, x_frozen, mask_tt,
      lp["wqkv"], lp["bqkv"], lp["wo"], lp["bo"],
      lp["ln1_g"], lp["ln1_b"], lp["wi"], lp["bi"],
      lp["wd"], lp["bd"], lp["ln2_g"], lp["ln2_b"])


# ------- kernel 3: pooler + classifier for BOTH copies + both blends ---------
def _head_pair_kernel(alpha_ref, cls_ref, pw_ref, pb_ref, cw_ref, cb_ref,
                      o_ref):
    x = cls_ref[...]                                       # (B, H)
    pooled = [jnp.tanh(jnp.dot(x, pw_ref[c],
                               preferred_element_type=jnp.float32) + pb_ref[c])
              for c in range(2)]
    a_pool = jax.nn.sigmoid(alpha_ref[0])
    xp = a_pool * pooled[0] + (1.0 - a_pool) * pooled[1]
    # TODO(synk): nn.Dropout between pooler and classifier is identity in eval.
    logits = [jnp.dot(xp, cw_ref[c],
                      preferred_element_type=jnp.float32) + cb_ref[c]
              for c in range(2)]
    a_cls = jax.nn.sigmoid(alpha_ref[1])
    o_ref[...] = a_cls * logits[0] + (1.0 - a_cls) * logits[1]


def pooler_classifier_pair(alpha_pc, cls_tok, pw, pb, cw, cb):
    out = pl.pallas_call(
        _head_pair_kernel,
        out_shape=jax.ShapeDtypeStruct((B, CLS_PAD), jnp.float32),
        in_specs=[_smem()] + [_vmem()] * 5,
        out_specs=_vmem(),
    )(alpha_pc, cls_tok, pw, pb, cw, cb)
    return out[:, :NUM_LABELS]          # drop the lane padding (zeros)


# ----------------------- parameter fusion (one-time) -------------------------
def _fuse_layer(lo, lf):
    stk = lambda a, b: jnp.stack([a, b], axis=0)
    wqkv = stk(jnp.concatenate([lo["wq"], lo["wk"], lo["wv"]], axis=1),
               jnp.concatenate([lf["wq"], lf["wk"], lf["wv"]], axis=1))
    bqkv = stk(jnp.concatenate([lo["bq"], lo["bk"], lo["bv"]]),
               jnp.concatenate([lf["bq"], lf["bk"], lf["bv"]]))
    return dict(
        wqkv=wqkv,                                   # (2, H, 3H)
        bqkv=bqkv.reshape(2, 1, 3 * H),
        wo=stk(lo["wo"], lf["wo"]),
        bo=stk(lo["bo"], lf["bo"]).reshape(2, 1, H),
        ln1_g=stk(lo["ln1_g"], lf["ln1_g"]).reshape(2, 1, H),
        ln1_b=stk(lo["ln1_b"], lf["ln1_b"]).reshape(2, 1, H),
        wi=stk(lo["wi"], lf["wi"]),
        bi=stk(lo["bi"], lf["bi"]).reshape(2, 1, INTER),
        wd=stk(lo["wd"], lf["wd"]),
        bd=stk(lo["bd"], lf["bd"]).reshape(2, 1, H),
        ln2_g=stk(lo["ln2_g"], lf["ln2_g"]).reshape(2, 1, H),
        ln2_b=stk(lo["ln2_b"], lf["ln2_b"]).reshape(2, 1, H),
    )


def fuse_params(po, pf):
    pad_w = lambda w: jnp.pad(w, ((0, 0), (0, CLS_PAD - NUM_LABELS)))
    pad_b = lambda b: jnp.pad(b, (0, CLS_PAD - NUM_LABELS))
    return dict(
        word_emb_o=po["word_emb"], pos_emb_o=po["pos_emb"],
        type_emb_o=po["type_emb"],
        word_emb_f=pf["word_emb"], pos_emb_f=pf["pos_emb"],
        type_emb_f=pf["type_emb"],
        emb_ln_g_o=po["emb_ln_g"].reshape(1, H),
        emb_ln_b_o=po["emb_ln_b"].reshape(1, H),
        emb_ln_g_f=pf["emb_ln_g"].reshape(1, H),
        emb_ln_b_f=pf["emb_ln_b"].reshape(1, H),
        layers=[_fuse_layer(po["layers"][i], pf["layers"][i])
                for i in range(NUM_LAYERS)],
        pooler_w=jnp.stack([po["pooler_w"], pf["pooler_w"]]),
        pooler_b=jnp.stack([po["pooler_b"], pf["pooler_b"]]).reshape(2, 1, H),
        cls_w=jnp.stack([pad_w(po["cls_w"]), pad_w(pf["cls_w"])]),
        cls_b=jnp.stack([pad_b(po["cls_b"]),
                         pad_b(pf["cls_b"])]).reshape(2, 1, CLS_PAD),
    )


# ---------------------- SurgicalFineTuningBert forward ----------------------
def _embed_sum(word_emb, pos_emb, type_emb, input_ids):
    # Embedding gathers / broadcast adds are XLA glue.
    we = jnp.take(word_emb, input_ids, axis=0)             # (B, S, H)
    pe = pos_emb[:S][None, :, :]                           # positions 0..S-1
    te = type_emb[0][None, None, :]                        # token_type_ids == 0
    return (we + pe + te).reshape(T, H).astype(jnp.float32)


def surgical_forward(fp, alphas, input_ids, attention_mask):
    # get_extended_attention_mask: (1 - mask) * dtype_min, additive over keys.
    # Folded into one (T, T) block-diagonal mask (-inf across batches) so a
    # single joint softmax over all tokens is exactly equal to the per-batch
    # softmax of the reference.
    ext = (1.0 - attention_mask.astype(jnp.float32)) * NEG_INF    # (B, S)
    batch_id = jnp.repeat(jnp.arange(B), S)                       # (T,)
    same_batch = batch_id[:, None] == batch_id[None, :]           # (T, T)
    mask_tt = jnp.where(same_batch, ext.reshape(T)[None, :],
                        -jnp.inf).astype(jnp.float32)

    # Both embedding copies, LayerNorm fused in one kernel.  NOTE: the blended
    # embedding (sigmoid(alphas[0]) mix) is never consumed by the reference
    # forward when there is >=1 encoder layer (x is overwritten at i==0), so
    # it is not computed.
    xo = _embed_sum(fp["word_emb_o"], fp["pos_emb_o"], fp["type_emb_o"],
                    input_ids)
    xf = _embed_sum(fp["word_emb_f"], fp["pos_emb_f"], fp["type_emb_f"],
                    input_ids)
    x_opti, x_frozen = embeddings_dual_ln(
        xo, xf, fp["emb_ln_g_o"], fp["emb_ln_b_o"],
        fp["emb_ln_g_f"], fp["emb_ln_b_f"])

    # Encoder: one fused pallas_call per layer runs both copies + the blend.
    # Alpha slicing mirrors the PyTorch module: layer i uses alphas[:-2][i]
    # (so alphas[0] is shared with the embedding blend, as in the reference).
    x = None
    for i in range(NUM_LAYERS):
        if i > 0:
            x_opti = x
            x_frozen = x
        x = bert_layer_pair(alphas[i:i + 1], x_opti, x_frozen, mask_tt,
                            fp["layers"][i])

    # Pooler ([CLS] token) + classifier, both copies + both blends, one kernel.
    cls_tok = x.reshape(B, S, H)[:, 0, :]
    return pooler_classifier_pair(alphas[-2:], cls_tok,
                                  fp["pooler_w"], fp["pooler_b"],
                                  fp["cls_w"], fp["cls_b"])


# ----------------------------- parameter init -------------------------------
def _init_layer(key):
    ks = jax.random.split(key, 6)
    w = lambda k, shape: (jax.random.normal(k, shape, jnp.float32) * 0.02)
    z = lambda n: jnp.zeros((n,), jnp.float32)
    return dict(
        wq=w(ks[0], (H, H)), bq=z(H),
        wk=w(ks[1], (H, H)), bk=z(H),
        wv=w(ks[2], (H, H)), bv=z(H),
        wo=w(ks[3], (H, H)), bo=z(H),
        ln1_g=jnp.ones((H,), jnp.float32), ln1_b=z(H),
        wi=w(ks[4], (H, INTER)), bi=z(INTER),
        wd=w(ks[5], (INTER, H)), bd=z(H),
        ln2_g=jnp.ones((H,), jnp.float32), ln2_b=z(H),
    )


def init_bert(key):
    ks = jax.random.split(key, NUM_LAYERS + 5)
    w = lambda k, shape: (jax.random.normal(k, shape, jnp.float32) * 0.02)
    z = lambda n: jnp.zeros((n,), jnp.float32)
    return dict(
        word_emb=w(ks[0], (VOCAB, H)),
        pos_emb=w(ks[1], (MAXPOS, H)),
        type_emb=w(ks[2], (2, H)),
        emb_ln_g=jnp.ones((H,), jnp.float32), emb_ln_b=z(H),
        layers=[_init_layer(ks[3 + i]) for i in range(NUM_LAYERS)],
        pooler_w=w(ks[3 + NUM_LAYERS], (H, H)), pooler_b=z(H),
        cls_w=w(ks[4 + NUM_LAYERS], (H, NUM_LABELS)), cls_b=z(NUM_LABELS),
    )


# ---------------------------------- main -------------------------------------
if __name__ == "__main__":
    key = jax.random.PRNGKey(0)
    k_opti, k_frozen, k_alpha, k_ids = jax.random.split(key, 4)

    p_opti = init_bert(k_opti)
    p_frozen = init_bert(k_frozen)   # distinct synthetic "frozen" copy
    # 'bert-small' / 'bert-med' branch: len(layers) + 3 alphas
    alphas = 0.1 * jax.random.normal(k_alpha, (NUM_LAYERS + 3,), jnp.float32)

    # One-time weight fusion (QKV concat, opti/frozen stacking, classifier
    # lane padding) — done outside the jitted forward.
    fp = fuse_params(p_opti, p_frozen)

    input_ids = jax.random.randint(k_ids, (B, S), 0, VOCAB, dtype=jnp.int32)
    attention_mask = jnp.array(
        [[1] * S, [1] * (S - 3) + [0] * 3], dtype=jnp.int32)  # batch 1 padded

    fwd = jax.jit(surgical_forward)
    logits = fwd(fp, alphas, input_ids, attention_mask)
    logits = jax.block_until_ready(logits)
    assert logits.shape == (B, NUM_LABELS)
    assert bool(jnp.all(jnp.isfinite(logits)))
    print("KERNEL_OK")
</pallas_src>

<mosaic_0001>
module attributes {stable_mosaic.version = 11 : i64} {
  func.func @_emb_dual_ln_kernel(%arg0: memref<16x128xf32, #tpu.memory_space<vmem>>, %arg1: memref<16x128xf32, #tpu.memory_space<vmem>>, %arg2: memref<1x128xf32, #tpu.memory_space<vmem>>, %arg3: memref<1x128xf32, #tpu.memory_space<vmem>>, %arg4: memref<1x128xf32, #tpu.memory_space<vmem>>, %arg5: memref<1x128xf32, #tpu.memory_space<vmem>>, %arg6: memref<16x128xf32, #tpu.memory_space<vmem>>, %arg7: memref<16x128xf32, #tpu.memory_space<vmem>>) attributes {dimension_semantics = [], scalar_prefetch = 0 : i64, scratch_operands = 0 : i64, tpu.core_type = #tpu.core_type<tc>} {
    %c0 = arith.constant 0 : index
    %c0_0 = arith.constant 0 : index
    %0 = vector.load %arg0[%c0, %c0_0] : memref<16x128xf32, #tpu.memory_space<vmem>>, vector<16x128xf32>
    %c0_1 = arith.constant 0 : index
    %c0_2 = arith.constant 0 : index
    %1 = vector.load %arg2[%c0_1, %c0_2] : memref<1x128xf32, #tpu.memory_space<vmem>>, vector<1x128xf32>
    %c0_3 = arith.constant 0 : index
    %c0_4 = arith.constant 0 : index
    %2 = vector.load %arg3[%c0_3, %c0_4] : memref<1x128xf32, #tpu.memory_space<vmem>>, vector<1x128xf32>
    %cst = arith.constant dense<0.000000e+00> : vector<16xf32>
    %3 = vector.multi_reduction <add>, %0, %cst [1] : vector<16x128xf32> to vector<16xf32>
    %4 = vector.shape_cast %3 : vector<16xf32> to vector<16x1xf32>
    %cst_5 = arith.constant 1.280000e+02 : f32
    %5 = vector.broadcast %cst_5 : f32 to vector<16x1xf32>
    %6 = arith.divf %4, %5 : vector<16x1xf32>
    %7 = vector.broadcast %6 : vector<16x1xf32> to vector<16x128xf32>
    %8 = arith.subf %0, %7 : vector<16x128xf32>
    %9 = arith.mulf %8, %8 : vector<16x128xf32>
    %cst_6 = arith.constant dense<0.000000e+00> : vector<16xf32>
    %10 = vector.multi_reduction <add>, %9, %cst_6 [1] : vector<16x128xf32> to vector<16xf32>
    %11 = vector.shape_cast %10 : vector<16xf32> to vector<16x1xf32>
    %cst_7 = arith.constant 1.280000e+02 : f32
    %12 = vector.broadcast %cst_7 : f32 to vector<16x1xf32>
    %13 = arith.divf %11, %12 : vector<16x1xf32>
    %cst_8 = arith.constant 9.99999996E-13 : f32
    %14 = vector.broadcast %cst_8 : f32 to vector<16x1xf32>
    %15 = arith.addf %13, %14 : vector<16x1xf32>
    %16 = math.rsqrt %15 : vector<16x1xf32>
    %17 = vector.broadcast %16 : vector<16x1xf32> to vector<16x128xf32>
    %18 = arith.mulf %8, %17 : vector<16x128xf32>
    %19 = vector.broadcast %1 : vector<1x128xf32> to vector<16x128xf32>
    %20 = arith.mulf %18, %19 : vector<16x128xf32>
    %21 = vector.broadcast %2 : vector<1x128xf32> to vector<16x128xf32>
    %22 = arith.addf %20, %21 : vector<16x128xf32>
    %c0_9 = arith.constant 0 : index
    %c0_10 = arith.constant 0 : index
    %23 = vector.load %arg6[%c0_9, %c0_10] : memref<16x128xf32, #tpu.memory_space<vmem>>, vector<16x128xf32>
    tpu.vector_store %arg6[%c0_9, %c0_10], %22 {strides = array<i32>} : memref<16x128xf32, #tpu.memory_space<vmem>>, vector<16x128xf32>,
    %c0_11 = arith.constant 0 : index
    %c0_12 = arith.constant 0 : index
    %24 = vector.load %arg1[%c0_11, %c0_12] : memref<16x128xf32, #tpu.memory_space<vmem>>, vector<16x128xf32>
    %c0_13 = arith.constant 0 : index
    %c0_14 = arith.constant 0 : index
    %25 = vector.load %arg4[%c0_13, %c0_14] : memref<1x128xf32, #tpu.memory_space<vmem>>, vector<1x128xf32>
    %c0_15 = arith.constant 0 : index
    %c0_16 = arith.constant 0 : index
    %26 = vector.load %arg5[%c0_15, %c0_16] : memref<1x128xf32, #tpu.memory_space<vmem>>, vector<1x128xf32>
    %cst_17 = arith.constant dense<0.000000e+00> : vector<16xf32>
    %27 = vector.multi_reduction <add>, %24, %cst_17 [1] : vector<16x128xf32> to vector<16xf32>
    %28 = vector.shape_cast %27 : vector<16xf32> to vector<16x1xf32>
    %cst_18 = arith.constant 1.280000e+02 : f32
    %29 = vector.broadcast %cst_18 : f32 to vector<16x1xf32>
    %30 = arith.divf %28, %29 : vector<16x1xf32>
    %31 = vector.broadcast %30 : vector<16x1xf32> to vector<16x128xf32>
    %32 = arith.subf %24, %31 : vector<16x128xf32>
    %33 = arith.mulf %32, %32 : vector<16x128xf32>
    %cst_19 = arith.constant dense<0.000000e+00> : vector<16xf32>
    %34 = vector.multi_reduction <add>, %33, %cst_19 [1] : vector<16x128xf32> to vector<16xf32>
    %35 = vector.shape_cast %34 : vector<16xf32> to vector<16x1xf32>
    %cst_20 = arith.constant 1.280000e+02 : f32
    %36 = vector.broadcast %cst_20 : f32 to vector<16x1xf32>
    %37 = arith.divf %35, %36 : vector<16x1xf32>
    %cst_21 = arith.constant 9.99999996E-13 : f32
    %38 = vector.broadcast %cst_21 : f32 to vector<16x1xf32>
    %39 = arith.addf %37, %38 : vector<16x1xf32>
    %40 = math.rsqrt %39 : vector<16x1xf32>
    %41 = vector.broadcast %40 : vector<16x1xf32> to vector<16x128xf32>
    %42 = arith.mulf %32, %41 : vector<16x128xf32>
    %43 = vector.broadcast %25 : vector<1x128xf32> to vector<16x128xf32>
    %44 = arith.mulf %42, %43 : vector<16x128xf32>
    %45 = vector.broadcast %26 : vector<1x128xf32> to vector<16x128xf32>
    %46 = arith.addf %44, %45 : vector<16x128xf32>
    %c0_22 = arith.constant 0 : index
    %c0_23 = arith.constant 0 : index
    %47 = vector.load %arg7[%c0_22, %c0_23] : memref<16x128xf32, #tpu.memory_space<vmem>>, vector<16x128xf32>
    tpu.vector_store %arg7[%c0_22, %c0_23], %46 {strides = array<i32>} : memref<16x128xf32, #tpu.memory_space<vmem>>, vector<16x128xf32>,
    return
  }
}

module attributes {stable_mosaic.version = 11 : i64} {
  func.func @_head_pair_kernel(%arg0: memref<2xf32, #tpu.memory_space<smem>>, %arg1: memref<2x128xf32, #tpu.memory_space<vmem>>, %arg2: memref<2x128x128xf32, #tpu.memory_space<vmem>>, %arg3: memref<2x1x128xf32, #tpu.memory_space<vmem>>, %arg4: memref<2x128x128xf32, #tpu.memory_space<vmem>>, %arg5: memref<2x1x128xf32, #tpu.memory_space<vmem>>, %arg6: memref<2x128xf32, #tpu.memory_space<vmem>>) attributes {dimension_semantics = [], scalar_prefetch = 0 : i64, scratch_operands = 0 : i64, tpu.core_type = #tpu.core_type<tc>} {
    %c0 = arith.constant 0 : index
    %c0_0 = arith.constant 0 : index
    %0 = vector.load %arg1[%c0, %c0_0] : memref<2x128xf32, #tpu.memory_space<vmem>>, vector<2x128xf32>
    %c0_1 = arith.constant 0 : index
    %c0_2 = arith.constant 0 : index
    %c0_3 = arith.constant 0 : index
    %1 = vector.load %arg2[%c0_1, %c0_2, %c0_3] : memref<2x128x128xf32, #tpu.memory_space<vmem>>, vector<1x128x128xf32>
    %2 = vector.shape_cast %1 : vector<1x128x128xf32> to vector<128x128xf32>
    %cst = arith.constant dense<0.000000e+00> : vector<2x128xf32>
    %3 = tpu.matmul %0, %2, %cst {dimension_numbers = #tpu.dot_dimension_numbers<[1], [0], [0], [1], [0, 0, 1, 1], [], []>} : vector<2x128xf32>, vector<128x128xf32>, vector<2x128xf32> -> vector<2x128xf32>
    %c0_4 = arith.constant 0 : index
    %c0_5 = arith.constant 0 : index
    %c0_6 = arith.constant 0 : index
    %4 = vector.load %arg3[%c0_4, %c0_5, %c0_6] : memref<2x1x128xf32, #tpu.memory_space<vmem>>, vector<1x1x128xf32>
    %5 = vector.shape_cast %4 : vector<1x1x128xf32> to vector<1x128xf32>
    %6 = vector.broadcast %5 : vector<1x128xf32> to vector<2x128xf32>
    %7 = arith.addf %3, %6 : vector<2x128xf32>
    %8 = math.tanh %7 : vector<2x128xf32>
    %c1 = arith.constant 1 : index
    %c0_7 = arith.constant 0 : index
    %c0_8 = arith.constant 0 : index
    %9 = vector.load %arg2[%c1, %c0_7, %c0_8] : memref<2x128x128xf32, #tpu.memory_space<vmem>>, vector<1x128x128xf32>
    %10 = vector.shape_cast %9 : vector<1x128x128xf32> to vector<128x128xf32>
    %cst_9 = arith.constant dense<0.000000e+00> : vector<2x128xf32>
    %11 = tpu.matmul %0, %10, %cst_9 {dimension_numbers = #tpu.dot_dimension_numbers<[1], [0], [0], [1], [0, 0, 1, 1], [], []>} : vector<2x128xf32>, vector<128x128xf32>, vector<2x128xf32> -> vector<2x128xf32>
    %c1_10 = arith.constant 1 : index
    %c0_11 = arith.constant 0 : index
    %c0_12 = arith.constant 0 : index
    %12 = vector.load %arg3[%c1_10, %c0_11, %c0_12] : memref<2x1x128xf32, #tpu.memory_space<vmem>>, vector<1x1x128xf32>
    %13 = vector.shape_cast %12 : vector<1x1x128xf32> to vector<1x128xf32>
    %14 = vector.broadcast %13 : vector<1x128xf32> to vector<2x128xf32>
    %15 = arith.addf %11, %14 : vector<2x128xf32>
    %16 = math.tanh %15 : vector<2x128xf32>
    %c0_13 = arith.constant 0 : index
    %17 = memref.load %arg0[%c0_13] : memref<2xf32, #tpu.memory_space<smem>>
    %18 = arith.negf %17 : f32
    %19 = math.exp %18 : f32
    %cst_14 = arith.constant 1.000000e+00 : f32
    %20 = arith.addf %cst_14, %19 : f32
    %21 = arith.divf %cst_14, %20 : f32
    %22 = vector.broadcast %21 : f32 to vector<2x128xf32>
    %23 = arith.mulf %22, %8 : vector<2x128xf32>
    %cst_15 = arith.constant 1.000000e+00 : f32
    %24 = arith.subf %cst_15, %21 : f32
    %25 = vector.broadcast %24 : f32 to vector<2x128xf32>
    %26 = arith.mulf %25, %16 : vector<2x128xf32>
    %27 = arith.addf %23, %26 : vector<2x128xf32>
    %c0_16 = arith.constant 0 : index
    %c0_17 = arith.constant 0 : index
    %c0_18 = arith.constant 0 : index
    %28 = vector.load %arg4[%c0_16, %c0_17, %c0_18] : memref<2x128x128xf32, #tpu.memory_space<vmem>>, vector<1x128x128xf32>
    %29 = vector.shape_cast %28 : vector<1x128x128xf32> to vector<128x128xf32>
    %cst_19 = arith.constant dense<0.000000e+00> : vector<2x128xf32>
    %30 = tpu.matmul %27, %29, %cst_19 {dimension_numbers = #tpu.dot_dimension_numbers<[1], [0], [0], [1], [0, 0, 1, 1], [], []>} : vector<2x128xf32>, vector<128x128xf32>, vector<2x128xf32> -> vector<2x128xf32>
    %c0_20 = arith.constant 0 : index
    %c0_21 = arith.constant 0 : index
    %c0_22 = arith.constant 0 : index
    %31 = vector.load %arg5[%c0_20, %c0_21, %c0_22] : memref<2x1x128xf32, #tpu.memory_space<vmem>>, vector<1x1x128xf32>
    %32 = vector.shape_cast %31 : vector<1x1x128xf32> to vector<1x128xf32>
    %33 = vector.broadcast %32 : vector<1x128xf32> to vector<2x128xf32>
    %34 = arith.addf %30, %33 : vector<2x128xf32>
    %c1_23 = arith.constant 1 : index
    %c0_24 = arith.constant 0 : index
    %c0_25 = arith.constant 0 : index
    %35 = vector.load %arg4[%c1_23, %c0_24, %c0_25] : memref<2x128x128xf32, #tpu.memory_space<vmem>>, vector<1x128x128xf32>
    %36 = vector.shape_cast %35 : vector<1x128x128xf32> to vector<128x128xf32>
    %cst_26 = arith.constant dense<0.000000e+00> : vector<2x128xf32>
    %37 = tpu.matmul %27, %36, %cst_26 {dimension_numbers = #tpu.dot_dimension_numbers<[1], [0], [0], [1], [0, 0, 1, 1], [], []>} : vector<2x128xf32>, vector<128x128xf32>, vector<2x128xf32> -> vector<2x128xf32>
    %c1_27 = arith.constant 1 : index
    %c0_28 = arith.constant 0 : index
    %c0_29 = arith.constant 0 : index
    %38 = vector.load %arg5[%c1_27, %c0_28, %c0_29] : memref<2x1x128xf32, #tpu.memory_space<vmem>>, vector<1x1x128xf32>
    %39 = vector.shape_cast %38 : vector<1x1x128xf32> to vector<1x128xf32>
    %40 = vector.broadcast %39 : vector<1x128xf32> to vector<2x128xf32>
    %41 = arith.addf %37, %40 : vector<2x128xf32>
    %c1_30 = arith.constant 1 : index
    %42 = memref.load %arg0[%c1_30] : memref<2xf32, #tpu.memory_space<smem>>
    %43 = arith.negf %42 : f32
    %44 = math.exp %43 : f32
    %cst_31 = arith.constant 1.000000e+00 : f32
    %45 = arith.addf %cst_31, %44 : f32
    %46 = arith.divf %cst_31, %45 : f32
    %47 = vector.broadcast %46 : f32 to vector<2x128xf32>
    %48 = arith.mulf %47, %34 : vector<2x128xf32>
    %cst_32 = arith.constant 1.000000e+00 : f32
    %49 = arith.subf %cst_32, %46 : f32
    %50 = vector.broadcast %49 : f32 to vector<2x128xf32>
    %51 = arith.mulf %50, %41 : vector<2x128xf32>
    %52 = arith.addf %48, %51 : vector<2x128xf32>
    %c0_33 = arith.constant 0 : index
    %c0_34 = arith.constant 0 : index
    %53 = vector.load %arg6[%c0_33, %c0_34] : memref<2x128xf32, #tpu.memory_space<vmem>>, vector<2x128xf32>
    tpu.vector_store %arg6[%c0_33, %c0_34], %52 {strides = array<i32>} : memref<2x128xf32, #tpu.memory_space<vmem>>, vector<2x128xf32>,
    return
  }
}

module attributes {stable_mosaic.version = 11 : i64} {
  func.func @_layer_pair_kernel(%arg0: memref<1xf32, #tpu.memory_space<smem>>, %arg1: memref<16x128xf32, #tpu.memory_space<vmem>>, %arg2: memref<16x128xf32, #tpu.memory_space<vmem>>, %arg3: memref<16x16xf32, #tpu.memory_space<vmem>>, %arg4: memref<2x128x384xf32, #tpu.memory_space<vmem>>, %arg5: memref<2x1x384xf32, #tpu.memory_space<vmem>>, %arg6: memref<2x128x128xf32, #tpu.memory_space<vmem>>, %arg7: memref<2x1x128xf32, #tpu.memory_space<vmem>>, %arg8: memref<2x1x128xf32, #tpu.memory_space<vmem>>, %arg9: memref<2x1x128xf32, #tpu.memory_space<vmem>>, %arg10: memref<2x128x256xf32, #tpu.memory_space<vmem>>, %arg11: memref<2x1x256xf32, #tpu.memory_space<vmem>>, %arg12: memref<2x256x128xf32, #tpu.memory_space<vmem>>, %arg13: memref<2x1x128xf32, #tpu.memory_space<vmem>>, %arg14: memref<2x1x128xf32, #tpu.memory_space<vmem>>, %arg15: memref<2x1x128xf32, #tpu.memory_space<vmem>>, %arg16: memref<16x128xf32, #tpu.memory_space<vmem>>, %arg17: memref<16x384xf32, #tpu.memory_space<vmem>>, %arg18: memref<16x128xf32, #tpu.memory_space<vmem>>) attributes {dimension_semantics = [], scalar_prefetch = 0 : i64, scratch_operands = 2 : i64, tpu.core_type = #tpu.core_type<tc>} {
    %c0 = arith.constant 0 : index
    %c0_0 = arith.constant 0 : index
    %0 = vector.load %arg3[%c0, %c0_0] : memref<16x16xf32, #tpu.memory_space<vmem>>, vector<16x16xf32>
    %c0_1 = arith.constant 0 : index
    %c0_2 = arith.constant 0 : index
    %1 = vector.load %arg1[%c0_1, %c0_2] : memref<16x128xf32, #tpu.memory_space<vmem>>, vector<16x128xf32>
    %c0_3 = arith.constant 0 : index
    %c0_4 = arith.constant 0 : index
    %2 = vector.load %arg2[%c0_3, %c0_4] : memref<16x128xf32, #tpu.memory_space<vmem>>, vector<16x128xf32>
    %c0_5 = arith.constant 0 : index
    %c0_6 = arith.constant 0 : index
    %c0_7 = arith.constant 0 : index
    %3 = vector.load %arg4[%c0_5, %c0_6, %c0_7] : memref<2x128x384xf32, #tpu.memory_space<vmem>>, vector<1x128x384xf32>
    %4 = vector.shape_cast %3 : vector<1x128x384xf32> to vector<128x384xf32>
    %cst = arith.constant dense<0.000000e+00> : vector<16x384xf32>
    %5 = tpu.matmul %1, %4, %cst {dimension_numbers = #tpu.dot_dimension_numbers<[1], [0], [0], [1], [0, 0, 1, 1], [], []>} : vector<16x128xf32>, vector<128x384xf32>, vector<16x384xf32> -> vector<16x384xf32>
    %c0_8 = arith.constant 0 : index
    %c0_9 = arith.constant 0 : index
    %c0_10 = arith.constant 0 : index
    %6 = vector.load %arg5[%c0_8, %c0_9, %c0_10] : memref<2x1x384xf32, #tpu.memory_space<vmem>>, vector<1x1x384xf32>
    %7 = vector.shape_cast %6 : vector<1x1x384xf32> to vector<1x384xf32>
    %8 = vector.broadcast %7 : vector<1x384xf32> to vector<16x384xf32>
    %9 = arith.addf %5, %8 : vector<16x384xf32>
    %c0_11 = arith.constant 0 : index
    %c0_12 = arith.constant 0 : index
    %10 = vector.load %arg17[%c0_11, %c0_12] : memref<16x384xf32, #tpu.memory_space<vmem>>, vector<16x384xf32>
    tpu.vector_store %arg17[%c0_11, %c0_12], %9 {strides = array<i32>} : memref<16x384xf32, #tpu.memory_space<vmem>>, vector<16x384xf32>,
    %c0_13 = arith.constant 0 : index
    %c0_14 = arith.constant 0 : index
    %11 = vector.load %arg17[%c0_13, %c0_14] : memref<16x384xf32, #tpu.memory_space<vmem>>, vector<16x32xf32>
    %c0_15 = arith.constant 0 : index
    %c128 = arith.constant 128 : index
    %12 = vector.load %arg17[%c0_15, %c128] : memref<16x384xf32, #tpu.memory_space<vmem>>, vector<16x32xf32>
    %c0_16 = arith.constant 0 : index
    %c256 = arith.constant 256 : index
    %13 = vector.load %arg17[%c0_16, %c256] : memref<16x384xf32, #tpu.memory_space<vmem>>, vector<16x32xf32>
    %14 = tpu.transpose %12, [1, 0] : vector<16x32xf32> -> vector<32x16xf32>
    %cst_17 = arith.constant dense<0.000000e+00> : vector<16x16xf32>
    %15 = tpu.matmul %11, %14, %cst_17 {dimension_numbers = #tpu.dot_dimension_numbers<[1], [0], [0], [1], [0, 0, 1, 1], [], []>} : vector<16x32xf32>, vector<32x16xf32>, vector<16x16xf32> -> vector<16x16xf32>
    %cst_18 = arith.constant 0.176776692 : f32
    %16 = vector.broadcast %cst_18 : f32 to vector<16x16xf32>
    %17 = arith.mulf %15, %16 : vector<16x16xf32>
    %18 = arith.addf %17, %0 : vector<16x16xf32>
    %cst_19 = arith.constant dense<0xFF800000> : vector<16xf32>
    %19 = vector.multi_reduction <maximumf>, %18, %cst_19 [1] : vector<16x16xf32> to vector<16xf32>
    %20 = vector.shape_cast %19 : vector<16xf32> to vector<16x1xf32>
    %21 = vector.broadcast %20 : vector<16x1xf32> to vector<16x16xf32>
    %22 = arith.subf %18, %21 : vector<16x16xf32>
    %23 = math.exp %22 : vector<16x16xf32>
    %cst_20 = arith.constant dense<0.000000e+00> : vector<16xf32>
    %24 = vector.multi_reduction <add>, %23, %cst_20 [1] : vector<16x16xf32> to vector<16xf32>
    %25 = vector.shape_cast %24 : vector<16xf32> to vector<16x1xf32>
    %26 = vector.broadcast %25 : vector<16x1xf32> to vector<16x16xf32>
    %27 = arith.divf %23, %26 : vector<16x16xf32>
    %cst_21 = arith.constant dense<0.000000e+00> : vector<16x32xf32>
    %28 = tpu.matmul %27, %13, %cst_21 {dimension_numbers = #tpu.dot_dimension_numbers<[1], [0], [0], [1], [0, 0, 1, 1], [], []>} : vector<16x16xf32>, vector<16x32xf32>, vector<16x32xf32> -> vector<16x32xf32>
    %c0_22 = arith.constant 0 : index
    %c0_23 = arith.constant 0 : index
    %29 = vector.load %arg18[%c0_22, %c0_23] : memref<16x128xf32, #tpu.memory_space<vmem>>, vector<16x32xf32>
    tpu.vector_store %arg18[%c0_22, %c0_23], %28 {strides = array<i32>} : memref<16x128xf32, #tpu.memory_space<vmem>>, vector<16x32xf32>,
    %c0_24 = arith.constant 0 : index
    %c32 = arith.constant 32 : index
    %30 = vector.load %arg17[%c0_24, %c32] : memref<16x384xf32, #tpu.memory_space<vmem>>, vector<16x32xf32>
    %c0_25 = arith.constant 0 : index
    %c160 = arith.constant 160 : index
    %31 = vector.load %arg17[%c0_25, %c160] : memref<16x384xf32, #tpu.memory_space<vmem>>, vector<16x32xf32>
    %c0_26 = arith.constant 0 : index
    %c288 = arith.constant 288 : index
    %32 = vector.load %arg17[%c0_26, %c288] : memref<16x384xf32, #tpu.memory_space<vmem>>, vector<16x32xf32>
    %33 = tpu.transpose %31, [1, 0] : vector<16x32xf32> -> vector<32x16xf32>
    %cst_27 = arith.constant dense<0.000000e+00> : vector<16x16xf32>
    %34 = tpu.matmul %30, %33, %cst_27 {dimension_numbers = #tpu.dot_dimension_numbers<[1], [0], [0], [1], [0, 0, 1, 1], [], []>} : vector<16x32xf32>, vector<32x16xf32>, vector<16x16xf32> -> vector<16x16xf32>
    %cst_28 = arith.constant 0.176776692 : f32
    %35 = vector.broadcast %cst_28 : f32 to vector<16x16xf32>
    %36 = arith.mulf %34, %35 : vector<16x16xf32>
    %37 = arith.addf %36, %0 : vector<16x16xf32>
    %cst_29 = arith.constant dense<0xFF800000> : vector<16xf32>
    %38 = vector.multi_reduction <maximumf>, %37, %cst_29 [1] : vector<16x16xf32> to vector<16xf32>
    %39 = vector.shape_cast %38 : vector<16xf32> to vector<16x1xf32>
    %40 = vector.broadcast %39 : vector<16x1xf32> to vector<16x16xf32>
    %41 = arith.subf %37, %40 : vector<16x16xf32>
    %42 = math.exp %41 : vector<16x16xf32>
    %cst_30 = arith.constant dense<0.000000e+00> : vector<16xf32>
    %43 = vector.multi_reduction <add>, %42, %cst_30 [1] : vector<16x16xf32> to vector<16xf32>
    %44 = vector.shape_cast %43 : vector<16xf32> to vector<16x1xf32>
    %45 = vector.broadcast %44 : vector<16x1xf32> to vector<16x16xf32>
    %46 = arith.divf %42, %45 : vector<16x16xf32>
    %cst_31 = arith.constant dense<0.000000e+00> : vector<16x32xf32>
    %47 = tpu.matmul %46, %32, %cst_31 {dimension_numbers = #tpu.dot_dimension_numbers<[1], [0], [0], [1], [0, 0, 1, 1], [], []>} : vector<16x16xf32>, vector<16x32xf32>, vector<16x32xf32> -> vector<16x32xf32>
    %c0_32 = arith.constant 0 : index
    %c32_33 = arith.constant 32 : index
    %48 = vector.load %arg18[%c0_32, %c32_33] : memref<16x128xf32, #tpu.memory_space<vmem>>, vector<16x32xf32>
    tpu.vector_store %arg18[%c0_32, %c32_33], %47 {strides = array<i32>} : memref<16x128xf32, #tpu.memory_space<vmem>>, vector<16x32xf32>,
    %c0_34 = arith.constant 0 : index
    %c64 = arith.constant 64 : index
    %49 = vector.load %arg17[%c0_34, %c64] : memref<16x384xf32, #tpu.memory_space<vmem>>, vector<16x32xf32>
    %c0_35 = arith.constant 0 : index
    %c192 = arith.constant 192 : index
    %50 = vector.load %arg17[%c0_35, %c192] : memref<16x384xf32, #tpu.memory_space<vmem>>, vector<16x32xf32>
    %c0_36 = arith.constant 0 : index
    %c320 = arith.constant 320 : index
    %51 = vector.load %arg17[%c0_36, %c320] : memref<16x384xf32, #tpu.memory_space<vmem>>, vector<16x32xf32>
    %52 = tpu.transpose %50, [1, 0] : vector<16x32xf32> -> vector<32x16xf32>
    %cst_37 = arith.constant dense<0.000000e+00> : vector<16x16xf32>
    %53 = tpu.matmul %49, %52, %cst_37 {dimension_numbers = #tpu.dot_dimension_numbers<[1], [0], [0], [1], [0, 0, 1, 1], [], []>} : vector<16x32xf32>, vector<32x16xf32>, vector<16x16xf32> -> vector<16x16xf32>
    %cst_38 = arith.constant 0.176776692 : f32
    %54 = vector.broadcast %cst_38 : f32 to vector<16x16xf32>
    %55 = arith.mulf %53, %54 : vector<16x16xf32>
    %56 = arith.addf %55, %0 : vector<16x16xf32>
    %cst_39 = arith.constant dense<0xFF800000> : vector<16xf32>
    %57 = vector.multi_reduction <maximumf>, %56, %cst_39 [1] : vector<16x16xf32> to vector<16xf32>
    %58 = vector.shape_cast %57 : vector<16xf32> to vector<16x1xf32>
    %59 = vector.broadcast %58 : vector<16x1xf32> to vector<16x16xf32>
    %60 = arith.subf %56, %59 : vector<16x16xf32>
    %61 = math.exp %60 : vector<16x16xf32>
    %cst_40 = arith.constant dense<0.000000e+00> : vector<16xf32>
    %62 = vector.multi_reduction <add>, %61, %cst_40 [1] : vector<16x16xf32> to vector<16xf32>
    %63 = vector.shape_cast %62 : vector<16xf32> to vector<16x1xf32>
    %64 = vector.broadcast %63 : vector<16x1xf32> to vector<16x16xf32>
    %65 = arith.divf %61, %64 : vector<16x16xf32>
    %cst_41 = arith.constant dense<0.000000e+00> : vector<16x32xf32>
    %66 = tpu.matmul %65, %51, %cst_41 {dimension_numbers = #tpu.dot_dimension_numbers<[1], [0], [0], [1], [0, 0, 1, 1], [], []>} : vector<16x16xf32>, vector<16x32xf32>, vector<16x32xf32> -> vector<16x32xf32>
    %c0_42 = arith.constant 0 : index
    %c64_43 = arith.constant 64 : index
    %67 = vector.load %arg18[%c0_42, %c64_43] : memref<16x128xf32, #tpu.memory_space<vmem>>, vector<16x32xf32>
    tpu.vector_store %arg18[%c0_42, %c64_43], %66 {strides = array<i32>} : memref<16x128xf32, #tpu.memory_space<vmem>>, vector<16x32xf32>,
    %c0_44 = arith.constant 0 : index
    %c96 = arith.constant 96 : index
    %68 = vector.load %arg17[%c0_44, %c96] : memref<16x384xf32, #tpu.memory_space<vmem>>, vector<16x32xf32>
    %c0_45 = arith.constant 0 : index
    %c224 = arith.constant 224 : index
    %69 = vector.load %arg17[%c0_45, %c224] : memref<16x384xf32, #tpu.memory_space<vmem>>, vector<16x32xf32>
    %c0_46 = arith.constant 0 : index
    %c352 = arith.constant 352 : index
    %70 = vector.load %arg17[%c0_46, %c352] : memref<16x384xf32, #tpu.memory_space<vmem>>, vector<16x32xf32>
    %71 = tpu.transpose %69, [1, 0] : vector<16x32xf32> -> vector<32x16xf32>
    %cst_47 = arith.constant dense<0.000000e+00> : vector<16x16xf32>
    %72 = tpu.matmul %68, %71, %cst_47 {dimension_numbers = #tpu.dot_dimension_numbers<[1], [0], [0], [1], [0, 0, 1, 1], [], []>} : vector<16x32xf32>, vector<32x16xf32>, vector<16x16xf32> -> vector<16x16xf32>
    %cst_48 = arith.constant 0.176776692 : f32
    %73 = vector.broadcast %cst_48 : f32 to vector<16x16xf32>
    %74 = arith.mulf %72, %73 : vector<16x16xf32>
    %75 = arith.addf %74, %0 : vector<16x16xf32>
    %cst_49 = arith.constant dense<0xFF800000> : vector<16xf32>
    %76 = vector.multi_reduction <maximumf>, %75, %cst_49 [1] : vector<16x16xf32> to vector<16xf32>
    %77 = vector.shape_cast %76 : vector<16xf32> to vector<16x1xf32>
    %78 = vector.broadcast %77 : vector<16x1xf32> to vector<16x16xf32>
    %79 = arith.subf %75, %78 : vector<16x16xf32>
    %80 = math.exp %79 : vector<16x16xf32>
    %cst_50 = arith.constant dense<0.000000e+00> : vector<16xf32>
    %81 = vector.multi_reduction <add>, %80, %cst_50 [1] : vector<16x16xf32> to vector<16xf32>
    %82 = vector.shape_cast %81 : vector<16xf32> to vector<16x1xf32>
    %83 = vector.broadcast %82 : vector<16x1xf32> to vector<16x16xf32>
    %84 = arith.divf %80, %83 : vector<16x16xf32>
    %cst_51 = arith.constant dense<0.000000e+00> : vector<16x32xf32>
    %85 = tpu.matmul %84, %70, %cst_51 {dimension_numbers = #tpu.dot_dimension_numbers<[1], [0], [0], [1], [0, 0, 1, 1], [], []>} : vector<16x16xf32>, vector<16x32xf32>, vector<16x32xf32> -> vector<16x32xf32>
    %c0_52 = arith.constant 0 : index
    %c96_53 = arith.constant 96 : index
    %86 = vector.load %arg18[%c0_52, %c96_53] : memref<16x128xf32, #tpu.memory_space<vmem>>, vector<16x32xf32>
    tpu.vector_store %arg18[%c0_52, %c96_53], %85 {strides = array<i32>} : memref<16x128xf32, #tpu.memory_space<vmem>>, vector<16x32xf32>,
    %c0_54 = arith.constant 0 : index
    %c0_55 = arith.constant 0 : index
    %87 = vector.load %arg18[%c0_54, %c0_55] : memref<16x128xf32, #tpu.memory_space<vmem>>, vector<16x128xf32>
    %c0_56 = arith.constant 0 : index
    %c0_57 = arith.constant 0 : index
    %c0_58 = arith.constant 0 : index
    %88 = vector.load %arg6[%c0_56, %c0_57, %c0_58] : memref<2x128x128xf32, #tpu.memory_space<vmem>>, vector<1x128x128xf32>
    %89 = vector.shape_cast %88 : vector<1x128x128xf32> to vector<128x128xf32>
    %cst_59 = arith.constant dense<0.000000e+00> : vector<16x128xf32>
    %90 = tpu.matmul %87, %89, %cst_59 {dimension_numbers = #tpu.dot_dimension_numbers<[1], [0], [0], [1], [0, 0, 1, 1], [], []>} : vector<16x128xf32>, vector<128x128xf32>, vector<16x128xf32> -> vector<16x128xf32>
    %c0_60 = arith.constant 0 : index
    %c0_61 = arith.constant 0 : index
    %c0_62 = arith.constant 0 : index
    %91 = vector.load %arg7[%c0_60, %c0_61, %c0_62] : memref<2x1x128xf32, #tpu.memory_space<vmem>>, vector<1x1x128xf32>
    %92 = vector.shape_cast %91 : vector<1x1x128xf32> to vector<1x128xf32>
    %93 = vector.broadcast %92 : vector<1x128xf32> to vector<16x128xf32>
    %94 = arith.addf %90, %93 : vector<16x128xf32>
    %95 = arith.addf %94, %1 : vector<16x128xf32>
    %c0_63 = arith.constant 0 : index
    %c0_64 = arith.constant 0 : index
    %c0_65 = arith.constant 0 : index
    %96 = vector.load %arg8[%c0_63, %c0_64, %c0_65] : memref<2x1x128xf32, #tpu.memory_space<vmem>>, vector<1x1x128xf32>
    %97 = vector.shape_cast %96 : vector<1x1x128xf32> to vector<1x128xf32>
    %c0_66 = arith.constant 0 : index
    %c0_67 = arith.constant 0 : index
    %c0_68 = arith.constant 0 : index
    %98 = vector.load %arg9[%c0_66, %c0_67, %c0_68] : memref<2x1x128xf32, #tpu.memory_space<vmem>>, vector<1x1x128xf32>
    %99 = vector.shape_cast %98 : vector<1x1x128xf32> to vector<1x128xf32>
    %cst_69 = arith.constant dense<0.000000e+00> : vector<16xf32>
    %100 = vector.multi_reduction <add>, %95, %cst_69 [1] : vector<16x128xf32> to vector<16xf32>
    %101 = vector.shape_cast %100 : vector<16xf32> to vector<16x1xf32>
    %cst_70 = arith.constant 1.280000e+02 : f32
    %102 = vector.broadcast %cst_70 : f32 to vector<16x1xf32>
    %103 = arith.divf %101, %102 : vector<16x1xf32>
    %104 = vector.broadcast %103 : vector<16x1xf32> to vector<16x128xf32>
    %105 = arith.subf %95, %104 : vector<16x128xf32>
    %106 = arith.mulf %105, %105 : vector<16x128xf32>
    %cst_71 = arith.constant dense<0.000000e+00> : vector<16xf32>
    %107 = vector.multi_reduction <add>, %106, %cst_71 [1] : vector<16x128xf32> to vector<16xf32>
    %108 = vector.shape_cast %107 : vector<16xf32> to vector<16x1xf32>
    %cst_72 = arith.constant 1.280000e+02 : f32
    %109 = vector.broadcast %cst_72 : f32 to vector<16x1xf32>
    %110 = arith.divf %108, %109 : vector<16x1xf32>
    %cst_73 = arith.constant 9.99999996E-13 : f32
    %111 = vector.broadcast %cst_73 : f32 to vector<16x1xf32>
    %112 = arith.addf %110, %111 : vector<16x1xf32>
    %113 = math.rsqrt %112 : vector<16x1xf32>
    %114 = vector.broadcast %113 : vector<16x1xf32> to vector<16x128xf32>
    %115 = arith.mulf %105, %114 : vector<16x128xf32>
    %116 = vector.broadcast %97 : vector<1x128xf32> to vector<16x128xf32>
    %117 = arith.mulf %115, %116 : vector<16x128xf32>
    %118 = vector.broadcast %99 : vector<1x128xf32> to vector<16x128xf32>
    %119 = arith.addf %117, %118 : vector<16x128xf32>
    %c0_74 = arith.constant 0 : index
    %c0_75 = arith.constant 0 : index
    %c0_76 = arith.constant 0 : index
    %120 = vector.load %arg10[%c0_74, %c0_75, %c0_76] : memref<2x128x256xf32, #tpu.memory_space<vmem>>, vector<1x128x256xf32>
    %121 = vector.shape_cast %120 : vector<1x128x256xf32> to vector<128x256xf32>
    %cst_77 = arith.constant dense<0.000000e+00> : vector<16x256xf32>
    %122 = tpu.matmul %119, %121, %cst_77 {dimension_numbers = #tpu.dot_dimension_numbers<[1], [0], [0], [1], [0, 0, 1, 1], [], []>} : vector<16x128xf32>, vector<128x256xf32>, vector<16x256xf32> -> vector<16x256xf32>
    %c0_78 = arith.constant 0 : index
    %c0_79 = arith.constant 0 : index
    %c0_80 = arith.constant 0 : index
    %123 = vector.load %arg11[%c0_78, %c0_79, %c0_80] : memref<2x1x256xf32, #tpu.memory_space<vmem>>, vector<1x1x256xf32>
    %124 = vector.shape_cast %123 : vector<1x1x256xf32> to vector<1x256xf32>
    %125 = vector.broadcast %124 : vector<1x256xf32> to vector<16x256xf32>
    %126 = arith.addf %122, %125 : vector<16x256xf32>
    %cst_81 = arith.constant 5.000000e-01 : f32
    %127 = vector.broadcast %cst_81 : f32 to vector<16x256xf32>
    %128 = arith.mulf %127, %126 : vector<16x256xf32>
    %cst_82 = arith.constant 2.000000e+00 : f32
    %129 = math.sqrt %cst_82 : f32
    %cst_83 = arith.constant 1.000000e+00 : f32
    %130 = arith.divf %cst_83, %129 : f32
    %131 = vector.broadcast %130 : f32 to vector<16x256xf32>
    %132 = arith.mulf %126, %131 : vector<16x256xf32>
    %133 = math.erf %132 : vector<16x256xf32>
    %cst_84 = arith.constant 1.000000e+00 : f32
    %134 = vector.broadcast %cst_84 : f32 to vector<16x256xf32>
    %135 = arith.addf %134, %133 : vector<16x256xf32>
    %136 = arith.mulf %128, %135 : vector<16x256xf32>
    %c0_85 = arith.constant 0 : index
    %c0_86 = arith.constant 0 : index
    %c0_87 = arith.constant 0 : index
    %137 = vector.load %arg12[%c0_85, %c0_86, %c0_87] : memref<2x256x128xf32, #tpu.memory_space<vmem>>, vector<1x256x128xf32>
    %138 = vector.shape_cast %137 : vector<1x256x128xf32> to vector<256x128xf32>
    %cst_88 = arith.constant dense<0.000000e+00> : vector<16x128xf32>
    %139 = tpu.matmul %136, %138, %cst_88 {dimension_numbers = #tpu.dot_dimension_numbers<[1], [0], [0], [1], [0, 0, 1, 1], [], []>} : vector<16x256xf32>, vector<256x128xf32>, vector<16x128xf32> -> vector<16x128xf32>
    %c0_89 = arith.constant 0 : index
    %c0_90 = arith.constant 0 : index
    %c0_91 = arith.constant 0 : index
    %140 = vector.load %arg13[%c0_89, %c0_90, %c0_91] : memref<2x1x128xf32, #tpu.memory_space<vmem>>, vector<1x1x128xf32>
    %141 = vector.shape_cast %140 : vector<1x1x128xf32> to vector<1x128xf32>
    %142 = vector.broadcast %141 : vector<1x128xf32> to vector<16x128xf32>
    %143 = arith.addf %139, %142 : vector<16x128xf32>
    %144 = arith.addf %143, %119 : vector<16x128xf32>
    %c0_92 = arith.constant 0 : index
    %c0_93 = arith.constant 0 : index
    %c0_94 = arith.constant 0 : index
    %145 = vector.load %arg14[%c0_92, %c0_93, %c0_94] : memref<2x1x128xf32, #tpu.memory_space<vmem>>, vector<1x1x128xf32>
    %146 = vector.shape_cast %145 : vector<1x1x128xf32> to vector<1x128xf32>
    %c0_95 = arith.constant 0 : index
    %c0_96 = arith.constant 0 : index
    %c0_97 = arith.constant 0 : index
    %147 = vector.load %arg15[%c0_95, %c0_96, %c0_97] : memref<2x1x128xf32, #tpu.memory_space<vmem>>, vector<1x1x128xf32>
    %148 = vector.shape_cast %147 : vector<1x1x128xf32> to vector<1x128xf32>
    %cst_98 = arith.constant dense<0.000000e+00> : vector<16xf32>
    %149 = vector.multi_reduction <add>, %144, %cst_98 [1] : vector<16x128xf32> to vector<16xf32>
    %150 = vector.shape_cast %149 : vector<16xf32> to vector<16x1xf32>
    %cst_99 = arith.constant 1.280000e+02 : f32
    %151 = vector.broadcast %cst_99 : f32 to vector<16x1xf32>
    %152 = arith.divf %150, %151 : vector<16x1xf32>
    %153 = vector.broadcast %152 : vector<16x1xf32> to vector<16x128xf32>
    %154 = arith.subf %144, %153 : vector<16x128xf32>
    %155 = arith.mulf %154, %154 : vector<16x128xf32>
    %cst_100 = arith.constant dense<0.000000e+00> : vector<16xf32>
    %156 = vector.multi_reduction <add>, %155, %cst_100 [1] : vector<16x128xf32> to vector<16xf32>
    %157 = vector.shape_cast %156 : vector<16xf32> to vector<16x1xf32>
    %cst_101 = arith.constant 1.280000e+02 : f32
    %158 = vector.broadcast %cst_101 : f32 to vector<16x1xf32>
    %159 = arith.divf %157, %158 : vector<16x1xf32>
    %cst_102 = arith.constant 9.99999996E-13 : f32
    %160 = vector.broadcast %cst_102 : f32 to vector<16x1xf32>
    %161 = arith.addf %159, %160 : vector<16x1xf32>
    %162 = math.rsqrt %161 : vector<16x1xf32>
    %163 = vector.broadcast %162 : vector<16x1xf32> to vector<16x128xf32>
    %164 = arith.mulf %154, %163 : vector<16x128xf32>
    %165 = vector.broadcast %146 : vector<1x128xf32> to vector<16x128xf32>
    %166 = arith.mulf %164, %165 : vector<16x128xf32>
    %167 = vector.broadcast %148 : vector<1x128xf32> to vector<16x128xf32>
    %168 = arith.addf %166, %167 : vector<16x128xf32>
    %c1 = arith.constant 1 : index
    %c0_103 = arith.constant 0 : index
    %c0_104 = arith.constant 0 : index
    %169 = vector.load %arg4[%c1, %c0_103, %c0_104] : memref<2x128x384xf32, #tpu.memory_space<vmem>>, vector<1x128x384xf32>
    %170 = vector.shape_cast %169 : vector<1x128x384xf32> to vector<128x384xf32>
    %cst_105 = arith.constant dense<0.000000e+00> : vector<16x384xf32>
    %171 = tpu.matmul %2, %170, %cst_105 {dimension_numbers = #tpu.dot_dimension_numbers<[1], [0], [0], [1], [0, 0, 1, 1], [], []>} : vector<16x128xf32>, vector<128x384xf32>, vector<16x384xf32> -> vector<16x384xf32>
    %c1_106 = arith.constant 1 : index
    %c0_107 = arith.constant 0 : index
    %c0_108 = arith.constant 0 : index
    %172 = vector.load %arg5[%c1_106, %c0_107, %c0_108] : memref<2x1x384xf32, #tpu.memory_space<vmem>>, vector<1x1x384xf32>
    %173 = vector.shape_cast %172 : vector<1x1x384xf32> to vector<1x384xf32>
    %174 = vector.broadcast %173 : vector<1x384xf32> to vector<16x384xf32>
    %175 = arith.addf %171, %174 : vector<16x384xf32>
    %c0_109 = arith.constant 0 : index
    %c0_110 = arith.constant 0 : index
    %176 = vector.load %arg17[%c0_109, %c0_110] : memref<16x384xf32, #tpu.memory_space<vmem>>, vector<16x384xf32>
    tpu.vector_store %arg17[%c0_109, %c0_110], %175 {strides = array<i32>} : memref<16x384xf32, #tpu.memory_space<vmem>>, vector<16x384xf32>,
    %c0_111 = arith.constant 0 : index
    %c0_112 = arith.constant 0 : index
    %177 = vector.load %arg17[%c0_111, %c0_112] : memref<16x384xf32, #tpu.memory_space<vmem>>, vector<16x32xf32>
    %c0_113 = arith.constant 0 : index
    %c128_114 = arith.constant 128 : index
    %178 = vector.load %arg17[%c0_113, %c128_114] : memref<16x384xf32, #tpu.memory_space<vmem>>, vector<16x32xf32>
    %c0_115 = arith.constant 0 : index
    %c256_116 = arith.constant 256 : index
    %179 = vector.load %arg17[%c0_115, %c256_116] : memref<16x384xf32, #tpu.memory_space<vmem>>, vector<16x32xf32>
    %180 = tpu.transpose %178, [1, 0] : vector<16x32xf32> -> vector<32x16xf32>
    %cst_117 = arith.constant dense<0.000000e+00> : vector<16x16xf32>
    %181 = tpu.matmul %177, %180, %cst_117 {dimension_numbers = #tpu.dot_dimension_numbers<[1], [0], [0], [1], [0, 0, 1, 1], [], []>} : vector<16x32xf32>, vector<32x16xf32>, vector<16x16xf32> -> vector<16x16xf32>
    %cst_118 = arith.constant 0.176776692 : f32
    %182 = vector.broadcast %cst_118 : f32 to vector<16x16xf32>
    %183 = arith.mulf %181, %182 : vector<16x16xf32>
    %184 = arith.addf %183, %0 : vector<16x16xf32>
    %cst_119 = arith.constant dense<0xFF800000> : vector<16xf32>
    %185 = vector.multi_reduction <maximumf>, %184, %cst_119 [1] : vector<16x16xf32> to vector<16xf32>
    %186 = vector.shape_cast %185 : vector<16xf32> to vector<16x1xf32>
    %187 = vector.broadcast %186 : vector<16x1xf32> to vector<16x16xf32>
    %188 = arith.subf %184, %187 : vector<16x16xf32>
    %189 = math.exp %188 : vector<16x16xf32>
    %cst_120 = arith.constant dense<0.000000e+00> : vector<16xf32>
    %190 = vector.multi_reduction <add>, %189, %cst_120 [1] : vector<16x16xf32> to vector<16xf32>
    %191 = vector.shape_cast %190 : vector<16xf32> to vector<16x1xf32>
    %192 = vector.broadcast %191 : vector<16x1xf32> to vector<16x16xf32>
    %193 = arith.divf %189, %192 : vector<16x16xf32>
    %cst_121 = arith.constant dense<0.000000e+00> : vector<16x32xf32>
    %194 = tpu.matmul %193, %179, %cst_121 {dimension_numbers = #tpu.dot_dimension_numbers<[1], [0], [0], [1], [0, 0, 1, 1], [], []>} : vector<16x16xf32>, vector<16x32xf32>, vector<16x32xf32> -> vector<16x32xf32>
    %c0_122 = arith.constant 0 : index
    %c0_123 = arith.constant 0 : index
    %195 = vector.load %arg18[%c0_122, %c0_123] : memref<16x128xf32, #tpu.memory_space<vmem>>, vector<16x32xf32>
    tpu.vector_store %arg18[%c0_122, %c0_123], %194 {strides = array<i32>} : memref<16x128xf32, #tpu.memory_space<vmem>>, vector<16x32xf32>,
    %c0_124 = arith.constant 0 : index
    %c32_125 = arith.constant 32 : index
    %196 = vector.load %arg17[%c0_124, %c32_125] : memref<16x384xf32, #tpu.memory_space<vmem>>, vector<16x32xf32>
    %c0_126 = arith.constant 0 : index
    %c160_127 = arith.constant 160 : index
    %197 = vector.load %arg17[%c0_126, %c160_127] : memref<16x384xf32, #tpu.memory_space<vmem>>, vector<16x32xf32>
    %c0_128 = arith.constant 0 : index
    %c288_129 = arith.constant 288 : index
    %198 = vector.load %arg17[%c0_128, %c288_129] : memref<16x384xf32, #tpu.memory_space<vmem>>, vector<16x32xf32>
    %199 = tpu.transpose %197, [1, 0] : vector<16x32xf32> -> vector<32x16xf32>
    %cst_130 = arith.constant dense<0.000000e+00> : vector<16x16xf32>
    %200 = tpu.matmul %196, %199, %cst_130 {dimension_numbers = #tpu.dot_dimension_numbers<[1], [0], [0], [1], [0, 0, 1, 1], [], []>} : vector<16x32xf32>, vector<32x16xf32>, vector<16x16xf32> -> vector<16x16xf32>
    %cst_131 = arith.constant 0.176776692 : f32
    %201 = vector.broadcast %cst_131 : f32 to vector<16x16xf32>
    %202 = arith.mulf %200, %201 : vector<16x16xf32>
    %203 = arith.addf %202, %0 : vector<16x16xf32>
    %cst_132 = arith.constant dense<0xFF800000> : vector<16xf32>
    %204 = vector.multi_reduction <maximumf>, %203, %cst_132 [1] : vector<16x16xf32> to vector<16xf32>
    %205 = vector.shape_cast %204 : vector<16xf32> to vector<16x1xf32>
    %206 = vector.broadcast %205 : vector<16x1xf32> to vector<16x16xf32>
    %207 = arith.subf %203, %206 : vector<16x16xf32>
    %208 = math.exp %207 : vector<16x16xf32>
    %cst_133 = arith.constant dense<0.000000e+00> : vector<16xf32>
    %209 = vector.multi_reduction <add>, %208, %cst_133 [1] : vector<16x16xf32> to vector<16xf32>
    %210 = vector.shape_cast %209 : vector<16xf32> to vector<16x1xf32>
    %211 = vector.broadcast %210 : vector<16x1xf32> to vector<16x16xf32>
    %212 = arith.divf %208, %211 : vector<16x16xf32>
    %cst_134 = arith.constant dense<0.000000e+00> : vector<16x32xf32>
    %213 = tpu.matmul %212, %198, %cst_134 {dimension_numbers = #tpu.dot_dimension_numbers<[1], [0], [0], [1], [0, 0, 1, 1], [], []>} : vector<16x16xf32>, vector<16x32xf32>, vector<16x32xf32> -> vector<16x32xf32>
    %c0_135 = arith.constant 0 : index
    %c32_136 = arith.constant 32 : index
    %214 = vector.load %arg18[%c0_135, %c32_136] : memref<16x128xf32, #tpu.memory_space<vmem>>, vector<16x32xf32>
    tpu.vector_store %arg18[%c0_135, %c32_136], %213 {strides = array<i32>} : memref<16x128xf32, #tpu.memory_space<vmem>>, vector<16x32xf32>,
    %c0_137 = arith.constant 0 : index
    %c64_138 = arith.constant 64 : index
    %215 = vector.load %arg17[%c0_137, %c64_138] : memref<16x384xf32, #tpu.memory_space<vmem>>, vector<16x32xf32>
    %c0_139 = arith.constant 0 : index
    %c192_140 = arith.constant 192 : index
    %216 = vector.load %arg17[%c0_139, %c192_140] : memref<16x384xf32, #tpu.memory_space<vmem>>, vector<16x32xf32>
    %c0_141 = arith.constant 0 : index
    %c320_142 = arith.constant 320 : index
    %217 = vector.load %arg17[%c0_141, %c320_142] : memref<16x384xf32, #tpu.memory_space<vmem>>, vector<16x32xf32>
    %218 = tpu.transpose %216, [1, 0] : vector<16x32xf32> -> vector<32x16xf32>
    %cst_143 = arith.constant dense<0.000000e+00> : vector<16x16xf32>
    %219 = tpu.matmul %215, %218, %cst_143 {dimension_numbers = #tpu.dot_dimension_numbers<[1], [0], [0], [1], [0, 0, 1, 1], [], []>} : vector<16x32xf32>, vector<32x16xf32>, vector<16x16xf32> -> vector<16x16xf32>
    %cst_144 = arith.constant 0.176776692 : f32
    %220 = vector.broadcast %cst_144 : f32 to vector<16x16xf32>
    %221 = arith.mulf %219, %220 : vector<16x16xf32>
    %222 = arith.addf %221, %0 : vector<16x16xf32>
    %cst_145 = arith.constant dense<0xFF800000> : vector<16xf32>
    %223 = vector.multi_reduction <maximumf>, %222, %cst_145 [1] : vector<16x16xf32> to vector<16xf32>
    %224 = vector.shape_cast %223 : vector<16xf32> to vector<16x1xf32>
    %225 = vector.broadcast %224 : vector<16x1xf32> to vector<16x16xf32>
    %226 = arith.subf %222, %225 : vector<16x16xf32>
    %227 = math.exp %226 : vector<16x16xf32>
    %cst_146 = arith.constant dense<0.000000e+00> : vector<16xf32>
    %228 = vector.multi_reduction <add>, %227, %cst_146 [1] : vector<16x16xf32> to vector<16xf32>
    %229 = vector.shape_cast %228 : vector<16xf32> to vector<16x1xf32>
    %230 = vector.broadcast %229 : vector<16x1xf32> to vector<16x16xf32>
    %231 = arith.divf %227, %230 : vector<16x16xf32>
    %cst_147 = arith.constant dense<0.000000e+00> : vector<16x32xf32>
    %232 = tpu.matmul %231, %217, %cst_147 {dimension_numbers = #tpu.dot_dimension_numbers<[1], [0], [0], [1], [0, 0, 1, 1], [], []>} : vector<16x16xf32>, vector<16x32xf32>, vector<16x32xf32> -> vector<16x32xf32>
    %c0_148 = arith.constant 0 : index
    %c64_149 = arith.constant 64 : index
    %233 = vector.load %arg18[%c0_148, %c64_149] : memref<16x128xf32, #tpu.memory_space<vmem>>, vector<16x32xf32>
    tpu.vector_store %arg18[%c0_148, %c64_149], %232 {strides = array<i32>} : memref<16x128xf32, #tpu.memory_space<vmem>>, vector<16x32xf32>,
    %c0_150 = arith.constant 0 : index
    %c96_151 = arith.constant 96 : index
    %234 = vector.load %arg17[%c0_150, %c96_151] : memref<16x384xf32, #tpu.memory_space<vmem>>, vector<16x32xf32>
    %c0_152 = arith.constant 0 : index
    %c224_153 = arith.constant 224 : index
    %235 = vector.load %arg17[%c0_152, %c224_153] : memref<16x384xf32, #tpu.memory_space<vmem>>, vector<16x32xf32>
    %c0_154 = arith.constant 0 : index
    %c352_155 = arith.constant 352 : index
    %236 = vector.load %arg17[%c0_154, %c352_155] : memref<16x384xf32, #tpu.memory_space<vmem>>, vector<16x32xf32>
    %237 = tpu.transpose %235, [1, 0] : vector<16x32xf32> -> vector<32x16xf32>
    %cst_156 = arith.constant dense<0.000000e+00> : vector<16x16xf32>
    %238 = tpu.matmul %234, %237, %cst_156 {dimension_numbers = #tpu.dot_dimension_numbers<[1], [0], [0], [1], [0, 0, 1, 1], [], []>} : vector<16x32xf32>, vector<32x16xf32>, vector<16x16xf32> -> vector<16x16xf32>
    %cst_157 = arith.constant 0.176776692 : f32
    %239 = vector.broadcast %cst_157 : f32 to vector<16x16xf32>
    %240 = arith.mulf %238, %239 : vector<16x16xf32>
    %241 = arith.addf %240, %0 : vector<16x16xf32>
    %cst_158 = arith.constant dense<0xFF800000> : vector<16xf32>
    %242 = vector.multi_reduction <maximumf>, %241, %cst_158 [1] : vector<16x16xf32> to vector<16xf32>
    %243 = vector.shape_cast %242 : vector<16xf32> to vector<16x1xf32>
    %244 = vector.broadcast %243 : vector<16x1xf32> to vector<16x16xf32>
    %245 = arith.subf %241, %244 : vector<16x16xf32>
    %246 = math.exp %245 : vector<16x16xf32>
    %cst_159 = arith.constant dense<0.000000e+00> : vector<16xf32>
    %247 = vector.multi_reduction <add>, %246, %cst_159 [1] : vector<16x16xf32> to vector<16xf32>
    %248 = vector.shape_cast %247 : vector<16xf32> to vector<16x1xf32>
    %249 = vector.broadcast %248 : vector<16x1xf32> to vector<16x16xf32>
    %250 = arith.divf %246, %249 : vector<16x16xf32>
    %cst_160 = arith.constant dense<0.000000e+00> : vector<16x32xf32>
    %251 = tpu.matmul %250, %236, %cst_160 {dimension_numbers = #tpu.dot_dimension_numbers<[1], [0], [0], [1], [0, 0, 1, 1], [], []>} : vector<16x16xf32>, vector<16x32xf32>, vector<16x32xf32> -> vector<16x32xf32>
    %c0_161 = arith.constant 0 : index
    %c96_162 = arith.constant 96 : index
    %252 = vector.load %arg18[%c0_161, %c96_162] : memref<16x128xf32, #tpu.memory_space<vmem>>, vector<16x32xf32>
    tpu.vector_store %arg18[%c0_161, %c96_162], %251 {strides = array<i32>} : memref<16x128xf32, #tpu.memory_space<vmem>>, vector<16x32xf32>,
    %c0_163 = arith.constant 0 : index
    %c0_164 = arith.constant 0 : index
    %253 = vector.load %arg18[%c0_163, %c0_164] : memref<16x128xf32, #tpu.memory_space<vmem>>, vector<16x128xf32>
    %c1_165 = arith.constant 1 : index
    %c0_166 = arith.constant 0 : index
    %c0_167 = arith.constant 0 : index
    %254 = vector.load %arg6[%c1_165, %c0_166, %c0_167] : memref<2x128x128xf32, #tpu.memory_space<vmem>>, vector<1x128x128xf32>
    %255 = vector.shape_cast %254 : vector<1x128x128xf32> to vector<128x128xf32>
    %cst_168 = arith.constant dense<0.000000e+00> : vector<16x128xf32>
    %256 = tpu.matmul %253, %255, %cst_168 {dimension_numbers = #tpu.dot_dimension_numbers<[1], [0], [0], [1], [0, 0, 1, 1], [], []>} : vector<16x128xf32>, vector<128x128xf32>, vector<16x128xf32> -> vector<16x128xf32>
    %c1_169 = arith.constant 1 : index
    %c0_170 = arith.constant 0 : index
    %c0_171 = arith.constant 0 : index
    %257 = vector.load %arg7[%c1_169, %c0_170, %c0_171] : memref<2x1x128xf32, #tpu.memory_space<vmem>>, vector<1x1x128xf32>
    %258 = vector.shape_cast %257 : vector<1x1x128xf32> to vector<1x128xf32>
    %259 = vector.broadcast %258 : vector<1x128xf32> to vector<16x128xf32>
    %260 = arith.addf %256, %259 : vector<16x128xf32>
    %261 = arith.addf %260, %2 : vector<16x128xf32>
    %c1_172 = arith.constant 1 : index
    %c0_173 = arith.constant 0 : index
    %c0_174 = arith.constant 0 : index
    %262 = vector.load %arg8[%c1_172, %c0_173, %c0_174] : memref<2x1x128xf32, #tpu.memory_space<vmem>>, vector<1x1x128xf32>
    %263 = vector.shape_cast %262 : vector<1x1x128xf32> to vector<1x128xf32>
    %c1_175 = arith.constant 1 : index
    %c0_176 = arith.constant 0 : index
    %c0_177 = arith.constant 0 : index
    %264 = vector.load %arg9[%c1_175, %c0_176, %c0_177] : memref<2x1x128xf32, #tpu.memory_space<vmem>>, vector<1x1x128xf32>
    %265 = vector.shape_cast %264 : vector<1x1x128xf32> to vector<1x128xf32>
    %cst_178 = arith.constant dense<0.000000e+00> : vector<16xf32>
    %266 = vector.multi_reduction <add>, %261, %cst_178 [1] : vector<16x128xf32> to vector<16xf32>
    %267 = vector.shape_cast %266 : vector<16xf32> to vector<16x1xf32>
    %cst_179 = arith.constant 1.280000e+02 : f32
    %268 = vector.broadcast %cst_179 : f32 to vector<16x1xf32>
    %269 = arith.divf %267, %268 : vector<16x1xf32>
    %270 = vector.broadcast %269 : vector<16x1xf32> to vector<16x128xf32>
    %271 = arith.subf %261, %270 : vector<16x128xf32>
    %272 = arith.mulf %271, %271 : vector<16x128xf32>
    %cst_180 = arith.constant dense<0.000000e+00> : vector<16xf32>
    %273 = vector.multi_reduction <add>, %272, %cst_180 [1] : vector<16x128xf32> to vector<16xf32>
    %274 = vector.shape_cast %273 : vector<16xf32> to vector<16x1xf32>
    %cst_181 = arith.constant 1.280000e+02 : f32
    %275 = vector.broadcast %cst_181 : f32 to vector<16x1xf32>
    %276 = arith.divf %274, %275 : vector<16x1xf32>
    %cst_182 = arith.constant 9.99999996E-13 : f32
    %277 = vector.broadcast %cst_182 : f32 to vector<16x1xf32>
    %278 = arith.addf %276, %277 : vector<16x1xf32>
    %279 = math.rsqrt %278 : vector<16x1xf32>
    %280 = vector.broadcast %279 : vector<16x1xf32> to vector<16x128xf32>
    %281 = arith.mulf %271, %280 : vector<16x128xf32>
    %282 = vector.broadcast %263 : vector<1x128xf32> to vector<16x128xf32>
    %283 = arith.mulf %281, %282 : vector<16x128xf32>
    %284 = vector.broadcast %265 : vector<1x128xf32> to vector<16x128xf32>
    %285 = arith.addf %283, %284 : vector<16x128xf32>
    %c1_183 = arith.constant 1 : index
    %c0_184 = arith.constant 0 : index
    %c0_185 = arith.constant 0 : index
    %286 = vector.load %arg10[%c1_183, %c0_184, %c0_185] : memref<2x128x256xf32, #tpu.memory_space<vmem>>, vector<1x128x256xf32>
    %287 = vector.shape_cast %286 : vector<1x128x256xf32> to vector<128x256xf32>
    %cst_186 = arith.constant dense<0.000000e+00> : vector<16x256xf32>
    %288 = tpu.matmul %285, %287, %cst_186 {dimension_numbers = #tpu.dot_dimension_numbers<[1], [0], [0], [1], [0, 0, 1, 1], [], []>} : vector<16x128xf32>, vector<128x256xf32>, vector<16x256xf32> -> vector<16x256xf32>
    %c1_187 = arith.constant 1 : index
    %c0_188 = arith.constant 0 : index
    %c0_189 = arith.constant 0 : index
    %289 = vector.load %arg11[%c1_187, %c0_188, %c0_189] : memref<2x1x256xf32, #tpu.memory_space<vmem>>, vector<1x1x256xf32>
    %290 = vector.shape_cast %289 : vector<1x1x256xf32> to vector<1x256xf32>
    %291 = vector.broadcast %290 : vector<1x256xf32> to vector<16x256xf32>
    %292 = arith.addf %288, %291 : vector<16x256xf32>
    %cst_190 = arith.constant 5.000000e-01 : f32
    %293 = vector.broadcast %cst_190 : f32 to vector<16x256xf32>
    %294 = arith.mulf %293, %292 : vector<16x256xf32>
    %cst_191 = arith.constant 2.000000e+00 : f32
    %295 = math.sqrt %cst_191 : f32
    %cst_192 = arith.constant 1.000000e+00 : f32
    %296 = arith.divf %cst_192, %295 : f32
    %297 = vector.broadcast %296 : f32 to vector<16x256xf32>
    %298 = arith.mulf %292, %297 : vector<16x256xf32>
    %299 = math.erf %298 : vector<16x256xf32>
    %cst_193 = arith.constant 1.000000e+00 : f32
    %300 = vector.broadcast %cst_193 : f32 to vector<16x256xf32>
    %301 = arith.addf %300, %299 : vector<16x256xf32>
    %302 = arith.mulf %294, %301 : vector<16x256xf32>
    %c1_194 = arith.constant 1 : index
    %c0_195 = arith.constant 0 : index
    %c0_196 = arith.constant 0 : index
    %303 = vector.load %arg12[%c1_194, %c0_195, %c0_196] : memref<2x256x128xf32, #tpu.memory_space<vmem>>, vector<1x256x128xf32>
    %304 = vector.shape_cast %303 : vector<1x256x128xf32> to vector<256x128xf32>
    %cst_197 = arith.constant dense<0.000000e+00> : vector<16x128xf32>
    %305 = tpu.matmul %302, %304, %cst_197 {dimension_numbers = #tpu.dot_dimension_numbers<[1], [0], [0], [1], [0, 0, 1, 1], [], []>} : vector<16x256xf32>, vector<256x128xf32>, vector<16x128xf32> -> vector<16x128xf32>
    %c1_198 = arith.constant 1 : index
    %c0_199 = arith.constant 0 : index
    %c0_200 = arith.constant 0 : index
    %306 = vector.load %arg13[%c1_198, %c0_199, %c0_200] : memref<2x1x128xf32, #tpu.memory_space<vmem>>, vector<1x1x128xf32>
    %307 = vector.shape_cast %306 : vector<1x1x128xf32> to vector<1x128xf32>
    %308 = vector.broadcast %307 : vector<1x128xf32> to vector<16x128xf32>
    %309 = arith.addf %305, %308 : vector<16x128xf32>
    %310 = arith.addf %309, %285 : vector<16x128xf32>
    %c1_201 = arith.constant 1 : index
    %c0_202 = arith.constant 0 : index
    %c0_203 = arith.constant 0 : index
    %311 = vector.load %arg14[%c1_201, %c0_202, %c0_203] : memref<2x1x128xf32, #tpu.memory_space<vmem>>, vector<1x1x128xf32>
    %312 = vector.shape_cast %311 : vector<1x1x128xf32> to vector<1x128xf32>
    %c1_204 = arith.constant 1 : index
    %c0_205 = arith.constant 0 : index
    %c0_206 = arith.constant 0 : index
    %313 = vector.load %arg15[%c1_204, %c0_205, %c0_206] : memref<2x1x128xf32, #tpu.memory_space<vmem>>, vector<1x1x128xf32>
    %314 = vector.shape_cast %313 : vector<1x1x128xf32> to vector<1x128xf32>
    %cst_207 = arith.constant dense<0.000000e+00> : vector<16xf32>
    %315 = vector.multi_reduction <add>, %310, %cst_207 [1] : vector<16x128xf32> to vector<16xf32>
    %316 = vector.shape_cast %315 : vector<16xf32> to vector<16x1xf32>
    %cst_208 = arith.constant 1.280000e+02 : f32
    %317 = vector.broadcast %cst_208 : f32 to vector<16x1xf32>
    %318 = arith.divf %316, %317 : vector<16x1xf32>
    %319 = vector.broadcast %318 : vector<16x1xf32> to vector<16x128xf32>
    %320 = arith.subf %310, %319 : vector<16x128xf32>
    %321 = arith.mulf %320, %320 : vector<16x128xf32>
    %cst_209 = arith.constant dense<0.000000e+00> : vector<16xf32>
    %322 = vector.multi_reduction <add>, %321, %cst_209 [1] : vector<16x128xf32> to vector<16xf32>
    %323 = vector.shape_cast %322 : vector<16xf32> to vector<16x1xf32>
    %cst_210 = arith.constant 1.280000e+02 : f32
    %324 = vector.broadcast %cst_210 : f32 to vector<16x1xf32>
    %325 = arith.divf %323, %324 : vector<16x1xf32>
    %cst_211 = arith.constant 9.99999996E-13 : f32
    %326 = vector.broadcast %cst_211 : f32 to vector<16x1xf32>
    %327 = arith.addf %325, %326 : vector<16x1xf32>
    %328 = math.rsqrt %327 : vector<16x1xf32>
    %329 = vector.broadcast %328 : vector<16x1xf32> to vector<16x128xf32>
    %330 = arith.mulf %320, %329 : vector<16x128xf32>
    %331 = vector.broadcast %312 : vector<1x128xf32> to vector<16x128xf32>
    %332 = arith.mulf %330, %331 : vector<16x128xf32>
    %333 = vector.broadcast %314 : vector<1x128xf32> to vector<16x128xf32>
    %334 = arith.addf %332, %333 : vector<16x128xf32>
    %c0_212 = arith.constant 0 : index
    %335 = memref.load %arg0[%c0_212] : memref<1xf32, #tpu.memory_space<smem>>
    %336 = arith.negf %335 : f32
    %337 = math.exp %336 : f32
    %cst_213 = arith.constant 1.000000e+00 : f32
    %338 = arith.addf %cst_213, %337 : f32
    %339 = arith.divf %cst_213, %338 : f32
    %340 = vector.broadcast %339 : f32 to vector<16x128xf32>
    %341 = arith.mulf %340, %168 : vector<16x128xf32>
    %cst_214 = arith.constant 1.000000e+00 : f32
    %342 = arith.subf %cst_214, %339 : f32
    %343 = vector.broadcast %342 : f32 to vector<16x128xf32>
    %344 = arith.mulf %343, %334 : vector<16x128xf32>
    %345 = arith.addf %341, %344 : vector<16x128xf32>
    %c0_215 = arith.constant 0 : index
    %c0_216 = arith.constant 0 : index
    %346 = vector.load %arg16[%c0_215, %c0_216] : memref<16x128xf32, #tpu.memory_space<vmem>>, vector<16x128xf32>
    tpu.vector_store %arg16[%c0_215, %c0_216], %345 {strides = array<i32>} : memref<16x128xf32, #tpu.memory_space<vmem>>, vector<16x128xf32>,
    return
  }
}

module attributes {stable_mosaic.version = 11 : i64} {
  func.func @_layer_pair_kernel(%arg0: memref<1xf32, #tpu.memory_space<smem>>, %arg1: memref<16x128xf32, #tpu.memory_space<vmem>>, %arg2: memref<16x128xf32, #tpu.memory_space<vmem>>, %arg3: memref<16x16xf32, #tpu.memory_space<vmem>>, %arg4: memref<2x128x384xf32, #tpu.memory_space<vmem>>, %arg5: memref<2x1x384xf32, #tpu.memory_space<vmem>>, %arg6: memref<2x128x128xf32, #tpu.memory_space<vmem>>, %arg7: memref<2x1x128xf32, #tpu.memory_space<vmem>>, %arg8: memref<2x1x128xf32, #tpu.memory_space<vmem>>, %arg9: memref<2x1x128xf32, #tpu.memory_space<vmem>>, %arg10: memref<2x128x256xf32, #tpu.memory_space<vmem>>, %arg11: memref<2x1x256xf32, #tpu.memory_space<vmem>>, %arg12: memref<2x256x128xf32, #tpu.memory_space<vmem>>, %arg13: memref<2x1x128xf32, #tpu.memory_space<vmem>>, %arg14: memref<2x1x128xf32, #tpu.memory_space<vmem>>, %arg15: memref<2x1x128xf32, #tpu.memory_space<vmem>>, %arg16: memref<16x128xf32, #tpu.memory_space<vmem>>, %arg17: memref<16x384xf32, #tpu.memory_space<vmem>>, %arg18: memref<16x128xf32, #tpu.memory_space<vmem>>) attributes {dimension_semantics = [], scalar_prefetch = 0 : i64, scratch_operands = 2 : i64, tpu.core_type = #tpu.core_type<tc>} {
    %c0 = arith.constant 0 : index
    %c0_0 = arith.constant 0 : index
    %0 = vector.load %arg3[%c0, %c0_0] : memref<16x16xf32, #tpu.memory_space<vmem>>, vector<16x16xf32>
    %c0_1 = arith.constant 0 : index
    %c0_2 = arith.constant 0 : index
    %1 = vector.load %arg1[%c0_1, %c0_2] : memref<16x128xf32, #tpu.memory_space<vmem>>, vector<16x128xf32>
    %c0_3 = arith.constant 0 : index
    %c0_4 = arith.constant 0 : index
    %2 = vector.load %arg2[%c0_3, %c0_4] : memref<16x128xf32, #tpu.memory_space<vmem>>, vector<16x128xf32>
    %c0_5 = arith.constant 0 : index
    %c0_6 = arith.constant 0 : index
    %c0_7 = arith.constant 0 : index
    %3 = vector.load %arg4[%c0_5, %c0_6, %c0_7] : memref<2x128x384xf32, #tpu.memory_space<vmem>>, vector<1x128x384xf32>
    %4 = vector.shape_cast %3 : vector<1x128x384xf32> to vector<128x384xf32>
    %cst = arith.constant dense<0.000000e+00> : vector<16x384xf32>
    %5 = tpu.matmul %1, %4, %cst {dimension_numbers = #tpu.dot_dimension_numbers<[1], [0], [0], [1], [0, 0, 1, 1], [], []>} : vector<16x128xf32>, vector<128x384xf32>, vector<16x384xf32> -> vector<16x384xf32>
    %c0_8 = arith.constant 0 : index
    %c0_9 = arith.constant 0 : index
    %c0_10 = arith.constant 0 : index
    %6 = vector.load %arg5[%c0_8, %c0_9, %c0_10] : memref<2x1x384xf32, #tpu.memory_space<vmem>>, vector<1x1x384xf32>
    %7 = vector.shape_cast %6 : vector<1x1x384xf32> to vector<1x384xf32>
    %8 = vector.broadcast %7 : vector<1x384xf32> to vector<16x384xf32>
    %9 = arith.addf %5, %8 : vector<16x384xf32>
    %c0_11 = arith.constant 0 : index
    %c0_12 = arith.constant 0 : index
    %10 = vector.load %arg17[%c0_11, %c0_12] : memref<16x384xf32, #tpu.memory_space<vmem>>, vector<16x384xf32>
    tpu.vector_store %arg17[%c0_11, %c0_12], %9 {strides = array<i32>} : memref<16x384xf32, #tpu.memory_space<vmem>>, vector<16x384xf32>,
    %c0_13 = arith.constant 0 : index
    %c0_14 = arith.constant 0 : index
    %11 = vector.load %arg17[%c0_13, %c0_14] : memref<16x384xf32, #tpu.memory_space<vmem>>, vector<16x32xf32>
    %c0_15 = arith.constant 0 : index
    %c128 = arith.constant 128 : index
    %12 = vector.load %arg17[%c0_15, %c128] : memref<16x384xf32, #tpu.memory_space<vmem>>, vector<16x32xf32>
    %c0_16 = arith.constant 0 : index
    %c256 = arith.constant 256 : index
    %13 = vector.load %arg17[%c0_16, %c256] : memref<16x384xf32, #tpu.memory_space<vmem>>, vector<16x32xf32>
    %14 = tpu.transpose %12, [1, 0] : vector<16x32xf32> -> vector<32x16xf32>
    %cst_17 = arith.constant dense<0.000000e+00> : vector<16x16xf32>
    %15 = tpu.matmul %11, %14, %cst_17 {dimension_numbers = #tpu.dot_dimension_numbers<[1], [0], [0], [1], [0, 0, 1, 1], [], []>} : vector<16x32xf32>, vector<32x16xf32>, vector<16x16xf32> -> vector<16x16xf32>
    %cst_18 = arith.constant 0.176776692 : f32
    %16 = vector.broadcast %cst_18 : f32 to vector<16x16xf32>
    %17 = arith.mulf %15, %16 : vector<16x16xf32>
    %18 = arith.addf %17, %0 : vector<16x16xf32>
    %cst_19 = arith.constant dense<0xFF800000> : vector<16xf32>
    %19 = vector.multi_reduction <maximumf>, %18, %cst_19 [1] : vector<16x16xf32> to vector<16xf32>
    %20 = vector.shape_cast %19 : vector<16xf32> to vector<16x1xf32>
    %21 = vector.broadcast %20 : vector<16x1xf32> to vector<16x16xf32>
    %22 = arith.subf %18, %21 : vector<16x16xf32>
    %23 = math.exp %22 : vector<16x16xf32>
    %cst_20 = arith.constant dense<0.000000e+00> : vector<16xf32>
    %24 = vector.multi_reduction <add>, %23, %cst_20 [1] : vector<16x16xf32> to vector<16xf32>
    %25 = vector.shape_cast %24 : vector<16xf32> to vector<16x1xf32>
    %26 = vector.broadcast %25 : vector<16x1xf32> to vector<16x16xf32>
    %27 = arith.divf %23, %26 : vector<16x16xf32>
    %cst_21 = arith.constant dense<0.000000e+00> : vector<16x32xf32>
    %28 = tpu.matmul %27, %13, %cst_21 {dimension_numbers = #tpu.dot_dimension_numbers<[1], [0], [0], [1], [0, 0, 1, 1], [], []>} : vector<16x16xf32>, vector<16x32xf32>, vector<16x32xf32> -> vector<16x32xf32>
    %c0_22 = arith.constant 0 : index
    %c0_23 = arith.constant 0 : index
    %29 = vector.load %arg18[%c0_22, %c0_23] : memref<16x128xf32, #tpu.memory_space<vmem>>, vector<16x32xf32>
    tpu.vector_store %arg18[%c0_22, %c0_23], %28 {strides = array<i32>} : memref<16x128xf32, #tpu.memory_space<vmem>>, vector<16x32xf32>,
    %c0_24 = arith.constant 0 : index
    %c32 = arith.constant 32 : index
    %30 = vector.load %arg17[%c0_24, %c32] : memref<16x384xf32, #tpu.memory_space<vmem>>, vector<16x32xf32>
    %c0_25 = arith.constant 0 : index
    %c160 = arith.constant 160 : index
    %31 = vector.load %arg17[%c0_25, %c160] : memref<16x384xf32, #tpu.memory_space<vmem>>, vector<16x32xf32>
    %c0_26 = arith.constant 0 : index
    %c288 = arith.constant 288 : index
    %32 = vector.load %arg17[%c0_26, %c288] : memref<16x384xf32, #tpu.memory_space<vmem>>, vector<16x32xf32>
    %33 = tpu.transpose %31, [1, 0] : vector<16x32xf32> -> vector<32x16xf32>
    %cst_27 = arith.constant dense<0.000000e+00> : vector<16x16xf32>
    %34 = tpu.matmul %30, %33, %cst_27 {dimension_numbers = #tpu.dot_dimension_numbers<[1], [0], [0], [1], [0, 0, 1, 1], [], []>} : vector<16x32xf32>, vector<32x16xf32>, vector<16x16xf32> -> vector<16x16xf32>
    %cst_28 = arith.constant 0.176776692 : f32
    %35 = vector.broadcast %cst_28 : f32 to vector<16x16xf32>
    %36 = arith.mulf %34, %35 : vector<16x16xf32>
    %37 = arith.addf %36, %0 : vector<16x16xf32>
    %cst_29 = arith.constant dense<0xFF800000> : vector<16xf32>
    %38 = vector.multi_reduction <maximumf>, %37, %cst_29 [1] : vector<16x16xf32> to vector<16xf32>
    %39 = vector.shape_cast %38 : vector<16xf32> to vector<16x1xf32>
    %40 = vector.broadcast %39 : vector<16x1xf32> to vector<16x16xf32>
    %41 = arith.subf %37, %40 : vector<16x16xf32>
    %42 = math.exp %41 : vector<16x16xf32>
    %cst_30 = arith.constant dense<0.000000e+00> : vector<16xf32>
    %43 = vector.multi_reduction <add>, %42, %cst_30 [1] : vector<16x16xf32> to vector<16xf32>
    %44 = vector.shape_cast %43 : vector<16xf32> to vector<16x1xf32>
    %45 = vector.broadcast %44 : vector<16x1xf32> to vector<16x16xf32>
    %46 = arith.divf %42, %45 : vector<16x16xf32>
    %cst_31 = arith.constant dense<0.000000e+00> : vector<16x32xf32>
    %47 = tpu.matmul %46, %32, %cst_31 {dimension_numbers = #tpu.dot_dimension_numbers<[1], [0], [0], [1], [0, 0, 1, 1], [], []>} : vector<16x16xf32>, vector<16x32xf32>, vector<16x32xf32> -> vector<16x32xf32>
    %c0_32 = arith.constant 0 : index
    %c32_33 = arith.constant 32 : index
    %48 = vector.load %arg18[%c0_32, %c32_33] : memref<16x128xf32, #tpu.memory_space<vmem>>, vector<16x32xf32>
    tpu.vector_store %arg18[%c0_32, %c32_33], %47 {strides = array<i32>} : memref<16x128xf32, #tpu.memory_space<vmem>>, vector<16x32xf32>,
    %c0_34 = arith.constant 0 : index
    %c64 = arith.constant 64 : index
    %49 = vector.load %arg17[%c0_34, %c64] : memref<16x384xf32, #tpu.memory_space<vmem>>, vector<16x32xf32>
    %c0_35 = arith.constant 0 : index
    %c192 = arith.constant 192 : index
    %50 = vector.load %arg17[%c0_35, %c192] : memref<16x384xf32, #tpu.memory_space<vmem>>, vector<16x32xf32>
    %c0_36 = arith.constant 0 : index
    %c320 = arith.constant 320 : index
    %51 = vector.load %arg17[%c0_36, %c320] : memref<16x384xf32, #tpu.memory_space<vmem>>, vector<16x32xf32>
    %52 = tpu.transpose %50, [1, 0] : vector<16x32xf32> -> vector<32x16xf32>
    %cst_37 = arith.constant dense<0.000000e+00> : vector<16x16xf32>
    %53 = tpu.matmul %49, %52, %cst_37 {dimension_numbers = #tpu.dot_dimension_numbers<[1], [0], [0], [1], [0, 0, 1, 1], [], []>} : vector<16x32xf32>, vector<32x16xf32>, vector<16x16xf32> -> vector<16x16xf32>
    %cst_38 = arith.constant 0.176776692 : f32
    %54 = vector.broadcast %cst_38 : f32 to vector<16x16xf32>
    %55 = arith.mulf %53, %54 : vector<16x16xf32>
    %56 = arith.addf %55, %0 : vector<16x16xf32>
    %cst_39 = arith.constant dense<0xFF800000> : vector<16xf32>
    %57 = vector.multi_reduction <maximumf>, %56, %cst_39 [1] : vector<16x16xf32> to vector<16xf32>
    %58 = vector.shape_cast %57 : vector<16xf32> to vector<16x1xf32>
    %59 = vector.broadcast %58 : vector<16x1xf32> to vector<16x16xf32>
    %60 = arith.subf %56, %59 : vector<16x16xf32>
    %61 = math.exp %60 : vector<16x16xf32>
    %cst_40 = arith.constant dense<0.000000e+00> : vector<16xf32>
    %62 = vector.multi_reduction <add>, %61, %cst_40 [1] : vector<16x16xf32> to vector<16xf32>
    %63 = vector.shape_cast %62 : vector<16xf32> to vector<16x1xf32>
    %64 = vector.broadcast %63 : vector<16x1xf32> to vector<16x16xf32>
    %65 = arith.divf %61, %64 : vector<16x16xf32>
    %cst_41 = arith.constant dense<0.000000e+00> : vector<16x32xf32>
    %66 = tpu.matmul %65, %51, %cst_41 {dimension_numbers = #tpu.dot_dimension_numbers<[1], [0], [0], [1], [0, 0, 1, 1], [], []>} : vector<16x16xf32>, vector<16x32xf32>, vector<16x32xf32> -> vector<16x32xf32>
    %c0_42 = arith.constant 0 : index
    %c64_43 = arith.constant 64 : index
    %67 = vector.load %arg18[%c0_42, %c64_43] : memref<16x128xf32, #tpu.memory_space<vmem>>, vector<16x32xf32>
    tpu.vector_store %arg18[%c0_42, %c64_43], %66 {strides = array<i32>} : memref<16x128xf32, #tpu.memory_space<vmem>>, vector<16x32xf32>,
    %c0_44 = arith.constant 0 : index
    %c96 = arith.constant 96 : index
    %68 = vector.load %arg17[%c0_44, %c96] : memref<16x384xf32, #tpu.memory_space<vmem>>, vector<16x32xf32>
    %c0_45 = arith.constant 0 : index
    %c224 = arith.constant 224 : index
    %69 = vector.load %arg17[%c0_45, %c224] : memref<16x384xf32, #tpu.memory_space<vmem>>, vector<16x32xf32>
    %c0_46 = arith.constant 0 : index
    %c352 = arith.constant 352 : index
    %70 = vector.load %arg17[%c0_46, %c352] : memref<16x384xf32, #tpu.memory_space<vmem>>, vector<16x32xf32>
    %71 = tpu.transpose %69, [1, 0] : vector<16x32xf32> -> vector<32x16xf32>
    %cst_47 = arith.constant dense<0.000000e+00> : vector<16x16xf32>
    %72 = tpu.matmul %68, %71, %cst_47 {dimension_numbers = #tpu.dot_dimension_numbers<[1], [0], [0], [1], [0, 0, 1, 1], [], []>} : vector<16x32xf32>, vector<32x16xf32>, vector<16x16xf32> -> vector<16x16xf32>
    %cst_48 = arith.constant 0.176776692 : f32
    %73 = vector.broadcast %cst_48 : f32 to vector<16x16xf32>
    %74 = arith.mulf %72, %73 : vector<16x16xf32>
    %75 = arith.addf %74, %0 : vector<16x16xf32>
    %cst_49 = arith.constant dense<0xFF800000> : vector<16xf32>
    %76 = vector.multi_reduction <maximumf>, %75, %cst_49 [1] : vector<16x16xf32> to vector<16xf32>
    %77 = vector.shape_cast %76 : vector<16xf32> to vector<16x1xf32>
    %78 = vector.broadcast %77 : vector<16x1xf32> to vector<16x16xf32>
    %79 = arith.subf %75, %78 : vector<16x16xf32>
    %80 = math.exp %79 : vector<16x16xf32>
    %cst_50 = arith.constant dense<0.000000e+00> : vector<16xf32>
    %81 = vector.multi_reduction <add>, %80, %cst_50 [1] : vector<16x16xf32> to vector<16xf32>
    %82 = vector.shape_cast %81 : vector<16xf32> to vector<16x1xf32>
    %83 = vector.broadcast %82 : vector<16x1xf32> to vector<16x16xf32>
    %84 = arith.divf %80, %83 : vector<16x16xf32>
    %cst_51 = arith.constant dense<0.000000e+00> : vector<16x32xf32>
    %85 = tpu.matmul %84, %70, %cst_51 {dimension_numbers = #tpu.dot_dimension_numbers<[1], [0], [0], [1], [0, 0, 1, 1], [], []>} : vector<16x16xf32>, vector<16x32xf32>, vector<16x32xf32> -> vector<16x32xf32>
    %c0_52 = arith.constant 0 : index
    %c96_53 = arith.constant 96 : index
    %86 = vector.load %arg18[%c0_52, %c96_53] : memref<16x128xf32, #tpu.memory_space<vmem>>, vector<16x32xf32>
    tpu.vector_store %arg18[%c0_52, %c96_53], %85 {strides = array<i32>} : memref<16x128xf32, #tpu.memory_space<vmem>>, vector<16x32xf32>,
    %c0_54 = arith.constant 0 : index
    %c0_55 = arith.constant 0 : index
    %87 = vector.load %arg18[%c0_54, %c0_55] : memref<16x128xf32, #tpu.memory_space<vmem>>, vector<16x128xf32>
    %c0_56 = arith.constant 0 : index
    %c0_57 = arith.constant 0 : index
    %c0_58 = arith.constant 0 : index
    %88 = vector.load %arg6[%c0_56, %c0_57, %c0_58] : memref<2x128x128xf32, #tpu.memory_space<vmem>>, vector<1x128x128xf32>
    %89 = vector.shape_cast %88 : vector<1x128x128xf32> to vector<128x128xf32>
    %cst_59 = arith.constant dense<0.000000e+00> : vector<16x128xf32>
    %90 = tpu.matmul %87, %89, %cst_59 {dimension_numbers = #tpu.dot_dimension_numbers<[1], [0], [0], [1], [0, 0, 1, 1], [], []>} : vector<16x128xf32>, vector<128x128xf32>, vector<16x128xf32> -> vector<16x128xf32>
    %c0_60 = arith.constant 0 : index
    %c0_61 = arith.constant 0 : index
    %c0_62 = arith.constant 0 : index
    %91 = vector.load %arg7[%c0_60, %c0_61, %c0_62] : memref<2x1x128xf32, #tpu.memory_space<vmem>>, vector<1x1x128xf32>
    %92 = vector.shape_cast %91 : vector<1x1x128xf32> to vector<1x128xf32>
    %93 = vector.broadcast %92 : vector<1x128xf32> to vector<16x128xf32>
    %94 = arith.addf %90, %93 : vector<16x128xf32>
    %95 = arith.addf %94, %1 : vector<16x128xf32>
    %c0_63 = arith.constant 0 : index
    %c0_64 = arith.constant 0 : index
    %c0_65 = arith.constant 0 : index
    %96 = vector.load %arg8[%c0_63, %c0_64, %c0_65] : memref<2x1x128xf32, #tpu.memory_space<vmem>>, vector<1x1x128xf32>
    %97 = vector.shape_cast %96 : vector<1x1x128xf32> to vector<1x128xf32>
    %c0_66 = arith.constant 0 : index
    %c0_67 = arith.constant 0 : index
    %c0_68 = arith.constant 0 : index
    %98 = vector.load %arg9[%c0_66, %c0_67, %c0_68] : memref<2x1x128xf32, #tpu.memory_space<vmem>>, vector<1x1x128xf32>
    %99 = vector.shape_cast %98 : vector<1x1x128xf32> to vector<1x128xf32>
    %cst_69 = arith.constant dense<0.000000e+00> : vector<16xf32>
    %100 = vector.multi_reduction <add>, %95, %cst_69 [1] : vector<16x128xf32> to vector<16xf32>
    %101 = vector.shape_cast %100 : vector<16xf32> to vector<16x1xf32>
    %cst_70 = arith.constant 1.280000e+02 : f32
    %102 = vector.broadcast %cst_70 : f32 to vector<16x1xf32>
    %103 = arith.divf %101, %102 : vector<16x1xf32>
    %104 = vector.broadcast %103 : vector<16x1xf32> to vector<16x128xf32>
    %105 = arith.subf %95, %104 : vector<16x128xf32>
    %106 = arith.mulf %105, %105 : vector<16x128xf32>
    %cst_71 = arith.constant dense<0.000000e+00> : vector<16xf32>
    %107 = vector.multi_reduction <add>, %106, %cst_71 [1] : vector<16x128xf32> to vector<16xf32>
    %108 = vector.shape_cast %107 : vector<16xf32> to vector<16x1xf32>
    %cst_72 = arith.constant 1.280000e+02 : f32
    %109 = vector.broadcast %cst_72 : f32 to vector<16x1xf32>
    %110 = arith.divf %108, %109 : vector<16x1xf32>
    %cst_73 = arith.constant 9.99999996E-13 : f32
    %111 = vector.broadcast %cst_73 : f32 to vector<16x1xf32>
    %112 = arith.addf %110, %111 : vector<16x1xf32>
    %113 = math.rsqrt %112 : vector<16x1xf32>
    %114 = vector.broadcast %113 : vector<16x1xf32> to vector<16x128xf32>
    %115 = arith.mulf %105, %114 : vector<16x128xf32>
    %116 = vector.broadcast %97 : vector<1x128xf32> to vector<16x128xf32>
    %117 = arith.mulf %115, %116 : vector<16x128xf32>
    %118 = vector.broadcast %99 : vector<1x128xf32> to vector<16x128xf32>
    %119 = arith.addf %117, %118 : vector<16x128xf32>
    %c0_74 = arith.constant 0 : index
    %c0_75 = arith.constant 0 : index
    %c0_76 = arith.constant 0 : index
    %120 = vector.load %arg10[%c0_74, %c0_75, %c0_76] : memref<2x128x256xf32, #tpu.memory_space<vmem>>, vector<1x128x256xf32>
    %121 = vector.shape_cast %120 : vector<1x128x256xf32> to vector<128x256xf32>
    %cst_77 = arith.constant dense<0.000000e+00> : vector<16x256xf32>
    %122 = tpu.matmul %119, %121, %cst_77 {dimension_numbers = #tpu.dot_dimension_numbers<[1], [0], [0], [1], [0, 0, 1, 1], [], []>} : vector<16x128xf32>, vector<128x256xf32>, vector<16x256xf32> -> vector<16x256xf32>
    %c0_78 = arith.constant 0 : index
    %c0_79 = arith.constant 0 : index
    %c0_80 = arith.constant 0 : index
    %123 = vector.load %arg11[%c0_78, %c0_79, %c0_80] : memref<2x1x256xf32, #tpu.memory_space<vmem>>, vector<1x1x256xf32>
    %124 = vector.shape_cast %123 : vector<1x1x256xf32> to vector<1x256xf32>
    %125 = vector.broadcast %124 : vector<1x256xf32> to vector<16x256xf32>
    %126 = arith.addf %122, %125 : vector<16x256xf32>
    %cst_81 = arith.constant 5.000000e-01 : f32
    %127 = vector.broadcast %cst_81 : f32 to vector<16x256xf32>
    %128 = arith.mulf %127, %126 : vector<16x256xf32>
    %cst_82 = arith.constant 2.000000e+00 : f32
    %129 = math.sqrt %cst_82 : f32
    %cst_83 = arith.constant 1.000000e+00 : f32
    %130 = arith.divf %cst_83, %129 : f32
    %131 = vector.broadcast %130 : f32 to vector<16x256xf32>
    %132 = arith.mulf %126, %131 : vector<16x256xf32>
    %133 = math.erf %132 : vector<16x256xf32>
    %cst_84 = arith.constant 1.000000e+00 : f32
    %134 = vector.broadcast %cst_84 : f32 to vector<16x256xf32>
    %135 = arith.addf %134, %133 : vector<16x256xf32>
    %136 = arith.mulf %128, %135 : vector<16x256xf32>
    %c0_85 = arith.constant 0 : index
    %c0_86 = arith.constant 0 : index
    %c0_87 = arith.constant 0 : index
    %137 = vector.load %arg12[%c0_85, %c0_86, %c0_87] : memref<2x256x128xf32, #tpu.memory_space<vmem>>, vector<1x256x128xf32>
    %138 = vector.shape_cast %137 : vector<1x256x128xf32> to vector<256x128xf32>
    %cst_88 = arith.constant dense<0.000000e+00> : vector<16x128xf32>
    %139 = tpu.matmul %136, %138, %cst_88 {dimension_numbers = #tpu.dot_dimension_numbers<[1], [0], [0], [1], [0, 0, 1, 1], [], []>} : vector<16x256xf32>, vector<256x128xf32>, vector<16x128xf32> -> vector<16x128xf32>
    %c0_89 = arith.constant 0 : index
    %c0_90 = arith.constant 0 : index
    %c0_91 = arith.constant 0 : index
    %140 = vector.load %arg13[%c0_89, %c0_90, %c0_91] : memref<2x1x128xf32, #tpu.memory_space<vmem>>, vector<1x1x128xf32>
    %141 = vector.shape_cast %140 : vector<1x1x128xf32> to vector<1x128xf32>
    %142 = vector.broadcast %141 : vector<1x128xf32> to vector<16x128xf32>
    %143 = arith.addf %139, %142 : vector<16x128xf32>
    %144 = arith.addf %143, %119 : vector<16x128xf32>
    %c0_92 = arith.constant 0 : index
    %c0_93 = arith.constant 0 : index
    %c0_94 = arith.constant 0 : index
    %145 = vector.load %arg14[%c0_92, %c0_93, %c0_94] : memref<2x1x128xf32, #tpu.memory_space<vmem>>, vector<1x1x128xf32>
    %146 = vector.shape_cast %145 : vector<1x1x128xf32> to vector<1x128xf32>
    %c0_95 = arith.constant 0 : index
    %c0_96 = arith.constant 0 : index
    %c0_97 = arith.constant 0 : index
    %147 = vector.load %arg15[%c0_95, %c0_96, %c0_97] : memref<2x1x128xf32, #tpu.memory_space<vmem>>, vector<1x1x128xf32>
    %148 = vector.shape_cast %147 : vector<1x1x128xf32> to vector<1x128xf32>
    %cst_98 = arith.constant dense<0.000000e+00> : vector<16xf32>
    %149 = vector.multi_reduction <add>, %144, %cst_98 [1] : vector<16x128xf32> to vector<16xf32>
    %150 = vector.shape_cast %149 : vector<16xf32> to vector<16x1xf32>
    %cst_99 = arith.constant 1.280000e+02 : f32
    %151 = vector.broadcast %cst_99 : f32 to vector<16x1xf32>
    %152 = arith.divf %150, %151 : vector<16x1xf32>
    %153 = vector.broadcast %152 : vector<16x1xf32> to vector<16x128xf32>
    %154 = arith.subf %144, %153 : vector<16x128xf32>
    %155 = arith.mulf %154, %154 : vector<16x128xf32>
    %cst_100 = arith.constant dense<0.000000e+00> : vector<16xf32>
    %156 = vector.multi_reduction <add>, %155, %cst_100 [1] : vector<16x128xf32> to vector<16xf32>
    %157 = vector.shape_cast %156 : vector<16xf32> to vector<16x1xf32>
    %cst_101 = arith.constant 1.280000e+02 : f32
    %158 = vector.broadcast %cst_101 : f32 to vector<16x1xf32>
    %159 = arith.divf %157, %158 : vector<16x1xf32>
    %cst_102 = arith.constant 9.99999996E-13 : f32
    %160 = vector.broadcast %cst_102 : f32 to vector<16x1xf32>
    %161 = arith.addf %159, %160 : vector<16x1xf32>
    %162 = math.rsqrt %161 : vector<16x1xf32>
    %163 = vector.broadcast %162 : vector<16x1xf32> to vector<16x128xf32>
    %164 = arith.mulf %154, %163 : vector<16x128xf32>
    %165 = vector.broadcast %146 : vector<1x128xf32> to vector<16x128xf32>
    %166 = arith.mulf %164, %165 : vector<16x128xf32>
    %167 = vector.broadcast %148 : vector<1x128xf32> to vector<16x128xf32>
    %168 = arith.addf %166, %167 : vector<16x128xf32>
    %c1 = arith.constant 1 : index
    %c0_103 = arith.constant 0 : index
    %c0_104 = arith.constant 0 : index
    %169 = vector.load %arg4[%c1, %c0_103, %c0_104] : memref<2x128x384xf32, #tpu.memory_space<vmem>>, vector<1x128x384xf32>
    %170 = vector.shape_cast %169 : vector<1x128x384xf32> to vector<128x384xf32>
    %cst_105 = arith.constant dense<0.000000e+00> : vector<16x384xf32>
    %171 = tpu.matmul %2, %170, %cst_105 {dimension_numbers = #tpu.dot_dimension_numbers<[1], [0], [0], [1], [0, 0, 1, 1], [], []>} : vector<16x128xf32>, vector<128x384xf32>, vector<16x384xf32> -> vector<16x384xf32>
    %c1_106 = arith.constant 1 : index
    %c0_107 = arith.constant 0 : index
    %c0_108 = arith.constant 0 : index
    %172 = vector.load %arg5[%c1_106, %c0_107, %c0_108] : memref<2x1x384xf32, #tpu.memory_space<vmem>>, vector<1x1x384xf32>
    %173 = vector.shape_cast %172 : vector<1x1x384xf32> to vector<1x384xf32>
    %174 = vector.broadcast %173 : vector<1x384xf32> to vector<16x384xf32>
    %175 = arith.addf %171, %174 : vector<16x384xf32>
    %c0_109 = arith.constant 0 : index
    %c0_110 = arith.constant 0 : index
    %176 = vector.load %arg17[%c0_109, %c0_110] : memref<16x384xf32, #tpu.memory_space<vmem>>, vector<16x384xf32>
    tpu.vector_store %arg17[%c0_109, %c0_110], %175 {strides = array<i32>} : memref<16x384xf32, #tpu.memory_space<vmem>>, vector<16x384xf32>,
    %c0_111 = arith.constant 0 : index
    %c0_112 = arith.constant 0 : index
    %177 = vector.load %arg17[%c0_111, %c0_112] : memref<16x384xf32, #tpu.memory_space<vmem>>, vector<16x32xf32>
    %c0_113 = arith.constant 0 : index
    %c128_114 = arith.constant 128 : index
    %178 = vector.load %arg17[%c0_113, %c128_114] : memref<16x384xf32, #tpu.memory_space<vmem>>, vector<16x32xf32>
    %c0_115 = arith.constant 0 : index
    %c256_116 = arith.constant 256 : index
    %179 = vector.load %arg17[%c0_115, %c256_116] : memref<16x384xf32, #tpu.memory_space<vmem>>, vector<16x32xf32>
    %180 = tpu.transpose %178, [1, 0] : vector<16x32xf32> -> vector<32x16xf32>
    %cst_117 = arith.constant dense<0.000000e+00> : vector<16x16xf32>
    %181 = tpu.matmul %177, %180, %cst_117 {dimension_numbers = #tpu.dot_dimension_numbers<[1], [0], [0], [1], [0, 0, 1, 1], [], []>} : vector<16x32xf32>, vector<32x16xf32>, vector<16x16xf32> -> vector<16x16xf32>
    %cst_118 = arith.constant 0.176776692 : f32
    %182 = vector.broadcast %cst_118 : f32 to vector<16x16xf32>
    %183 = arith.mulf %181, %182 : vector<16x16xf32>
    %184 = arith.addf %183, %0 : vector<16x16xf32>
    %cst_119 = arith.constant dense<0xFF800000> : vector<16xf32>
    %185 = vector.multi_reduction <maximumf>, %184, %cst_119 [1] : vector<16x16xf32> to vector<16xf32>
    %186 = vector.shape_cast %185 : vector<16xf32> to vector<16x1xf32>
    %187 = vector.broadcast %186 : vector<16x1xf32> to vector<16x16xf32>
    %188 = arith.subf %184, %187 : vector<16x16xf32>
    %189 = math.exp %188 : vector<16x16xf32>
    %cst_120 = arith.constant dense<0.000000e+00> : vector<16xf32>
    %190 = vector.multi_reduction <add>, %189, %cst_120 [1] : vector<16x16xf32> to vector<16xf32>
    %191 = vector.shape_cast %190 : vector<16xf32> to vector<16x1xf32>
    %192 = vector.broadcast %191 : vector<16x1xf32> to vector<16x16xf32>
    %193 = arith.divf %189, %192 : vector<16x16xf32>
    %cst_121 = arith.constant dense<0.000000e+00> : vector<16x32xf32>
    %194 = tpu.matmul %193, %179, %cst_121 {dimension_numbers = #tpu.dot_dimension_numbers<[1], [0], [0], [1], [0, 0, 1, 1], [], []>} : vector<16x16xf32>, vector<16x32xf32>, vector<16x32xf32> -> vector<16x32xf32>
    %c0_122 = arith.constant 0 : index
    %c0_123 = arith.constant 0 : index
    %195 = vector.load %arg18[%c0_122, %c0_123] : memref<16x128xf32, #tpu.memory_space<vmem>>, vector<16x32xf32>
    tpu.vector_store %arg18[%c0_122, %c0_123], %194 {strides = array<i32>} : memref<16x128xf32, #tpu.memory_space<vmem>>, vector<16x32xf32>,
    %c0_124 = arith.constant 0 : index
    %c32_125 = arith.constant 32 : index
    %196 = vector.load %arg17[%c0_124, %c32_125] : memref<16x384xf32, #tpu.memory_space<vmem>>, vector<16x32xf32>
    %c0_126 = arith.constant 0 : index
    %c160_127 = arith.constant 160 : index
    %197 = vector.load %arg17[%c0_126, %c160_127] : memref<16x384xf32, #tpu.memory_space<vmem>>, vector<16x32xf32>
    %c0_128 = arith.constant 0 : index
    %c288_129 = arith.constant 288 : index
    %198 = vector.load %arg17[%c0_128, %c288_129] : memref<16x384xf32, #tpu.memory_space<vmem>>, vector<16x32xf32>
    %199 = tpu.transpose %197, [1, 0] : vector<16x32xf32> -> vector<32x16xf32>
    %cst_130 = arith.constant dense<0.000000e+00> : vector<16x16xf32>
    %200 = tpu.matmul %196, %199, %cst_130 {dimension_numbers = #tpu.dot_dimension_numbers<[1], [0], [0], [1], [0, 0, 1, 1], [], []>} : vector<16x32xf32>, vector<32x16xf32>, vector<16x16xf32> -> vector<16x16xf32>
    %cst_131 = arith.constant 0.176776692 : f32
    %201 = vector.broadcast %cst_131 : f32 to vector<16x16xf32>
    %202 = arith.mulf %200, %201 : vector<16x16xf32>
    %203 = arith.addf %202, %0 : vector<16x16xf32>
    %cst_132 = arith.constant dense<0xFF800000> : vector<16xf32>
    %204 = vector.multi_reduction <maximumf>, %203, %cst_132 [1] : vector<16x16xf32> to vector<16xf32>
    %205 = vector.shape_cast %204 : vector<16xf32> to vector<16x1xf32>
    %206 = vector.broadcast %205 : vector<16x1xf32> to vector<16x16xf32>
    %207 = arith.subf %203, %206 : vector<16x16xf32>
    %208 = math.exp %207 : vector<16x16xf32>
    %cst_133 = arith.constant dense<0.000000e+00> : vector<16xf32>
    %209 = vector.multi_reduction <add>, %208, %cst_133 [1] : vector<16x16xf32> to vector<16xf32>
    %210 = vector.shape_cast %209 : vector<16xf32> to vector<16x1xf32>
    %211 = vector.broadcast %210 : vector<16x1xf32> to vector<16x16xf32>
    %212 = arith.divf %208, %211 : vector<16x16xf32>
    %cst_134 = arith.constant dense<0.000000e+00> : vector<16x32xf32>
    %213 = tpu.matmul %212, %198, %cst_134 {dimension_numbers = #tpu.dot_dimension_numbers<[1], [0], [0], [1], [0, 0, 1, 1], [], []>} : vector<16x16xf32>, vector<16x32xf32>, vector<16x32xf32> -> vector<16x32xf32>
    %c0_135 = arith.constant 0 : index
    %c32_136 = arith.constant 32 : index
    %214 = vector.load %arg18[%c0_135, %c32_136] : memref<16x128xf32, #tpu.memory_space<vmem>>, vector<16x32xf32>
    tpu.vector_store %arg18[%c0_135, %c32_136], %213 {strides = array<i32>} : memref<16x128xf32, #tpu.memory_space<vmem>>, vector<16x32xf32>,
    %c0_137 = arith.constant 0 : index
    %c64_138 = arith.constant 64 : index
    %215 = vector.load %arg17[%c0_137, %c64_138] : memref<16x384xf32, #tpu.memory_space<vmem>>, vector<16x32xf32>
    %c0_139 = arith.constant 0 : index
    %c192_140 = arith.constant 192 : index
    %216 = vector.load %arg17[%c0_139, %c192_140] : memref<16x384xf32, #tpu.memory_space<vmem>>, vector<16x32xf32>
    %c0_141 = arith.constant 0 : index
    %c320_142 = arith.constant 320 : index
    %217 = vector.load %arg17[%c0_141, %c320_142] : memref<16x384xf32, #tpu.memory_space<vmem>>, vector<16x32xf32>
    %218 = tpu.transpose %216, [1, 0] : vector<16x32xf32> -> vector<32x16xf32>
    %cst_143 = arith.constant dense<0.000000e+00> : vector<16x16xf32>
    %219 = tpu.matmul %215, %218, %cst_143 {dimension_numbers = #tpu.dot_dimension_numbers<[1], [0], [0], [1], [0, 0, 1, 1], [], []>} : vector<16x32xf32>, vector<32x16xf32>, vector<16x16xf32> -> vector<16x16xf32>
    %cst_144 = arith.constant 0.176776692 : f32
    %220 = vector.broadcast %cst_144 : f32 to vector<16x16xf32>
    %221 = arith.mulf %219, %220 : vector<16x16xf32>
    %222 = arith.addf %221, %0 : vector<16x16xf32>
    %cst_145 = arith.constant dense<0xFF800000> : vector<16xf32>
    %223 = vector.multi_reduction <maximumf>, %222, %cst_145 [1] : vector<16x16xf32> to vector<16xf32>
    %224 = vector.shape_cast %223 : vector<16xf32> to vector<16x1xf32>
    %225 = vector.broadcast %224 : vector<16x1xf32> to vector<16x16xf32>
    %226 = arith.subf %222, %225 : vector<16x16xf32>
    %227 = math.exp %226 : vector<16x16xf32>
    %cst_146 = arith.constant dense<0.000000e+00> : vector<16xf32>
    %228 = vector.multi_reduction <add>, %227, %cst_146 [1] : vector<16x16xf32> to vector<16xf32>
    %229 = vector.shape_cast %228 : vector<16xf32> to vector<16x1xf32>
    %230 = vector.broadcast %229 : vector<16x1xf32> to vector<16x16xf32>
    %231 = arith.divf %227, %230 : vector<16x16xf32>
    %cst_147 = arith.constant dense<0.000000e+00> : vector<16x32xf32>
    %232 = tpu.matmul %231, %217, %cst_147 {dimension_numbers = #tpu.dot_dimension_numbers<[1], [0], [0], [1], [0, 0, 1, 1], [], []>} : vector<16x16xf32>, vector<16x32xf32>, vector<16x32xf32> -> vector<16x32xf32>
    %c0_148 = arith.constant 0 : index
    %c64_149 = arith.constant 64 : index
    %233 = vector.load %arg18[%c0_148, %c64_149] : memref<16x128xf32, #tpu.memory_space<vmem>>, vector<16x32xf32>
    tpu.vector_store %arg18[%c0_148, %c64_149], %232 {strides = array<i32>} : memref<16x128xf32, #tpu.memory_space<vmem>>, vector<16x32xf32>,
    %c0_150 = arith.constant 0 : index
    %c96_151 = arith.constant 96 : index
    %234 = vector.load %arg17[%c0_150, %c96_151] : memref<16x384xf32, #tpu.memory_space<vmem>>, vector<16x32xf32>
    %c0_152 = arith.constant 0 : index
    %c224_153 = arith.constant 224 : index
    %235 = vector.load %arg17[%c0_152, %c224_153] : memref<16x384xf32, #tpu.memory_space<vmem>>, vector<16x32xf32>
    %c0_154 = arith.constant 0 : index
    %c352_155 = arith.constant 352 : index
    %236 = vector.load %arg17[%c0_154, %c352_155] : memref<16x384xf32, #tpu.memory_space<vmem>>, vector<16x32xf32>
    %237 = tpu.transpose %235, [1, 0] : vector<16x32xf32> -> vector<32x16xf32>
    %cst_156 = arith.constant dense<0.000000e+00> : vector<16x16xf32>
    %238 = tpu.matmul %234, %237, %cst_156 {dimension_numbers = #tpu.dot_dimension_numbers<[1], [0], [0], [1], [0, 0, 1, 1], [], []>} : vector<16x32xf32>, vector<32x16xf32>, vector<16x16xf32> -> vector<16x16xf32>
    %cst_157 = arith.constant 0.176776692 : f32
    %239 = vector.broadcast %cst_157 : f32 to vector<16x16xf32>
    %240 = arith.mulf %238, %239 : vector<16x16xf32>
    %241 = arith.addf %240, %0 : vector<16x16xf32>
    %cst_158 = arith.constant dense<0xFF800000> : vector<16xf32>
    %242 = vector.multi_reduction <maximumf>, %241, %cst_158 [1] : vector<16x16xf32> to vector<16xf32>
    %243 = vector.shape_cast %242 : vector<16xf32> to vector<16x1xf32>
    %244 = vector.broadcast %243 : vector<16x1xf32> to vector<16x16xf32>
    %245 = arith.subf %241, %244 : vector<16x16xf32>
    %246 = math.exp %245 : vector<16x16xf32>
    %cst_159 = arith.constant dense<0.000000e+00> : vector<16xf32>
    %247 = vector.multi_reduction <add>, %246, %cst_159 [1] : vector<16x16xf32> to vector<16xf32>
    %248 = vector.shape_cast %247 : vector<16xf32> to vector<16x1xf32>
    %249 = vector.broadcast %248 : vector<16x1xf32> to vector<16x16xf32>
    %250 = arith.divf %246, %249 : vector<16x16xf32>
    %cst_160 = arith.constant dense<0.000000e+00> : vector<16x32xf32>
    %251 = tpu.matmul %250, %236, %cst_160 {dimension_numbers = #tpu.dot_dimension_numbers<[1], [0], [0], [1], [0, 0, 1, 1], [], []>} : vector<16x16xf32>, vector<16x32xf32>, vector<16x32xf32> -> vector<16x32xf32>
    %c0_161 = arith.constant 0 : index
    %c96_162 = arith.constant 96 : index
    %252 = vector.load %arg18[%c0_161, %c96_162] : memref<16x128xf32, #tpu.memory_space<vmem>>, vector<16x32xf32>
    tpu.vector_store %arg18[%c0_161, %c96_162], %251 {strides = array<i32>} : memref<16x128xf32, #tpu.memory_space<vmem>>, vector<16x32xf32>,
    %c0_163 = arith.constant 0 : index
    %c0_164 = arith.constant 0 : index
    %253 = vector.load %arg18[%c0_163, %c0_164] : memref<16x128xf32, #tpu.memory_space<vmem>>, vector<16x128xf32>
    %c1_165 = arith.constant 1 : index
    %c0_166 = arith.constant 0 : index
    %c0_167 = arith.constant 0 : index
    %254 = vector.load %arg6[%c1_165, %c0_166, %c0_167] : memref<2x128x128xf32, #tpu.memory_space<vmem>>, vector<1x128x128xf32>
    %255 = vector.shape_cast %254 : vector<1x128x128xf32> to vector<128x128xf32>
    %cst_168 = arith.constant dense<0.000000e+00> : vector<16x128xf32>
    %256 = tpu.matmul %253, %255, %cst_168 {dimension_numbers = #tpu.dot_dimension_numbers<[1], [0], [0], [1], [0, 0, 1, 1], [], []>} : vector<16x128xf32>, vector<128x128xf32>, vector<16x128xf32> -> vector<16x128xf32>
    %c1_169 = arith.constant 1 : index
    %c0_170 = arith.constant 0 : index
    %c0_171 = arith.constant 0 : index
    %257 = vector.load %arg7[%c1_169, %c0_170, %c0_171] : memref<2x1x128xf32, #tpu.memory_space<vmem>>, vector<1x1x128xf32>
    %258 = vector.shape_cast %257 : vector<1x1x128xf32> to vector<1x128xf32>
    %259 = vector.broadcast %258 : vector<1x128xf32> to vector<16x128xf32>
    %260 = arith.addf %256, %259 : vector<16x128xf32>
    %261 = arith.addf %260, %2 : vector<16x128xf32>
    %c1_172 = arith.constant 1 : index
    %c0_173 = arith.constant 0 : index
    %c0_174 = arith.constant 0 : index
    %262 = vector.load %arg8[%c1_172, %c0_173, %c0_174] : memref<2x1x128xf32, #tpu.memory_space<vmem>>, vector<1x1x128xf32>
    %263 = vector.shape_cast %262 : vector<1x1x128xf32> to vector<1x128xf32>
    %c1_175 = arith.constant 1 : index
    %c0_176 = arith.constant 0 : index
    %c0_177 = arith.constant 0 : index
    %264 = vector.load %arg9[%c1_175, %c0_176, %c0_177] : memref<2x1x128xf32, #tpu.memory_space<vmem>>, vector<1x1x128xf32>
    %265 = vector.shape_cast %264 : vector<1x1x128xf32> to vector<1x128xf32>
    %cst_178 = arith.constant dense<0.000000e+00> : vector<16xf32>
    %266 = vector.multi_reduction <add>, %261, %cst_178 [1] : vector<16x128xf32> to vector<16xf32>
    %267 = vector.shape_cast %266 : vector<16xf32> to vector<16x1xf32>
    %cst_179 = arith.constant 1.280000e+02 : f32
    %268 = vector.broadcast %cst_179 : f32 to vector<16x1xf32>
    %269 = arith.divf %267, %268 : vector<16x1xf32>
    %270 = vector.broadcast %269 : vector<16x1xf32> to vector<16x128xf32>
    %271 = arith.subf %261, %270 : vector<16x128xf32>
    %272 = arith.mulf %271, %271 : vector<16x128xf32>
    %cst_180 = arith.constant dense<0.000000e+00> : vector<16xf32>
    %273 = vector.multi_reduction <add>, %272, %cst_180 [1] : vector<16x128xf32> to vector<16xf32>
    %274 = vector.shape_cast %273 : vector<16xf32> to vector<16x1xf32>
    %cst_181 = arith.constant 1.280000e+02 : f32
    %275 = vector.broadcast %cst_181 : f32 to vector<16x1xf32>
    %276 = arith.divf %274, %275 : vector<16x1xf32>
    %cst_182 = arith.constant 9.99999996E-13 : f32
    %277 = vector.broadcast %cst_182 : f32 to vector<16x1xf32>
    %278 = arith.addf %276, %277 : vector<16x1xf32>
    %279 = math.rsqrt %278 : vector<16x1xf32>
    %280 = vector.broadcast %279 : vector<16x1xf32> to vector<16x128xf32>
    %281 = arith.mulf %271, %280 : vector<16x128xf32>
    %282 = vector.broadcast %263 : vector<1x128xf32> to vector<16x128xf32>
    %283 = arith.mulf %281, %282 : vector<16x128xf32>
    %284 = vector.broadcast %265 : vector<1x128xf32> to vector<16x128xf32>
    %285 = arith.addf %283, %284 : vector<16x128xf32>
    %c1_183 = arith.constant 1 : index
    %c0_184 = arith.constant 0 : index
    %c0_185 = arith.constant 0 : index
    %286 = vector.load %arg10[%c1_183, %c0_184, %c0_185] : memref<2x128x256xf32, #tpu.memory_space<vmem>>, vector<1x128x256xf32>
    %287 = vector.shape_cast %286 : vector<1x128x256xf32> to vector<128x256xf32>
    %cst_186 = arith.constant dense<0.000000e+00> : vector<16x256xf32>
    %288 = tpu.matmul %285, %287, %cst_186 {dimension_numbers = #tpu.dot_dimension_numbers<[1], [0], [0], [1], [0, 0, 1, 1], [], []>} : vector<16x128xf32>, vector<128x256xf32>, vector<16x256xf32> -> vector<16x256xf32>
    %c1_187 = arith.constant 1 : index
    %c0_188 = arith.constant 0 : index
    %c0_189 = arith.constant 0 : index
    %289 = vector.load %arg11[%c1_187, %c0_188, %c0_189] : memref<2x1x256xf32, #tpu.memory_space<vmem>>, vector<1x1x256xf32>
    %290 = vector.shape_cast %289 : vector<1x1x256xf32> to vector<1x256xf32>
    %291 = vector.broadcast %290 : vector<1x256xf32> to vector<16x256xf32>
    %292 = arith.addf %288, %291 : vector<16x256xf32>
    %cst_190 = arith.constant 5.000000e-01 : f32
    %293 = vector.broadcast %cst_190 : f32 to vector<16x256xf32>
    %294 = arith.mulf %293, %292 : vector<16x256xf32>
    %cst_191 = arith.constant 2.000000e+00 : f32
    %295 = math.sqrt %cst_191 : f32
    %cst_192 = arith.constant 1.000000e+00 : f32
    %296 = arith.divf %cst_192, %295 : f32
    %297 = vector.broadcast %296 : f32 to vector<16x256xf32>
    %298 = arith.mulf %292, %297 : vector<16x256xf32>
    %299 = math.erf %298 : vector<16x256xf32>
    %cst_193 = arith.constant 1.000000e+00 : f32
    %300 = vector.broadcast %cst_193 : f32 to vector<16x256xf32>
    %301 = arith.addf %300, %299 : vector<16x256xf32>
    %302 = arith.mulf %294, %301 : vector<16x256xf32>
    %c1_194 = arith.constant 1 : index
    %c0_195 = arith.constant 0 : index
    %c0_196 = arith.constant 0 : index
    %303 = vector.load %arg12[%c1_194, %c0_195, %c0_196] : memref<2x256x128xf32, #tpu.memory_space<vmem>>, vector<1x256x128xf32>
    %304 = vector.shape_cast %303 : vector<1x256x128xf32> to vector<256x128xf32>
    %cst_197 = arith.constant dense<0.000000e+00> : vector<16x128xf32>
    %305 = tpu.matmul %302, %304, %cst_197 {dimension_numbers = #tpu.dot_dimension_numbers<[1], [0], [0], [1], [0, 0, 1, 1], [], []>} : vector<16x256xf32>, vector<256x128xf32>, vector<16x128xf32> -> vector<16x128xf32>
    %c1_198 = arith.constant 1 : index
    %c0_199 = arith.constant 0 : index
    %c0_200 = arith.constant 0 : index
    %306 = vector.load %arg13[%c1_198, %c0_199, %c0_200] : memref<2x1x128xf32, #tpu.memory_space<vmem>>, vector<1x1x128xf32>
    %307 = vector.shape_cast %306 : vector<1x1x128xf32> to vector<1x128xf32>
    %308 = vector.broadcast %307 : vector<1x128xf32> to vector<16x128xf32>
    %309 = arith.addf %305, %308 : vector<16x128xf32>
    %310 = arith.addf %309, %285 : vector<16x128xf32>
    %c1_201 = arith.constant 1 : index
    %c0_202 = arith.constant 0 : index
    %c0_203 = arith.constant 0 : index
    %311 = vector.load %arg14[%c1_201, %c0_202, %c0_203] : memref<2x1x128xf32, #tpu.memory_space<vmem>>, vector<1x1x128xf32>
    %312 = vector.shape_cast %311 : vector<1x1x128xf32> to vector<1x128xf32>
    %c1_204 = arith.constant 1 : index
    %c0_205 = arith.constant 0 : index
    %c0_206 = arith.constant 0 : index
    %313 = vector.load %arg15[%c1_204, %c0_205, %c0_206] : memref<2x1x128xf32, #tpu.memory_space<vmem>>, vector<1x1x128xf32>
    %314 = vector.shape_cast %313 : vector<1x1x128xf32> to vector<1x128xf32>
    %cst_207 = arith.constant dense<0.000000e+00> : vector<16xf32>
    %315 = vector.multi_reduction <add>, %310, %cst_207 [1] : vector<16x128xf32> to vector<16xf32>
    %316 = vector.shape_cast %315 : vector<16xf32> to vector<16x1xf32>
    %cst_208 = arith.constant 1.280000e+02 : f32
    %317 = vector.broadcast %cst_208 : f32 to vector<16x1xf32>
    %318 = arith.divf %316, %317 : vector<16x1xf32>
    %319 = vector.broadcast %318 : vector<16x1xf32> to vector<16x128xf32>
    %320 = arith.subf %310, %319 : vector<16x128xf32>
    %321 = arith.mulf %320, %320 : vector<16x128xf32>
    %cst_209 = arith.constant dense<0.000000e+00> : vector<16xf32>
    %322 = vector.multi_reduction <add>, %321, %cst_209 [1] : vector<16x128xf32> to vector<16xf32>
    %323 = vector.shape_cast %322 : vector<16xf32> to vector<16x1xf32>
    %cst_210 = arith.constant 1.280000e+02 : f32
    %324 = vector.broadcast %cst_210 : f32 to vector<16x1xf32>
    %325 = arith.divf %323, %324 : vector<16x1xf32>
    %cst_211 = arith.constant 9.99999996E-13 : f32
    %326 = vector.broadcast %cst_211 : f32 to vector<16x1xf32>
    %327 = arith.addf %325, %326 : vector<16x1xf32>
    %328 = math.rsqrt %327 : vector<16x1xf32>
    %329 = vector.broadcast %328 : vector<16x1xf32> to vector<16x128xf32>
    %330 = arith.mulf %320, %329 : vector<16x128xf32>
    %331 = vector.broadcast %312 : vector<1x128xf32> to vector<16x128xf32>
    %332 = arith.mulf %330, %331 : vector<16x128xf32>
    %333 = vector.broadcast %314 : vector<1x128xf32> to vector<16x128xf32>
    %334 = arith.addf %332, %333 : vector<16x128xf32>
    %c0_212 = arith.constant 0 : index
    %335 = memref.load %arg0[%c0_212] : memref<1xf32, #tpu.memory_space<smem>>
    %336 = arith.negf %335 : f32
    %337 = math.exp %336 : f32
    %cst_213 = arith.constant 1.000000e+00 : f32
    %338 = arith.addf %cst_213, %337 : f32
    %339 = arith.divf %cst_213, %338 : f32
    %340 = vector.broadcast %339 : f32 to vector<16x128xf32>
    %341 = arith.mulf %340, %168 : vector<16x128xf32>
    %cst_214 = arith.constant 1.000000e+00 : f32
    %342 = arith.subf %cst_214, %339 : f32
    %343 = vector.broadcast %342 : f32 to vector<16x128xf32>
    %344 = arith.mulf %343, %334 : vector<16x128xf32>
    %345 = arith.addf %341, %344 : vector<16x128xf32>
    %c0_215 = arith.constant 0 : index
    %c0_216 = arith.constant 0 : index
    %346 = vector.load %arg16[%c0_215, %c0_216] : memref<16x128xf32, #tpu.memory_space<vmem>>, vector<16x128xf32>
    tpu.vector_store %arg16[%c0_215, %c0_216], %345 {strides = array<i32>} : memref<16x128xf32, #tpu.memory_space<vmem>>, vector<16x128xf32>,
    return
  }
}

</mosaic_0001>

<bundles_post_ra>
// kernel: surgical_forward.4
= control target key start
LH: loop header
LB: loop body
LE: loop exit
PB: predicated region body
PF: predicated region fallthrough
CT: control target
= control target key end

     0   :  { %s210_s0 = inlined_call_operand.vmem [shape: f32[16,128], index: 0, kind: input, shape index: {}]   ;;  %s211_s1 = inlined_call_operand.vmem [shape: f32[16,128], index: 1, kind: input, shape index: {}]   ;;  %s212_s2 = inlined_call_operand.vmem [shape: f32[1,128], index: 2, kind: input, shape index: {}]   ;;  %s213_s3 = inlined_call_operand.vmem [shape: f32[1,128], index: 3, kind: input, shape index: {}]   ;;  %s214_s4 = inlined_call_operand.vmem [shape: f32[1,128], index: 4, kind: input, shape index: {}]   ;;  %s215_s6 = inlined_call_operand.vmem [shape: f32[16,128], index: 6, kind: output, shape index: {0}]   ;;  %s216_s5 = inlined_call_operand.vmem [shape: f32[1,128], index: 5, kind: input, shape index: {}]   ;;  %s217_s7 = inlined_call_operand.vmem [shape: f32[16,128], index: 7, kind: output, shape index: {1}]  }
   0x1   :  { %v25_v0 = vld [vmem:[%s210_s0] sm:$0xff]  ;;  %v26_v2 = vld [vmem:[%s210_s0 + $0x8] sm:$0xff] }
   0x2   :  { %v70_v1 = vld [vmem:[%s211_s1] sm:$0xff]  ;;  %29 = vadd.xlane.f32.xlu0 %v25_v0  ;;  %v71_v3 = vld [vmem:[%s211_s1 + $0x8] sm:$0xff] }
   0x3   :  { %74 = vadd.xlane.f32.xlu1 %v70_v1  ;;  %v122_v33 = vld [vmem:[%s212_s2] ss:$0 sm:$0xff] }
   0x4   :  { %v123_v35 = vld [vmem:[%s213_s3] ss:$0 sm:$0xff] }
   0x5   :  { %v124_v41 = vld [vmem:[%s214_s4] ss:$0 sm:$0xff] }
   0x6   :  { %31 = vadd.xlane.f32.xlu0 %v26_v2  ;;  %v125_v44 = vld [vmem:[%s216_s5] ss:$0 sm:$0xff] }
   0x7   :  { %76 = vadd.xlane.f32.xlu1 %v71_v3 }
  0x8f   :  { %v30_v4 = vpop.xlane.xlu0 %29 }
  0x90   :  { %v75_v5 = vpop.xlane.xlu1 %74  ;;  %v34_v6 = vmul.f32 0.0078125, %v30_v4 }
  0x91   :  { %v78_v7 = vmul.f32 0.0078125, %v75_v5 }
  0x92   :  { %v36_v8 = vsub.f32 %v25_v0, %v34_v6 }
  0x93   :  { %v80_v9 = vsub.f32 %v70_v1, %v78_v7  ;;  %v32_v10 = vpop.xlane.xlu0 %31 }
  0x94   :  { %v77_v11 = vpop.xlane.xlu1 %76  ;;  %v35_v12 = vmul.f32 0.0078125, %v32_v10  ;;  %v38_v13 = vmul.f32 %v36_v8, %v36_v8 }
  0x95   :  { %v79_v14 = vmul.f32 0.0078125, %v77_v11  ;;  %v82_v17 = vmul.f32 %v80_v9, %v80_v9 }
  0x96   :  { %v37_v15 = vsub.f32 %v26_v2, %v35_v12  ;;  %40 = vadd.xlane.f32.xlu0 %v38_v13 }
  0x97   :  { %v81_v16 = vsub.f32 %v71_v3, %v79_v14 }
  0x98   :  { %v39_v18 = vmul.f32 %v37_v15, %v37_v15 }
  0x99   :  { %v83_v19 = vmul.f32 %v81_v16, %v81_v16 }
  0x9a   :  { %84 = vadd.xlane.f32.xlu0 %v82_v17  ;;  %42 = vadd.xlane.f32.xlu1 %v39_v18 }
  0x9e   :  { %86 = vadd.xlane.f32.xlu1 %v83_v19 }
 0x123   :  { %v41_v20 = vpop.xlane.xlu0 %40 }
 0x124   :  { %v44_v21 = vmul.f32 0.0078125, %v41_v20 }
 0x126   :  { %v46_v22 = vadd.f32 1e-12, %v44_v21 }
 0x127   :  { %v43_v23 = vpop.xlane.xlu1 %42  ;;  %v85_v24 = vpop.xlane.xlu0 %84 }
 0x128   :  { %126 = vrsqrt.f32 %v46_v22  ;;  %v45_v25 = vmul.f32 0.0078125, %v43_v23  ;;  %v88_v26 = vmul.f32 0.0078125, %v85_v24 }
 0x12a   :  { %v47_v27 = vadd.f32 1e-12, %v45_v25  ;;  %v90_v28 = vadd.f32 1e-12, %v88_v26 }
 0x12b   :  { %v87_v29 = vpop.xlane.xlu1 %86 }
 0x12c   :  { %128 = vrsqrt.f32 %v47_v27  ;;  %v89_v30 = vmul.f32 0.0078125, %v87_v29 }
 0x12d   :  { %130 = vrsqrt.f32 %v90_v28 }
 0x12e   :  { %v91_v31 = vadd.f32 1e-12, %v89_v30 }
 0x130   :  { %132 = vrsqrt.f32 %v91_v31 }
 0x132   :  { %v127_v32 = vpop.eup %126 }
 0x133   :  { %v50_v34 = vmul.f32 %v127_v32, %v36_v8 }
 0x135   :  { %v58_v36 = vmul.f32 %v122_v33, %v50_v34 }
 0x136   :  { %v129_v37 = vpop.eup %128 }
 0x137   :  { %v131_v38 = vpop.eup %130  ;;  %v66_v39 = vadd.f32 %v123_v35, %v58_v36  ;;  %v51_v40 = vmul.f32 %v129_v37, %v37_v15 }
 0x138   :  { %v94_v42 = vmul.f32 %v131_v38, %v80_v9 }
 0x139   :  { %68 = vst [vmem:[%s215_s6] sm:$0xff] %v66_v39  ;;  %v59_v43 = vmul.f32 %v122_v33, %v51_v40 }
 0x13a   :  { %v133_v45 = vpop.eup %132  ;;  %v102_v46 = vmul.f32 %v124_v41, %v94_v42 }
 0x13b   :  { %v67_v47 = vadd.f32 %v123_v35, %v59_v43  ;;  %v95_v48 = vmul.f32 %v133_v45, %v81_v16 }
 0x13c   :  { %v110_v49 = vadd.f32 %v125_v44, %v102_v46 }
 0x13d   :  { %69 = vst [vmem:[%s215_s6 + $0x8] sm:$0xff] %v67_v47  ;;  %v103_v50 = vmul.f32 %v124_v41, %v95_v48 }
 0x13e   :  { %112 = vst [vmem:[%s217_s7] sm:$0xff] %v110_v49 }
 0x13f   :  { %v111_v51 = vadd.f32 %v125_v44, %v103_v50 }
 0x141   :  { %113 = vst [vmem:[%s217_s7 + $0x8] sm:$0xff] %v111_v51 }

// kernel: surgical_forward.7
= control target key start
LH: loop header
LB: loop body
LE: loop exit
PB: predicated region body
PF: predicated region fallthrough
CT: control target
= control target key end

     0   :  { %11 = vsyncpa [#allocation4], 0  ;;  %s1172_s0 = inlined_call_operand.vmem [shape: f32[2], index: 0, kind: input, shape index: {}]   ;;  %s1173_s1 = inlined_call_operand.vmem [shape: f32[2,128], index: 1, kind: input, shape index: {}]   ;;  %s1174_s2 = inlined_call_operand.vmem [shape: f32[2,128,128], index: 2, kind: input, shape index: {}]   ;;  %s1175_s3 = inlined_call_operand.vmem [shape: f32[2,1,128], index: 3, kind: input, shape index: {}]   ;;  %s1176_s4 = inlined_call_operand.vmem [shape: f32[2,128,128], index: 4, kind: input, shape index: {}]   ;;  %s1177_s5 = inlined_call_operand.vmem [shape: f32[2,1,128], index: 5, kind: input, shape index: {}]   ;;  %s1178_s6 = inlined_call_operand.hbm [shape: f32[2,128], index: 6, kind: output, shape index: {}]  }
   0x1   :  { %12 = vsyncpa [#allocation3], 0  ;;  %s19_s23 = sshll.u32 %s1172_s0, 4  ;;  %s20_s23 = int_to_ptr.vmem [resolvable:$true] %s19_s23 }
   0x2   :  { %s832_s24 = scalar_lea.vmem %s20_s23, 16  ;;  %p837_p1 = scmp.lt.s32.totalorder %s20_s23, %s20_s23 }
   0x3   :  { %p833_p0 = scmp.ne.s32.totalorder %s20_s23, %s832_s24  ;;  %p838_p2 = scmp.lt.s32.totalorder %s832_s24, %s832_s24 }
   0x5   :  { %p839_p3 = por %p838_p2, %p837_p1 }
   0x7   :  { %p840_p4 = pnand %p839_p3, %p833_p0 }
   0x9   :  { %843 = shalt.err (!%p840_p4)
}
   0xa   :  { %s870_s25 = smov [#allocation2]  }
   0xb   :  { %22 = dma.vmem_to_smem %s20_s23, 16, %s870_s25, [#allocation4]  }
   0xc   :  { %866 = dma.done.wait [#allocation4], 16  }
   0xd   :  { %867 = vsyncadd [#allocation4], 4294967280 }
   0xe   :  { %36 = sfence }
   0xf   :  { %v38_v0 = vld [vmem:[%s1174_s2] sm:$0xff]  ;;  %v39_v1 = vld [vmem:[%s1174_s2 + $0x8] sm:$0xff]  ;;  %v871_v3 = vmov 0.0|0.0   ;;  %v40_v6 = vld [vmem:[%s1174_s2 + $0x10] sm:$0xff]  ;;  %s228_s13 = sld [smem:[#allocation2]]  ;;  %vm872_vm0 = vmmov 0  }
  0x10   :  { %v465_v2 = vld [vmem:[%s1174_s2 + $0x80] sm:$0xff]  ;;  %711 = vmatprep.subr.bf16.mxu0 %v871_v3  ;;  %735 = vmatprep.subr.bf16.mxu1 %v871_v3  ;;  %v712_v4 = vpack.c.bf16 %v39_v1, %v38_v0  ;;  %v466_v5 = vld [vmem:[%s1174_s2 + $0x88] sm:$0xff]  ;;  %v41_v7 = vld [vmem:[%s1174_s2 + $0x18] sm:$0xff]  ;;  %v873_v11 = vmov 0.0   ;;  %s502_s0 = sld [smem:[#allocation2 + $0x1]]  ;;  %s874_s18 = smov [#allocation5]  }
  0x11   :  { %v736_v8 = vpack.c.bf16 %v466_v5, %v465_v2  ;;  %v467_v9 = vld [vmem:[%s1174_s2 + $0x90] sm:$0xff]  ;;  %v468_v10 = vld [vmem:[%s1174_s2 + $0x98] sm:$0xff]  ;;  %603 = vmatprep.mubr.msk.f32.mxu0 %vm872_vm0, %v873_v11  ;;  %638 = vmatprep.mubr.msk.f32.mxu1 %vm872_vm0, %v873_v11  ;;  %v715_v12 = vpack.c.bf16 %v41_v7, %v40_v6  ;;  %v42_v14 = vld [vmem:[%s1174_s2 + $0x20] sm:$0xff]  ;;  %s455_s19 = sshll.u32 %s874_s18, 4  ;;  %s456_s19 = int_to_ptr.vmem [resolvable:$true] %s455_s19 }
  0x12   :  { %713 = vmatpush3.bf16.msra.mxu0 %v712_v4  ;;  %v739_v13 = vpack.c.bf16 %v468_v10, %v467_v9  ;;  %v43_v15 = vld [vmem:[%s1174_s2 + $0x28] sm:$0xff]  ;;  %v469_v16 = vld [vmem:[%s1174_s2 + $0xa0] sm:$0xff]  ;;  %v44_v20 = vld [vmem:[%s1174_s2 + $0x30] sm:$0xff]  ;;  %s844_s20 = scalar_lea.vmem %s456_s19, 32  ;;  %p849_p6 = scmp.lt.s32.totalorder %s456_s19, %s456_s19 }
  0x13   :  { %737 = vmatpush3.bf16.msra.mxu1 %v736_v8  ;;  %714 = vmatprep.subr.bf16.mxu0 %v871_v3  ;;  %v470_v17 = vld [vmem:[%s1174_s2 + $0xa8] sm:$0xff]  ;;  %v718_v18 = vpack.c.bf16 %v43_v15, %v42_v14  ;;  %v45_v21 = vld [vmem:[%s1174_s2 + $0x38] sm:$0xff]  ;;  %v471_v23 = vld [vmem:[%s1174_s2 + $0xb0] sm:$0xff]  ;;  %p845_p5 = scmp.ne.s32.totalorder %s456_s19, %s844_s20  ;;  %p850_p7 = scmp.lt.s32.totalorder %s844_s20, %s844_s20 }
  0x14   :  { %738 = vmatprep.subr.bf16.mxu1 %v871_v3  ;;  %v742_v19 = vpack.c.bf16 %v470_v17, %v469_v16  ;;  %v472_v24 = vld [vmem:[%s1174_s2 + $0xb8] sm:$0xff]  ;;  %v721_v26 = vpack.c.bf16 %v45_v21, %v44_v20  ;;  %v46_v28 = vld [vmem:[%s1174_s2 + $0x40] sm:$0xff]  ;;  %v47_v29 = vld [vmem:[%s1174_s2 + $0x48] sm:$0xff] }
  0x15   :  { %s229_s26 = sxor.u32 2147483648, %s228_s13  ;;  %v745_v27 = vpack.c.bf16 %v472_v24, %v471_v23  ;;  %v473_v30 = vld [vmem:[%s1174_s2 + $0xc0] sm:$0xff]  ;;  %v474_v31 = vld [vmem:[%s1174_s2 + $0xc8] sm:$0xff]  ;;  %v724_v32 = vpack.c.bf16 %v47_v29, %v46_v28  ;;  %v48_v34 = vld [vmem:[%s1174_s2 + $0x50] sm:$0xff]  ;;  %p851_p8 = por %p850_p7, %p849_p6 }
  0x16   :  { %716 = vmatpush3.bf16.msra.mxu0 %v715_v12  ;;  %v230_v22 = vstv %s229_s26  ;;  %v748_v33 = vpack.c.bf16 %v474_v31, %v473_v30  ;;  %v49_v35 = vld [vmem:[%s1174_s2 + $0x58] sm:$0xff]  ;;  %v475_v36 = vld [vmem:[%s1174_s2 + $0xd0] sm:$0xff]  ;;  %v50_v40 = vld [vmem:[%s1174_s2 + $0x60] sm:$0xff]  ;;  %s433_s30 = sxor.u32 2147483648, %s502_s0 }
  0x17   :  { %740 = vmatpush3.bf16.msra.mxu1 %v739_v13  ;;  %717 = vmatprep.subr.bf16.mxu0 %v871_v3  ;;  %v231_v25 = vmul.f32 1.442695, %v230_v22  ;;  %v476_v37 = vld [vmem:[%s1174_s2 + $0xd8] sm:$0xff]  ;;  %v727_v38 = vpack.c.bf16 %v49_v35, %v48_v34  ;;  %v51_v41 = vld [vmem:[%s1174_s2 + $0x68] sm:$0xff]  ;;  %v477_v43 = vld [vmem:[%s1174_s2 + $0xe0] sm:$0xff]  ;;  %p852_p9 = pnand %p851_p8, %p845_p5 }
  0x18   :  { %741 = vmatprep.subr.bf16.mxu1 %v871_v3  ;;  %v751_v39 = vpack.c.bf16 %v476_v37, %v475_v36  ;;  %v478_v44 = vld [vmem:[%s1174_s2 + $0xe8] sm:$0xff]  ;;  %v730_v45 = vpack.c.bf16 %v51_v41, %v50_v40  ;;  %v52_v47 = vld [vmem:[%s1174_s2 + $0x70] sm:$0xff]  ;;  %v53_v48 = vld [vmem:[%s1174_s2 + $0x78] sm:$0xff]  ;;  %v434_v41 = vstv %s433_s30 }
  0x19   :  { %820 = vpow2.f32 %v231_v25  ;;  %v754_v46 = vpack.c.bf16 %v478_v44, %v477_v43  ;;  %v479_v49 = vld [vmem:[%s1174_s2 + $0xf0] sm:$0xff]  ;;  %v480_v50 = vld [vmem:[%s1174_s2 + $0xf8] sm:$0xff]  ;;  %v733_v51 = vpack.c.bf16 %v53_v48, %v52_v47  ;;  %v244_v53 = vld [vmem:[%s1176_s4] sm:$0xff] }
  0x1a   :  { %719 = vmatpush3.bf16.msra.mxu0 %v718_v18  ;;  %v757_v52 = vpack.c.bf16 %v480_v50, %v479_v49  ;;  %v245_v54 = vld [vmem:[%s1176_s4 + $0x8] sm:$0xff]  ;;  %v484_v55 = vld [vmem:[%s1176_s4 + $0x80] sm:$0xff]  ;;  %v246_v60 = vld [vmem:[%s1176_s4 + $0x10] sm:$0xff] }
  0x1b   :  { %743 = vmatpush3.bf16.msra.mxu1 %v742_v19  ;;  %720 = vmatprep.subr.bf16.mxu0 %v871_v3  ;;  %v485_v56 = vld [vmem:[%s1176_s4 + $0x88] sm:$0xff]  ;;  %v37_v57 = vld [vmem:[%s1173_s1] sm:$0x3]  ;;  %v760_v58 = vpack.c.bf16 %v245_v54, %v244_v53  ;;  %v247_v61 = vld [vmem:[%s1176_s4 + $0x18] sm:$0xff] }
  0x1c   :  { %744 = vmatprep.subr.bf16.mxu1 %v871_v3  ;;  %v784_v59 = vpack.c.bf16 %v485_v56, %v484_v55  ;;  %v486_v62 = vld [vmem:[%s1176_s4 + $0x90] sm:$0xff]  ;;  %v487_v63 = vld [vmem:[%s1176_s4 + $0x98] sm:$0xff]  ;;  %v763_v0 = vpack.c.bf16 %v247_v61, %v246_v60  ;;  %v248_v2 = vld [vmem:[%s1176_s4 + $0x20] sm:$0xff] }
  0x1d   :  { %v787_v1 = vpack.c.bf16 %v487_v63, %v486_v62  ;;  %v249_v4 = vld [vmem:[%s1176_s4 + $0x28] sm:$0xff]  ;;  %v488_v5 = vld [vmem:[%s1176_s4 + $0xa0] sm:$0xff]  ;;  %v250_v9 = vld [vmem:[%s1176_s4 + $0x30] sm:$0xff] }
  0x1e   :  { %722 = vmatpush3.bf16.msra.mxu0 %v721_v26  ;;  %v489_v6 = vld [vmem:[%s1176_s4 + $0xa8] sm:$0xff]  ;;  %v766_v7 = vpack.c.bf16 %v249_v4, %v248_v2  ;;  %v251_v10 = vld [vmem:[%s1176_s4 + $0x38] sm:$0xff]  ;;  %v252_v17 = vld [vmem:[%s1176_s4 + $0x40] sm:$0xff] }
  0x1f   :  { %746 = vmatpush3.bf16.msra.mxu1 %v745_v27  ;;  %723 = vmatprep.subr.bf16.mxu0 %v871_v3  ;;  %v790_v8 = vpack.c.bf16 %v489_v6, %v488_v5  ;;  %v491_v12 = vld [vmem:[%s1176_s4 + $0xb8] sm:$0xff]  ;;  %v769_v13 = vpack.c.bf16 %v251_v10, %v250_v9  ;;  %v253_v18 = vld [vmem:[%s1176_s4 + $0x48] sm:$0xff]  ;;  %v492_v20 = vld [vmem:[%s1176_s4 + $0xc0] sm:$0xff] }
  0x20   :  { %747 = vmatprep.subr.bf16.mxu1 %v871_v3  ;;  %v772_v19 = vpack.c.bf16 %v253_v18, %v252_v17  ;;  %v493_v21 = vld [vmem:[%s1176_s4 + $0xc8] sm:$0xff]  ;;  %v254_v23 = vld [vmem:[%s1176_s4 + $0x50] sm:$0xff]  ;;  %v255_v24 = vld [vmem:[%s1176_s4 + $0x58] sm:$0xff] }
  0x21   :  { %v796_v22 = vpack.c.bf16 %v493_v21, %v492_v20  ;;  %v494_v25 = vld [vmem:[%s1176_s4 + $0xd0] sm:$0xff]  ;;  %v775_v26 = vpack.c.bf16 %v255_v24, %v254_v23  ;;  %v495_v27 = vld [vmem:[%s1176_s4 + $0xd8] sm:$0xff]  ;;  %v256_v29 = vld [vmem:[%s1176_s4 + $0x60] sm:$0xff] }
  0x22   :  { %725 = vmatpush3.bf16.msra.mxu0 %v724_v32  ;;  %v799_v28 = vpack.c.bf16 %v495_v27, %v494_v25  ;;  %v257_v30 = vld [vmem:[%s1176_s4 + $0x68] sm:$0xff]  ;;  %v496_v31 = vld [vmem:[%s1176_s4 + $0xe0] sm:$0xff]  ;;  %v258_v35 = vld [vmem:[%s1176_s4 + $0x70] sm:$0xff] }
  0x23   :  { %749 = vmatpush3.bf16.msra.mxu1 %v748_v33  ;;  %726 = vmatprep.subr.bf16.mxu0 %v871_v3  ;;  %v821_v42 = vpop.eup %820  ;;  %v778_v32 = vpack.c.bf16 %v257_v30, %v256_v29  ;;  %v497_v33 = vld [vmem:[%s1176_s4 + $0xe8] sm:$0xff]  ;;  %v259_v36 = vld [vmem:[%s1176_s4 + $0x78] sm:$0xff]  ;;  %v498_v37 = vld [vmem:[%s1176_s4 + $0xf0] sm:$0xff] }
  0x24   :  { %750 = vmatprep.subr.bf16.mxu1 %v871_v3  ;;  %807 = vpush %v821_v42  ;;  %v802_v34 = vpack.c.bf16 %v497_v33, %v496_v31  ;;  %v435_v42 = vmul.f32 1.442695, %v434_v41  ;;  %v483_v60 = vld [vmem:[%s1177_s5] ss:$0 sm:$0xff]  ;;  %v501_v61 = vld [vmem:[%s1177_s5 + $0x1] ss:$0 sm:$0xff] }
  0x26   :  { %728 = vmatpush3.bf16.msra.mxu0 %v727_v38  ;;  %v781_v38 = vpack.c.bf16 %v259_v36, %v258_v35 }
  0x27   :  { %752 = vmatpush3.bf16.msra.mxu1 %v751_v39  ;;  %729 = vmatprep.subr.bf16.mxu0 %v871_v3  ;;  %v499_v39 = vld [vmem:[%s1176_s4 + $0xf8] sm:$0xff] }
  0x28   :  { %753 = vmatprep.subr.bf16.mxu1 %v871_v3  ;;  %v805_v40 = vpack.c.bf16 %v499_v39, %v498_v37 }
  0x2a   :  { %731 = vmatpush3.bf16.msra.mxu0 %v730_v45  ;;  %v464_v45 = vld [vmem:[%s1175_s3] ss:$0 sm:$0xff] }
  0x2b   :  { %755 = vmatpush3.bf16.msra.mxu1 %v754_v46  ;;  %732 = vmatprep.subr.bf16.mxu0 %v871_v3  ;;  %v482_v46 = vld [vmem:[%s1175_s3 + $0x1] ss:$0 sm:$0xff] }
  0x2c   :  { %756 = vmatprep.subr.bf16.mxu1 %v871_v3 }
  0x2e   :  { %734 = vmatpush3.bf16.msra.mxu0 %v733_v51 }
  0x2f   :  { %758 = vmatpush3.bf16.msra.mxu1 %v757_v52  ;;  %759 = vmatprep.subr.bf16.mxu0 %v871_v3 }
  0x30   :  { %783 = vmatprep.subr.bf16.mxu1 %v871_v3 }
  0x31   :  { %604 = vmatmul.mubr.f32.vlgmr.msra.gmra.mrb[0].mxu0 %v37_v57 }
  0x32   :  { %639 = vmatmul.mubr.f32.vlgmr.msra.gmra.mrb[0].mxu1 %v37_v57  ;;  %761 = vmatpush3.bf16.msra.mxu0 %v760_v58 }
  0x33   :  { %785 = vmatpush3.bf16.msra.mxu1 %v784_v59  ;;  %762 = vmatprep.subr.bf16.mxu0 %v871_v3 }
  0x34   :  { %786 = vmatprep.subr.bf16.mxu1 %v871_v3  ;;  %673 = vmatprep.mubr.msk.f32.mxu0 %vm872_vm0, %v873_v11 }
  0x35   :  { %708 = vmatprep.mubr.msk.f32.mxu1 %vm872_vm0, %v873_v11  ;;  %v490_v11 = vld [vmem:[%s1176_s4 + $0xb0] sm:$0xff] }
  0x36   :  { %764 = vmatpush3.bf16.msra.mxu0 %v763_v0  ;;  %v793_v14 = vpack.c.bf16 %v491_v12, %v490_v11 }
  0x37   :  { %788 = vmatpush3.bf16.msra.mxu1 %v787_v1  ;;  %765 = vmatprep.subr.bf16.mxu0 %v871_v3 }
  0x38   :  { %789 = vmatprep.subr.bf16.mxu1 %v871_v3 }
  0x3a   :  { %767 = vmatpush3.bf16.msra.mxu0 %v766_v7 }
  0x3b   :  { %791 = vmatpush3.bf16.msra.mxu1 %v790_v8  ;;  %768 = vmatprep.subr.bf16.mxu0 %v871_v3 }
  0x3c   :  { %792 = vmatprep.subr.bf16.mxu1 %v871_v3 }
  0x3e   :  { %770 = vmatpush3.bf16.msra.mxu0 %v769_v13 }
  0x3f   :  { %794 = vmatpush3.bf16.msra.mxu1 %v793_v14  ;;  %771 = vmatprep.subr.bf16.mxu0 %v871_v3 }
  0x40   :  { %795 = vmatprep.subr.bf16.mxu1 %v871_v3 }
  0x42   :  { %773 = vmatpush3.bf16.msra.mxu0 %v772_v19 }
  0x43   :  { %797 = vmatpush3.bf16.msra.mxu1 %v796_v22  ;;  %774 = vmatprep.subr.bf16.mxu0 %v871_v3 }
  0x44   :  { %798 = vmatprep.subr.bf16.mxu1 %v871_v3 }
  0x46   :  { %776 = vmatpush3.bf16.msra.mxu0 %v775_v26 }
  0x47   :  { %800 = vmatpush3.bf16.msra.mxu1 %v799_v28  ;;  %777 = vmatprep.subr.bf16.mxu0 %v871_v3 }
  0x48   :  { %801 = vmatprep.subr.bf16.mxu1 %v871_v3 }
  0x4a   :  { %779 = vmatpush3.bf16.msra.mxu0 %v778_v32 }
  0x4b   :  { %803 = vmatpush3.bf16.msra.mxu1 %v802_v34  ;;  %780 = vmatprep.subr.bf16.mxu0 %v871_v3 }
  0x4c   :  { %804 = vmatprep.subr.bf16.mxu1 %v871_v3 }
  0x4e   :  { %782 = vmatpush3.bf16.msra.mxu0 %v781_v38 }
  0x4f   :  { %806 = vmatpush3.bf16.msra.mxu1 %v805_v40 }
  0x55   :  { %s808_s23 = spop %807 }
  0x56   :  { %s234_s24 = sadd.f32 1.0, %s808_s23 }
  0x58   :  { %v235_v15 = vstv %s234_s24 }
  0x59   :  { %822 = vrcp.f32 %v235_v15 }
  0x5a   :  { %824 = vpow2.f32 %v435_v42 }
  0x63   :  { %v823_v16 = vpop.eup %822 }
  0x64   :  { %809 = vpush %v823_v16  ;;  %v825_v43 = vpop.eup %824 }
  0x65   :  { %811 = vpush %v825_v43 }
  0x95   :  { %s810_s1 = spop %809 }
  0x96   :  { %s812_s7 = spop %811  ;;  %s240_s12 = ssub.f32 1.0, %s810_s1  ;;  %v238_v55 = vstv %s810_s1 }
  0x97   :  { %s438_s8 = sadd.f32 1.0, %s812_s7 }
  0x98   :  { %v241_v53 = vstv %s240_s12 }
  0x99   :  { %v439_v44 = vstv %s438_s8 }
  0x9a   :  { %826 = vrcp.f32 %v439_v44 }
  0xa4   :  { %v827_v3 = vpop.eup %826 }
  0xa5   :  { %813 = vpush %v827_v3 }
  0xd6   :  { %s814_s13 = spop %813 }
  0xd7   :  { %s444_s3 = ssub.f32 1.0, %s814_s13  ;;  %v442_v6 = vstv %s814_s13 }
  0xd9   :  { %v445_v62 = vstv %s444_s3 }
 0x104   :  { %v127_v47 = vpop.f32.mrb[0].mxu0 }
 0x105   :  { %v128_v48 = vadd.f32 %v464_v45, %v127_v47  ;;  %v223_v49 = vpop.f32.mrb[0].mxu1  ;;  %v605_v50 = vpop.f32.mrb[1].mxu0 }
 0x106   :  { %v224_v51 = vadd.f32 %v482_v46, %v223_v49  ;;  %v640_v52 = vpop.f32.mrb[1].mxu1 }
 0x107   :  { %828 = vtanh.f32 %v128_v48 }
 0x108   :  { %830 = vtanh.f32 %v224_v51 }
 0x111   :  { %v829_v54 = vpop.eup %828 }
 0x112   :  { %v831_v56 = vpop.eup %830  ;;  %v239_v57 = vmul.f32 %v829_v54, %v238_v55 }
 0x113   :  { %v242_v58 = vmul.f32 %v831_v56, %v241_v53 }
 0x115   :  { %v243_v59 = vadd.f32 %v242_v58, %v239_v57 }
 0x117   :  { %674 = vmatmul.mubr.f32.vlgmr.msra.gmra.mrb[2].mxu0 %v243_v59  ;;  %709 = vmatmul.mubr.f32.vlgmr.msra.gmra.mrb[2].mxu1 %v243_v59 }
 0x1ea   :  { %v333_v63 = vpop.f32.mrb[2].mxu0  ;;  %v428_v0 = vpop.f32.mrb[2].mxu1 }
 0x1eb   :  { %v334_v1 = vadd.f32 %v483_v60, %v333_v63  ;;  %v429_v2 = vadd.f32 %v501_v61, %v428_v0  ;;  %v675_v4 = vpop.f32.mrb[3].mxu0  ;;  %v710_v5 = vpop.f32.mrb[3].mxu1 }
 0x1ed   :  { %v443_v7 = vmul.f32 %v442_v6, %v334_v1  ;;  %v446_v8 = vmul.f32 %v445_v62, %v429_v2 }
 0x1ef   :  { %v447_v9 = vadd.f32 %v446_v8, %v443_v7 }
 0x1f1   :  { %448 = vst [vmem:[#allocation5] sm:$0x3] %v447_v9 }
 0x1f2   :  { %855 = shalt.err (!%p852_p9)
}
 0x1f3   :  { %s856_s22 = scalar_lea.hbm %s1178_s6, 32 }
 0x1f4   :  { %p857_p10 = scmp.ne.s32.totalorder %s1178_s6, %s856_s22  ;;  %p860_p11 = scmp.lt.u32.totalorder %s856_s22, %s1178_s6 }
 0x1f6   :  { %p862_p12 = pnand %p860_p11, %p857_p10 }
 0x1f8   :  { %865 = shalt.err (!%p862_p12)
}
 0x1f9   :  { %458 = dma.vmem_to_hbm [thread:$0]  %s456_s19, 32, %s1178_s6, [#allocation3]  }
 0x1fa   :  { %868 = dma.done.wait [#allocation3], 32  }
 0x1fb   :  { %869 = vsyncadd [#allocation3], 4294967264 }
 0x1fc   :  { %462 = vsyncpa [#allocation3], 1 }
 0x1fd   :  { %463 = vsyncpa [#allocation4], 1 }

// kernel: surgical_forward.6
= control target key start
LH: loop header
LB: loop body
LE: loop exit
PB: predicated region body
PF: predicated region fallthrough
CT: control target
= control target key end

     0   :  { %v4417_v3 = vmov 0.0   ;;  %vm289_vm0 = vcmask 261120   ;;  %s4419_s26 = smov 96   ;;  %vm381_vm2 = vcmask 130048   ;;  %vm711_vm3 = vcmask 523520   ;;  %s5700_s4 = inlined_call_operand.vmem [shape: f32[2,128,384], index: 4, kind: input, shape index: {}]   ;;  %s5701_s1 = inlined_call_operand.vmem [shape: f32[16,128], index: 1, kind: input, shape index: {}, may-alias: {1,2}]   ;;  %s5702_s5 = inlined_call_operand.vmem [shape: f32[2,1,384], index: 5, kind: input, shape index: {}]   ;;  %s5703_s3 = inlined_call_operand.vmem [shape: f32[16,16], index: 3, kind: input, shape index: {}]   ;;  %s5704_s6 = inlined_call_operand.vmem [shape: f32[2,128,128], index: 6, kind: input, shape index: {}]   ;;  %s5705_s7 = inlined_call_operand.vmem [shape: f32[2,1,128], index: 7, kind: input, shape index: {}]   ;;  %s5706_s10 = inlined_call_operand.vmem [shape: f32[2,128,256], index: 10, kind: input, shape index: {}]   ;;  %s5707_s12 = inlined_call_operand.vmem [shape: f32[2,256,128], index: 12, kind: input, shape index: {}]   ;;  %s5708_s8 = inlined_call_operand.vmem [shape: f32[2,1,128], index: 8, kind: input, shape index: {}]   ;;  %s5709_s9 = inlined_call_operand.vmem [shape: f32[2,1,128], index: 9, kind: input, shape index: {}]   ;;  %s5710_s2 = inlined_call_operand.vmem [shape: f32[16,128], index: 2, kind: input, shape index: {}, may-alias: {1,2}]   ;;  %s5711_s11 = inlined_call_operand.vmem [shape: f32[2,1,256], index: 11, kind: input, shape index: {}]   ;;  %s5712_s13 = inlined_call_operand.vmem [shape: f32[2,1,128], index: 13, kind: input, shape index: {}]   ;;  %s5713_s0 = inlined_call_operand.<no memory space> [shape: f32[1], index: 0, kind: input, shape index: {}]   ;;  %s5714_s14 = inlined_call_operand.vmem [shape: f32[2,1,128], index: 14, kind: input, shape index: {}]   ;;  %s5715_s15 = inlined_call_operand.vmem [shape: f32[2,1,128], index: 15, kind: input, shape index: {}]   ;;  %s5716_s16 = inlined_call_operand.vmem [shape: f32[16,128], index: 16, kind: output, shape index: {}]  }
   0x1   :  { %5718 = sst [smem:[#allocation5_spill]] %s5700_s4  ;;  %189 = vmatprep.mubr.f32.mxu0 %v4417_v3  ;;  %v4564_v26 = vld [vmem:[%s5701_s1] sm:$0xff]  ;;  %vm4686_vm1 = vmpackc.low %vm289_vm0, %vm289_vm0  ;;  %s4420_s4 = smov 32   ;;  %vm938_vm4 = vcmask 785920   ;;  %vm1165_vm5 = vcmask 1048320  }
   0x2   :  { %s5719_s23 = sld [smem:[#allocation5_spill]]  ;;  %3627 = vmatprep.mubr.f32.mxu1 %v4564_v26 }
   0x8   :  { %v61_v0 = vld [vmem:[%s5719_s23 + $0x8] sm:$0xff]  ;;  %v64_v1 = vld [vmem:[%s5719_s23 + $0x20] sm:$0xff]  ;;  %v63_v5 = vld [vmem:[%s5719_s23 + $0x18] sm:$0xff] }
   0x9   :  { %v60_v2 = vld [vmem:[%s5719_s23] sm:$0xff]  ;;  %v3847_v4 = vpack.c.bf16 %v64_v1, %v61_v0  ;;  %v67_v6 = vld [vmem:[%s5719_s23 + $0x38] sm:$0xff]  ;;  %v70_v7 = vld [vmem:[%s5719_s23 + $0x50] sm:$0xff] }
   0xa   :  { %v3849_v8 = vpack.c.bf16 %v63_v5, %v60_v2  ;;  %v3851_v9 = vpack.c.bf16 %v70_v7, %v67_v6  ;;  %v66_v10 = vld [vmem:[%s5719_s23 + $0x30] sm:$0xff]  ;;  %v69_v11 = vld [vmem:[%s5719_s23 + $0x48] sm:$0xff]  ;;  %v76_v13 = vld [vmem:[%s5719_s23 + $0x80] sm:$0xff] }
   0xb   :  { %v73_v12 = vld [vmem:[%s5719_s23 + $0x68] sm:$0xff]  ;;  %3848 = vmatprep.subr.bf16.mxu0 %v3847_v4  ;;  %v3853_v14 = vpack.c.bf16 %v69_v11, %v66_v10  ;;  %v72_v16 = vld [vmem:[%s5719_s23 + $0x60] sm:$0xff]  ;;  %v75_v17 = vld [vmem:[%s5719_s23 + $0x78] sm:$0xff] }
   0xc   :  { %3850 = vmatpush1.bf16.msra.mxu0 %v3849_v8  ;;  %v3855_v15 = vpack.c.bf16 %v76_v13, %v73_v12  ;;  %v79_v18 = vld [vmem:[%s5719_s23 + $0x98] sm:$0xff]  ;;  %v82_v19 = vld [vmem:[%s5719_s23 + $0xb0] sm:$0xff]  ;;  %v3857_v20 = vpack.c.bf16 %v75_v17, %v72_v16  ;;  %v81_v23 = vld [vmem:[%s5719_s23 + $0xa8] sm:$0xff]  ;;  %v110_v12 = vlaneseq }
   0xd   :  { %3852 = vmatprep.subr.bf16.mxu0 %v3851_v9  ;;  %v3859_v21 = vpack.c.bf16 %v82_v19, %v79_v18  ;;  %v78_v22 = vld [vmem:[%s5719_s23 + $0x90] sm:$0xff]  ;;  %v85_v24 = vld [vmem:[%s5719_s23 + $0xc8] sm:$0xff]  ;;  %v88_v25 = vld [vmem:[%s5719_s23 + $0xe0] sm:$0xff] }
   0xe   :  { %v62_v27 = vld [vmem:[%s5719_s23 + $0x10] sm:$0xff]  ;;  %v65_v28 = vld [vmem:[%s5719_s23 + $0x28] sm:$0xff]  ;;  %v3861_v29 = vpack.c.bf16 %v81_v23, %v78_v22  ;;  %v84_v30 = vld [vmem:[%s5719_s23 + $0xc0] sm:$0xff]  ;;  %v3863_v34 = vpack.c.bf16 %v88_v25, %v85_v24  ;;  %v4666_v13 = vshrl.u32 %v110_v12, 7 }
   0xf   :  { %v3879_v31 = vpack.c.bf16 %v65_v28, %v62_v27  ;;  %v68_v32 = vld [vmem:[%s5719_s23 + $0x40] sm:$0xff]  ;;  %v71_v33 = vld [vmem:[%s5719_s23 + $0x58] sm:$0xff]  ;;  %v74_v37 = vld [vmem:[%s5719_s23 + $0x70] sm:$0xff] }
  0x10   :  { %3854 = vmatpush1.bf16.msra.mxu0 %v3853_v14  ;;  %v87_v35 = vld [vmem:[%s5719_s23 + $0xd8] sm:$0xff]  ;;  %v3883_v36 = vpack.c.bf16 %v71_v33, %v68_v32  ;;  %v77_v38 = vld [vmem:[%s5719_s23 + $0x88] sm:$0xff]  ;;  %v94_v40 = vld [vmem:[%s5719_s23 + $0x110] sm:$0xff]  ;;  %v4669_v14 = vsub.s32 0, %v4666_v13  ;;  %v4676_v17 = vsub.s32 1, %v4666_v13  ;;  %v120_v22 = vsub.s32 2, %v4666_v13 }
  0x11   :  { %3856 = vmatprep.subr.bf16.mxu0 %v3855_v15  ;;  %v91_v39 = vld [vmem:[%s5719_s23 + $0xf8] sm:$0xff]  ;;  %3880 = vmatprep.subr.bf16.mxu1 %v3879_v31  ;;  %v3865_v41 = vpack.c.bf16 %v87_v35, %v84_v30  ;;  %v90_v42 = vld [vmem:[%s5719_s23 + $0xf0] sm:$0xff]  ;;  %v3887_v43 = vpack.c.bf16 %v77_v38, %v74_v37  ;;  %v93_v45 = vld [vmem:[%s5719_s23 + $0x108] sm:$0xff] }
  0x12   :  { %3882 = vmatpush3.bf16.msra.mxu1 %v3879_v31  ;;  %v3867_v44 = vpack.c.bf16 %v94_v40, %v91_v39  ;;  %v80_v46 = vld [vmem:[%s5719_s23 + $0xa0] sm:$0xff]  ;;  %v83_v47 = vld [vmem:[%s5719_s23 + $0xb8] sm:$0xff]  ;;  %v97_v48 = vld [vmem:[%s5719_s23 + $0x128] sm:$0xff]  ;;  %v3869_v50 = vpack.c.bf16 %v93_v45, %v90_v42 }
  0x13   :  { %3884 = vmatprep.subr.bf16.mxu1 %v3883_v36  ;;  %v100_v49 = vld [vmem:[%s5719_s23 + $0x140] sm:$0xff]  ;;  %v3891_v52 = vpack.c.bf16 %v83_v47, %v80_v46  ;;  %v99_v54 = vld [vmem:[%s5719_s23 + $0x138] sm:$0xff]  ;;  %v86_v55 = vld [vmem:[%s5719_s23 + $0xd0] sm:$0xff] }
  0x14   :  { %3858 = vmatpush1.bf16.msra.mxu0 %v3857_v20  ;;  %v96_v51 = vld [vmem:[%s5719_s23 + $0x120] sm:$0xff]  ;;  %v3871_v53 = vpack.c.bf16 %v100_v49, %v97_v48  ;;  %v89_v56 = vld [vmem:[%s5719_s23 + $0xe8] sm:$0xff]  ;;  %v103_v57 = vld [vmem:[%s5719_s23 + $0x158] sm:$0xff] }
  0x15   :  { %3860 = vmatprep.subr.bf16.mxu0 %v3859_v21  ;;  %v106_v58 = vld [vmem:[%s5719_s23 + $0x170] sm:$0xff]  ;;  %v3873_v59 = vpack.c.bf16 %v99_v54, %v96_v51  ;;  %v3895_v61 = vpack.c.bf16 %v89_v56, %v86_v55  ;;  %v105_v63 = vld [vmem:[%s5719_s23 + $0x168] sm:$0xff]  ;;  %v92_v0 = vld [vmem:[%s5719_s23 + $0x100] sm:$0xff] }
  0x16   :  { %3886 = vmatpush3.bf16.msra.mxu1 %v3883_v36  ;;  %v102_v60 = vld [vmem:[%s5719_s23 + $0x150] sm:$0xff]  ;;  %v3875_v62 = vpack.c.bf16 %v106_v58, %v103_v57  ;;  %v95_v1 = vld [vmem:[%s5719_s23 + $0x118] sm:$0xff]  ;;  %v101_v6 = vld [vmem:[%s5719_s23 + $0x148] sm:$0xff] }
  0x17   :  { %3888 = vmatprep.subr.bf16.mxu1 %v3887_v43  ;;  %v3877_v2 = vpack.c.bf16 %v105_v63, %v102_v60  ;;  %v3899_v4 = vpack.c.bf16 %v95_v1, %v92_v0  ;;  %v98_v5 = vld [vmem:[%s5719_s23 + $0x130] sm:$0xff]  ;;  %v104_v8 = vld [vmem:[%s5719_s23 + $0x160] sm:$0xff]  ;;  %v107_v9 = vld [vmem:[%s5719_s23 + $0x178] sm:$0xff] }
  0x18   :  { %3862 = vmatpush1.bf16.msra.mxu0 %v3861_v29  ;;  %v3903_v7 = vpack.c.bf16 %v101_v6, %v98_v5  ;;  %v4662_v10 = vld [vmem:[%s5701_s1 + $0x8] sm:$0xff]  ;;  %v3907_v11 = vpack.c.bf16 %v107_v9, %v104_v8  ;;  %v108_v15 = vld [vmem:[%s5702_s5] sm:$0x7]  ;;  %s4418_s1 = smov 64  }
  0x19   :  { %3864 = vmatprep.subr.bf16.mxu0 %v3863_v34  ;;  %v113_v16 = vrot.slane %v108_v15, %v4669_v14  ;;  %v117_v21 = vrot.slane %v108_v15, %v4676_v17  ;;  %v121_v29 = vrot.slane %v108_v15, %v120_v22  ;;  %v4715_v40 = vld [vmem:[%s5703_s3] sm:$0xff] }
  0x1a   :  { %3890 = vmatpush3.bf16.msra.mxu1 %v3887_v43  ;;  %v4720_v43 = vld [vmem:[%s5703_s3 + $0x8] sm:$0xff] }
  0x1b   :  { %3892 = vmatprep.subr.bf16.mxu1 %v3891_v52 }
  0x1c   :  { %3866 = vmatpush1.bf16.msra.mxu0 %v3865_v41 }
  0x1d   :  { %3868 = vmatprep.subr.bf16.mxu0 %v3867_v44 }
  0x1e   :  { %3894 = vmatpush3.bf16.msra.mxu1 %v3891_v52 }
  0x1f   :  { %3896 = vmatprep.subr.bf16.mxu1 %v3895_v61 }
  0x20   :  { %3870 = vmatpush1.bf16.msra.mxu0 %v3869_v50 }
  0x21   :  { %3872 = vmatprep.subr.bf16.mxu0 %v3871_v53 }
  0x22   :  { %3898 = vmatpush3.bf16.msra.mxu1 %v3895_v61 }
  0x23   :  { %3900 = vmatprep.subr.bf16.mxu1 %v3899_v4 }
  0x24   :  { %3874 = vmatpush1.bf16.msra.mxu0 %v3873_v59 }
  0x25   :  { %3876 = vmatprep.subr.bf16.mxu0 %v3875_v62 }
  0x26   :  { %3902 = vmatpush3.bf16.msra.mxu1 %v3899_v4 }
  0x27   :  { %3904 = vmatprep.subr.bf16.mxu1 %v3903_v7 }
  0x28   :  { %3878 = vmatpush1.bf16.msra.mxu0 %v3877_v2 }
  0x2a   :  { %3906 = vmatpush3.bf16.msra.mxu1 %v3903_v7 }
  0x2b   :  { %190 = vmatmul.mubr.f32.vlgmr.msra.gmra.mrb[0].mxu0 %v4564_v26  ;;  %3908 = vmatprep.subr.bf16.mxu1 %v3907_v11 }
  0x2c   :  { %195 = vmatprep.mubr.f32.mxu0 %v4417_v3 }
  0x2e   :  { %3910 = vmatpush3.bf16.msra.mxu1 %v3907_v11 }
  0x2f   :  { %196 = vmatmul.mubr.f32.gmra.mrb[2].mxu0 %v4662_v10 }
  0x31   :  { %3628 = vmatmul.mubr.f32.vlgmr.msra.gmra.mrb[0].mxu1 %v4662_v10 }
  0xfe   :  { %v191_v18 = vpop.f32.mrb[0].mxu0 }
  0xff   :  { %v4678_v19 = vadd.f32 %v191_v18, %v113_v16  ;;  %v193_v20 = vpop.f32.mrb[1].mxu0 }
 0x100   :  { %v194_v25 = vadd.f32 %v193_v20, %v117_v21 }
 0x101   :  { %3634 = vmatprep.mubr.msk.f32.mxu1 %vm289_vm0, %v4678_v19 }
 0x102   :  { %v197_v23 = vpop.f32.mrb[2].mxu0 }
 0x103   :  { %v199_v24 = vpop.f32.mrb[3].mxu0  ;;  %v4708_v37 = vadd.f32 %v197_v23, %v113_v16 }
 0x104   :  { %v200_v27 = vadd.f32 %v199_v24, %v117_v21  ;;  %v3629_v32 = vpop.f32.mrb[0].mxu1 }
 0x105   :  { %v4700_v33 = vadd.f32 %v3629_v32, %v121_v29  ;;  %v268_v34 = vpop.f32.mrb[1].mxu1 }
 0x106   :  { %v4692_v30 = vpack.i.bf16 %v200_v27, %v194_v25  ;;  %v3911_v31 = vpack.c.bf16 %v200_v27, %v194_v25  ;;  %v4702_v35 = vadd.f32 %v268_v34, %v121_v29 }
 0x108   :  { %4261 = vrot.lane.b32.xlu1 %v4692_v30, %s4418_s1  ;;  %3913 = vmatprep.subr.msk.bf16.mxu1 %vm4686_vm1, %v3911_v31  ;;  %v3917_v36 = vpack.c.bf16 %v4700_v33, %v4702_v35 }
 0x109   :  { %3916 = vmatpush3.bf16.xpose.msk.msra.mxu1 %vm4686_vm1, %v3911_v31 }
 0x10a   :  { %3918 = vmatprep.subr.bf16.mxu1 %v3917_v36 }
 0x10c   :  { %495 = vrot.lane.b32.xlu1 %v4678_v19, %s4419_s26 }
 0x110   :  { %3635 = vmatmul.mubr.msk.f32.vlgmr.msra.gmra.mrb[2].mxu1 %vm289_vm0, %v4708_v37 }
 0x111   :  { %3920 = vmatpush3.bf16.msra.mxu1 %v3917_v36 }
 0x17a   :  { %v4262_v62 = vpop.permute.xlu1 %4261 }
 0x17b   :  { %v4264_v5 = vunpack.i.h.bf16 %v4262_v62  ;;  %v4263_v6 = vunpack.i.l.bf16 %v4262_v62 }
 0x17d   :  { %v3931_v9 = vpack.c.bf16 %v4264_v5, %v4263_v6 }
 0x17e   :  { %v496_v63 = vpop.permute.xlu1 %495 }
 0x1e3   :  { %v3636_v38 = vpop.f32.mrb[2].mxu1 }
 0x1e4   :  { %v368_v39 = vpop.f32.mrb[3].mxu1  ;;  %v378_v41 = vmul.f32 0.17677669, %v3636_v38 }
 0x1e5   :  { %v377_v42 = vmul.f32 0.17677669, %v368_v39 }
 0x1e6   :  { %v380_v46 = vadd.f32 %v378_v41, %v4720_v43 }
 0x1e7   :  { %v379_v44 = vadd.f32 %v377_v42, %v4715_v40 }
 0x1e8   :  { %v385_v47 = vsel %vm381_vm2, %v380_v46, -inf }
 0x1e9   :  { %v382_v45 = vsel %vm381_vm2, %v379_v44, -inf }
 0x1ea   :  { %383 = vmax.xlane.f32.xlu0 %v382_v45 }
 0x1ee   :  { %386 = vmax.xlane.f32.xlu0 %v385_v47 }
 0x204   :  { %4256 = vrot.lane.b32.xlu0 %v4692_v30, %s4419_s26 }
 0x208   :  { %722 = vrot.lane.b32.xlu0 %v4678_v19, %s4418_s1 }
 0x277   :  { %v384_v48 = vpop.xlane.xlu0 %383 }
 0x278   :  { %v388_v49 = vsub.f32 %v379_v44, %v384_v48 }
 0x27a   :  { %v390_v52 = vmul.f32 1.442695, %v388_v49  ;;  %v4768_v49 = vpack.i.bf16 %v4700_v33, %v4702_v35 }
 0x27b   :  { %v387_v50 = vpop.xlane.xlu0 %386 }
 0x27c   :  { %v389_v51 = vsub.f32 %v380_v46, %v387_v50 }
 0x27e   :  { %v392_v53 = vmul.f32 1.442695, %v389_v51 }
 0x27f   :  { %v4257_v54 = vpop.permute.xlu0 %4256 }
 0x280   :  { %4315 = vpow2.f32 %v392_v53  ;;  %v4259_v55 = vunpack.i.h.bf16 %v4257_v54  ;;  %v4258_v56 = vunpack.i.l.bf16 %v4257_v54 }
 0x281   :  { %4317 = vpow2.f32 %v390_v52 }
 0x282   :  { %v3921_v57 = vpack.c.bf16 %v4259_v55, %v4258_v56 }
 0x283   :  { %v723_v12 = vpop.permute.xlu0 %722 }
 0x284   :  { %3923 = vmatprep.subr.msk.bf16.mxu1 %vm4686_vm1, %v3921_v57 }
 0x28a   :  { %v4316_v58 = vpop.eup %4315 }
 0x28b   :  { %v397_v59 = vsel %vm381_vm2, %v4316_v58, 0.0  ;;  %v4318_v60 = vpop.eup %4317 }
 0x28c   :  { %398 = vadd.xlane.f32.xlu1 %v397_v59  ;;  %v394_v61 = vsel %vm381_vm2, %v4318_v60, 0.0 }
 0x290   :  { %395 = vadd.xlane.f32.xlu1 %v394_v61 }
 0x2a1   :  { %497 = vrot.lane.b32.xlu1 %v4708_v37, %s4419_s26 }
 0x2a5   :  { %724 = vrot.lane.b32.xlu1 %v4708_v37, %s4418_s1 }
 0x319   :  { %v399_v0 = vpop.xlane.xlu1 %398 }
 0x31a   :  { %4319 = vrcp.f32 %v399_v0 }
 0x31d   :  { %v396_v1 = vpop.xlane.xlu1 %395 }
 0x31e   :  { %4321 = vrcp.f32 %v396_v1 }
 0x321   :  { %v498_v11 = vpop.permute.xlu1 %497 }
 0x324   :  { %v4320_v2 = vpop.eup %4319 }
 0x325   :  { %v403_v8 = vmul.f32 %v4320_v2, %v4316_v58  ;;  %v725_v15 = vpop.permute.xlu1 %724 }
 0x328   :  { %v4322_v4 = vpop.eup %4321 }
 0x329   :  { %v401_v7 = vmul.f32 %v4322_v4, %v4318_v60 }
 0x32b   :  { %3641 = vmatprep.mubr.msk.f32.mxu1 %vm381_vm2, %v401_v7 }
 0x32c   :  { %3642 = vmatmul.mubr.msk.f32.vlgmr.msra.gmra.mrb[4].mxu1 %vm381_vm2, %v403_v8 }
 0x32d   :  { %3926 = vmatpush3.bf16.xpose.msk.msra.mxu1 %vm4686_vm1, %v3921_v57  ;;  %3648 = vmatprep.mubr.msk.f32.mxu1 %vm289_vm0, %v496_v63 }
 0x32e   :  { %3933 = vmatprep.subr.msk.bf16.mxu1 %vm4686_vm1, %v3931_v9 }
 0x334   :  { %3649 = vmatmul.mubr.msk.f32.vlgmr.msra.gmra.mrb[6].mxu1 %vm289_vm0, %v498_v11 }
 0x335   :  { %3936 = vmatpush3.bf16.xpose.msk.msra.mxu1 %vm4686_vm1, %v3931_v9  ;;  %3662 = vmatprep.mubr.msk.f32.mxu1 %vm289_vm0, %v723_v12 }
 0x33c   :  { %3663 = vmatmul.mubr.msk.f32.vlgmr.msra.gmra.mrb[8].mxu1 %vm289_vm0, %v725_v15 }
 0x3ff   :  { %v3643_v16 = vpop.f32.mrb[4].mxu1 }
 0x400   :  { %486 = vst.msk [vmem:[#allocation3 + $0x8] sm:$0xff] %vm289_vm0, %v3643_v16  ;;  %v476_v18 = vpop.f32.mrb[5].mxu1 }
 0x401   :  { %485 = vst.msk [vmem:[#allocation3] sm:$0xff] %vm289_vm0, %v476_v18 }
 0x407   :  { %v3650_v20 = vpop.f32.mrb[6].mxu1 }
 0x408   :  { %v579_v21 = vpop.f32.mrb[7].mxu1  ;;  %v589_v36 = vmul.f32 0.17677669, %v3650_v20 }
 0x409   :  { %v588_v56 = vmul.f32 0.17677669, %v579_v21 }
 0x40a   :  { %v591_v38 = vadd.f32 %v589_v36, %v4720_v43 }
 0x40b   :  { %v590_v57 = vadd.f32 %v588_v56, %v4715_v40 }
 0x40c   :  { %v595_v39 = vsel %vm381_vm2, %v591_v38, -inf }
 0x40d   :  { %v592_v58 = vsel %vm381_vm2, %v590_v57, -inf }
 0x40f   :  { %v3664_v23 = vpop.f32.mrb[8].mxu1 }
 0x410   :  { %v816_v24 = vmul.f32 0.17677669, %v3664_v23  ;;  %v806_v25 = vpop.f32.mrb[9].mxu1 }
 0x411   :  { %v815_v27 = vmul.f32 0.17677669, %v806_v25 }
 0x412   :  { %v818_v29 = vadd.f32 %v816_v24, %v4720_v43 }
 0x413   :  { %v817_v31 = vadd.f32 %v815_v27, %v4715_v40 }
 0x414   :  { %v822_v32 = vsel %vm381_vm2, %v818_v29, -inf }
 0x415   :  { %823 = vmax.xlane.f32.xlu1 %v822_v32  ;;  %v819_v34 = vsel %vm381_vm2, %v817_v31, -inf }
 0x416   :  { %820 = vmax.xlane.f32.xlu0 %v819_v34 }
 0x426   :  { %4271 = vrot.lane.b32.xlu1 %v4692_v30, %s4420_s4 }
 0x42a   :  { %949 = vrot.lane.b32.xlu1 %v4678_v19, %s4420_s4 }
 0x42e   :  { %951 = vrot.lane.b32.xlu1 %v4708_v37, %s4420_s4 }
 0x452   :  { %596 = vmax.xlane.f32.xlu1 %v595_v39 }
 0x4a2   :  { %v824_v41 = vpop.xlane.xlu1 %823 }
 0x4a3   :  { %v826_v42 = vsub.f32 %v818_v29, %v824_v41  ;;  %v821_v44 = vpop.xlane.xlu0 %820 }
 0x4a4   :  { %v825_v45 = vsub.f32 %v817_v31, %v821_v44 }
 0x4a5   :  { %v829_v46 = vmul.f32 1.442695, %v826_v42 }
 0x4a6   :  { %v827_v47 = vmul.f32 1.442695, %v825_v45  ;;  %v4272_v50 = vpop.permute.xlu1 %4271 }
 0x4a7   :  { %4323 = vpow2.f32 %v829_v46  ;;  %v4274_v62 = vunpack.i.h.bf16 %v4272_v50  ;;  %v4273_v63 = vunpack.i.l.bf16 %v4272_v50 }
 0x4a8   :  { %4325 = vpow2.f32 %v827_v47 }
 0x4a9   :  { %v3941_v4 = vpack.c.bf16 %v4274_v62, %v4273_v63  ;;  %v1170_v62 = vld [vmem:[%s5704_s6] sm:$0xff]  ;;  %v1172_v63 = vld [vmem:[%s5704_s6 + $0x10] sm:$0xff] }
 0x4aa   :  { %v950_v51 = vpop.permute.xlu1 %949 }
 0x4ae   :  { %v952_v52 = vpop.permute.xlu1 %951 }
 0x4b1   :  { %v4324_v30 = vpop.eup %4323 }
 0x4b2   :  { %v834_v19 = vsel %vm381_vm2, %v4324_v30, 0.0  ;;  %v4326_v48 = vpop.eup %4325 }
 0x4b3   :  { %835 = vadd.xlane.f32.xlu0 %v834_v19  ;;  %v831_v37 = vsel %vm381_vm2, %v4326_v48, 0.0 }
 0x4b7   :  { %832 = vadd.xlane.f32.xlu0 %v831_v37 }
 0x4cd   :  { %4266 = vrot.lane.b32.xlu0 %v4768_v49, %s4418_s1 }
 0x4df   :  { %v597_v53 = vpop.xlane.xlu1 %596 }
 0x4e0   :  { %v599_v54 = vsub.f32 %v591_v38, %v597_v53 }
 0x4e2   :  { %v602_v55 = vmul.f32 1.442695, %v599_v54 }
 0x4e4   :  { %4327 = vpow2.f32 %v602_v55 }
 0x4ec   :  { %593 = vmax.xlane.f32.xlu0 %v592_v58 }
 0x4ee   :  { %v4774_v59 = vpop.eup %4327 }
 0x4ef   :  { %v607_v33 = vsel %vm381_vm2, %v4774_v59, 0.0 }
 0x4f0   :  { %608 = vadd.xlane.f32.xlu1 %v607_v33 }
 0x540   :  { %v836_v35 = vpop.xlane.xlu0 %835 }
 0x541   :  { %4329 = vrcp.f32 %v836_v35 }
 0x544   :  { %v833_v60 = vpop.xlane.xlu0 %832 }
 0x545   :  { %4331 = vrcp.f32 %v833_v60 }
 0x548   :  { %v4267_v61 = vpop.permute.xlu0 %4266 }
 0x549   :  { %v4269_v0 = vunpack.i.h.bf16 %v4267_v61  ;;  %v4268_v1 = vunpack.i.l.bf16 %v4267_v61 }
 0x54b   :  { %v3937_v2 = vpack.c.bf16 %v4269_v0, %v4268_v1  ;;  %v4330_v5 = vpop.eup %4329  ;;  %v1173_v1 = vld [vmem:[%s5704_s6 + $0x18] sm:$0xff] }
 0x54c   :  { %v840_v8 = vmul.f32 %v4330_v5, %v4324_v30  ;;  %v1175_v5 = vld [vmem:[%s5704_s6 + $0x28] sm:$0xff] }
 0x54d   :  { %3938 = vmatprep.subr.bf16.mxu1 %v3937_v2 }
 0x54e   :  { %3940 = vmatpush3.bf16.msra.mxu1 %v3937_v2  ;;  %v3955_v2 = vpack.c.bf16 %v1173_v1, %v1172_v63 }
 0x54f   :  { %v4332_v6 = vpop.eup %4331  ;;  %3943 = vmatprep.subr.msk.bf16.mxu1 %vm4686_vm1, %v3941_v4 }
 0x550   :  { %v838_v7 = vmul.f32 %v4332_v6, %v4326_v48 }
 0x552   :  { %3669 = vmatprep.mubr.msk.f32.mxu1 %vm381_vm2, %v838_v7  ;;  %v1176_v7 = vld [vmem:[%s5704_s6 + $0x30] sm:$0xff] }
 0x553   :  { %3670 = vmatmul.mubr.msk.f32.vlgmr.msra.gmra.mrb[10].mxu1 %vm381_vm2, %v840_v8  ;;  %v1177_v8 = vld [vmem:[%s5704_s6 + $0x38] sm:$0xff] }
 0x554   :  { %3676 = vmatprep.mubr.msk.f32.mxu1 %vm289_vm0, %v950_v51 }
 0x557   :  { %3946 = vmatpush3.bf16.xpose.msk.msra.mxu1 %vm4686_vm1, %v3941_v4  ;;  %v1174_v4 = vld [vmem:[%s5704_s6 + $0x20] sm:$0xff] }
 0x558   :  { %v3959_v6 = vpack.c.bf16 %v1175_v5, %v1174_v4 }
 0x55e   :  { %3677 = vmatmul.mubr.msk.f32.vlgmr.msra.gmra.mrb[12].mxu1 %vm289_vm0, %v952_v52 }
 0x55f   :  { %1419 = vmatprep.mubr.f32.mxu1 %v4417_v3 }
 0x579   :  { %v594_v11 = vpop.xlane.xlu0 %593 }
 0x57a   :  { %v598_v15 = vsub.f32 %v590_v57, %v594_v11  ;;  %v3963_v11 = vpack.c.bf16 %v1177_v8, %v1176_v7 }
 0x57c   :  { %v600_v16 = vmul.f32 1.442695, %v598_v15  ;;  %v1179_v15 = vld [vmem:[%s5704_s6 + $0x48] sm:$0xff] }
 0x57d   :  { %v609_v19 = vpop.xlane.xlu1 %608 }
 0x57e   :  { %4333 = vpow2.f32 %v600_v16 }
 0x588   :  { %v4334_v31 = vpop.eup %4333 }
 0x589   :  { %v604_v32 = vsel %vm381_vm2, %v4334_v31, 0.0 }
 0x626   :  { %v4787_v9 = vpop.f32.mrb[10].mxu1 }
 0x627   :  { %v921_v12 = vpop.f32.mrb[11].mxu1 }
 0x631   :  { %v3678_v18 = vpop.f32.mrb[12].mxu1 }
 0x632   :  { %v1033_v20 = vpop.f32.mrb[13].mxu1  ;;  %v1043_v21 = vmul.f32 0.17677669, %v3678_v18  ;;  %v1180_v18 = vld [vmem:[%s5704_s6 + $0x50] sm:$0xff] }
 0x633   :  { %v1042_v23 = vmul.f32 0.17677669, %v1033_v20  ;;  %v1181_v20 = vld [vmem:[%s5704_s6 + $0x58] sm:$0xff] }
 0x634   :  { %v1045_v27 = vadd.f32 %v1043_v21, %v4720_v43  ;;  %v3971_v21 = vpack.c.bf16 %v1181_v20, %v1180_v18  ;;  %v1325_v18 = vld [vmem:[%s5706_s10 + $0x70] sm:$0xff] }
 0x635   :  { %v1044_v24 = vadd.f32 %v1042_v23, %v4715_v40  ;;  %v1182_v23 = vld [vmem:[%s5704_s6 + $0x60] sm:$0xff] }
 0x636   :  { %v1049_v29 = vsel %vm381_vm2, %v1045_v27, -inf }
 0x637   :  { %v1046_v25 = vsel %vm381_vm2, %v1044_v24, -inf }
 0x638   :  { %1047 = vmax.xlane.f32.xlu0 %v1046_v25 }
 0x63c   :  { %1050 = vmax.xlane.f32.xlu0 %v1049_v29 }
 0x640   :  { %605 = vadd.xlane.f32.xlu0 %v604_v32  ;;  %v1185_v32 = vld [vmem:[%s5704_s6 + $0x78] sm:$0xff] }
 0x6c5   :  { %v1048_v34 = vpop.xlane.xlu0 %1047 }
 0x6c6   :  { %v1052_v36 = vsub.f32 %v1044_v24, %v1048_v34  ;;  %v1183_v24 = vld [vmem:[%s5704_s6 + $0x68] sm:$0xff] }
 0x6c8   :  { %v1054_v38 = vmul.f32 1.442695, %v1052_v36 }
 0x6c9   :  { %v1051_v39 = vpop.xlane.xlu0 %1050 }
 0x6ca   :  { %4335 = vpow2.f32 %v1054_v38  ;;  %v1053_v41 = vsub.f32 %v1045_v27, %v1051_v39  ;;  %v3975_v27 = vpack.c.bf16 %v1183_v24, %v1182_v23  ;;  %v1330_v23 = vld [vmem:[%s5706_s10 + $0x98] sm:$0xff] }
 0x6cc   :  { %v1056_v42 = vmul.f32 1.442695, %v1053_v41 }
 0x6cd   :  { %v606_v40 = vpop.xlane.xlu0 %605 }
 0x6ce   :  { %4337 = vpow2.f32 %v1056_v42 }
 0x6cf   :  { %4339 = vrcp.f32 %v606_v40 }
 0x6d0   :  { %4341 = vrcp.f32 %v609_v19 }
 0x6d4   :  { %v4336_v44 = vpop.eup %4335 }
 0x6d5   :  { %v1058_v43 = vsel %vm381_vm2, %v4336_v44, 0.0 }
 0x6d6   :  { %1059 = vadd.xlane.f32.xlu0 %v1058_v43 }
 0x6d8   :  { %v4338_v45 = vpop.eup %4337 }
 0x6d9   :  { %v4340_v46 = vpop.eup %4339  ;;  %v1061_v47 = vsel %vm381_vm2, %v4338_v45, 0.0 }
 0x6da   :  { %1062 = vadd.xlane.f32.xlu1 %v1061_v47  ;;  %v611_v30 = vmul.f32 %v4340_v46, %v4334_v31  ;;  %v4342_v54 = vpop.eup %4341  ;;  %v1184_v31 = vld [vmem:[%s5704_s6 + $0x70] sm:$0xff]  ;;  %v3211_v46 = vld [vmem:[%s5705_s7] ss:$0 sm:$0xff] }
 0x6db   :  { %v3979_v34 = vpack.c.bf16 %v1185_v32, %v1184_v31  ;;  %v1332_v31 = vld [vmem:[%s5706_s10 + $0xa8] sm:$0xff]  ;;  %v1334_v32 = vld [vmem:[%s5706_s10 + $0xb8] sm:$0xff] }
 0x6dc   :  { %3655 = vmatprep.mubr.msk.f32.mxu0 %vm381_vm2, %v611_v30 }
 0x6eb   :  { %4281 = vrot.lane.b32.xlu1 %v4768_v49, %s4420_s4 }
 0x6ec   :  { %4276 = vrot.lane.b32.xlu0 %v4768_v49, %s4419_s26  ;;  %v613_v49 = vmul.f32 %v4342_v54, %v4774_v59  ;;  %v1171_v59 = vld [vmem:[%s5704_s6 + $0x8] sm:$0xff] }
 0x6ed   :  { %v3951_v0 = vpack.c.bf16 %v1171_v59, %v1170_v62  ;;  %v1319_v62 = vld [vmem:[%s5706_s10 + $0x40] sm:$0xff]  ;;  %v1321_v59 = vld [vmem:[%s5706_s10 + $0x50] sm:$0xff] }
 0x6ee   :  { %v3993_v63 = vpack.c.bf16 %v1321_v59, %v1319_v62  ;;  %v1456_v59 = vld [vmem:[%s5707_s12 + $0x20] sm:$0xff] }
 0x6f0   :  { %932 = vrot.lane.b32.xlu0 %v921_v12, %s4418_s1  ;;  %v1178_v12 = vld [vmem:[%s5704_s6 + $0x40] sm:$0xff] }
 0x6f1   :  { %v3967_v16 = vpack.c.bf16 %v1179_v15, %v1178_v12  ;;  %v1326_v12 = vld [vmem:[%s5706_s10 + $0x78] sm:$0xff] }
 0x763   :  { %v1060_v48 = vpop.xlane.xlu0 %1059 }
 0x764   :  { %4343 = vrcp.f32 %v1060_v48 }
 0x767   :  { %v1063_v37 = vpop.xlane.xlu1 %1062  ;;  %v4277_v50 = vpop.permute.xlu0 %4276 }
 0x768   :  { %4345 = vrcp.f32 %v1063_v37  ;;  %v4279_v51 = vunpack.i.h.bf16 %v4277_v50  ;;  %v4278_v52 = vunpack.i.l.bf16 %v4277_v50 }
 0x76a   :  { %v3927_v53 = vpack.c.bf16 %v4279_v51, %v4278_v52  ;;  %v1312_v51 = vld [vmem:[%s5706_s10 + $0x8] sm:$0xff]  ;;  %v1314_v52 = vld [vmem:[%s5706_s10 + $0x18] sm:$0xff] }
 0x76b   :  { %v4282_v55 = vpop.permute.xlu1 %4281  ;;  %v933_v41 = vpop.permute.xlu0 %932  ;;  %v3983_v54 = vpack.c.bf16 %v1314_v52, %v1312_v51  ;;  %v1468_v52 = vld [vmem:[%s5707_s12 + $0x80] sm:$0xff] }
 0x76c   :  { %v4284_v56 = vunpack.i.h.bf16 %v4282_v55  ;;  %v4283_v57 = vunpack.i.l.bf16 %v4282_v55  ;;  %3928 = vmatprep.subr.bf16.mxu0 %v3927_v53  ;;  %v1318_v55 = vld [vmem:[%s5706_s10 + $0x38] sm:$0xff] }
 0x76d   :  { %3930 = vmatpush3.bf16.msra.mxu0 %v3927_v53  ;;  %v1311_v53 = vld [vmem:[%s5706_s10] sm:$0xff]  ;;  %3984 = vmatprep.subr.bf16.mxu1 %v3983_v54 }
 0x76e   :  { %v4344_v58 = vpop.eup %4343  ;;  %v3947_v33 = vpack.c.bf16 %v4284_v56, %v4283_v57  ;;  %v1452_v54 = vld [vmem:[%s5707_s12] sm:$0xff] }
 0x76f   :  { %v1065_v35 = vmul.f32 %v4344_v58, %v4336_v44  ;;  %v1315_v58 = vld [vmem:[%s5706_s10 + $0x20] sm:$0xff] }
 0x770   :  { %3656 = vmatmul.mubr.msk.f32.vlgmr.msra.gmra.mrb[4].mxu0 %vm381_vm2, %v613_v49  ;;  %3948 = vmatprep.subr.bf16.mxu0 %v3947_v33  ;;  %v1317_v49 = vld [vmem:[%s5706_s10 + $0x30] sm:$0xff] }
 0x771   :  { %3950 = vmatpush3.bf16.msra.mxu0 %v3947_v33  ;;  %3683 = vmatprep.mubr.msk.f32.mxu0 %vm381_vm2, %v1065_v35  ;;  %v1320_v33 = vld [vmem:[%s5706_s10 + $0x48] sm:$0xff]  ;;  %v1322_v35 = vld [vmem:[%s5706_s10 + $0x58] sm:$0xff] }
 0x772   :  { %v4346_v60 = vpop.eup %4345  ;;  %3952 = vmatprep.subr.bf16.mxu0 %v3951_v0 }
 0x773   :  { %v1067_v61 = vmul.f32 %v4346_v60, %v4338_v45  ;;  %v3989_v60 = vpack.c.bf16 %v1317_v49, %v1315_v58  ;;  %v1454_v49 = vld [vmem:[%s5707_s12 + $0x10] sm:$0xff] }
 0x775   :  { %3684 = vmatmul.mubr.msk.f32.vlgmr.msra.gmra.mrb[6].mxu0 %vm381_vm2, %v1067_v61  ;;  %v3991_v61 = vpack.c.bf16 %v1322_v35, %v1320_v33  ;;  %v1455_v33 = vld [vmem:[%s5707_s12 + $0x18] sm:$0xff]  ;;  %v1472_v35 = vld [vmem:[%s5707_s12 + $0xa0] sm:$0xff] }
 0x776   :  { %3954 = vmatpush3.bf16.msra.mxu0 %v3951_v0 }
 0x777   :  { %3956 = vmatprep.subr.bf16.mxu0 %v3955_v2 }
 0x77a   :  { %3958 = vmatpush3.bf16.msra.mxu0 %v3955_v2 }
 0x77b   :  { %3960 = vmatprep.subr.bf16.mxu0 %v3959_v6 }
 0x77e   :  { %3962 = vmatpush3.bf16.msra.mxu0 %v3959_v6 }
 0x77f   :  { %3964 = vmatprep.subr.bf16.mxu0 %v3963_v11 }
 0x782   :  { %3966 = vmatpush3.bf16.msra.mxu0 %v3963_v11  ;;  %v1324_v11 = vld [vmem:[%s5706_s10 + $0x68] sm:$0xff] }
 0x783   :  { %3968 = vmatprep.subr.bf16.mxu0 %v3967_v16  ;;  %v3995_v15 = vpack.c.bf16 %v1326_v12, %v1324_v11 }
 0x786   :  { %3970 = vmatpush3.bf16.msra.mxu0 %v3967_v16  ;;  %v1323_v16 = vld [vmem:[%s5706_s10 + $0x60] sm:$0xff] }
 0x787   :  { %3972 = vmatprep.subr.bf16.mxu0 %v3971_v21  ;;  %v3997_v20 = vpack.c.bf16 %v1325_v18, %v1323_v16  ;;  %v3217_v18 = vld [vmem:[%s5719_s23 + $0x180] sm:$0xff] }
 0x78a   :  { %3974 = vmatpush3.bf16.msra.mxu0 %v3971_v21  ;;  %v1328_v21 = vld [vmem:[%s5706_s10 + $0x88] sm:$0xff] }
 0x78b   :  { %3976 = vmatprep.subr.bf16.mxu0 %v3975_v27  ;;  %v3999_v24 = vpack.c.bf16 %v1330_v23, %v1328_v21  ;;  %v3213_v21 = vld [vmem:[%s5709_s9] ss:$0 sm:$0xff]  ;;  %v3224_v23 = vld [vmem:[%s5719_s23 + $0x1b8] sm:$0xff] }
 0x78e   :  { %3978 = vmatpush3.bf16.msra.mxu0 %v3975_v27  ;;  %v1329_v27 = vld [vmem:[%s5706_s10 + $0x90] sm:$0xff] }
 0x78f   :  { %3980 = vmatprep.subr.bf16.mxu0 %v3979_v34 }
 0x792   :  { %3982 = vmatpush3.bf16.msra.mxu0 %v3979_v34  ;;  %v4003_v34 = vpack.c.bf16 %v1334_v32, %v1332_v31 }
 0x843   :  { %v3657_v25 = vpop.f32.mrb[4].mxu0 }
 0x844   :  { %v694_v29 = vpop.f32.mrb[5].mxu0 }
 0x845   :  { %705 = vrot.lane.b32.xlu1 %v694_v29, %s4420_s4 }
 0x848   :  { %v3685_v36 = vpop.f32.mrb[6].mxu0 }
 0x849   :  { %707 = vrot.lane.b32.xlu1 %v3657_v25, %s4420_s4  ;;  %v1148_v38 = vpop.f32.mrb[7].mxu0  ;;  %v1327_v25 = vld [vmem:[%s5706_s10 + $0x80] sm:$0xff] }
 0x84a   :  { %1159 = vrot.lane.b32.xlu0 %v1148_v38, %s4419_s26  ;;  %v4001_v29 = vpack.c.bf16 %v1329_v27, %v1327_v25  ;;  %v1333_v38 = vld [vmem:[%s5706_s10 + $0xb0] sm:$0xff] }
 0x84d   :  { %934 = vrot.lane.b32.xlu1 %v4787_v9, %s4418_s1 }
 0x851   :  { %1161 = vrot.lane.b32.xlu1 %v3685_v36, %s4419_s26  ;;  %v1331_v36 = vld [vmem:[%s5706_s10 + $0xa0] sm:$0xff] }
 0x8b7   :  { %v706_v39 = vpop.permute.xlu1 %705 }
 0x8b8   :  { %712 = vst.msk [vmem:[#allocation3] sm:$0xff] %vm711_vm3, %v706_v39  ;;  %v4005_v39 = vpack.c.bf16 %v1333_v38, %v1331_v36  ;;  %v3226_v36 = vld [vmem:[%s5719_s23 + $0x1c8] sm:$0xff] }
 0x8b9   :  { %939 = vst.msk [vmem:[#allocation3] sm:$0xff] %vm938_vm4, %v933_v41  ;;  %v1336_v41 = vld [vmem:[%s5706_s10 + $0xc8] sm:$0xff] }
 0x8ba   :  { %v3230_v38 = vld [vmem:[%s5719_s23 + $0x1e8] sm:$0xff] }
 0x8bb   :  { %v708_v42 = vpop.permute.xlu1 %707 }
 0x8bc   :  { %713 = vst.msk [vmem:[#allocation3 + $0x8] sm:$0xff] %vm711_vm3, %v708_v42  ;;  %v1160_v40 = vpop.permute.xlu0 %1159  ;;  %v1338_v42 = vld [vmem:[%s5706_s10 + $0xd8] sm:$0xff] }
 0x8bd   :  { %1166 = vst.msk [vmem:[#allocation3] sm:$0xff] %vm1165_vm5, %v1160_v40  ;;  %v1335_v40 = vld [vmem:[%s5706_s10 + $0xc0] sm:$0xff] }
 0x8bf   :  { %v935_v44 = vpop.permute.xlu1 %934 }
 0x8c0   :  { %940 = vst.msk [vmem:[#allocation3 + $0x8] sm:$0xff] %vm938_vm4, %v935_v44  ;;  %v4007_v44 = vpack.c.bf16 %v1338_v42, %v1336_v41 }
 0x8c3   :  { %v1162_v9 = vpop.permute.xlu1 %1161 }
 0x8c4   :  { %1167 = vst.msk [vmem:[#allocation3 + $0x8] sm:$0xff] %vm1165_vm5, %v1162_v9  ;;  %v1168_v43 = vld [vmem:[#allocation3] sm:$0xff]  ;;  %v1337_v9 = vld [vmem:[%s5706_s10 + $0xd0] sm:$0xff] }
 0x8c5   :  { %3718 = vmatprep.mubr.f32.mxu0 %v1168_v43  ;;  %v1340_v43 = vld [vmem:[%s5706_s10 + $0xe8] sm:$0xff] }
 0x8cb   :  { %v1169_v45 = vld [vmem:[#allocation3 + $0x8] sm:$0xff] }
 0x8cc   :  { %3719 = vmatmul.mubr.f32.vlgmr.msra.gmra.mrb[8].mxu0 %v1169_v45  ;;  %v1342_v45 = vld [vmem:[%s5706_s10 + $0xf8] sm:$0xff] }
 0x99f   :  { %v3720_v47 = vpop.f32.mrb[8].mxu0 }
 0x9a0   :  { %v1265_v30 = vadd.f32 %v3720_v47, %v3211_v46  ;;  %v1259_v19 = vpop.f32.mrb[9].mxu0  ;;  %v4011_v47 = vpack.c.bf16 %v1342_v45, %v1340_v43  ;;  %v3236_v43 = vld [vmem:[%s5719_s23 + $0x218] sm:$0xff]  ;;  %v3239_v45 = vld [vmem:[%s5719_s23 + $0x230] sm:$0xff] }
 0x9a1   :  { %v1260_v48 = vadd.f32 %v3211_v46, %v1259_v19  ;;  %v4009_v46 = vpack.c.bf16 %v1337_v9, %v1335_v40  ;;  %v1341_v19 = vld [vmem:[%s5706_s10 + $0xf0] sm:$0xff]  ;;  %v3232_v9 = vld [vmem:[%s5719_s23 + $0x1f8] sm:$0xff] }
 0x9a2   :  { %v1269_v37 = vadd.f32 %v1265_v30, %v4662_v10  ;;  %v1313_v10 = vld [vmem:[%s5706_s10 + $0x10] sm:$0xff]  ;;  %v1339_v30 = vld [vmem:[%s5706_s10 + $0xe0] sm:$0xff] }
 0x9a3   :  { %v1268_v50 = vadd.f32 %v1260_v48, %v4564_v26  ;;  %v1316_v26 = vld [vmem:[%s5706_s10 + $0x28] sm:$0xff]  ;;  %v3985_v56 = vpack.c.bf16 %v1313_v10, %v1311_v53 }
 0x9a4   :  { %1274 = vadd.xlane.f32.xlu1 %v1269_v37  ;;  %v3987_v57 = vpack.c.bf16 %v1318_v55, %v1316_v26  ;;  %v3218_v48 = vld [vmem:[%s5719_s23 + $0x188] sm:$0xff]  ;;  %v1470_v55 = vld [vmem:[%s5707_s12 + $0x90] sm:$0xff] }
 0x9a5   :  { %1272 = vadd.xlane.f32.xlu0 %v1268_v50  ;;  %3986 = vmatpush1.bf16.msra.mxu1 %v3985_v56  ;;  %v1469_v53 = vld [vmem:[%s5707_s12 + $0x88] sm:$0xff]  ;;  %v1471_v56 = vld [vmem:[%s5707_s12 + $0x98] sm:$0xff] }
 0x9a6   :  { %3988 = vmatprep.subr.bf16.mxu1 %v3987_v57  ;;  %v4015_v10 = vpack.c.bf16 %v1469_v53, %v1468_v52  ;;  %v1453_v26 = vld [vmem:[%s5707_s12 + $0x8] sm:$0xff]  ;;  %v4019_v58 = vpack.c.bf16 %v1471_v56, %v1470_v55  ;;  %v3241_v52 = vld [vmem:[%s5719_s23 + $0x240] sm:$0xff]  ;;  %v3244_v53 = vld [vmem:[%s5719_s23 + $0x258] sm:$0xff] }
 0x9a7   :  { %v4017_v57 = vpack.c.bf16 %v1453_v26, %v1452_v54  ;;  %v3248_v54 = vld [vmem:[%s5719_s23 + $0x278] sm:$0xff]  ;;  %v4065_v26 = vpack.c.bf16 %v3244_v53, %v3241_v52  ;;  %v3247_v56 = vld [vmem:[%s5719_s23 + $0x270] sm:$0xff] }
 0x9a8   :  { %4016 = vmatprep.subr.bf16.mxu0 %v4015_v10  ;;  %v3251_v10 = vld [vmem:[%s5719_s23 + $0x290] sm:$0xff] }
 0x9a9   :  { %3990 = vmatpush1.bf16.msra.mxu1 %v3989_v60  ;;  %v1473_v60 = vld [vmem:[%s5707_s12 + $0xa8] sm:$0xff]  ;;  %4018 = vmatpush3.bf16.msra.mxu0 %v4017_v57  ;;  %v4067_v55 = vpack.c.bf16 %v3251_v10, %v3248_v54 }
 0x9aa   :  { %3992 = vmatprep.subr.bf16.mxu1 %v3991_v61  ;;  %v4021_v61 = vpack.c.bf16 %v1455_v33, %v1454_v49  ;;  %4020 = vmatprep.subr.bf16.mxu0 %v4019_v58  ;;  %v4023_v62 = vpack.c.bf16 %v1473_v60, %v1472_v35  ;;  %v3250_v57 = vld [vmem:[%s5719_s23 + $0x288] sm:$0xff]  ;;  %v3257_v49 = vld [vmem:[%s5719_s23 + $0x2c0] sm:$0xff] }
 0x9ab   :  { %v3254_v58 = vld [vmem:[%s5719_s23 + $0x2a8] sm:$0xff]  ;;  %v4069_v33 = vpack.c.bf16 %v3250_v57, %v3247_v56  ;;  %v3253_v60 = vld [vmem:[%s5719_s23 + $0x2a0] sm:$0xff] }
 0x9ac   :  { %v4071_v35 = vpack.c.bf16 %v3257_v49, %v3254_v58 }
 0x9ad   :  { %3994 = vmatpush1.bf16.msra.mxu1 %v3993_v63  ;;  %v1457_v63 = vld [vmem:[%s5707_s12 + $0x28] sm:$0xff]  ;;  %4022 = vmatpush3.bf16.msra.mxu0 %v4021_v61  ;;  %v3256_v61 = vld [vmem:[%s5719_s23 + $0x2b8] sm:$0xff] }
 0x9ae   :  { %3996 = vmatprep.subr.bf16.mxu1 %v3995_v15  ;;  %4024 = vmatprep.subr.bf16.mxu0 %v4023_v62  ;;  %v3212_v15 = vld [vmem:[%s5708_s8] ss:$0 sm:$0xff]  ;;  %v3260_v62 = vld [vmem:[%s5719_s23 + $0x2d8] sm:$0xff] }
 0x9b1   :  { %3998 = vmatpush1.bf16.msra.mxu1 %v3997_v20  ;;  %v3220_v20 = vld [vmem:[%s5719_s23 + $0x198] sm:$0xff] }
 0x9b2   :  { %4000 = vmatprep.subr.bf16.mxu1 %v3999_v24  ;;  %v4049_v27 = vpack.c.bf16 %v3220_v20, %v3217_v18  ;;  %v1459_v18 = vld [vmem:[%s5707_s12 + $0x38] sm:$0xff] }
 0x9b5   :  { %4002 = vmatpush1.bf16.msra.mxu1 %v4001_v29 }
 0x9b6   :  { %4004 = vmatprep.subr.bf16.mxu1 %v4003_v34  ;;  %v3223_v34 = vld [vmem:[%s5719_s23 + $0x1b0] sm:$0xff] }
 0x9b9   :  { %4006 = vmatpush1.bf16.msra.mxu1 %v4005_v39  ;;  %v3233_v39 = vld [vmem:[%s5719_s23 + $0x200] sm:$0xff] }
 0x9ba   :  { %4008 = vmatprep.subr.bf16.mxu1 %v4007_v44  ;;  %v4055_v40 = vpack.c.bf16 %v3233_v39, %v3230_v38  ;;  %v3229_v44 = vld [vmem:[%s5719_s23 + $0x1e0] sm:$0xff]  ;;  %v1463_v38 = vld [vmem:[%s5707_s12 + $0x58] sm:$0xff] }
 0x9bd   :  { %4010 = vmatpush1.bf16.msra.mxu1 %v4009_v46  ;;  %v4057_v46 = vpack.c.bf16 %v3232_v9, %v3229_v44  ;;  %v1464_v44 = vld [vmem:[%s5707_s12 + $0x60] sm:$0xff]  ;;  %v1465_v9 = vld [vmem:[%s5707_s12 + $0x68] sm:$0xff] }
 0x9be   :  { %4012 = vmatprep.subr.bf16.mxu1 %v4011_v47  ;;  %v4059_v47 = vpack.c.bf16 %v3239_v45, %v3236_v43  ;;  %v4041_v43 = vpack.c.bf16 %v1465_v9, %v1464_v44  ;;  %v1482_v45 = vld [vmem:[%s5707_s12 + $0xf0] sm:$0xff]  ;;  %v3222_v44 = vld [vmem:[%s5719_s23 + $0x1a8] sm:$0xff]  ;;  %v3225_v9 = vld [vmem:[%s5719_s23 + $0x1c0] sm:$0xff] }
 0xa31   :  { %v1275_v0 = vpop.xlane.xlu1 %1274 }
 0xa32   :  { %v1273_v1 = vpop.xlane.xlu0 %1272  ;;  %v1278_v2 = vmul.f32 0.0078125, %v1275_v0  ;;  %v4025_v0 = vpack.c.bf16 %v1457_v63, %v1456_v59  ;;  %v3263_v59 = vld [vmem:[%s5719_s23 + $0x2f0] sm:$0xff]  ;;  %v4073_v63 = vpack.c.bf16 %v3256_v61, %v3253_v60 }
 0xa33   :  { %v1277_v4 = vmul.f32 0.0078125, %v1273_v1 }
 0xa34   :  { %v4909_v6 = vsub.f32 %v1269_v37, %v1278_v2  ;;  %v3221_v37 = vld [vmem:[%s5719_s23 + $0x1a0] sm:$0xff]  ;;  %4026 = vmatpush3.bf16.msra.mxu0 %v4025_v0  ;;  %v4075_v0 = vpack.c.bf16 %v3263_v59, %v3260_v62 }
 0xa35   :  { %v4907_v5 = vsub.f32 %v1268_v50, %v1277_v4  ;;  %v4013_v50 = vpack.c.bf16 %v1341_v19, %v1339_v30  ;;  %v4047_v51 = vpack.c.bf16 %v3221_v37, %v3218_v48  ;;  %v3235_v30 = vld [vmem:[%s5719_s23 + $0x210] sm:$0xff]  ;;  %v3238_v19 = vld [vmem:[%s5719_s23 + $0x228] sm:$0xff]  ;;  %v3245_v37 = vld [vmem:[%s5719_s23 + $0x260] sm:$0xff] }
 0xa36   :  { %v1282_v8 = vmul.f32 %v4909_v6, %v4909_v6  ;;  %v3242_v48 = vld [vmem:[%s5719_s23 + $0x248] sm:$0xff] }
 0xa37   :  { %v1281_v7 = vmul.f32 %v4907_v5, %v4907_v5  ;;  %4014 = vmatpush1.bf16.msra.mxu1 %v4013_v50  ;;  %v4061_v50 = vpack.c.bf16 %v3238_v19, %v3235_v30  ;;  %v1466_v30 = vld [vmem:[%s5707_s12 + $0x70] sm:$0xff]  ;;  %v1467_v19 = vld [vmem:[%s5707_s12 + $0x78] sm:$0xff] }
 0xa38   :  { %4048 = vmatprep.subr.bf16.mxu1 %v4047_v51  ;;  %v4063_v51 = vpack.c.bf16 %v3245_v37, %v3242_v48  ;;  %v4045_v48 = vpack.c.bf16 %v1467_v19, %v1466_v30  ;;  %v1343_v37 = vld [vmem:[%s5711_s11] sm:$0x3]  ;;  %v3234_v30 = vld [vmem:[%s5719_s23 + $0x208] sm:$0xff] }
 0xa39   :  { %1283 = vadd.xlane.f32.xlu0 %v1281_v7 }
 0xa3d   :  { %1285 = vadd.xlane.f32.xlu0 %v1282_v8 }
 0xac6   :  { %v1284_v1 = vpop.xlane.xlu0 %1283 }
 0xac7   :  { %v1287_v2 = vmul.f32 0.0078125, %v1284_v1  ;;  %v3259_v1 = vld [vmem:[%s5719_s23 + $0x2d0] sm:$0xff] }
 0xac9   :  { %v1289_v4 = vadd.f32 1e-12, %v1287_v2  ;;  %v3262_v2 = vld [vmem:[%s5719_s23 + $0x2e8] sm:$0xff] }
 0xaca   :  { %v1286_v7 = vpop.xlane.xlu0 %1285 }
 0xacb   :  { %4347 = vrsqrt.f32 %v1289_v4  ;;  %v1288_v8 = vmul.f32 0.0078125, %v1286_v7  ;;  %v4077_v4 = vpack.c.bf16 %v3262_v2, %v3259_v1  ;;  %v5126_v7 = vld [vmem:[%s5710_s2] sm:$0xff] }
 0xacd   :  { %v1290_v11 = vadd.f32 1e-12, %v1288_v8  ;;  %v5133_v8 = vld [vmem:[%s5710_s2 + $0x8] sm:$0xff] }
 0xacf   :  { %4349 = vrsqrt.f32 %v1290_v11  ;;  %v1474_v11 = vld [vmem:[%s5707_s12 + $0xb0] sm:$0xff] }
 0xad5   :  { %v4348_v12 = vpop.eup %4347 }
 0xad6   :  { %v1293_v16 = vmul.f32 %v4348_v12, %v4907_v5  ;;  %v3227_v5 = vld [vmem:[%s5719_s23 + $0x1d0] sm:$0xff]  ;;  %v1475_v12 = vld [vmem:[%s5707_s12 + $0xb8] sm:$0xff] }
 0xad7   :  { %v4051_v31 = vpack.c.bf16 %v3227_v5, %v3224_v23  ;;  %v1477_v23 = vld [vmem:[%s5707_s12 + $0xc8] sm:$0xff] }
 0xad8   :  { %v1301_v24 = vmul.f32 %v3212_v15, %v1293_v16  ;;  %v1458_v16 = vld [vmem:[%s5707_s12 + $0x30] sm:$0xff] }
 0xad9   :  { %v4350_v25 = vpop.eup %4349  ;;  %v4029_v20 = vpack.c.bf16 %v1459_v18, %v1458_v16 }
 0xada   :  { %v5036_v29 = vadd.f32 %v3213_v21, %v1301_v24  ;;  %v1294_v32 = vmul.f32 %v4350_v25, %v4909_v6  ;;  %v4053_v6 = vpack.c.bf16 %v3226_v36, %v3223_v34  ;;  %v1460_v24 = vld [vmem:[%s5707_s12 + $0x40] sm:$0xff]  ;;  %v1461_v25 = vld [vmem:[%s5707_s12 + $0x48] sm:$0xff]  ;;  %v1462_v36 = vld [vmem:[%s5707_s12 + $0x50] sm:$0xff] }
 0xadb   :  { %v4037_v39 = vpack.c.bf16 %v1463_v38, %v1462_v36 }
 0xadc   :  { %1420 = vmatmul.mubr.f32.vlgmr.msra.gmra.mrb[14].mxu1 %v5036_v29  ;;  %v1302_v41 = vmul.f32 %v3212_v15, %v1294_v32  ;;  %v4027_v15 = vpack.c.bf16 %v1475_v12, %v1474_v11  ;;  %v1479_v32 = vld [vmem:[%s5707_s12 + $0xd8] sm:$0xff] }
 0xadd   :  { %4050 = vmatpush1.bf16.msra.mxu1 %v4049_v27  ;;  %1425 = vmatprep.mubr.f32.mxu1 %v4417_v3  ;;  %v4033_v27 = vpack.c.bf16 %v1461_v25, %v1460_v24 }
 0xade   :  { %4052 = vmatprep.subr.bf16.mxu1 %v4051_v31  ;;  %v5053_v42 = vadd.f32 %v3213_v21, %v1302_v41  ;;  %4028 = vmatprep.subr.bf16.mxu0 %v4027_v15  ;;  %v1476_v21 = vld [vmem:[%s5707_s12 + $0xc0] sm:$0xff]  ;;  %v1478_v31 = vld [vmem:[%s5707_s12 + $0xd0] sm:$0xff] }
 0xadf   :  { %4030 = vmatpush3.bf16.msra.mxu0 %v4029_v20  ;;  %v4031_v5 = vpack.c.bf16 %v1477_v23, %v1476_v21  ;;  %v4035_v34 = vpack.c.bf16 %v1479_v32, %v1478_v31  ;;  %v1480_v41 = vld [vmem:[%s5707_s12 + $0xe0] sm:$0xff] }
 0xae0   :  { %1426 = vmatmul.mubr.f32.gmra.mrb[16].mxu1 %v5053_v42  ;;  %v5204_v23 = vld [vmem:[%s5702_s5 + $0x3] sm:$0x7] }
 0xae1   :  { %4054 = vmatpush1.bf16.msra.mxu1 %v4053_v6  ;;  %1739 = vmatprep.mubr.f32.mxu1 %v4417_v3  ;;  %v1481_v6 = vld [vmem:[%s5707_s12 + $0xe8] sm:$0xff]  ;;  %v1667_v31 = vrot.slane %v5204_v23, %v4676_v17 }
 0xae2   :  { %4056 = vmatprep.subr.bf16.mxu1 %v4055_v40  ;;  %4032 = vmatprep.subr.bf16.mxu0 %v4031_v5  ;;  %v4039_v40 = vpack.c.bf16 %v1481_v6, %v1480_v41  ;;  %v1663_v5 = vrot.slane %v5204_v23, %v4669_v14 }
 0xae3   :  { %4034 = vmatpush3.bf16.msra.mxu0 %v4033_v27 }
 0xae4   :  { %4036 = vmatprep.subr.bf16.mxu0 %v4035_v34 }
 0xae5   :  { %4058 = vmatpush1.bf16.msra.mxu1 %v4057_v46  ;;  %v1483_v46 = vld [vmem:[%s5707_s12 + $0xf8] sm:$0xff] }
 0xae6   :  { %4060 = vmatprep.subr.bf16.mxu1 %v4059_v47  ;;  %v4043_v47 = vpack.c.bf16 %v1483_v46, %v1482_v45  ;;  %v3228_v45 = vld [vmem:[%s5719_s23 + $0x1d8] sm:$0xff] }
 0xae7   :  { %4038 = vmatpush3.bf16.msra.mxu0 %v4037_v39  ;;  %v4083_v46 = vpack.c.bf16 %v3228_v45, %v3225_v9  ;;  %v1671_v9 = vrot.slane %v5204_v23, %v120_v22 }
 0xae8   :  { %4040 = vmatprep.subr.bf16.mxu0 %v4039_v40  ;;  %v3219_v40 = vld [vmem:[%s5719_s23 + $0x190] sm:$0xff] }
 0xae9   :  { %4062 = vmatpush1.bf16.msra.mxu1 %v4061_v50  ;;  %v1348_v50 = vrot.slane %v1343_v37, %v4669_v14 }
 0xaea   :  { %4064 = vmatprep.subr.bf16.mxu1 %v4063_v51  ;;  %v1352_v51 = vrot.slane %v1343_v37, %v4676_v17  ;;  %v3240_v37 = vld [vmem:[%s5719_s23 + $0x238] sm:$0xff] }
 0xaeb   :  { %4042 = vmatpush3.bf16.msra.mxu0 %v4041_v43  ;;  %v4079_v43 = vpack.c.bf16 %v3222_v44, %v3219_v40 }
 0xaec   :  { %4044 = vmatprep.subr.bf16.mxu0 %v4043_v47  ;;  %v3231_v47 = vld [vmem:[%s5719_s23 + $0x1f0] sm:$0xff] }
 0xaed   :  { %4066 = vmatpush1.bf16.msra.mxu1 %v4065_v26  ;;  %v4087_v19 = vpack.c.bf16 %v3234_v30, %v3231_v47 }
 0xaee   :  { %4068 = vmatprep.subr.bf16.mxu1 %v4067_v55 }
 0xaef   :  { %4046 = vmatpush3.bf16.msra.mxu0 %v4045_v48  ;;  %v3237_v48 = vld [vmem:[%s5719_s23 + $0x220] sm:$0xff] }
 0xaf0   :  { %4080 = vmatprep.subr.bf16.mxu0 %v4079_v43 }
 0xaf1   :  { %4070 = vmatpush1.bf16.msra.mxu1 %v4069_v33 }
 0xaf2   :  { %4072 = vmatprep.subr.bf16.mxu1 %v4071_v35 }
 0xaf5   :  { %4074 = vmatpush1.bf16.msra.mxu1 %v4073_v63 }
 0xaf6   :  { %4076 = vmatprep.subr.bf16.mxu1 %v4075_v0 }
 0xaf9   :  { %4078 = vmatpush1.bf16.msra.mxu1 %v4077_v4 }
 0xafc   :  { %1740 = vmatmul.mubr.f32.vlgmr.msra.gmra.mrb[18].mxu1 %v5126_v7 }
 0xafd   :  { %1745 = vmatprep.mubr.f32.mxu1 %v4417_v3 }
 0xb00   :  { %1746 = vmatmul.mubr.f32.gmra.mrb[20].mxu1 %v5133_v8 }
 0xbaf   :  { %v1421_v52 = vpop.f32.mrb[14].mxu1 }
 0xbb0   :  { %v1422_v53 = vadd.f32 %v1421_v52, %v1348_v50  ;;  %v1423_v54 = vpop.f32.mrb[15].mxu1  ;;  %v3246_v52 = vld [vmem:[%s5719_s23 + $0x268] sm:$0xff] }
 0xbb1   :  { %v1424_v10 = vadd.f32 %v1423_v54, %v1352_v51  ;;  %v3249_v54 = vld [vmem:[%s5719_s23 + $0x280] sm:$0xff] }
 0xbb2   :  { %v1436_v26 = vmul.f32 0.70710677, %v1422_v53  ;;  %v1432_v0 = vmul.f32 0.5, %v1422_v53 }
 0xbb3   :  { %v1437_v55 = vmul.f32 0.70710677, %v1424_v10  ;;  %v1427_v56 = vpop.f32.mrb[16].mxu1  ;;  %v1433_v59 = vmul.f32 0.5, %v1424_v10  ;;  %v3252_v10 = vld [vmem:[%s5719_s23 + $0x298] sm:$0xff] }
 0xbb4   :  { %4351 = verf.f32 %v1436_v26  ;;  %v1428_v57 = vadd.f32 %v1427_v56, %v1348_v50  ;;  %v1429_v58 = vpop.f32.mrb[17].mxu1  ;;  %v4091_v50 = vpack.c.bf16 %v3240_v37, %v3237_v48  ;;  %v4099_v26 = vpack.c.bf16 %v3252_v10, %v3249_v54  ;;  %v3258_v56 = vld [vmem:[%s5719_s23 + $0x2c8] sm:$0xff] }
 0xbb5   :  { %4353 = verf.f32 %v1437_v55  ;;  %v1430_v49 = vadd.f32 %v1429_v58, %v1352_v51  ;;  %v3243_v51 = vld [vmem:[%s5719_s23 + $0x250] sm:$0xff]  ;;  %v3261_v58 = vld [vmem:[%s5719_s23 + $0x2e0] sm:$0xff] }
 0xbb6   :  { %v1438_v33 = vmul.f32 0.70710677, %v1428_v57  ;;  %v1434_v18 = vmul.f32 0.5, %v1428_v57  ;;  %v4095_v53 = vpack.c.bf16 %v3246_v52, %v3243_v51  ;;  %v3255_v55 = vld [vmem:[%s5719_s23 + $0x2b0] sm:$0xff] }
 0xbb7   :  { %v1439_v35 = vmul.f32 0.70710677, %v1430_v49  ;;  %v1435_v15 = vmul.f32 0.5, %v1430_v49  ;;  %v4103_v57 = vpack.c.bf16 %v3258_v56, %v3255_v55  ;;  %v3264_v49 = vld [vmem:[%s5719_s23 + $0x2f8] sm:$0xff] }
 0xbb8   :  { %4355 = verf.f32 %v1438_v33  ;;  %v4107_v33 = vpack.c.bf16 %v3264_v49, %v3261_v58 }
 0xbb9   :  { %4357 = verf.f32 %v1439_v35 }
 0xbbe   :  { %v4352_v60 = vpop.eup %4351 }
 0xbbf   :  { %v4354_v61 = vpop.eup %4353  ;;  %v1444_v62 = vadd.f32 1.0, %v4352_v60  ;;  %v5277_v60 = vld [vmem:[%s5712_s13] ss:$0 sm:$0xff] }
 0xbc0   :  { %v1445_v63 = vadd.f32 1.0, %v4354_v61 }
 0xbc1   :  { %v1448_v11 = vmul.f32 %v1444_v62, %v1432_v0 }
 0xbc2   :  { %v4356_v1 = vpop.eup %4355  ;;  %v1449_v2 = vmul.f32 %v1445_v63, %v1433_v59 }
 0xbc3   :  { %v4358_v4 = vpop.eup %4357  ;;  %v1446_v12 = vadd.f32 1.0, %v4356_v1 }
 0xbc4   :  { %v1447_v16 = vadd.f32 1.0, %v4358_v4  ;;  %1555 = vmatprep.mubr.f32.mxu0 %v1449_v2 }
 0xbc5   :  { %1556 = vmatmul.mubr.f32.vlgmr.msra.gmra.mrb[10].mxu0 %v1448_v11  ;;  %v1450_v21 = vmul.f32 %v1446_v12, %v1434_v18  ;;  %v5293_v18 = vld [vmem:[%s5703_s3] sm:$0xff] }
 0xbc6   :  { %v1451_v20 = vmul.f32 %v1447_v16, %v1435_v15  ;;  %4082 = vmatpush3.bf16.msra.mxu0 %v4079_v43  ;;  %v5287_v15 = vld [vmem:[%s5703_s3 + $0x8] sm:$0xff] }
 0xbc7   :  { %4084 = vmatprep.subr.bf16.mxu0 %v4083_v46 }
 0xbc8   :  { %1560 = vmatprep.mubr.f32.mxu0 %v1451_v20 }
 0xbc9   :  { %1561 = vmatmul.mubr.f32.gmra.mrb[12].mxu0 %v1450_v21 }
 0xbca   :  { %3753 = vmatprep.mubr.f32.mxu0 %v5126_v7  ;;  %4086 = vmatpush3.bf16.msra.mxu0 %v4083_v46 }
 0xbcb   :  { %4088 = vmatprep.subr.bf16.mxu0 %v4087_v19 }
 0xbce   :  { %4090 = vmatpush3.bf16.msra.mxu0 %v4087_v19 }
 0xbcf   :  { %v1741_v24 = vpop.f32.mrb[18].mxu1  ;;  %4092 = vmatprep.subr.bf16.mxu0 %v4091_v50 }
 0xbd0   :  { %v5209_v25 = vadd.f32 %v1741_v24, %v1663_v5  ;;  %v1743_v27 = vpop.f32.mrb[19].mxu1 }
 0xbd1   :  { %v1744_v36 = vadd.f32 %v1743_v27, %v1667_v31 }
 0xbd2   :  { %3760 = vmatprep.mubr.msk.f32.mxu1 %vm289_vm0, %v5209_v25  ;;  %4094 = vmatpush3.bf16.msra.mxu0 %v4091_v50 }
 0xbd3   :  { %v1747_v32 = vpop.f32.mrb[20].mxu1  ;;  %4096 = vmatprep.subr.bf16.mxu0 %v4095_v53 }
 0xbd4   :  { %v1749_v34 = vpop.f32.mrb[21].mxu1  ;;  %v5221_v6 = vadd.f32 %v1747_v32, %v1663_v5 }
 0xbd5   :  { %v1750_v38 = vadd.f32 %v1749_v34, %v1667_v31 }
 0xbd6   :  { %4098 = vmatpush3.bf16.msra.mxu0 %v4095_v53 }
 0xbd7   :  { %v4111_v39 = vpack.c.bf16 %v1750_v38, %v1744_v36  ;;  %v5215_v41 = vpack.i.bf16 %v1750_v38, %v1744_v36  ;;  %4100 = vmatprep.subr.bf16.mxu0 %v4099_v26 }
 0xbd9   :  { %4113 = vmatprep.subr.msk.bf16.mxu1 %vm4686_vm1, %v4111_v39 }
 0xbda   :  { %4116 = vmatpush3.bf16.xpose.msk.msra.mxu1 %vm4686_vm1, %v4111_v39  ;;  %4102 = vmatpush3.bf16.msra.mxu0 %v4099_v26 }
 0xbdb   :  { %4104 = vmatprep.subr.bf16.mxu0 %v4103_v57 }
 0xbde   :  { %4106 = vmatpush3.bf16.msra.mxu0 %v4103_v57 }
 0xbdf   :  { %4108 = vmatprep.subr.bf16.mxu0 %v4107_v33 }
 0xbe1   :  { %3761 = vmatmul.mubr.msk.f32.vlgmr.msra.gmra.mrb[22].mxu1 %vm289_vm0, %v5221_v6 }
 0xbe2   :  { %4110 = vmatpush3.bf16.msra.mxu0 %v4107_v33 }
 0xbe5   :  { %3754 = vmatmul.mubr.f32.vlgmr.msra.gmra.mrb[14].mxu0 %v5133_v8 }
 0xc98   :  { %v3483_v35 = vpop.f32.mrb[10].mxu0 }
 0xc99   :  { %v3484_v61 = vpop.f32.mrb[11].mxu0 }
 0xc9a   :  { %v3485_v62 = vadd.f32 %v3484_v61, %v3483_v35 }
 0xc9c   :  { %v5280_v59 = vadd.f32 %v3485_v62, %v5277_v60  ;;  %v3486_v63 = vpop.f32.mrb[12].mxu0 }
 0xc9d   :  { %v3487_v0 = vpop.f32.mrb[13].mxu0 }
 0xc9e   :  { %v5282_v1 = vadd.f32 %v3487_v0, %v3486_v63 }
 0xcb4   :  { %v3762_v2 = vpop.f32.mrb[22].mxu1 }
 0xcb5   :  { %v1927_v4 = vmul.f32 0.17677669, %v3762_v2  ;;  %v1917_v11 = vpop.f32.mrb[23].mxu1 }
 0xcb6   :  { %v1926_v12 = vmul.f32 0.17677669, %v1917_v11 }
 0xcb7   :  { %v1929_v16 = vadd.f32 %v5287_v15, %v1927_v4 }
 0xcb8   :  { %v1928_v20 = vadd.f32 %v5293_v18, %v1926_v12  ;;  %v3755_v43 = vpop.f32.mrb[14].mxu0 }
 0xcb9   :  { %v1933_v21 = vsel %vm381_vm2, %v1929_v16, -inf  ;;  %v1818_v45 = vpop.f32.mrb[15].mxu0  ;;  %v1824_v46 = vadd.f32 %v3755_v43, %v1671_v9 }
 0xcba   :  { %1934 = vmax.xlane.f32.xlu1 %v1933_v21  ;;  %v1930_v5 = vsel %vm381_vm2, %v1928_v20, -inf  ;;  %v1819_v47 = vadd.f32 %v1818_v45, %v1671_v9 }
 0xcbb   :  { %1931 = vmax.xlane.f32.xlu0 %v1930_v5 }
 0xcbc   :  { %v4117_v30 = vpack.c.bf16 %v1824_v46, %v1819_v47  ;;  %v5305_v19 = vpack.i.bf16 %v1824_v46, %v1819_v47 }
 0xcbe   :  { %4118 = vmatprep.subr.bf16.mxu1 %v4117_v30 }
 0xcbf   :  { %4120 = vmatpush3.bf16.msra.mxu1 %v4117_v30 }
 0xd47   :  { %v1935_v24 = vpop.xlane.xlu1 %1934 }
 0xd48   :  { %v1937_v27 = vsub.f32 %v1929_v16, %v1935_v24  ;;  %v1932_v31 = vpop.xlane.xlu0 %1931 }
 0xd49   :  { %v1936_v32 = vsub.f32 %v1928_v20, %v1932_v31 }
 0xd4a   :  { %v1940_v34 = vmul.f32 1.442695, %v1937_v27 }
 0xd4b   :  { %v1938_v36 = vmul.f32 1.442695, %v1936_v32 }
 0xd4c   :  { %4359 = vpow2.f32 %v1940_v34 }
 0xd4d   :  { %4361 = vpow2.f32 %v1938_v36 }
 0xd56   :  { %v4360_v38 = vpop.eup %4359 }
 0xd57   :  { %v4362_v39 = vpop.eup %4361  ;;  %v1945_v40 = vsel %vm381_vm2, %v4360_v38, 0.0 }
 0xd58   :  { %1946 = vadd.xlane.f32.xlu1 %v1945_v40  ;;  %v1942_v44 = vsel %vm381_vm2, %v4362_v39, 0.0 }
 0xd59   :  { %1943 = vadd.xlane.f32.xlu0 %v1942_v44 }
 0xd69   :  { %2043 = vrot.lane.b32.xlu1 %v5209_v25, %s4419_s26 }
 0xd6d   :  { %2045 = vrot.lane.b32.xlu1 %v5221_v6, %s4419_s26 }
 0xd6f   :  { %4286 = vrot.lane.b32.xlu0 %v5215_v41, %s4419_s26 }
 0xde5   :  { %v1947_v13 = vpop.xlane.xlu1 %1946 }
 0xde6   :  { %4363 = vrcp.f32 %v1947_v13  ;;  %v1944_v22 = vpop.xlane.xlu0 %1943 }
 0xde7   :  { %4365 = vrcp.f32 %v1944_v22 }
 0xde9   :  { %v2044_v10 = vpop.permute.xlu1 %2043 }
 0xdea   :  { %v4287_v23 = vpop.permute.xlu0 %4286 }
 0xdeb   :  { %v4289_v48 = vunpack.i.h.bf16 %v4287_v23  ;;  %v4288_v37 = vunpack.i.l.bf16 %v4287_v23 }
 0xded   :  { %v4121_v50 = vpack.c.bf16 %v4289_v48, %v4288_v37  ;;  %v2046_v26 = vpop.permute.xlu1 %2045 }
 0xdef   :  { %4123 = vmatprep.subr.msk.bf16.mxu1 %vm4686_vm1, %v4121_v50 }
 0xdf0   :  { %v4364_v51 = vpop.eup %4363 }
 0xdf1   :  { %v4366_v52 = vpop.eup %4365  ;;  %v1951_v54 = vmul.f32 %v4364_v51, %v4360_v38 }
 0xdf2   :  { %v1949_v53 = vmul.f32 %v4366_v52, %v4362_v39 }
 0xdf4   :  { %3767 = vmatprep.mubr.msk.f32.mxu1 %vm381_vm2, %v1949_v53 }
 0xdf5   :  { %3768 = vmatmul.mubr.msk.f32.vlgmr.msra.gmra.mrb[24].mxu1 %vm381_vm2, %v1951_v54 }
 0xdf6   :  { %4126 = vmatpush3.bf16.xpose.msk.msra.mxu1 %vm4686_vm1, %v4121_v50  ;;  %3774 = vmatprep.mubr.msk.f32.mxu1 %vm289_vm0, %v2044_v10 }
 0xdfd   :  { %3775 = vmatmul.mubr.msk.f32.vlgmr.msra.gmra.mrb[26].mxu1 %vm289_vm0, %v2046_v26 }
 0xec8   :  { %v3769_v55 = vpop.f32.mrb[24].mxu1 }
 0xec9   :  { %2034 = vst.msk [vmem:[#allocation3 + $0x8] sm:$0xff] %vm289_vm0, %v3769_v55  ;;  %v2024_v56 = vpop.f32.mrb[25].mxu1 }
 0xeca   :  { %2033 = vst.msk [vmem:[#allocation3] sm:$0xff] %vm289_vm0, %v2024_v56 }
 0xed0   :  { %v3776_v57 = vpop.f32.mrb[26].mxu1 }
 0xed1   :  { %v2137_v58 = vmul.f32 0.17677669, %v3776_v57  ;;  %v2127_v49 = vpop.f32.mrb[27].mxu1 }
 0xed2   :  { %v2136_v33 = vmul.f32 0.17677669, %v2127_v49 }
 0xed3   :  { %v2139_v35 = vadd.f32 %v5287_v15, %v2137_v58 }
 0xed4   :  { %v2138_v61 = vadd.f32 %v5293_v18, %v2136_v33 }
 0xed5   :  { %v2143_v62 = vsel %vm381_vm2, %v2139_v35, -inf }
 0xed6   :  { %2144 = vmax.xlane.f32.xlu0 %v2143_v62  ;;  %v2140_v63 = vsel %vm381_vm2, %v2138_v61, -inf }
 0xed7   :  { %2141 = vmax.xlane.f32.xlu1 %v2140_v63 }
 0xee8   :  { %4291 = vrot.lane.b32.xlu1 %v5305_v19, %s4419_s26 }
 0xeec   :  { %4301 = vrot.lane.b32.xlu1 %v5215_v41, %s4420_s4 }
 0xef0   :  { %2269 = vrot.lane.b32.xlu1 %v5209_v25, %s4418_s1 }
 0xef4   :  { %2271 = vrot.lane.b32.xlu1 %v5221_v6, %s4418_s1 }
 0xef8   :  { %2497 = vrot.lane.b32.xlu1 %v5221_v6, %s4420_s4 }
 0xf63   :  { %v2145_v0 = vpop.xlane.xlu0 %2144 }
 0xf64   :  { %v2147_v2 = vsub.f32 %v2139_v35, %v2145_v0  ;;  %v2142_v4 = vpop.xlane.xlu1 %2141 }
 0xf65   :  { %v2146_v11 = vsub.f32 %v2138_v61, %v2142_v4 }
 0xf66   :  { %v2150_v12 = vmul.f32 1.442695, %v2147_v2 }
 0xf67   :  { %v2148_v16 = vmul.f32 1.442695, %v2146_v11 }
 0xf68   :  { %4367 = vpow2.f32 %v2150_v12  ;;  %v4292_v20 = vpop.permute.xlu1 %4291 }
 0xf69   :  { %v4294_v21 = vunpack.i.h.bf16 %v4292_v20  ;;  %v4293_v5 = vunpack.i.l.bf16 %v4292_v20  ;;  %4369 = vpow2.f32 %v2148_v16 }
 0xf6b   :  { %v4127_v24 = vpack.c.bf16 %v4294_v21, %v4293_v5 }
 0xf6c   :  { %v4302_v9 = vpop.permute.xlu1 %4301 }
 0xf6d   :  { %4128 = vmatprep.subr.bf16.mxu1 %v4127_v24  ;;  %v4304_v46 = vunpack.i.h.bf16 %v4302_v9  ;;  %v4303_v47 = vunpack.i.l.bf16 %v4302_v9 }
 0xf6e   :  { %4130 = vmatpush3.bf16.msra.mxu1 %v4127_v24 }
 0xf70   :  { %v2270_v13 = vpop.permute.xlu1 %2269 }
 0xf72   :  { %v4368_v27 = vpop.eup %4367 }
 0xf73   :  { %v2155_v31 = vsel %vm381_vm2, %v4368_v27, 0.0  ;;  %v4370_v32 = vpop.eup %4369 }
 0xf74   :  { %2156 = vadd.xlane.f32.xlu0 %v2155_v31  ;;  %v2152_v6 = vsel %vm381_vm2, %v4370_v32, 0.0  ;;  %v2272_v22 = vpop.permute.xlu1 %2271 }
 0xf78   :  { %2153 = vadd.xlane.f32.xlu0 %v2152_v6  ;;  %v2498_v48 = vpop.permute.xlu1 %2497 }
 0xf8e   :  { %4296 = vrot.lane.b32.xlu0 %v5215_v41, %s4418_s1 }
 0xf92   :  { %2495 = vrot.lane.b32.xlu0 %v5209_v25, %s4420_s4  ;;  %v4141_v25 = vpack.c.bf16 %v4304_v46, %v4303_v47 }
0x1001   :  { %v2157_v34 = vpop.xlane.xlu0 %2156 }
0x1002   :  { %4371 = vrcp.f32 %v2157_v34 }
0x1005   :  { %v2154_v36 = vpop.xlane.xlu0 %2153 }
0x1006   :  { %4373 = vrcp.f32 %v2154_v36 }
0x1009   :  { %v4297_v38 = vpop.permute.xlu0 %4296 }
0x100a   :  { %v4299_v39 = vunpack.i.h.bf16 %v4297_v38  ;;  %v4298_v40 = vunpack.i.l.bf16 %v4297_v38 }
0x100c   :  { %v4131_v44 = vpack.c.bf16 %v4299_v39, %v4298_v40  ;;  %v4372_v43 = vpop.eup %4371 }
0x100d   :  { %v2161_v30 = vmul.f32 %v4372_v43, %v4368_v27  ;;  %v2496_v23 = vpop.permute.xlu0 %2495 }
0x100e   :  { %4133 = vmatprep.subr.msk.bf16.mxu1 %vm4686_vm1, %v4131_v44 }
0x1010   :  { %v4374_v45 = vpop.eup %4373 }
0x1011   :  { %v2159_v41 = vmul.f32 %v4374_v45, %v4370_v32 }
0x1013   :  { %3781 = vmatprep.mubr.msk.f32.mxu1 %vm381_vm2, %v2159_v41 }
0x1014   :  { %3782 = vmatmul.mubr.msk.f32.vlgmr.msra.gmra.mrb[28].mxu1 %vm381_vm2, %v2161_v30 }
0x1015   :  { %4136 = vmatpush3.bf16.xpose.msk.msra.mxu1 %vm4686_vm1, %v4131_v44  ;;  %3788 = vmatprep.mubr.msk.f32.mxu1 %vm289_vm0, %v2270_v13 }
0x1016   :  { %4143 = vmatprep.subr.msk.bf16.mxu1 %vm4686_vm1, %v4141_v25 }
0x101c   :  { %3789 = vmatmul.mubr.msk.f32.vlgmr.msra.gmra.mrb[30].mxu1 %vm289_vm0, %v2272_v22 }
0x101d   :  { %4146 = vmatpush3.bf16.xpose.msk.msra.mxu1 %vm4686_vm1, %v4141_v25  ;;  %3802 = vmatprep.mubr.msk.f32.mxu1 %vm289_vm0, %v2496_v23 }
0x1024   :  { %3803 = vmatmul.mubr.msk.f32.vlgmr.msra.gmra.mrb[32].mxu1 %vm289_vm0, %v2498_v48 }
0x1025   :  { %2969 = vmatprep.mubr.f32.mxu1 %v4417_v3 }
0x10e7   :  { %v3783_v37 = vpop.f32.mrb[28].mxu1 }
0x10e8   :  { %v2242_v50 = vpop.f32.mrb[29].mxu1 }
0x10ef   :  { %v3790_v51 = vpop.f32.mrb[30].mxu1 }
0x10f0   :  { %v2363_v52 = vmul.f32 0.17677669, %v3790_v51  ;;  %v2353_v53 = vpop.f32.mrb[31].mxu1 }
0x10f1   :  { %v2362_v54 = vmul.f32 0.17677669, %v2353_v53 }
0x10f2   :  { %v2365_v10 = vadd.f32 %v5287_v15, %v2363_v52 }
0x10f3   :  { %v2364_v26 = vadd.f32 %v5293_v18, %v2362_v54 }
0x10f4   :  { %v2369_v28 = vsel %vm381_vm2, %v2365_v10, -inf }
0x10f5   :  { %2370 = vmax.xlane.f32.xlu1 %v2369_v28  ;;  %v2366_v55 = vsel %vm381_vm2, %v2364_v26, -inf  ;;  %v3292_v28 = vld [vmem:[%s5704_s6 + $0x90] sm:$0xff] }
0x10f6   :  { %2367 = vmax.xlane.f32.xlu0 %v2366_v55 }
0x10f7   :  { %v3804_v56 = vpop.f32.mrb[32].mxu1 }
0x10f8   :  { %v2579_v57 = vpop.f32.mrb[33].mxu1  ;;  %v2589_v58 = vmul.f32 0.17677669, %v3804_v56  ;;  %v3293_v56 = vld [vmem:[%s5704_s6 + $0x98] sm:$0xff] }
0x10f9   :  { %v2588_v49 = vmul.f32 0.17677669, %v2579_v57  ;;  %v4155_v57 = vpack.c.bf16 %v3293_v56, %v3292_v28 }
0x10fa   :  { %v2591_v61 = vadd.f32 %v5287_v15, %v2589_v58  ;;  %v3294_v58 = vld [vmem:[%s5704_s6 + $0xa0] sm:$0xff] }
0x10fb   :  { %v2590_v33 = vadd.f32 %v5293_v18, %v2588_v49  ;;  %v3295_v49 = vld [vmem:[%s5704_s6 + $0xa8] sm:$0xff] }
0x10fc   :  { %v2595_v62 = vsel %vm381_vm2, %v2591_v61, -inf }
0x10fd   :  { %v2592_v35 = vsel %vm381_vm2, %v2590_v33, -inf }
0x10fe   :  { %2593 = vmax.xlane.f32.xlu0 %v2592_v35  ;;  %v3296_v35 = vld [vmem:[%s5704_s6 + $0xb0] sm:$0xff] }
0x1102   :  { %2596 = vmax.xlane.f32.xlu0 %v2595_v62 }
0x1182   :  { %v2371_v63 = vpop.xlane.xlu1 %2370 }
0x1183   :  { %v2373_v0 = vsub.f32 %v2365_v10, %v2371_v63  ;;  %v2368_v2 = vpop.xlane.xlu0 %2367  ;;  %v3290_v10 = vld [vmem:[%s5704_s6 + $0x80] sm:$0xff] }
0x1184   :  { %v2372_v4 = vsub.f32 %v2364_v26, %v2368_v2  ;;  %v3291_v26 = vld [vmem:[%s5704_s6 + $0x88] sm:$0xff]  ;;  %v3298_v63 = vld [vmem:[%s5704_s6 + $0xc0] sm:$0xff] }
0x1185   :  { %v2376_v11 = vmul.f32 1.442695, %v2373_v0  ;;  %v4151_v55 = vpack.c.bf16 %v3291_v26, %v3290_v10  ;;  %v3299_v0 = vld [vmem:[%s5704_s6 + $0xc8] sm:$0xff]  ;;  %v3322_v10 = vld [vmem:[%s5706_s10 + $0x150] sm:$0xff] }
0x1186   :  { %v2374_v12 = vmul.f32 1.442695, %v2372_v4  ;;  %v4167_v2 = vpack.c.bf16 %v3299_v0, %v3298_v63  ;;  %v3300_v4 = vld [vmem:[%s5704_s6 + $0xd0] sm:$0xff]  ;;  %v3327_v63 = vld [vmem:[%s5706_s10 + $0x178] sm:$0xff] }
0x1187   :  { %4375 = vpow2.f32 %v2376_v11  ;;  %v3301_v11 = vld [vmem:[%s5704_s6 + $0xd8] sm:$0xff] }
0x1188   :  { %4377 = vpow2.f32 %v2374_v12  ;;  %v4171_v12 = vpack.c.bf16 %v3301_v11, %v3300_v4  ;;  %v3329_v4 = vld [vmem:[%s5706_s10 + $0x188] sm:$0xff]  ;;  %v3331_v11 = vld [vmem:[%s5706_s10 + $0x198] sm:$0xff] }
0x118b   :  { %v2594_v16 = vpop.xlane.xlu0 %2593 }
0x118c   :  { %v2598_v20 = vsub.f32 %v2590_v33, %v2594_v16  ;;  %v4159_v33 = vpack.c.bf16 %v3295_v49, %v3294_v58  ;;  %v3302_v16 = vld [vmem:[%s5704_s6 + $0xe0] sm:$0xff] }
0x118e   :  { %v2600_v21 = vmul.f32 1.442695, %v2598_v20  ;;  %v3303_v20 = vld [vmem:[%s5704_s6 + $0xe8] sm:$0xff] }
0x118f   :  { %v2597_v18 = vpop.xlane.xlu0 %2596 }
0x1190   :  { %4379 = vpow2.f32 %v2600_v21  ;;  %v2599_v5 = vsub.f32 %v2591_v61, %v2597_v18  ;;  %v3297_v61 = vld [vmem:[%s5704_s6 + $0xb8] sm:$0xff]  ;;  %v4175_v21 = vpack.c.bf16 %v3303_v20, %v3302_v16  ;;  %v3304_v18 = vld [vmem:[%s5704_s6 + $0xf0] sm:$0xff]  ;;  %v3328_v16 = vld [vmem:[%s5706_s10 + $0x180] sm:$0xff] }
0x1191   :  { %v4376_v24 = vpop.eup %4375  ;;  %v4163_v62 = vpack.c.bf16 %v3297_v61, %v3296_v35  ;;  %v5493_v61 = vadd.f32 %v5280_v59, %v5036_v29  ;;  %v3326_v29 = vld [vmem:[%s5706_s10 + $0x170] sm:$0xff] }
0x1192   :  { %v4378_v15 = vpop.eup %4377  ;;  %v2602_v27 = vmul.f32 1.442695, %v2599_v5  ;;  %v2381_v31 = vsel %vm381_vm2, %v4376_v24, 0.0  ;;  %v3305_v5 = vld [vmem:[%s5704_s6 + $0xf8] sm:$0xff]  ;;  %v3330_v20 = vld [vmem:[%s5706_s10 + $0x190] sm:$0xff] }
0x1193   :  { %2382 = vadd.xlane.f32.xlu1 %v2381_v31  ;;  %v2378_v32 = vsel %vm381_vm2, %v4378_v15, 0.0 }
0x1194   :  { %4381 = vpow2.f32 %v2602_v27  ;;  %2379 = vadd.xlane.f32.xlu0 %v2378_v32 }
0x119a   :  { %v4380_v6 = vpop.eup %4379 }
0x119b   :  { %v2604_v34 = vsel %vm381_vm2, %v4380_v6, 0.0 }
0x119c   :  { %2605 = vadd.xlane.f32.xlu0 %v2604_v34 }
0x119e   :  { %v4382_v36 = vpop.eup %4381 }
0x119f   :  { %v2607_v38 = vsel %vm381_vm2, %v4382_v36, 0.0 }
0x11a0   :  { %2608 = vadd.xlane.f32.xlu1 %v2607_v38 }
0x11b1   :  { %4311 = vrot.lane.b32.xlu1 %v5305_v19, %s4420_s4 }
0x11b2   :  { %4306 = vrot.lane.b32.xlu0 %v5305_v19, %s4418_s1 }
0x11b5   :  { %2253 = vrot.lane.b32.xlu1 %v2242_v50, %s4420_s4 }
0x11b9   :  { %2255 = vrot.lane.b32.xlu1 %v3783_v37, %s4420_s4 }
0x1220   :  { %v2383_v40 = vpop.xlane.xlu1 %2382 }
0x1221   :  { %v2380_v39 = vpop.xlane.xlu0 %2379 }
0x1222   :  { %4383 = vrcp.f32 %v2380_v39 }
0x1223   :  { %4385 = vrcp.f32 %v2383_v40 }
0x1229   :  { %v2606_v44 = vpop.xlane.xlu0 %2605 }
0x122a   :  { %4387 = vrcp.f32 %v2606_v44  ;;  %v3307_v44 = vld [vmem:[%s5705_s7 + $0x1] ss:$0 sm:$0xff]  ;;  %s3163_s7 = sxor.u32 2147483648, %s5713_s0 }
0x122c   :  { %v4384_v9 = vpop.eup %4383 }
0x122d   :  { %v2609_v43 = vpop.xlane.xlu1 %2608  ;;  %v4307_v45 = vpop.permute.xlu0 %4306  ;;  %v2385_v46 = vmul.f32 %v4384_v9, %v4378_v15 }
0x122e   :  { %4389 = vrcp.f32 %v2609_v43  ;;  %v4309_v47 = vunpack.i.h.bf16 %v4307_v45  ;;  %v4308_v41 = vunpack.i.l.bf16 %v4307_v45  ;;  %v4386_v30 = vpop.eup %4385 }
0x122f   :  { %3795 = vmatprep.mubr.msk.f32.mxu0 %vm381_vm2, %v2385_v46  ;;  %v2387_v48 = vmul.f32 %v4386_v30, %v4376_v24  ;;  %v4179_v24 = vpack.c.bf16 %v3305_v5, %v3304_v18  ;;  %v3333_v18 = vld [vmem:[%s5706_s10 + $0x1a8] sm:$0xff]  ;;  %v3335_v5 = vld [vmem:[%s5706_s10 + $0x1b8] sm:$0xff] }
0x1230   :  { %v4137_v19 = vpack.c.bf16 %v4309_v47, %v4308_v41  ;;  %v1563_v47 = vadd.f32 %v5282_v1, %v5277_v60  ;;  %v3317_v60 = vld [vmem:[%s5706_s10 + $0x128] sm:$0xff]  ;;  %v3319_v1 = vld [vmem:[%s5706_s10 + $0x138] sm:$0xff] }
0x1231   :  { %v4312_v25 = vpop.permute.xlu1 %4311 }
0x1232   :  { %v4314_v13 = vunpack.i.h.bf16 %v4312_v25  ;;  %v4313_v22 = vunpack.i.l.bf16 %v4312_v25  ;;  %4138 = vmatprep.subr.bf16.mxu0 %v4137_v19  ;;  %v5444_v30 = vadd.f32 %v1563_v47, %v5053_v42  ;;  %v3313_v25 = vld [vmem:[%s5706_s10 + $0x108] sm:$0xff]  ;;  %v3314_v42 = vld [vmem:[%s5706_s10 + $0x110] sm:$0xff]  ;;  %v3361_v47 = vld [vmem:[%s5707_s12 + $0x180] sm:$0xff] }
0x1233   :  { %4140 = vmatpush3.bf16.msra.mxu0 %v4137_v19 }
0x1234   :  { %v4388_v23 = vpop.eup %4387  ;;  %v4147_v37 = vpack.c.bf16 %v4314_v13, %v4313_v22  ;;  %v3315_v13 = vld [vmem:[%s5706_s10 + $0x118] sm:$0xff] }
0x1235   :  { %v2254_v50 = vpop.permute.xlu1 %2253  ;;  %v2611_v51 = vmul.f32 %v4388_v23, %v4380_v6  ;;  %v4187_v23 = vpack.c.bf16 %v3319_v1, %v3317_v60  ;;  %v3347_v1 = vld [vmem:[%s5707_s12 + $0x110] sm:$0xff] }
0x1236   :  { %2259 = vst.msk [vmem:[#allocation3] sm:$0xff] %vm711_vm3, %v2254_v50  ;;  %3796 = vmatmul.mubr.msk.f32.vlgmr.msra.gmra.mrb[16].mxu0 %vm381_vm2, %v2387_v48  ;;  %4148 = vmatprep.subr.bf16.mxu0 %v4147_v37  ;;  %v3316_v48 = vld [vmem:[%s5706_s10 + $0x120] sm:$0xff]  ;;  %v3321_v50 = vld [vmem:[%s5706_s10 + $0x148] sm:$0xff] }
0x1237   :  { %4150 = vmatpush3.bf16.msra.mxu0 %v4147_v37  ;;  %3809 = vmatprep.mubr.msk.f32.mxu0 %vm381_vm2, %v2611_v51  ;;  %v3318_v37 = vld [vmem:[%s5706_s10 + $0x130] sm:$0xff]  ;;  %v3323_v51 = vld [vmem:[%s5706_s10 + $0x158] sm:$0xff] }
0x1238   :  { %v4390_v52 = vpop.eup %4389  ;;  %4152 = vmatprep.subr.bf16.mxu0 %v4151_v55 }
0x1239   :  { %v2613_v53 = vmul.f32 %v4390_v52, %v4382_v36  ;;  %v2256_v54 = vpop.permute.xlu1 %2255  ;;  %v4189_v52 = vpack.c.bf16 %v3318_v37, %v3316_v48  ;;  %v3366_v48 = vld [vmem:[%s5707_s12 + $0x1a8] sm:$0xff] }
0x123a   :  { %2260 = vst.msk [vmem:[#allocation3 + $0x8] sm:$0xff] %vm711_vm3, %v2256_v54  ;;  %v3320_v54 = vld [vmem:[%s5706_s10 + $0x140] sm:$0xff] }
0x123b   :  { %3810 = vmatmul.mubr.msk.f32.vlgmr.msra.gmra.mrb[18].mxu0 %vm381_vm2, %v2613_v53  ;;  %v4191_v53 = vpack.c.bf16 %v3323_v51, %v3321_v50  ;;  %v4193_v26 = vpack.c.bf16 %v3322_v10, %v3320_v54  ;;  %v3349_v51 = vld [vmem:[%s5707_s12 + $0x120] sm:$0xff] }
0x123c   :  { %4154 = vmatpush3.bf16.msra.mxu0 %v4151_v55 }
0x123d   :  { %4156 = vmatprep.subr.bf16.mxu0 %v4155_v57 }
0x1240   :  { %4158 = vmatpush3.bf16.msra.mxu0 %v4155_v57 }
0x1241   :  { %4160 = vmatprep.subr.bf16.mxu0 %v4159_v33 }
0x1244   :  { %4162 = vmatpush3.bf16.msra.mxu0 %v4159_v33 }
0x1245   :  { %4164 = vmatprep.subr.bf16.mxu0 %v4163_v62 }
0x1248   :  { %4166 = vmatpush3.bf16.msra.mxu0 %v4163_v62  ;;  %v3325_v62 = vld [vmem:[%s5706_s10 + $0x168] sm:$0xff] }
0x1249   :  { %4168 = vmatprep.subr.bf16.mxu0 %v4167_v2  ;;  %v4195_v0 = vpack.c.bf16 %v3327_v63, %v3325_v62  ;;  %v3311_v62 = vld [vmem:[%s5709_s9 + $0x1] ss:$0 sm:$0xff] }
0x124c   :  { %4170 = vmatpush3.bf16.msra.mxu0 %v4167_v2  ;;  %v3324_v2 = vld [vmem:[%s5706_s10 + $0x160] sm:$0xff] }
0x124d   :  { %4172 = vmatprep.subr.bf16.mxu0 %v4171_v12  ;;  %v4197_v59 = vpack.c.bf16 %v3326_v29, %v3324_v2 }
0x1250   :  { %4174 = vmatpush3.bf16.msra.mxu0 %v4171_v12  ;;  %v4199_v12 = vpack.c.bf16 %v3331_v11, %v3329_v4  ;;  %v3368_v11 = vld [vmem:[%s5707_s12 + $0x1b8] sm:$0xff] }
0x1251   :  { %4176 = vmatprep.subr.bf16.mxu0 %v4175_v21 }
0x1254   :  { %4178 = vmatpush3.bf16.msra.mxu0 %v4175_v21  ;;  %v4201_v21 = vpack.c.bf16 %v3330_v20, %v3328_v16  ;;  %v3369_v20 = vld [vmem:[%s5707_s12 + $0x1c0] sm:$0xff] }
0x1255   :  { %4180 = vmatprep.subr.bf16.mxu0 %v4179_v24 }
0x1258   :  { %4182 = vmatpush3.bf16.msra.mxu0 %v4179_v24  ;;  %v4203_v24 = vpack.c.bf16 %v3335_v5, %v3333_v18  ;;  %v3353_v5 = vld [vmem:[%s5707_s12 + $0x140] sm:$0xff] }
0x1309   :  { %v3797_v15 = vpop.f32.mrb[16].mxu0 }
0x130a   :  { %2481 = vrot.lane.b32.xlu1 %v3797_v15, %s4418_s1  ;;  %v2468_v27 = vpop.f32.mrb[17].mxu0  ;;  %v3332_v15 = vld [vmem:[%s5706_s10 + $0x1a0] sm:$0xff] }
0x130b   :  { %2479 = vrot.lane.b32.xlu0 %v2468_v27, %s4418_s1  ;;  %v3334_v27 = vld [vmem:[%s5706_s10 + $0x1b0] sm:$0xff] }
0x130e   :  { %v3811_v31 = vpop.f32.mrb[18].mxu0 }
0x130f   :  { %2707 = vrot.lane.b32.xlu1 %v3811_v31, %s4419_s26  ;;  %v2694_v32 = vpop.f32.mrb[19].mxu0  ;;  %v4205_v31 = vpack.c.bf16 %v3334_v27, %v3332_v15  ;;  %v3371_v27 = vld [vmem:[%s5707_s12 + $0x1d0] sm:$0xff] }
0x1310   :  { %2705 = vrot.lane.b32.xlu0 %v2694_v32, %s4419_s26  ;;  %v3337_v32 = vld [vmem:[%s5706_s10 + $0x1c8] sm:$0xff] }
0x137c   :  { %v2482_v6 = vpop.permute.xlu1 %2481 }
0x137d   :  { %2486 = vst.msk [vmem:[#allocation3 + $0x8] sm:$0xff] %vm938_vm4, %v2482_v6  ;;  %v2480_v34 = vpop.permute.xlu0 %2479  ;;  %v3339_v6 = vld [vmem:[%s5706_s10 + $0x1d8] sm:$0xff] }
0x137e   :  { %2485 = vst.msk [vmem:[#allocation3] sm:$0xff] %vm938_vm4, %v2480_v34  ;;  %v3336_v34 = vld [vmem:[%s5706_s10 + $0x1c0] sm:$0xff] }
0x1381   :  { %v2708_v36 = vpop.permute.xlu1 %2707 }
0x1382   :  { %2712 = vst.msk [vmem:[#allocation3 + $0x8] sm:$0xff] %vm1165_vm5, %v2708_v36  ;;  %v2706_v38 = vpop.permute.xlu0 %2705  ;;  %v4207_v36 = vpack.c.bf16 %v3339_v6, %v3337_v32  ;;  %v3355_v6 = vld [vmem:[%s5707_s12 + $0x150] sm:$0xff] }
0x1383   :  { %2711 = vst.msk [vmem:[#allocation3] sm:$0xff] %vm1165_vm5, %v2706_v38  ;;  %v3338_v38 = vld [vmem:[%s5706_s10 + $0x1d0] sm:$0xff] }
0x1389   :  { %v2714_v40 = vld [vmem:[#allocation3 + $0x8] sm:$0xff] }
0x138a   :  { %v2713_v39 = vld [vmem:[#allocation3] sm:$0xff] }
0x138b   :  { %3844 = vmatprep.mubr.f32.mxu0 %v2713_v39  ;;  %v3341_v39 = vld [vmem:[%s5706_s10 + $0x1e8] sm:$0xff] }
0x138c   :  { %3845 = vmatmul.mubr.f32.vlgmr.msra.gmra.mrb[20].mxu0 %v2714_v40  ;;  %v3343_v40 = vld [vmem:[%s5706_s10 + $0x1f8] sm:$0xff] }
0x145f   :  { %v3846_v9 = vpop.f32.mrb[20].mxu0 }
0x1460   :  { %v2812_v43 = vadd.f32 %v3846_v9, %v3307_v44  ;;  %v2806_v45 = vpop.f32.mrb[21].mxu0  ;;  %v4211_v9 = vpack.c.bf16 %v3343_v40, %v3341_v39  ;;  %v3374_v39 = vld [vmem:[%s5707_s12 + $0x1e8] sm:$0xff] }
0x1461   :  { %v2807_v46 = vadd.f32 %v3307_v44, %v2806_v45  ;;  %v4209_v44 = vpack.c.bf16 %v3338_v38, %v3336_v34  ;;  %v3342_v45 = vld [vmem:[%s5706_s10 + $0x1f0] sm:$0xff]  ;;  %v3356_v34 = vld [vmem:[%s5707_s12 + $0x158] sm:$0xff]  ;;  %v3373_v38 = vld [vmem:[%s5707_s12 + $0x1e0] sm:$0xff] }
0x1462   :  { %v2816_v41 = vadd.f32 %v2812_v43, %v5133_v8  ;;  %v3312_v8 = vld [vmem:[%s5706_s10 + $0x100] sm:$0xff]  ;;  %v4239_v40 = vpack.c.bf16 %v3374_v39, %v3373_v38 }
0x1463   :  { %v2815_v19 = vadd.f32 %v2807_v46, %v5126_v7  ;;  %v4183_v7 = vpack.c.bf16 %v3315_v13, %v3313_v25  ;;  %v4185_v22 = vpack.c.bf16 %v3314_v42, %v3312_v8  ;;  %v3340_v43 = vld [vmem:[%s5706_s10 + $0x1e0] sm:$0xff]  ;;  %v3346_v13 = vld [vmem:[%s5707_s12 + $0x108] sm:$0xff]  ;;  %v3363_v8 = vld [vmem:[%s5707_s12 + $0x190] sm:$0xff] }
0x1464   :  { %2823 = vadd.xlane.f32.xlu1 %v2816_v41  ;;  %v4213_v46 = vpack.c.bf16 %v3342_v45, %v3340_v43  ;;  %v3375_v45 = vld [vmem:[%s5707_s12 + $0x1f0] sm:$0xff] }
0x1465   :  { %2821 = vadd.xlane.f32.xlu0 %v2815_v19  ;;  %4184 = vmatprep.subr.bf16.mxu1 %v4183_v7  ;;  %v3364_v7 = vld [vmem:[%s5707_s12 + $0x198] sm:$0xff] }
0x1466   :  { %4186 = vmatpush1.bf16.msra.mxu1 %v4185_v22  ;;  %v4219_v60 = vpack.c.bf16 %v3364_v7, %v3363_v8  ;;  %v3348_v22 = vld [vmem:[%s5707_s12 + $0x118] sm:$0xff] }
0x1467   :  { %4188 = vmatprep.subr.bf16.mxu1 %v4187_v23  ;;  %v3365_v23 = vld [vmem:[%s5707_s12 + $0x1a0] sm:$0xff]  ;;  %v4221_v37 = vpack.c.bf16 %v3348_v22, %v3347_v1 }
0x1468   :  { %1572 = vadd.xlane.f32.xlu1 %v5444_v30  ;;  %v4223_v50 = vpack.c.bf16 %v3366_v48, %v3365_v23 }
0x146a   :  { %4190 = vmatpush1.bf16.msra.mxu1 %v4189_v52  ;;  %v3350_v52 = vld [vmem:[%s5707_s12 + $0x128] sm:$0xff] }
0x146b   :  { %4192 = vmatprep.subr.bf16.mxu1 %v4191_v53  ;;  %v4225_v53 = vpack.c.bf16 %v3350_v52, %v3349_v51 }
0x146e   :  { %4194 = vmatpush1.bf16.msra.mxu1 %v4193_v26 }
0x146f   :  { %4196 = vmatprep.subr.bf16.mxu1 %v4195_v0 }
0x1472   :  { %4198 = vmatpush1.bf16.msra.mxu1 %v4197_v59 }
0x1473   :  { %4200 = vmatprep.subr.bf16.mxu1 %v4199_v12 }
0x1476   :  { %4202 = vmatpush1.bf16.msra.mxu1 %v4201_v21  ;;  %v3370_v21 = vld [vmem:[%s5707_s12 + $0x1c8] sm:$0xff] }
0x1477   :  { %4204 = vmatprep.subr.bf16.mxu1 %v4203_v24  ;;  %v4231_v18 = vpack.c.bf16 %v3370_v21, %v3369_v20  ;;  %v3354_v24 = vld [vmem:[%s5707_s12 + $0x148] sm:$0xff] }
0x1478   :  { %v4233_v15 = vpack.c.bf16 %v3354_v24, %v3353_v5 }
0x147a   :  { %4206 = vmatpush1.bf16.msra.mxu1 %v4205_v31  ;;  %v3372_v31 = vld [vmem:[%s5707_s12 + $0x1d8] sm:$0xff] }
0x147b   :  { %4208 = vmatprep.subr.bf16.mxu1 %v4207_v36  ;;  %v4235_v32 = vpack.c.bf16 %v3372_v31, %v3371_v27  ;;  %v4237_v36 = vpack.c.bf16 %v3356_v34, %v3355_v6 }
0x147e   :  { %4210 = vmatpush1.bf16.msra.mxu1 %v4209_v44  ;;  %v3357_v44 = vld [vmem:[%s5707_s12 + $0x160] sm:$0xff] }
0x147f   :  { %4212 = vmatprep.subr.bf16.mxu1 %v4211_v9  ;;  %v3358_v9 = vld [vmem:[%s5707_s12 + $0x168] sm:$0xff] }
0x1480   :  { %v4241_v43 = vpack.c.bf16 %v3358_v9, %v3357_v44 }
0x1482   :  { %4214 = vmatpush1.bf16.msra.mxu1 %v4213_v46  ;;  %v3376_v46 = vld [vmem:[%s5707_s12 + $0x1f8] sm:$0xff] }
0x14f1   :  { %v2824_v28 = vpop.xlane.xlu1 %2823 }
0x14f2   :  { %v2822_v55 = vpop.xlane.xlu0 %2821  ;;  %v2826_v56 = vmul.f32 0.0078125, %v2824_v28 }
0x14f3   :  { %v2825_v57 = vmul.f32 0.0078125, %v2822_v55 }
0x14f4   :  { %v5485_v49 = vsub.f32 %v2816_v41, %v2826_v56  ;;  %v3362_v41 = vld [vmem:[%s5707_s12 + $0x188] sm:$0xff] }
0x14f5   :  { %v5483_v58 = vsub.f32 %v2815_v19, %v2825_v57  ;;  %v3345_v19 = vld [vmem:[%s5707_s12 + $0x100] sm:$0xff]  ;;  %v4215_v25 = vpack.c.bf16 %v3362_v41, %v3361_v47  ;;  %v4243_v47 = vpack.c.bf16 %v3376_v46, %v3375_v45  ;;  %v3359_v41 = vld [vmem:[%s5707_s12 + $0x170] sm:$0xff]  ;;  %v1573_v27 = vpop.xlane.xlu1 %1572 }
0x14f6   :  { %v2830_v35 = vmul.f32 %v5485_v49, %v5485_v49  ;;  %v4217_v42 = vpack.c.bf16 %v3346_v13, %v3345_v19  ;;  %v3360_v19 = vld [vmem:[%s5707_s12 + $0x178] sm:$0xff]  ;;  %v3344_v13 = vld [vmem:[%s5711_s11 + $0x2] sm:$0x3]  ;;  %v1575_v34 = vmul.f32 0.0078125, %v1573_v27 }
0x14f7   :  { %v2829_v33 = vmul.f32 %v5483_v58, %v5483_v58  ;;  %4216 = vmatprep.subr.bf16.mxu0 %v4215_v25  ;;  %v4245_v25 = vpack.c.bf16 %v3360_v19, %v3359_v41  ;;  %v2898_v8 = vrot.slane %v3344_v13, %v4669_v14  ;;  %v2902_v7 = vrot.slane %v3344_v13, %v4676_v17 }
0x14f8   :  { %4218 = vmatpush3.bf16.msra.mxu0 %v4217_v42  ;;  %v1577_v44 = vsub.f32 %v5444_v30, %v1575_v34 }
0x14f9   :  { %2831 = vadd.xlane.f32.xlu0 %v2829_v33  ;;  %4220 = vmatprep.subr.bf16.mxu0 %v4219_v60  ;;  %v3310_v33 = vld [vmem:[%s5708_s8 + $0x1] ss:$0 sm:$0xff] }
0x14fa   :  { %v1579_v45 = vmul.f32 %v1577_v44, %v1577_v44 }
0x14fc   :  { %4222 = vmatpush3.bf16.msra.mxu0 %v4221_v37 }
0x14fd   :  { %2833 = vadd.xlane.f32.xlu0 %v2830_v35  ;;  %4224 = vmatprep.subr.bf16.mxu0 %v4223_v50 }
0x1500   :  { %4226 = vmatpush3.bf16.msra.mxu0 %v4225_v53 }
0x1501   :  { %1570 = vadd.xlane.f32.xlu0 %v5493_v61 }
0x1586   :  { %v2832_v54 = vpop.xlane.xlu0 %2831 }
0x1587   :  { %v2835_v10 = vmul.f32 0.0078125, %v2832_v54 }
0x1589   :  { %v2837_v26 = vadd.f32 1e-12, %v2835_v10 }
0x158a   :  { %v2834_v28 = vpop.xlane.xlu0 %2833 }
0x158b   :  { %4391 = vrsqrt.f32 %v2837_v26  ;;  %v2836_v55 = vmul.f32 0.0078125, %v2834_v28 }
0x158d   :  { %v2838_v56 = vadd.f32 1e-12, %v2836_v55 }
0x158e   :  { %v1571_v20 = vpop.xlane.xlu0 %1570 }
0x158f   :  { %4393 = vrsqrt.f32 %v2838_v56  ;;  %v1574_v24 = vmul.f32 0.0078125, %v1571_v20 }
0x1595   :  { %v4392_v57 = vpop.eup %4391 }
0x1596   :  { %v2841_v35 = vmul.f32 %v4392_v57, %v5483_v58  ;;  %v3367_v58 = vld [vmem:[%s5707_s12 + $0x1b0] sm:$0xff] }
0x1597   :  { %v4227_v12 = vpack.c.bf16 %v3368_v11, %v3367_v58  ;;  %v3164_v11 = vstv %s3163_s7 }
0x1598   :  { %v2849_v63 = vmul.f32 %v3310_v33, %v2841_v35 }
0x1599   :  { %v4394_v0 = vpop.eup %4393  ;;  %4228 = vmatprep.subr.bf16.mxu0 %v4227_v12  ;;  %v3165_v12 = vmul.f32 1.442695, %v3164_v11 }
0x159a   :  { %v5599_v2 = vadd.f32 %v3311_v62, %v2849_v63  ;;  %v2842_v29 = vmul.f32 %v4394_v0, %v5485_v49  ;;  %v3351_v49 = vld [vmem:[%s5707_s12 + $0x130] sm:$0xff] }
0x159c   :  { %2970 = vmatmul.mubr.f32.vlgmr.msra.gmra.mrb[34].mxu1 %v5599_v2  ;;  %v2850_v59 = vmul.f32 %v3310_v33, %v2842_v29 }
0x159d   :  { %2975 = vmatprep.mubr.f32.mxu1 %v4417_v3  ;;  %v3352_v3 = vld [vmem:[%s5707_s12 + $0x138] sm:$0xff] }
0x159e   :  { %v5604_v4 = vadd.f32 %v3311_v62, %v2850_v59  ;;  %v4229_v16 = vpack.c.bf16 %v3352_v3, %v3351_v49 }
0x15a0   :  { %2976 = vmatmul.mubr.f32.gmra.mrb[36].mxu1 %v5604_v4  ;;  %4230 = vmatpush3.bf16.msra.mxu0 %v4229_v16 }
0x15a1   :  { %4232 = vmatprep.subr.bf16.mxu0 %v4231_v18  ;;  %v3378_v18 = vld [vmem:[%s5712_s13 + $0x1] ss:$0 sm:$0xff] }
0x15a4   :  { %4234 = vmatpush3.bf16.msra.mxu0 %v4233_v15 }
0x15a5   :  { %4236 = vmatprep.subr.bf16.mxu0 %v4235_v32 }
0x15a8   :  { %4238 = vmatpush3.bf16.msra.mxu0 %v4237_v36  ;;  %v1576_v36 = vsub.f32 %v5493_v61, %v1574_v24 }
0x15a9   :  { %4240 = vmatprep.subr.bf16.mxu0 %v4239_v40 }
0x15aa   :  { %v1578_v9 = vmul.f32 %v1576_v36, %v1576_v36 }
0x15ac   :  { %4242 = vmatpush3.bf16.msra.mxu0 %v4241_v43 }
0x15ad   :  { %4244 = vmatprep.subr.bf16.mxu0 %v4243_v47 }
0x15b0   :  { %4246 = vmatpush3.bf16.msra.mxu0 %v4245_v25 }
0x166f   :  { %v2971_v42 = vpop.f32.mrb[34].mxu1 }
0x1670   :  { %v2972_v60 = vadd.f32 %v2971_v42, %v2898_v8  ;;  %v2973_v1 = vpop.f32.mrb[35].mxu1 }
0x1671   :  { %v2974_v22 = vadd.f32 %v2973_v1, %v2902_v7 }
0x1672   :  { %v2986_v23 = vmul.f32 0.70710677, %v2972_v60  ;;  %v2982_v55 = vmul.f32 0.5, %v2972_v60 }
0x1673   :  { %v2987_v48 = vmul.f32 0.70710677, %v2974_v22  ;;  %v2977_v37 = vpop.f32.mrb[36].mxu1  ;;  %v2983_v17 = vmul.f32 0.5, %v2974_v22 }
0x1674   :  { %4395 = verf.f32 %v2986_v23  ;;  %v2978_v50 = vadd.f32 %v2977_v37, %v2898_v8  ;;  %v2979_v51 = vpop.f32.mrb[37].mxu1 }
0x1675   :  { %4397 = verf.f32 %v2987_v48  ;;  %v2980_v52 = vadd.f32 %v2979_v51, %v2902_v7 }
0x1676   :  { %v2988_v53 = vmul.f32 0.70710677, %v2978_v50  ;;  %v2984_v29 = vmul.f32 0.5, %v2978_v50 }
0x1677   :  { %v2989_v54 = vmul.f32 0.70710677, %v2980_v52  ;;  %v2985_v63 = vmul.f32 0.5, %v2980_v52 }
0x1678   :  { %4399 = verf.f32 %v2988_v53 }
0x1679   :  { %4401 = verf.f32 %v2989_v54  ;;  %v3215_v54 = vld [vmem:[%s5714_s14] ss:$0 sm:$0xff] }
0x167a   :  { %4403 = vpow2.f32 %v3165_v12 }
0x167e   :  { %v4396_v10 = vpop.eup %4395 }
0x167f   :  { %v4398_v14 = vpop.eup %4397  ;;  %v2994_v26 = vadd.f32 1.0, %v4396_v10 }
0x1680   :  { %v2995_v28 = vadd.f32 1.0, %v4398_v14 }
0x1681   :  { %v2998_v35 = vmul.f32 %v2994_v26, %v2982_v55 }
0x1682   :  { %v4400_v56 = vpop.eup %4399  ;;  %v2999_v57 = vmul.f32 %v2995_v28, %v2983_v17  ;;  %v3216_v17 = vld [vmem:[%s5715_s15] ss:$0 sm:$0xff]  ;;  %v3381_v28 = vld [vmem:[%s5714_s14 + $0x1] ss:$0 sm:$0xff] }
0x1683   :  { %v4402_v33 = vpop.eup %4401  ;;  %v2996_v62 = vadd.f32 1.0, %v4400_v56  ;;  %v3382_v56 = vld [vmem:[%s5715_s15 + $0x1] ss:$0 sm:$0xff] }
0x1684   :  { %v2997_v0 = vadd.f32 1.0, %v4402_v33  ;;  %3107 = vmatprep.mubr.f32.mxu0 %v2999_v57  ;;  %v4404_v49 = vpop.eup %4403 }
0x1685   :  { %3108 = vmatmul.mubr.f32.vlgmr.msra.gmra.mrb[22].mxu0 %v2998_v35  ;;  %v3000_v58 = vmul.f32 %v2996_v62, %v2984_v29  ;;  %4247 = vpush %v4404_v49 }
0x1686   :  { %v3001_v59 = vmul.f32 %v2997_v0, %v2985_v63 }
0x1688   :  { %3112 = vmatprep.mubr.f32.mxu0 %v3001_v59 }
0x1689   :  { %3113 = vmatmul.mubr.f32.gmra.mrb[24].mxu0 %v3000_v58 }
0x16b6   :  { %s4248_s17 = spop %4247 }
0x16b7   :  { %s3168_s18 = sadd.f32 1.0, %s4248_s17 }
0x16b9   :  { %v3169_v3 = vstv %s3168_s18 }
0x16ba   :  { %4405 = vrcp.f32 %v3169_v3 }
0x16c4   :  { %v4406_v16 = vpop.eup %4405 }
0x16c5   :  { %4249 = vpush %v4406_v16 }
0x16f6   :  { %s4250_s19 = spop %4249 }
0x16f7   :  { %s3175_s21 = ssub.f32 1.0, %s4250_s19  ;;  %v3172_v63 = vstv %s4250_s19 }
0x16f9   :  { %v3176_v0 = vstv %s3175_s21 }
0x1758   :  { %v3589_v21 = vpop.f32.mrb[22].mxu0 }
0x1759   :  { %v3590_v5 = vpop.f32.mrb[23].mxu0 }
0x175a   :  { %v3591_v15 = vadd.f32 %v3590_v5, %v3589_v21 }
0x175c   :  { %v3110_v31 = vadd.f32 %v3591_v15, %v3378_v18  ;;  %v3592_v32 = vpop.f32.mrb[24].mxu0 }
0x175d   :  { %v3593_v6 = vpop.f32.mrb[25].mxu0 }
0x175e   :  { %v3594_v38 = vadd.f32 %v3593_v6, %v3592_v32  ;;  %v3118_v39 = vadd.f32 %v3110_v31, %v5599_v2 }
0x1760   :  { %v3115_v40 = vadd.f32 %v3594_v38, %v3378_v18  ;;  %3124 = vadd.xlane.f32.xlu0 %v3118_v39 }
0x1762   :  { %v3119_v43 = vadd.f32 %v3115_v40, %v5604_v4 }
0x1764   :  { %1580 = vadd.xlane.f32.xlu0 %v1578_v9  ;;  %3126 = vadd.xlane.f32.xlu1 %v3119_v43 }
0x1768   :  { %1582 = vadd.xlane.f32.xlu1 %v1579_v45 }
0x17ed   :  { %v3125_v46 = vpop.xlane.xlu0 %3124 }
0x17ee   :  { %v3128_v47 = vmul.f32 0.0078125, %v3125_v46 }
0x17f0   :  { %v3130_v41 = vsub.f32 %v3118_v39, %v3128_v47 }
0x17f1   :  { %v3127_v19 = vpop.xlane.xlu1 %3126  ;;  %v1581_v8 = vpop.xlane.xlu0 %1580 }
0x17f2   :  { %v3129_v25 = vmul.f32 0.0078125, %v3127_v19  ;;  %v3132_v61 = vmul.f32 %v3130_v41, %v3130_v41  ;;  %v1584_v7 = vmul.f32 0.0078125, %v1581_v8 }
0x17f4   :  { %v3131_v13 = vsub.f32 %v3119_v43, %v3129_v25  ;;  %3134 = vadd.xlane.f32.xlu0 %v3132_v61  ;;  %v1586_v42 = vadd.f32 1e-12, %v1584_v7 }
0x17f5   :  { %v1583_v30 = vpop.xlane.xlu1 %1582 }
0x17f6   :  { %v3133_v2 = vmul.f32 %v3131_v13, %v3131_v13  ;;  %v1585_v60 = vmul.f32 0.0078125, %v1583_v30  ;;  %4407 = vrsqrt.f32 %v1586_v42 }
0x17f8   :  { %3136 = vadd.xlane.f32.xlu1 %v3133_v2  ;;  %v1587_v4 = vadd.f32 1e-12, %v1585_v60 }
0x17fa   :  { %4409 = vrsqrt.f32 %v1587_v4 }
0x1800   :  { %v4408_v50 = vpop.eup %4407 }
0x1801   :  { %v1590_v52 = vmul.f32 %v4408_v50, %v1576_v36 }
0x1803   :  { %v1598_v14 = vmul.f32 %v3215_v54, %v1590_v52 }
0x1804   :  { %v4410_v53 = vpop.eup %4409 }
0x1805   :  { %v1591_v10 = vmul.f32 %v4410_v53, %v1577_v44  ;;  %v1606_v33 = vadd.f32 %v3216_v17, %v1598_v14 }
0x1807   :  { %v1599_v57 = vmul.f32 %v3215_v54, %v1591_v10  ;;  %v3173_v11 = vmul.f32 %v3172_v63, %v1606_v33 }
0x1809   :  { %v1607_v58 = vadd.f32 %v3216_v17, %v1599_v57 }
0x180b   :  { %v3174_v20 = vmul.f32 %v3172_v63, %v1607_v58 }
0x1881   :  { %v3135_v1 = vpop.xlane.xlu0 %3134 }
0x1882   :  { %v3138_v22 = vmul.f32 0.0078125, %v3135_v1 }
0x1884   :  { %v3140_v23 = vadd.f32 1e-12, %v3138_v22 }
0x1885   :  { %v3137_v48 = vpop.xlane.xlu1 %3136 }
0x1886   :  { %4411 = vrsqrt.f32 %v3140_v23  ;;  %v3139_v37 = vmul.f32 0.0078125, %v3137_v48 }
0x1888   :  { %v3141_v51 = vadd.f32 1e-12, %v3139_v37 }
0x188a   :  { %4413 = vrsqrt.f32 %v3141_v51 }
0x1890   :  { %v4412_v26 = vpop.eup %4411 }
0x1891   :  { %v3144_v55 = vmul.f32 %v4412_v26, %v3130_v41 }
0x1893   :  { %v3152_v35 = vmul.f32 %v3381_v28, %v3144_v55 }
0x1894   :  { %v4414_v62 = vpop.eup %4413 }
0x1895   :  { %v3160_v29 = vadd.f32 %v3382_v56, %v3152_v35  ;;  %v3145_v59 = vmul.f32 %v4414_v62, %v3131_v13 }
0x1897   :  { %v3177_v12 = vmul.f32 %v3176_v0, %v3160_v29  ;;  %v3153_v49 = vmul.f32 %v3381_v28, %v3145_v59 }
0x1899   :  { %v3179_v3 = vadd.f32 %v3177_v12, %v3173_v11  ;;  %v3161_v16 = vadd.f32 %v3382_v56, %v3153_v49 }
0x189b   :  { %3181 = vst [vmem:[%s5716_s16] sm:$0xff] %v3179_v3  ;;  %v3178_v21 = vmul.f32 %v3176_v0, %v3161_v16 }
0x189d   :  { %v3180_v18 = vadd.f32 %v3178_v21, %v3174_v20 }
0x189f   :  { %3182 = vst [vmem:[%s5716_s16 + $0x8] sm:$0xff] %v3180_v18 }

// kernel: surgical_forward.5
= control target key start
LH: loop header
LB: loop body
LE: loop exit
PB: predicated region body
PF: predicated region fallthrough
CT: control target
= control target key end

     0   :  { %s5295_s0 = inlined_call_operand.<no memory space> [shape: f32[1], index: 0, kind: input, shape index: {}]   ;;  %s5296_s1 = inlined_call_operand.vmem [shape: f32[16,128], index: 1, kind: input, shape index: {}]   ;;  %s5297_s2 = inlined_call_operand.vmem [shape: f32[16,128], index: 2, kind: input, shape index: {}]   ;;  %s5298_s3 = inlined_call_operand.vmem [shape: f32[16,16], index: 3, kind: input, shape index: {}]   ;;  %s5299_s4 = inlined_call_operand.hbm [shape: f32[2,128,384], index: 4, kind: input, shape index: {}]   ;;  %s5300_s5 = inlined_call_operand.vmem [shape: f32[2,1,384], index: 5, kind: input, shape index: {}]   ;;  %s5301_s6 = inlined_call_operand.hbm [shape: f32[2,128,128], index: 6, kind: input, shape index: {}]   ;;  %s5302_s7 = inlined_call_operand.vmem [shape: f32[2,1,128], index: 7, kind: input, shape index: {}]   ;;  %s5303_s8 = inlined_call_operand.vmem [shape: f32[2,1,128], index: 8, kind: input, shape index: {}]   ;;  %s5304_s9 = inlined_call_operand.vmem [shape: f32[2,1,128], index: 9, kind: input, shape index: {}]   ;;  %s5305_s10 = inlined_call_operand.vmem [shape: f32[2,128,256], index: 10, kind: input, shape index: {}]   ;;  %s5306_s11 = inlined_call_operand.vmem [shape: f32[2,1,256], index: 11, kind: input, shape index: {}]   ;;  %s5307_s12 = inlined_call_operand.hbm [shape: f32[2,256,128], index: 12, kind: input, shape index: {}]   ;;  %s5308_s13 = inlined_call_operand.vmem [shape: f32[2,1,128], index: 13, kind: input, shape index: {}]   ;;  %s5309_s14 = inlined_call_operand.hbm [shape: f32[2,1,128], index: 14, kind: input, shape index: {}]   ;;  %s5310_s15 = inlined_call_operand.hbm [shape: f32[2,1,128], index: 15, kind: input, shape index: {}]   ;;  %s5311_s16 = inlined_call_operand.vmem [shape: f32[16,128], index: 16, kind: output, shape index: {}]  }
   0x1   :  { %5315 = sst [smem:[#allocation16_spill]] %s5295_s0 }
   0x2   :  { %22 = vsyncpa [#allocation6], 0 }
   0x3   :  { %23 = vsyncpa [#allocation8], 0 }
   0x4   :  { %24 = vsyncpa [#allocation11], 0  ;;  %s4517_s21 = smov [#allocation7]   ;;  %s4401_s25 = scalar_lea.hbm %s5301_s6, 4096 }
   0x5   :  { %s52_s22 = sshll.u32 %s4517_s21, 4  ;;  %p4402_p0 = scmp.ne.s32.totalorder %s5301_s6, %s4401_s25  ;;  %s53_s22 = int_to_ptr.vmem [resolvable:$true] %s52_s22 }
   0x6   :  { %p4405_p1 = scmp.lt.u32.totalorder %s4401_s25, %s5301_s6 }
   0x8   :  { %p4407_p2 = pnand %p4405_p1, %p4402_p0 }
   0xa   :  { %4410 = shalt.err (!%p4407_p2)
}
   0xb   :  { %s4411_s30 = scalar_lea.vmem %s53_s22, 4096  ;;  %p4416_p4 = scmp.lt.s32.totalorder %s53_s22, %s53_s22 }
   0xc   :  { %p4412_p3 = scmp.ne.s32.totalorder %s53_s22, %s4411_s30  ;;  %p4417_p5 = scmp.lt.s32.totalorder %s4411_s30, %s4411_s30 }
   0xe   :  { %p4418_p6 = por %p4417_p5, %p4416_p4 }
  0x10   :  { %p4419_p7 = pnand %p4418_p6, %p4412_p3 }
  0x12   :  { %4422 = shalt.err (!%p4419_p7)
}
  0x13   :  { %s5312_s0 = smov 128   ;;  %s4519_s17 = smov 8  }
  0x14   :  { %58 = dma.hbm_to_vmem [thread:$0]  %s5301_s6, 4096, %s53_s22, [#allocation8], %s5312_s0, %s5312_s0, %s4519_s17  }
  0x15   :  { %s4520_s20 = smov [#allocation10]   ;;  %s4423_s25 = scalar_lea.hbm %s5309_s14, 32 }
  0x16   :  { %s88_s21 = sshll.u32 %s4520_s20, 4  ;;  %p4424_p8 = scmp.ne.s32.totalorder %s5309_s14, %s4423_s25  ;;  %s89_s21 = int_to_ptr.vmem [resolvable:$true] %s88_s21 }
  0x17   :  { %p4427_p9 = scmp.lt.u32.totalorder %s4423_s25, %s5309_s14 }
  0x19   :  { %p4429_p10 = pnand %p4427_p9, %p4424_p8 }
  0x1b   :  { %4432 = shalt.err (!%p4429_p10)
}
  0x1c   :  { %s4433_s30 = scalar_lea.vmem %s89_s21, 32  ;;  %p4438_p12 = scmp.lt.s32.totalorder %s89_s21, %s89_s21 }
  0x1d   :  { %p4434_p11 = scmp.ne.s32.totalorder %s89_s21, %s4433_s30  ;;  %p4439_p13 = scmp.lt.s32.totalorder %s4433_s30, %s4433_s30 }
  0x1f   :  { %p4440_p0 = por %p4439_p13, %p4438_p12 }
  0x21   :  { %p4441_p1 = pnand %p4440_p0, %p4434_p11 }
  0x23   :  { %4444 = shalt.err (!%p4441_p1)
}
  0x24   :  { %s5313_s6 = smov 16   ;;  %s5314_s22 = smov 1  }
  0x25   :  { %94 = dma.hbm_to_vmem [thread:$0]  %s5309_s14, 32, %s89_s21, [#allocation11], %s5313_s6, %s5313_s6, %s5314_s22  }
  0x26   :  { %s4523_s20 = smov [#allocation5]   ;;  %s4445_s26 = scalar_lea.hbm %s5299_s4, 12288 }
  0x27   :  { %s38_s23 = sshll.u32 %s4523_s20, 4  ;;  %p4446_p2 = scmp.ne.s32.totalorder %s5299_s4, %s4445_s26  ;;  %s39_s23 = int_to_ptr.vmem [resolvable:$true] %s38_s23 }
  0x28   :  { %p4449_p3 = scmp.lt.u32.totalorder %s4445_s26, %s5299_s4 }
  0x2a   :  { %p4451_p4 = pnand %p4449_p3, %p4446_p2 }
  0x2c   :  { %4454 = shalt.err (!%p4451_p4)
}
  0x2d   :  { %s4455_s0 = scalar_lea.vmem %s39_s23, 12288  ;;  %p4460_p6 = scmp.lt.s32.totalorder %s39_s23, %s39_s23 }
  0x2e   :  { %p4456_p5 = scmp.ne.s32.totalorder %s39_s23, %s4455_s0  ;;  %p4461_p7 = scmp.lt.s32.totalorder %s4455_s0, %s4455_s0 }
  0x30   :  { %p4462_p8 = por %p4461_p7, %p4460_p6 }
  0x32   :  { %p4463_p9 = pnand %p4462_p8, %p4456_p5 }
  0x34   :  { %4466 = shalt.err (!%p4463_p9)
}
  0x35   :  { %s4524_s14 = smov 384   ;;  %s4525_s21 = smov 24  }
  0x36   :  { %44 = dma.hbm_to_vmem [thread:$0]  %s5299_s4, 12288, %s39_s23, [#allocation6], %s4524_s14, %s4524_s14, %s4525_s21  }
  0x37   :  { %s4526_s20 = smov [#allocation9]   ;;  %s4527_s25 = smov [#allocation12]  }
  0x38   :  { %s74_s24 = sshll.u32 %s4526_s20, 4  ;;  %s100_s26 = sshll.u32 %s4527_s25, 4  ;;  %s75_s24 = int_to_ptr.vmem [resolvable:$true] %s74_s24  ;;  %s101_s26 = int_to_ptr.vmem [resolvable:$true] %s100_s26 }
  0x39   :  { %s4467_s29 = scalar_lea.hbm %s5307_s12, 8192 }
  0x3a   :  { %p4468_p10 = scmp.ne.s32.totalorder %s5307_s12, %s4467_s29  ;;  %p4471_p11 = scmp.lt.u32.totalorder %s4467_s29, %s5307_s12 }
  0x3c   :  { %p4473_p12 = pnand %p4471_p11, %p4468_p10 }
  0x3e   :  { %4476 = shalt.err (!%p4473_p12)
}
  0x3f   :  { %s4477_s4 = scalar_lea.vmem %s75_s24, 8192  ;;  %p4482_p0 = scmp.lt.s32.totalorder %s75_s24, %s75_s24 }
  0x40   :  { %p4478_p13 = scmp.ne.s32.totalorder %s75_s24, %s4477_s4  ;;  %p4483_p1 = scmp.lt.s32.totalorder %s4477_s4, %s4477_s4 }
  0x42   :  { %p4484_p2 = por %p4483_p1, %p4482_p0 }
  0x44   :  { %p4485_p3 = pnand %p4484_p2, %p4478_p13 }
  0x46   :  { %4488 = shalt.err (!%p4485_p3)
}
  0x47   :  { %s5316_s23 = smov 128   ;;  %s4489_s22 = scalar_lea.hbm %s5310_s15, 32 }
  0x48   :  { %80 = dma.hbm_to_vmem [thread:$0]  %s5307_s12, 8192, %s75_s24, [#allocation8], %s5316_s23, %s5316_s23, %s4519_s17  }
  0x49   :  { %p4490_p4 = scmp.ne.s32.totalorder %s5310_s15, %s4489_s22  ;;  %p4493_p5 = scmp.lt.u32.totalorder %s4489_s22, %s5310_s15 }
  0x4b   :  { %p4495_p6 = pnand %p4493_p5, %p4490_p4 }
  0x4d   :  { %4498 = shalt.err (!%p4495_p6)
}
  0x4e   :  { %s4499_s28 = scalar_lea.vmem %s101_s26, 32  ;;  %p4504_p8 = scmp.lt.s32.totalorder %s101_s26, %s101_s26 }
  0x4f   :  { %p4500_p7 = scmp.ne.s32.totalorder %s101_s26, %s4499_s28  ;;  %p4505_p9 = scmp.lt.s32.totalorder %s4499_s28, %s4499_s28 }
  0x51   :  { %p4506_p10 = por %p4505_p9, %p4504_p8 }
  0x53   :  { %p4507_p11 = pnand %p4506_p10, %p4500_p7 }
  0x55   :  { %4510 = shalt.err (!%p4507_p11)
}
  0x56   :  { %s5317_s12 = smov 1   ;;  %s5318_s17 = smov 16  }
  0x57   :  { %106 = dma.hbm_to_vmem [thread:$0]  %s5310_s15, 32, %s101_s26, [#allocation11], %s5318_s17, %s5318_s17, %s5317_s12  }
  0x58   :  { %4511 = dma.done.wait [#allocation6], 12288  }
  0x59   :  { %4512 = vsyncadd [#allocation6], 4294955008 }
  0x5a   :  { %4513 = dma.done.wait [#allocation8], 12288  }
  0x5b   :  { %4514 = vsyncadd [#allocation8], 4294955008 }
  0x5c   :  { %4515 = dma.done.wait [#allocation11], 64  }
  0x5d   :  { %4516 = vsyncadd [#allocation11], 4294967232  ;;  %v4528_v0 = vmov 0.0   ;;  %v129_v1 = vld [vmem:[#allocation5 + $0x8] sm:$0xff]  ;;  %v132_v2 = vld [vmem:[#allocation5 + $0x20] sm:$0xff]  ;;  %vm357_vm0 = vcmask 261120  }
  0x5e   :  { %257 = vmatprep.mubr.f32.mxu0 %v4528_v0  ;;  %v128_v3 = vld [vmem:[#allocation5] sm:$0xff]  ;;  %v3820_v4 = vpack.c.bf16 %v132_v2, %v129_v1  ;;  %v131_v5 = vld [vmem:[#allocation5 + $0x18] sm:$0xff]  ;;  %v138_v7 = vld [vmem:[#allocation5 + $0x50] sm:$0xff]  ;;  %s4530_s14 = smov 96   ;;  %vm449_vm2 = vcmask 130048   ;;  %s4531_s19 = smov 32  }
  0x5f   :  { %v135_v6 = vld [vmem:[#allocation5 + $0x38] sm:$0xff]  ;;  %v3822_v8 = vpack.c.bf16 %v131_v5, %v128_v3  ;;  %v134_v10 = vld [vmem:[#allocation5 + $0x30] sm:$0xff]  ;;  %v137_v11 = vld [vmem:[#allocation5 + $0x48] sm:$0xff]  ;;  %vm779_vm3 = vcmask 523520   ;;  %vm1006_vm4 = vcmask 785920   ;;  %vm1233_vm5 = vcmask 1048320  }
  0x60   :  { %v3824_v9 = vpack.c.bf16 %v138_v7, %v135_v6  ;;  %v141_v12 = vld [vmem:[#allocation5 + $0x68] sm:$0xff]  ;;  %3821 = vmatprep.subr.bf16.mxu0 %v3820_v4  ;;  %v144_v13 = vld [vmem:[#allocation5 + $0x80] sm:$0xff]  ;;  %v3826_v14 = vpack.c.bf16 %v137_v11, %v134_v10  ;;  %v143_v17 = vld [vmem:[#allocation5 + $0x78] sm:$0xff]  ;;  %s5321_s17 = sld [smem:[#allocation16_spill]] }
  0x61   :  { %3823 = vmatpush1.bf16.msra.mxu0 %v3822_v8  ;;  %v3828_v15 = vpack.c.bf16 %v144_v13, %v141_v12  ;;  %v140_v16 = vld [vmem:[#allocation5 + $0x60] sm:$0xff]  ;;  %v147_v18 = vld [vmem:[#allocation5 + $0x98] sm:$0xff]  ;;  %v150_v19 = vld [vmem:[#allocation5 + $0xb0] sm:$0xff]  ;;  %v178_v12 = vlaneseq }
  0x62   :  { %3825 = vmatprep.subr.bf16.mxu0 %v3824_v9  ;;  %v3830_v20 = vpack.c.bf16 %v143_v17, %v140_v16  ;;  %v3832_v21 = vpack.c.bf16 %v150_v19, %v147_v18  ;;  %v146_v22 = vld [vmem:[#allocation5 + $0x90] sm:$0xff]  ;;  %v149_v23 = vld [vmem:[#allocation5 + $0xa8] sm:$0xff]  ;;  %v156_v25 = vld [vmem:[#allocation5 + $0xe0] sm:$0xff] }
  0x63   :  { %v153_v24 = vld [vmem:[#allocation5 + $0xc8] sm:$0xff]  ;;  %v4693_v26 = vld [vmem:[%s5296_s1] sm:$0xff]  ;;  %v3834_v29 = vpack.c.bf16 %v149_v23, %v146_v22  ;;  %v152_v30 = vld [vmem:[#allocation5 + $0xc0] sm:$0xff]  ;;  %v4705_v13 = vshrl.u32 %v178_v12, 7 }
  0x64   :  { %v130_v27 = vld [vmem:[#allocation5 + $0x10] sm:$0xff]  ;;  %v133_v28 = vld [vmem:[#allocation5 + $0x28] sm:$0xff]  ;;  %3600 = vmatprep.mubr.f32.mxu1 %v4693_v26  ;;  %v136_v32 = vld [vmem:[#allocation5 + $0x40] sm:$0xff]  ;;  %v3836_v34 = vpack.c.bf16 %v156_v25, %v153_v24 }
  0x65   :  { %3827 = vmatpush1.bf16.msra.mxu0 %v3826_v14  ;;  %v3852_v31 = vpack.c.bf16 %v133_v28, %v130_v27  ;;  %v139_v33 = vld [vmem:[#allocation5 + $0x58] sm:$0xff]  ;;  %v142_v37 = vld [vmem:[#allocation5 + $0x70] sm:$0xff]  ;;  %v145_v38 = vld [vmem:[#allocation5 + $0x88] sm:$0xff]  ;;  %v4708_v14 = vsub.s32 0, %v4705_v13  ;;  %v4715_v17 = vsub.s32 1, %v4705_v13  ;;  %v188_v22 = vsub.s32 2, %v4705_v13 }
  0x66   :  { %3829 = vmatprep.subr.bf16.mxu0 %v3828_v15  ;;  %v155_v35 = vld [vmem:[#allocation5 + $0xd8] sm:$0xff]  ;;  %v3856_v36 = vpack.c.bf16 %v139_v33, %v136_v32  ;;  %v162_v40 = vld [vmem:[#allocation5 + $0x110] sm:$0xff]  ;;  %v3860_v43 = vpack.c.bf16 %v145_v38, %v142_v37  ;;  %v161_v45 = vld [vmem:[#allocation5 + $0x108] sm:$0xff]  ;;  %s3231_s24 = sxor.u32 2147483648, %s5321_s17 }
  0x67   :  { %v159_v39 = vld [vmem:[#allocation5 + $0xf8] sm:$0xff]  ;;  %3853 = vmatprep.subr.bf16.mxu1 %v3852_v31  ;;  %v3838_v41 = vpack.c.bf16 %v155_v35, %v152_v30  ;;  %v158_v42 = vld [vmem:[#allocation5 + $0xf0] sm:$0xff]  ;;  %v148_v46 = vld [vmem:[#allocation5 + $0xa0] sm:$0xff] }
  0x68   :  { %3855 = vmatpush3.bf16.msra.mxu1 %v3852_v31  ;;  %v3840_v44 = vpack.c.bf16 %v162_v40, %v159_v39  ;;  %v151_v47 = vld [vmem:[#allocation5 + $0xb8] sm:$0xff]  ;;  %v165_v48 = vld [vmem:[#allocation5 + $0x128] sm:$0xff]  ;;  %v168_v49 = vld [vmem:[#allocation5 + $0x140] sm:$0xff]  ;;  %v3842_v50 = vpack.c.bf16 %v161_v45, %v158_v42 }
  0x69   :  { %3831 = vmatpush1.bf16.msra.mxu0 %v3830_v20  ;;  %3857 = vmatprep.subr.bf16.mxu1 %v3856_v36  ;;  %v164_v51 = vld [vmem:[#allocation5 + $0x120] sm:$0xff]  ;;  %v3864_v52 = vpack.c.bf16 %v151_v47, %v148_v46  ;;  %v3844_v53 = vpack.c.bf16 %v168_v49, %v165_v48  ;;  %v167_v54 = vld [vmem:[#allocation5 + $0x138] sm:$0xff]  ;;  %v154_v55 = vld [vmem:[#allocation5 + $0xd0] sm:$0xff] }
  0x6a   :  { %3833 = vmatprep.subr.bf16.mxu0 %v3832_v21  ;;  %v157_v56 = vld [vmem:[#allocation5 + $0xe8] sm:$0xff]  ;;  %v171_v57 = vld [vmem:[#allocation5 + $0x158] sm:$0xff]  ;;  %v174_v58 = vld [vmem:[#allocation5 + $0x170] sm:$0xff]  ;;  %v3846_v59 = vpack.c.bf16 %v167_v54, %v164_v51 }
  0x6b   :  { %v170_v60 = vld [vmem:[#allocation5 + $0x150] sm:$0xff]  ;;  %v3868_v61 = vpack.c.bf16 %v157_v56, %v154_v55  ;;  %v3848_v62 = vpack.c.bf16 %v174_v58, %v171_v57  ;;  %v173_v63 = vld [vmem:[#allocation5 + $0x168] sm:$0xff]  ;;  %v160_v1 = vld [vmem:[#allocation5 + $0x100] sm:$0xff] }
  0x6c   :  { %3859 = vmatpush3.bf16.msra.mxu1 %v3856_v36  ;;  %v163_v2 = vld [vmem:[#allocation5 + $0x118] sm:$0xff]  ;;  %v3850_v3 = vpack.c.bf16 %v173_v63, %v170_v60  ;;  %v166_v5 = vld [vmem:[#allocation5 + $0x130] sm:$0xff]  ;;  %v169_v6 = vld [vmem:[#allocation5 + $0x148] sm:$0xff] }
  0x6d   :  { %3835 = vmatpush1.bf16.msra.mxu0 %v3834_v29  ;;  %3861 = vmatprep.subr.bf16.mxu1 %v3860_v43  ;;  %v3872_v4 = vpack.c.bf16 %v163_v2, %v160_v1  ;;  %v3876_v7 = vpack.c.bf16 %v169_v6, %v166_v5  ;;  %v172_v8 = vld [vmem:[#allocation5 + $0x160] sm:$0xff]  ;;  %v175_v9 = vld [vmem:[#allocation5 + $0x178] sm:$0xff]  ;;  %v176_v15 = vld [vmem:[%s5300_s5] sm:$0x7] }
  0x6e   :  { %3837 = vmatprep.subr.bf16.mxu0 %v3836_v34  ;;  %v4701_v10 = vld [vmem:[%s5296_s1 + $0x8] sm:$0xff]  ;;  %v3880_v11 = vpack.c.bf16 %v175_v9, %v172_v8  ;;  %v181_v16 = vrot.slane %v176_v15, %v4708_v14  ;;  %v185_v21 = vrot.slane %v176_v15, %v4715_v17  ;;  %vm4725_vm1 = vmpackc.low %vm357_vm0, %vm357_vm0  ;;  %v189_v29 = vrot.slane %v176_v15, %v188_v22  ;;  %s4529_s1 = smov 64   ;;  %v4754_v40 = vld [vmem:[%s5298_s3] sm:$0xff] }
  0x70   :  { %3863 = vmatpush3.bf16.msra.mxu1 %v3860_v43  ;;  %v4759_v43 = vld [vmem:[%s5298_s3 + $0x8] sm:$0xff] }
  0x71   :  { %3839 = vmatpush1.bf16.msra.mxu0 %v3838_v41  ;;  %3865 = vmatprep.subr.bf16.mxu1 %v3864_v52 }
  0x72   :  { %3841 = vmatprep.subr.bf16.mxu0 %v3840_v44 }
  0x74   :  { %3867 = vmatpush3.bf16.msra.mxu1 %v3864_v52 }
  0x75   :  { %3843 = vmatpush1.bf16.msra.mxu0 %v3842_v50  ;;  %3869 = vmatprep.subr.bf16.mxu1 %v3868_v61 }
  0x76   :  { %3845 = vmatprep.subr.bf16.mxu0 %v3844_v53 }
  0x78   :  { %3871 = vmatpush3.bf16.msra.mxu1 %v3868_v61 }
  0x79   :  { %3847 = vmatpush1.bf16.msra.mxu0 %v3846_v59  ;;  %3873 = vmatprep.subr.bf16.mxu1 %v3872_v4 }
  0x7a   :  { %3849 = vmatprep.subr.bf16.mxu0 %v3848_v62 }
  0x7c   :  { %3875 = vmatpush3.bf16.msra.mxu1 %v3872_v4 }
  0x7d   :  { %3851 = vmatpush1.bf16.msra.mxu0 %v3850_v3  ;;  %3877 = vmatprep.subr.bf16.mxu1 %v3876_v7 }
  0x80   :  { %258 = vmatmul.mubr.f32.vlgmr.msra.gmra.mrb[0].mxu0 %v4693_v26  ;;  %3879 = vmatpush3.bf16.msra.mxu1 %v3876_v7 }
  0x81   :  { %263 = vmatprep.mubr.f32.mxu0 %v4528_v0  ;;  %3881 = vmatprep.subr.bf16.mxu1 %v3880_v11 }
  0x84   :  { %264 = vmatmul.mubr.f32.gmra.mrb[2].mxu0 %v4701_v10  ;;  %3883 = vmatpush3.bf16.msra.mxu1 %v3880_v11 }
  0x87   :  { %3601 = vmatmul.mubr.f32.vlgmr.msra.gmra.mrb[0].mxu1 %v4701_v10 }
 0x153   :  { %v259_v18 = vpop.f32.mrb[0].mxu0 }
 0x154   :  { %v4717_v19 = vadd.f32 %v259_v18, %v181_v16  ;;  %v261_v20 = vpop.f32.mrb[1].mxu0 }
 0x155   :  { %v262_v25 = vadd.f32 %v261_v20, %v185_v21 }
 0x156   :  { %3607 = vmatprep.mubr.msk.f32.mxu1 %vm357_vm0, %v4717_v19 }
 0x157   :  { %v265_v23 = vpop.f32.mrb[2].mxu0 }
 0x158   :  { %v267_v24 = vpop.f32.mrb[3].mxu0  ;;  %v4747_v37 = vadd.f32 %v265_v23, %v181_v16 }
 0x159   :  { %v268_v27 = vadd.f32 %v267_v24, %v185_v21 }
 0x15a   :  { %v3602_v32 = vpop.f32.mrb[0].mxu1 }
 0x15b   :  { %v4731_v30 = vpack.i.bf16 %v268_v27, %v262_v25  ;;  %v3884_v31 = vpack.c.bf16 %v268_v27, %v262_v25  ;;  %v4739_v33 = vadd.f32 %v3602_v32, %v189_v29  ;;  %v336_v34 = vpop.f32.mrb[1].mxu1 }
 0x15c   :  { %v4741_v35 = vadd.f32 %v336_v34, %v189_v29 }
 0x15d   :  { %4245 = vrot.lane.b32.xlu1 %v4731_v30, %s4529_s1  ;;  %3886 = vmatprep.subr.msk.bf16.mxu1 %vm4725_vm1, %v3884_v31 }
 0x15e   :  { %3889 = vmatpush3.bf16.xpose.msk.msra.mxu1 %vm4725_vm1, %v3884_v31  ;;  %v3890_v36 = vpack.c.bf16 %v4739_v33, %v4741_v35 }
 0x160   :  { %3891 = vmatprep.subr.bf16.mxu1 %v3890_v36 }
 0x161   :  { %563 = vrot.lane.b32.xlu1 %v4717_v19, %s4530_s14 }
 0x165   :  { %3608 = vmatmul.mubr.msk.f32.vlgmr.msra.gmra.mrb[2].mxu1 %vm357_vm0, %v4747_v37 }
 0x166   :  { %3893 = vmatpush3.bf16.msra.mxu1 %v3890_v36 }
 0x1cf   :  { %v4246_v62 = vpop.permute.xlu1 %4245 }
 0x1d0   :  { %v4248_v5 = vunpack.i.h.bf16 %v4246_v62  ;;  %v4247_v6 = vunpack.i.l.bf16 %v4246_v62 }
 0x1d2   :  { %v3904_v9 = vpack.c.bf16 %v4248_v5, %v4247_v6 }
 0x1d3   :  { %v564_v63 = vpop.permute.xlu1 %563 }
 0x238   :  { %v3609_v38 = vpop.f32.mrb[2].mxu1 }
 0x239   :  { %v436_v39 = vpop.f32.mrb[3].mxu1  ;;  %v446_v41 = vmul.f32 0.17677669, %v3609_v38 }
 0x23a   :  { %v445_v42 = vmul.f32 0.17677669, %v436_v39 }
 0x23b   :  { %v448_v46 = vadd.f32 %v446_v41, %v4759_v43 }
 0x23c   :  { %v447_v44 = vadd.f32 %v445_v42, %v4754_v40 }
 0x23d   :  { %v453_v47 = vsel %vm449_vm2, %v448_v46, -inf }
 0x23e   :  { %v450_v45 = vsel %vm449_vm2, %v447_v44, -inf }
 0x23f   :  { %451 = vmax.xlane.f32.xlu0 %v450_v45 }
 0x243   :  { %454 = vmax.xlane.f32.xlu0 %v453_v47 }
 0x259   :  { %4240 = vrot.lane.b32.xlu0 %v4731_v30, %s4530_s14 }
 0x25d   :  { %790 = vrot.lane.b32.xlu0 %v4717_v19, %s4529_s1 }
 0x2cc   :  { %v452_v48 = vpop.xlane.xlu0 %451 }
 0x2cd   :  { %v456_v49 = vsub.f32 %v447_v44, %v452_v48 }
 0x2cf   :  { %v458_v52 = vmul.f32 1.442695, %v456_v49  ;;  %v4807_v49 = vpack.i.bf16 %v4739_v33, %v4741_v35 }
 0x2d0   :  { %v455_v50 = vpop.xlane.xlu0 %454 }
 0x2d1   :  { %v457_v51 = vsub.f32 %v448_v46, %v455_v50 }
 0x2d3   :  { %v460_v53 = vmul.f32 1.442695, %v457_v51 }
 0x2d4   :  { %v4241_v54 = vpop.permute.xlu0 %4240 }
 0x2d5   :  { %4299 = vpow2.f32 %v460_v53  ;;  %v4243_v55 = vunpack.i.h.bf16 %v4241_v54  ;;  %v4242_v56 = vunpack.i.l.bf16 %v4241_v54 }
 0x2d6   :  { %4301 = vpow2.f32 %v458_v52 }
 0x2d7   :  { %v3894_v57 = vpack.c.bf16 %v4243_v55, %v4242_v56 }
 0x2d8   :  { %v791_v12 = vpop.permute.xlu0 %790 }
 0x2d9   :  { %3896 = vmatprep.subr.msk.bf16.mxu1 %vm4725_vm1, %v3894_v57 }
 0x2df   :  { %v4300_v58 = vpop.eup %4299 }
 0x2e0   :  { %v465_v59 = vsel %vm449_vm2, %v4300_v58, 0.0  ;;  %v4302_v60 = vpop.eup %4301 }
 0x2e1   :  { %466 = vadd.xlane.f32.xlu1 %v465_v59  ;;  %v462_v61 = vsel %vm449_vm2, %v4302_v60, 0.0 }
 0x2e5   :  { %463 = vadd.xlane.f32.xlu1 %v462_v61 }
 0x2f6   :  { %565 = vrot.lane.b32.xlu1 %v4747_v37, %s4530_s14 }
 0x2fa   :  { %792 = vrot.lane.b32.xlu1 %v4747_v37, %s4529_s1 }
 0x36e   :  { %v467_v1 = vpop.xlane.xlu1 %466 }
 0x36f   :  { %4303 = vrcp.f32 %v467_v1 }
 0x372   :  { %v464_v2 = vpop.xlane.xlu1 %463 }
 0x373   :  { %4305 = vrcp.f32 %v464_v2 }
 0x376   :  { %v566_v11 = vpop.permute.xlu1 %565 }
 0x379   :  { %v4304_v3 = vpop.eup %4303 }
 0x37a   :  { %v471_v8 = vmul.f32 %v4304_v3, %v4300_v58  ;;  %v793_v15 = vpop.permute.xlu1 %792 }
 0x37d   :  { %v4306_v4 = vpop.eup %4305 }
 0x37e   :  { %v469_v7 = vmul.f32 %v4306_v4, %v4302_v60 }
 0x380   :  { %3614 = vmatprep.mubr.msk.f32.mxu1 %vm449_vm2, %v469_v7 }
 0x381   :  { %3615 = vmatmul.mubr.msk.f32.vlgmr.msra.gmra.mrb[4].mxu1 %vm449_vm2, %v471_v8 }
 0x382   :  { %3899 = vmatpush3.bf16.xpose.msk.msra.mxu1 %vm4725_vm1, %v3894_v57  ;;  %3621 = vmatprep.mubr.msk.f32.mxu1 %vm357_vm0, %v564_v63 }
 0x383   :  { %3906 = vmatprep.subr.msk.bf16.mxu1 %vm4725_vm1, %v3904_v9 }
 0x389   :  { %3622 = vmatmul.mubr.msk.f32.vlgmr.msra.gmra.mrb[6].mxu1 %vm357_vm0, %v566_v11 }
 0x38a   :  { %3909 = vmatpush3.bf16.xpose.msk.msra.mxu1 %vm4725_vm1, %v3904_v9  ;;  %3635 = vmatprep.mubr.msk.f32.mxu1 %vm357_vm0, %v791_v12 }
 0x391   :  { %3636 = vmatmul.mubr.msk.f32.vlgmr.msra.gmra.mrb[8].mxu1 %vm357_vm0, %v793_v15 }
 0x454   :  { %v3616_v16 = vpop.f32.mrb[4].mxu1 }
 0x455   :  { %554 = vst.msk [vmem:[#allocation3 + $0x8] sm:$0xff] %vm357_vm0, %v3616_v16  ;;  %v544_v18 = vpop.f32.mrb[5].mxu1 }
 0x456   :  { %553 = vst.msk [vmem:[#allocation3] sm:$0xff] %vm357_vm0, %v544_v18 }
 0x45c   :  { %v3623_v20 = vpop.f32.mrb[6].mxu1 }
 0x45d   :  { %v647_v21 = vpop.f32.mrb[7].mxu1  ;;  %v657_v36 = vmul.f32 0.17677669, %v3623_v20 }
 0x45e   :  { %v656_v56 = vmul.f32 0.17677669, %v647_v21 }
 0x45f   :  { %v659_v38 = vadd.f32 %v657_v36, %v4759_v43 }
 0x460   :  { %v658_v57 = vadd.f32 %v656_v56, %v4754_v40 }
 0x461   :  { %v663_v39 = vsel %vm449_vm2, %v659_v38, -inf }
 0x462   :  { %v660_v58 = vsel %vm449_vm2, %v658_v57, -inf }
 0x464   :  { %v3637_v23 = vpop.f32.mrb[8].mxu1 }
 0x465   :  { %v884_v24 = vmul.f32 0.17677669, %v3637_v23  ;;  %v874_v25 = vpop.f32.mrb[9].mxu1 }
 0x466   :  { %v883_v27 = vmul.f32 0.17677669, %v874_v25 }
 0x467   :  { %v886_v29 = vadd.f32 %v884_v24, %v4759_v43 }
 0x468   :  { %v885_v31 = vadd.f32 %v883_v27, %v4754_v40 }
 0x469   :  { %v890_v32 = vsel %vm449_vm2, %v886_v29, -inf }
 0x46a   :  { %891 = vmax.xlane.f32.xlu1 %v890_v32  ;;  %v887_v34 = vsel %vm449_vm2, %v885_v31, -inf }
 0x46b   :  { %888 = vmax.xlane.f32.xlu0 %v887_v34 }
 0x47b   :  { %4255 = vrot.lane.b32.xlu1 %v4731_v30, %s4531_s19 }
 0x47f   :  { %1017 = vrot.lane.b32.xlu1 %v4717_v19, %s4531_s19 }
 0x483   :  { %1019 = vrot.lane.b32.xlu1 %v4747_v37, %s4531_s19 }
 0x4a7   :  { %664 = vmax.xlane.f32.xlu1 %v663_v39 }
 0x4f7   :  { %v892_v41 = vpop.xlane.xlu1 %891 }
 0x4f8   :  { %v894_v42 = vsub.f32 %v886_v29, %v892_v41  ;;  %v889_v44 = vpop.xlane.xlu0 %888 }
 0x4f9   :  { %v893_v45 = vsub.f32 %v885_v31, %v889_v44 }
 0x4fa   :  { %v897_v46 = vmul.f32 1.442695, %v894_v42 }
 0x4fb   :  { %v895_v47 = vmul.f32 1.442695, %v893_v45  ;;  %v4256_v50 = vpop.permute.xlu1 %4255 }
 0x4fc   :  { %4307 = vpow2.f32 %v897_v46  ;;  %v4258_v62 = vunpack.i.h.bf16 %v4256_v50  ;;  %v4257_v63 = vunpack.i.l.bf16 %v4256_v50 }
 0x4fd   :  { %4309 = vpow2.f32 %v895_v47 }
 0x4fe   :  { %v3914_v4 = vpack.c.bf16 %v4258_v62, %v4257_v63  ;;  %v1238_v62 = vld [vmem:[#allocation7] sm:$0xff]  ;;  %v1239_v63 = vld [vmem:[#allocation7 + $0x8] sm:$0xff] }
 0x4ff   :  { %v1018_v51 = vpop.permute.xlu1 %1017 }
 0x503   :  { %v1020_v52 = vpop.permute.xlu1 %1019 }
 0x506   :  { %v4308_v30 = vpop.eup %4307 }
 0x507   :  { %v902_v19 = vsel %vm449_vm2, %v4308_v30, 0.0  ;;  %v4310_v48 = vpop.eup %4309 }
 0x508   :  { %903 = vadd.xlane.f32.xlu0 %v902_v19  ;;  %v899_v37 = vsel %vm449_vm2, %v4310_v48, 0.0 }
 0x50c   :  { %900 = vadd.xlane.f32.xlu0 %v899_v37 }
 0x522   :  { %4250 = vrot.lane.b32.xlu0 %v4807_v49, %s4529_s1 }
 0x534   :  { %v665_v53 = vpop.xlane.xlu1 %664 }
 0x535   :  { %v667_v54 = vsub.f32 %v659_v38, %v665_v53 }
 0x537   :  { %v670_v55 = vmul.f32 1.442695, %v667_v54 }
 0x539   :  { %4311 = vpow2.f32 %v670_v55 }
 0x541   :  { %661 = vmax.xlane.f32.xlu0 %v660_v58 }
 0x543   :  { %v4813_v59 = vpop.eup %4311 }
 0x544   :  { %v675_v33 = vsel %vm449_vm2, %v4813_v59, 0.0 }
 0x545   :  { %676 = vadd.xlane.f32.xlu1 %v675_v33 }
 0x595   :  { %v904_v35 = vpop.xlane.xlu0 %903 }
 0x596   :  { %4313 = vrcp.f32 %v904_v35 }
 0x599   :  { %v901_v60 = vpop.xlane.xlu0 %900 }
 0x59a   :  { %4315 = vrcp.f32 %v901_v60 }
 0x59d   :  { %v4251_v61 = vpop.permute.xlu0 %4250 }
 0x59e   :  { %v4253_v1 = vunpack.i.h.bf16 %v4251_v61  ;;  %v4252_v2 = vunpack.i.l.bf16 %v4251_v61 }
 0x5a0   :  { %v3910_v3 = vpack.c.bf16 %v4253_v1, %v4252_v2  ;;  %v4314_v5 = vpop.eup %4313  ;;  %v1240_v1 = vld [vmem:[#allocation7 + $0x10] sm:$0xff]  ;;  %v3924_v2 = vpack.c.bf16 %v1239_v63, %v1238_v62  ;;  %v1389_v63 = vld [vmem:[%s5305_s10 + $0x50] sm:$0xff] }
 0x5a1   :  { %v908_v8 = vmul.f32 %v4314_v5, %v4308_v30  ;;  %v1242_v5 = vld [vmem:[#allocation7 + $0x20] sm:$0xff]  ;;  %v1387_v62 = vld [vmem:[%s5305_s10 + $0x40] sm:$0xff] }
 0x5a2   :  { %3911 = vmatprep.subr.bf16.mxu1 %v3910_v3 }
 0x5a3   :  { %3913 = vmatpush3.bf16.msra.mxu1 %v3910_v3  ;;  %v1241_v3 = vld [vmem:[#allocation7 + $0x18] sm:$0xff] }
 0x5a4   :  { %v4316_v6 = vpop.eup %4315  ;;  %3916 = vmatprep.subr.msk.bf16.mxu1 %vm4725_vm1, %v3914_v4 }
 0x5a5   :  { %v906_v7 = vmul.f32 %v4316_v6, %v4310_v48 }
 0x5a7   :  { %3642 = vmatprep.mubr.msk.f32.mxu1 %vm449_vm2, %v906_v7  ;;  %v1244_v7 = vld [vmem:[#allocation7 + $0x30] sm:$0xff] }
 0x5a8   :  { %3643 = vmatmul.mubr.msk.f32.vlgmr.msra.gmra.mrb[10].mxu1 %vm449_vm2, %v908_v8  ;;  %v1245_v8 = vld [vmem:[#allocation7 + $0x38] sm:$0xff] }
 0x5a9   :  { %3649 = vmatprep.mubr.msk.f32.mxu1 %vm357_vm0, %v1018_v51 }
 0x5ac   :  { %3919 = vmatpush3.bf16.xpose.msk.msra.mxu1 %vm4725_vm1, %v3914_v4  ;;  %v3928_v4 = vpack.c.bf16 %v1241_v3, %v1240_v1  ;;  %v3966_v1 = vpack.c.bf16 %v1389_v63, %v1387_v62  ;;  %v1524_v63 = vld [vmem:[#allocation9 + $0x20] sm:$0xff] }
 0x5b3   :  { %3650 = vmatmul.mubr.msk.f32.vlgmr.msra.gmra.mrb[12].mxu1 %vm357_vm0, %v1020_v52 }
 0x5b4   :  { %1487 = vmatprep.mubr.f32.mxu1 %v4528_v0 }
 0x5ce   :  { %v662_v11 = vpop.xlane.xlu0 %661 }
 0x5cf   :  { %v666_v15 = vsub.f32 %v658_v57, %v662_v11  ;;  %v3936_v11 = vpack.c.bf16 %v1245_v8, %v1244_v7 }
 0x5d1   :  { %v668_v16 = vmul.f32 1.442695, %v666_v15  ;;  %v1247_v15 = vld [vmem:[#allocation7 + $0x48] sm:$0xff] }
 0x5d2   :  { %v677_v19 = vpop.xlane.xlu1 %676 }
 0x5d3   :  { %4317 = vpow2.f32 %v668_v16 }
 0x5dd   :  { %v4318_v31 = vpop.eup %4317 }
 0x5de   :  { %v672_v32 = vsel %vm449_vm2, %v4318_v31, 0.0 }
 0x67b   :  { %v4826_v9 = vpop.f32.mrb[10].mxu1 }
 0x67c   :  { %v989_v12 = vpop.f32.mrb[11].mxu1 }
 0x686   :  { %v3651_v18 = vpop.f32.mrb[12].mxu1 }
 0x687   :  { %v1101_v20 = vpop.f32.mrb[13].mxu1  ;;  %v1111_v21 = vmul.f32 0.17677669, %v3651_v18  ;;  %v1248_v18 = vld [vmem:[#allocation7 + $0x50] sm:$0xff] }
 0x688   :  { %v1110_v23 = vmul.f32 0.17677669, %v1101_v20  ;;  %v1249_v20 = vld [vmem:[#allocation7 + $0x58] sm:$0xff] }
 0x689   :  { %v1113_v27 = vadd.f32 %v1111_v21, %v4759_v43  ;;  %v3944_v21 = vpack.c.bf16 %v1249_v20, %v1248_v18  ;;  %v1393_v18 = vld [vmem:[%s5305_s10 + $0x70] sm:$0xff] }
 0x68a   :  { %v1112_v24 = vadd.f32 %v1110_v23, %v4754_v40  ;;  %v1250_v23 = vld [vmem:[#allocation7 + $0x60] sm:$0xff] }
 0x68b   :  { %v1117_v29 = vsel %vm449_vm2, %v1113_v27, -inf }
 0x68c   :  { %v1114_v25 = vsel %vm449_vm2, %v1112_v24, -inf }
 0x68d   :  { %1115 = vmax.xlane.f32.xlu0 %v1114_v25 }
 0x691   :  { %1118 = vmax.xlane.f32.xlu0 %v1117_v29 }
 0x695   :  { %673 = vadd.xlane.f32.xlu0 %v672_v32  ;;  %v1253_v32 = vld [vmem:[#allocation7 + $0x78] sm:$0xff] }
 0x71a   :  { %v1116_v34 = vpop.xlane.xlu0 %1115 }
 0x71b   :  { %v1120_v36 = vsub.f32 %v1112_v24, %v1116_v34  ;;  %v1251_v24 = vld [vmem:[#allocation7 + $0x68] sm:$0xff] }
 0x71d   :  { %v1122_v38 = vmul.f32 1.442695, %v1120_v36 }
 0x71e   :  { %v1119_v39 = vpop.xlane.xlu0 %1118 }
 0x71f   :  { %4319 = vpow2.f32 %v1122_v38  ;;  %v1121_v41 = vsub.f32 %v1113_v27, %v1119_v39  ;;  %v3948_v27 = vpack.c.bf16 %v1251_v24, %v1250_v23  ;;  %v1398_v23 = vld [vmem:[%s5305_s10 + $0x98] sm:$0xff] }
 0x721   :  { %v1124_v42 = vmul.f32 1.442695, %v1121_v41 }
 0x722   :  { %v674_v40 = vpop.xlane.xlu0 %673 }
 0x723   :  { %4321 = vpow2.f32 %v1124_v42 }
 0x724   :  { %4323 = vrcp.f32 %v674_v40 }
 0x725   :  { %4325 = vrcp.f32 %v677_v19 }
 0x729   :  { %v4320_v44 = vpop.eup %4319 }
 0x72a   :  { %v1126_v43 = vsel %vm449_vm2, %v4320_v44, 0.0 }
 0x72b   :  { %1127 = vadd.xlane.f32.xlu0 %v1126_v43 }
 0x72d   :  { %v4322_v45 = vpop.eup %4321 }
 0x72e   :  { %v4324_v46 = vpop.eup %4323  ;;  %v1129_v47 = vsel %vm449_vm2, %v4322_v45, 0.0 }
 0x72f   :  { %1130 = vadd.xlane.f32.xlu1 %v1129_v47  ;;  %v679_v30 = vmul.f32 %v4324_v46, %v4318_v31  ;;  %v4326_v54 = vpop.eup %4325  ;;  %v1252_v31 = vld [vmem:[#allocation7 + $0x70] sm:$0xff] }
 0x730   :  { %v3952_v34 = vpack.c.bf16 %v1253_v32, %v1252_v31  ;;  %v3282_v46 = vld [vmem:[%s5302_s7] ss:$0 sm:$0xff]  ;;  %v1400_v31 = vld [vmem:[%s5305_s10 + $0xa8] sm:$0xff]  ;;  %v1402_v32 = vld [vmem:[%s5305_s10 + $0xb8] sm:$0xff] }
 0x731   :  { %3628 = vmatprep.mubr.msk.f32.mxu0 %vm449_vm2, %v679_v30 }
 0x740   :  { %4265 = vrot.lane.b32.xlu1 %v4807_v49, %s4531_s19 }
 0x741   :  { %4260 = vrot.lane.b32.xlu0 %v4807_v49, %s4530_s14  ;;  %v681_v49 = vmul.f32 %v4326_v54, %v4813_v59  ;;  %v1243_v59 = vld [vmem:[#allocation7 + $0x28] sm:$0xff] }
 0x742   :  { %v3932_v6 = vpack.c.bf16 %v1243_v59, %v1242_v5 }
 0x745   :  { %1000 = vrot.lane.b32.xlu0 %v989_v12, %s4529_s1  ;;  %v1246_v12 = vld [vmem:[#allocation7 + $0x40] sm:$0xff] }
 0x746   :  { %v3940_v16 = vpack.c.bf16 %v1247_v15, %v1246_v12  ;;  %v1394_v12 = vld [vmem:[%s5305_s10 + $0x78] sm:$0xff] }
 0x7b8   :  { %v1128_v48 = vpop.xlane.xlu0 %1127 }
 0x7b9   :  { %4327 = vrcp.f32 %v1128_v48 }
 0x7bc   :  { %v1131_v37 = vpop.xlane.xlu1 %1130  ;;  %v4261_v50 = vpop.permute.xlu0 %4260 }
 0x7bd   :  { %4329 = vrcp.f32 %v1131_v37  ;;  %v4263_v51 = vunpack.i.h.bf16 %v4261_v50  ;;  %v4262_v52 = vunpack.i.l.bf16 %v4261_v50 }
 0x7bf   :  { %v3900_v53 = vpack.c.bf16 %v4263_v51, %v4262_v52  ;;  %v1380_v51 = vld [vmem:[%s5305_s10 + $0x8] sm:$0xff]  ;;  %v1382_v52 = vld [vmem:[%s5305_s10 + $0x18] sm:$0xff] }
 0x7c0   :  { %v4266_v55 = vpop.permute.xlu1 %4265  ;;  %v1001_v41 = vpop.permute.xlu0 %1000  ;;  %v3956_v54 = vpack.c.bf16 %v1382_v52, %v1380_v51  ;;  %v1536_v52 = vld [vmem:[#allocation9 + $0x80] sm:$0xff] }
 0x7c1   :  { %v4268_v56 = vunpack.i.h.bf16 %v4266_v55  ;;  %v4267_v57 = vunpack.i.l.bf16 %v4266_v55  ;;  %3901 = vmatprep.subr.bf16.mxu0 %v3900_v53  ;;  %v1386_v55 = vld [vmem:[%s5305_s10 + $0x38] sm:$0xff] }
 0x7c2   :  { %3903 = vmatpush3.bf16.msra.mxu0 %v3900_v53  ;;  %v1379_v53 = vld [vmem:[%s5305_s10] sm:$0xff]  ;;  %3957 = vmatprep.subr.bf16.mxu1 %v3956_v54  ;;  %v1520_v54 = vld [vmem:[#allocation9] sm:$0xff] }
 0x7c3   :  { %v4328_v58 = vpop.eup %4327  ;;  %v3920_v33 = vpack.c.bf16 %v4268_v56, %v4267_v57 }
 0x7c4   :  { %v1133_v35 = vmul.f32 %v4328_v58, %v4320_v44  ;;  %v1383_v58 = vld [vmem:[%s5305_s10 + $0x20] sm:$0xff] }
 0x7c5   :  { %3629 = vmatmul.mubr.msk.f32.vlgmr.msra.gmra.mrb[4].mxu0 %vm449_vm2, %v681_v49  ;;  %3921 = vmatprep.subr.bf16.mxu0 %v3920_v33  ;;  %v1385_v49 = vld [vmem:[%s5305_s10 + $0x30] sm:$0xff] }
 0x7c6   :  { %3923 = vmatpush3.bf16.msra.mxu0 %v3920_v33  ;;  %3656 = vmatprep.mubr.msk.f32.mxu0 %vm449_vm2, %v1133_v35  ;;  %v1388_v33 = vld [vmem:[%s5305_s10 + $0x48] sm:$0xff]  ;;  %v1390_v35 = vld [vmem:[%s5305_s10 + $0x58] sm:$0xff] }
 0x7c7   :  { %v4330_v60 = vpop.eup %4329  ;;  %3925 = vmatprep.subr.bf16.mxu0 %v3924_v2 }
 0x7c8   :  { %v1135_v61 = vmul.f32 %v4330_v60, %v4322_v45  ;;  %v3962_v60 = vpack.c.bf16 %v1385_v49, %v1383_v58  ;;  %v1522_v49 = vld [vmem:[#allocation9 + $0x10] sm:$0xff] }
 0x7ca   :  { %3657 = vmatmul.mubr.msk.f32.vlgmr.msra.gmra.mrb[6].mxu0 %vm449_vm2, %v1135_v61  ;;  %v3964_v61 = vpack.c.bf16 %v1390_v35, %v1388_v33  ;;  %v1523_v33 = vld [vmem:[#allocation9 + $0x18] sm:$0xff]  ;;  %v1540_v35 = vld [vmem:[#allocation9 + $0xa0] sm:$0xff] }
 0x7cb   :  { %3927 = vmatpush3.bf16.msra.mxu0 %v3924_v2 }
 0x7cc   :  { %3929 = vmatprep.subr.bf16.mxu0 %v3928_v4 }
 0x7cf   :  { %3931 = vmatpush3.bf16.msra.mxu0 %v3928_v4 }
 0x7d0   :  { %3933 = vmatprep.subr.bf16.mxu0 %v3932_v6 }
 0x7d3   :  { %3935 = vmatpush3.bf16.msra.mxu0 %v3932_v6 }
 0x7d4   :  { %3937 = vmatprep.subr.bf16.mxu0 %v3936_v11 }
 0x7d7   :  { %3939 = vmatpush3.bf16.msra.mxu0 %v3936_v11  ;;  %v1392_v11 = vld [vmem:[%s5305_s10 + $0x68] sm:$0xff] }
 0x7d8   :  { %3941 = vmatprep.subr.bf16.mxu0 %v3940_v16  ;;  %v3968_v15 = vpack.c.bf16 %v1394_v12, %v1392_v11 }
 0x7db   :  { %3943 = vmatpush3.bf16.msra.mxu0 %v3940_v16  ;;  %v1391_v16 = vld [vmem:[%s5305_s10 + $0x60] sm:$0xff] }
 0x7dc   :  { %3945 = vmatprep.subr.bf16.mxu0 %v3944_v21  ;;  %v3970_v20 = vpack.c.bf16 %v1393_v18, %v1391_v16  ;;  %v1677_v18 = vld [vmem:[#allocation5 + $0x180] sm:$0xff] }
 0x7df   :  { %3947 = vmatpush3.bf16.msra.mxu0 %v3944_v21  ;;  %v1396_v21 = vld [vmem:[%s5305_s10 + $0x88] sm:$0xff] }
 0x7e0   :  { %3949 = vmatprep.subr.bf16.mxu0 %v3948_v27  ;;  %v3972_v24 = vpack.c.bf16 %v1398_v23, %v1396_v21  ;;  %v3284_v21 = vld [vmem:[%s5304_s9] ss:$0 sm:$0xff]  ;;  %v1684_v23 = vld [vmem:[#allocation5 + $0x1b8] sm:$0xff] }
 0x7e3   :  { %3951 = vmatpush3.bf16.msra.mxu0 %v3948_v27  ;;  %v1397_v27 = vld [vmem:[%s5305_s10 + $0x90] sm:$0xff] }
 0x7e4   :  { %3953 = vmatprep.subr.bf16.mxu0 %v3952_v34 }
 0x7e7   :  { %3955 = vmatpush3.bf16.msra.mxu0 %v3952_v34  ;;  %v3976_v34 = vpack.c.bf16 %v1402_v32, %v1400_v31 }
 0x898   :  { %v3630_v25 = vpop.f32.mrb[4].mxu0 }
 0x899   :  { %v762_v29 = vpop.f32.mrb[5].mxu0 }
 0x89a   :  { %773 = vrot.lane.b32.xlu1 %v762_v29, %s4531_s19 }
 0x89d   :  { %v3658_v36 = vpop.f32.mrb[6].mxu0 }
 0x89e   :  { %775 = vrot.lane.b32.xlu1 %v3630_v25, %s4531_s19  ;;  %v1216_v38 = vpop.f32.mrb[7].mxu0  ;;  %v1395_v25 = vld [vmem:[%s5305_s10 + $0x80] sm:$0xff] }
 0x89f   :  { %1227 = vrot.lane.b32.xlu0 %v1216_v38, %s4530_s14  ;;  %v3974_v29 = vpack.c.bf16 %v1397_v27, %v1395_v25  ;;  %v1401_v38 = vld [vmem:[%s5305_s10 + $0xb0] sm:$0xff] }
 0x8a2   :  { %1002 = vrot.lane.b32.xlu1 %v4826_v9, %s4529_s1 }
 0x8a6   :  { %1229 = vrot.lane.b32.xlu1 %v3658_v36, %s4530_s14  ;;  %v1399_v36 = vld [vmem:[%s5305_s10 + $0xa0] sm:$0xff] }
 0x90c   :  { %v774_v39 = vpop.permute.xlu1 %773 }
 0x90d   :  { %780 = vst.msk [vmem:[#allocation3] sm:$0xff] %vm779_vm3, %v774_v39  ;;  %v3978_v39 = vpack.c.bf16 %v1401_v38, %v1399_v36  ;;  %v1683_v36 = vld [vmem:[#allocation5 + $0x1b0] sm:$0xff]  ;;  %v1686_v38 = vld [vmem:[#allocation5 + $0x1c8] sm:$0xff] }
 0x90e   :  { %1007 = vst.msk [vmem:[#allocation3] sm:$0xff] %vm1006_vm4, %v1001_v41  ;;  %v1404_v41 = vld [vmem:[%s5305_s10 + $0xc8] sm:$0xff] }
 0x910   :  { %v776_v42 = vpop.permute.xlu1 %775 }
 0x911   :  { %781 = vst.msk [vmem:[#allocation3 + $0x8] sm:$0xff] %vm779_vm3, %v776_v42  ;;  %v1228_v40 = vpop.permute.xlu0 %1227  ;;  %v1406_v42 = vld [vmem:[%s5305_s10 + $0xd8] sm:$0xff] }
 0x912   :  { %1234 = vst.msk [vmem:[#allocation3] sm:$0xff] %vm1233_vm5, %v1228_v40  ;;  %v1403_v40 = vld [vmem:[%s5305_s10 + $0xc0] sm:$0xff] }
 0x914   :  { %v1003_v44 = vpop.permute.xlu1 %1002 }
 0x915   :  { %1008 = vst.msk [vmem:[#allocation3 + $0x8] sm:$0xff] %vm1006_vm4, %v1003_v44  ;;  %v3980_v44 = vpack.c.bf16 %v1406_v42, %v1404_v41  ;;  %v4026_v42 = vpack.c.bf16 %v1686_v38, %v1683_v36  ;;  %v1530_v38 = vld [vmem:[#allocation9 + $0x50] sm:$0xff] }
 0x918   :  { %v1230_v9 = vpop.permute.xlu1 %1229 }
 0x919   :  { %1235 = vst.msk [vmem:[#allocation3 + $0x8] sm:$0xff] %vm1233_vm5, %v1230_v9  ;;  %v1236_v43 = vld [vmem:[#allocation3] sm:$0xff]  ;;  %v1405_v9 = vld [vmem:[%s5305_s10 + $0xd0] sm:$0xff] }
 0x91a   :  { %3691 = vmatprep.mubr.f32.mxu0 %v1236_v43  ;;  %v1408_v43 = vld [vmem:[%s5305_s10 + $0xe8] sm:$0xff] }
 0x920   :  { %v1237_v45 = vld [vmem:[#allocation3 + $0x8] sm:$0xff] }
 0x921   :  { %3692 = vmatmul.mubr.f32.vlgmr.msra.gmra.mrb[8].mxu0 %v1237_v45  ;;  %v1410_v45 = vld [vmem:[%s5305_s10 + $0xf8] sm:$0xff] }
 0x9f4   :  { %v3693_v47 = vpop.f32.mrb[8].mxu0 }
 0x9f5   :  { %v1333_v30 = vadd.f32 %v3693_v47, %v3282_v46  ;;  %v1327_v19 = vpop.f32.mrb[9].mxu0  ;;  %v3984_v47 = vpack.c.bf16 %v1410_v45, %v1408_v43  ;;  %v1692_v43 = vld [vmem:[#allocation5 + $0x1f8] sm:$0xff] }
 0x9f6   :  { %v1328_v48 = vadd.f32 %v3282_v46, %v1327_v19  ;;  %v3982_v46 = vpack.c.bf16 %v1405_v9, %v1403_v40  ;;  %v1409_v19 = vld [vmem:[%s5305_s10 + $0xf0] sm:$0xff]  ;;  %v1696_v45 = vld [vmem:[#allocation5 + $0x218] sm:$0xff] }
 0x9f7   :  { %v1337_v37 = vadd.f32 %v1333_v30, %v4701_v10  ;;  %v1381_v10 = vld [vmem:[%s5305_s10 + $0x10] sm:$0xff]  ;;  %v1407_v30 = vld [vmem:[%s5305_s10 + $0xe0] sm:$0xff] }
 0x9f8   :  { %v1336_v50 = vadd.f32 %v1328_v48, %v4693_v26  ;;  %v1384_v26 = vld [vmem:[%s5305_s10 + $0x28] sm:$0xff]  ;;  %v3958_v56 = vpack.c.bf16 %v1381_v10, %v1379_v53  ;;  %v1678_v48 = vld [vmem:[#allocation5 + $0x188] sm:$0xff]  ;;  %v1689_v9 = vld [vmem:[#allocation5 + $0x1e0] sm:$0xff] }
 0x9f9   :  { %1342 = vadd.xlane.f32.xlu1 %v1337_v37  ;;  %v3960_v57 = vpack.c.bf16 %v1386_v55, %v1384_v26  ;;  %v1537_v53 = vld [vmem:[#allocation9 + $0x88] sm:$0xff]  ;;  %v1538_v55 = vld [vmem:[#allocation9 + $0x90] sm:$0xff] }
 0x9fa   :  { %1340 = vadd.xlane.f32.xlu0 %v1336_v50  ;;  %3959 = vmatpush1.bf16.msra.mxu1 %v3958_v56  ;;  %v3988_v10 = vpack.c.bf16 %v1537_v53, %v1536_v52  ;;  %v1521_v26 = vld [vmem:[#allocation9 + $0x8] sm:$0xff]  ;;  %v1539_v56 = vld [vmem:[#allocation9 + $0x98] sm:$0xff]  ;;  %v1701_v52 = vld [vmem:[#allocation5 + $0x240] sm:$0xff] }
 0x9fb   :  { %3961 = vmatprep.subr.bf16.mxu1 %v3960_v57  ;;  %v3990_v57 = vpack.c.bf16 %v1521_v26, %v1520_v54  ;;  %v3992_v58 = vpack.c.bf16 %v1539_v56, %v1538_v55  ;;  %v1704_v53 = vld [vmem:[#allocation5 + $0x258] sm:$0xff]  ;;  %v1707_v56 = vld [vmem:[#allocation5 + $0x270] sm:$0xff] }
 0x9fc   :  { %3989 = vmatprep.subr.bf16.mxu0 %v3988_v10  ;;  %v1708_v54 = vld [vmem:[#allocation5 + $0x278] sm:$0xff]  ;;  %v1711_v10 = vld [vmem:[#allocation5 + $0x290] sm:$0xff]  ;;  %v4038_v26 = vpack.c.bf16 %v1704_v53, %v1701_v52 }
 0x9fd   :  { %3991 = vmatpush3.bf16.msra.mxu0 %v3990_v57  ;;  %v4040_v55 = vpack.c.bf16 %v1711_v10, %v1708_v54  ;;  %v1710_v57 = vld [vmem:[#allocation5 + $0x288] sm:$0xff] }
 0x9fe   :  { %3963 = vmatpush1.bf16.msra.mxu1 %v3962_v60  ;;  %v1541_v60 = vld [vmem:[#allocation9 + $0xa8] sm:$0xff]  ;;  %3993 = vmatprep.subr.bf16.mxu0 %v3992_v58 }
 0x9ff   :  { %3965 = vmatprep.subr.bf16.mxu1 %v3964_v61  ;;  %v3994_v61 = vpack.c.bf16 %v1523_v33, %v1522_v49  ;;  %v3996_v62 = vpack.c.bf16 %v1541_v60, %v1540_v35  ;;  %v1714_v58 = vld [vmem:[#allocation5 + $0x2a8] sm:$0xff]  ;;  %v1717_v49 = vld [vmem:[#allocation5 + $0x2c0] sm:$0xff]  ;;  %v4042_v33 = vpack.c.bf16 %v1710_v57, %v1707_v56 }
 0xa00   :  { %v4044_v35 = vpack.c.bf16 %v1717_v49, %v1714_v58  ;;  %v1713_v60 = vld [vmem:[#allocation5 + $0x2a0] sm:$0xff] }
 0xa01   :  { %3995 = vmatpush3.bf16.msra.mxu0 %v3994_v61  ;;  %v1716_v61 = vld [vmem:[#allocation5 + $0x2b8] sm:$0xff] }
 0xa02   :  { %3967 = vmatpush1.bf16.msra.mxu1 %v3966_v1  ;;  %v1525_v1 = vld [vmem:[#allocation9 + $0x28] sm:$0xff]  ;;  %3997 = vmatprep.subr.bf16.mxu0 %v3996_v62  ;;  %v1720_v62 = vld [vmem:[#allocation5 + $0x2d8] sm:$0xff] }
 0xa03   :  { %3969 = vmatprep.subr.bf16.mxu1 %v3968_v15  ;;  %v3283_v15 = vld [vmem:[%s5303_s8] ss:$0 sm:$0xff] }
 0xa06   :  { %3971 = vmatpush1.bf16.msra.mxu1 %v3970_v20  ;;  %v1680_v20 = vld [vmem:[#allocation5 + $0x198] sm:$0xff] }
 0xa07   :  { %3973 = vmatprep.subr.bf16.mxu1 %v3972_v24  ;;  %v1687_v24 = vld [vmem:[#allocation5 + $0x1d0] sm:$0xff] }
 0xa08   :  { %v4024_v32 = vpack.c.bf16 %v1687_v24, %v1684_v23  ;;  %v1545_v23 = vld [vmem:[#allocation9 + $0xc8] sm:$0xff] }
 0xa0a   :  { %3975 = vmatpush1.bf16.msra.mxu1 %v3974_v29  ;;  %v4022_v29 = vpack.c.bf16 %v1680_v20, %v1677_v18  ;;  %v1527_v18 = vld [vmem:[#allocation9 + $0x38] sm:$0xff] }
 0xa0b   :  { %3977 = vmatprep.subr.bf16.mxu1 %v3976_v34 }
 0xa0e   :  { %3979 = vmatpush1.bf16.msra.mxu1 %v3978_v39  ;;  %v1690_v39 = vld [vmem:[#allocation5 + $0x1e8] sm:$0xff] }
 0xa0f   :  { %3981 = vmatprep.subr.bf16.mxu1 %v3980_v44 }
 0xa12   :  { %3983 = vmatpush1.bf16.msra.mxu1 %v3982_v46  ;;  %v1699_v46 = vld [vmem:[#allocation5 + $0x230] sm:$0xff] }
 0xa13   :  { %3985 = vmatprep.subr.bf16.mxu1 %v3984_v47  ;;  %v4032_v47 = vpack.c.bf16 %v1699_v46, %v1696_v45  ;;  %v1550_v46 = vld [vmem:[#allocation9 + $0xf0] sm:$0xff] }
 0xa86   :  { %v1343_v2 = vpop.xlane.xlu1 %1342 }
 0xa87   :  { %v1341_v3 = vpop.xlane.xlu0 %1340  ;;  %v1346_v4 = vmul.f32 0.0078125, %v1343_v2  ;;  %v3998_v2 = vpack.c.bf16 %v1525_v1, %v1524_v63  ;;  %v1723_v63 = vld [vmem:[#allocation5 + $0x2f0] sm:$0xff]  ;;  %v4046_v1 = vpack.c.bf16 %v1716_v61, %v1713_v60 }
 0xa88   :  { %v1345_v5 = vmul.f32 0.0078125, %v1341_v3 }
 0xa89   :  { %v4900_v6 = vsub.f32 %v1337_v37, %v1346_v4  ;;  %v1681_v37 = vld [vmem:[#allocation5 + $0x1a0] sm:$0xff]  ;;  %3999 = vmatpush3.bf16.msra.mxu0 %v3998_v2  ;;  %v4048_v2 = vpack.c.bf16 %v1723_v63, %v1720_v62 }
 0xa8a   :  { %v4898_v59 = vsub.f32 %v1336_v50, %v1345_v5  ;;  %v3986_v50 = vpack.c.bf16 %v1409_v19, %v1407_v30  ;;  %v4020_v51 = vpack.c.bf16 %v1681_v37, %v1678_v48  ;;  %v1695_v30 = vld [vmem:[#allocation5 + $0x210] sm:$0xff]  ;;  %v1698_v19 = vld [vmem:[#allocation5 + $0x228] sm:$0xff]  ;;  %v1705_v37 = vld [vmem:[#allocation5 + $0x260] sm:$0xff] }
 0xa8b   :  { %v1350_v8 = vmul.f32 %v4900_v6, %v4900_v6  ;;  %v1702_v48 = vld [vmem:[#allocation5 + $0x248] sm:$0xff] }
 0xa8c   :  { %v1349_v7 = vmul.f32 %v4898_v59, %v4898_v59  ;;  %3987 = vmatpush1.bf16.msra.mxu1 %v3986_v50  ;;  %v4034_v50 = vpack.c.bf16 %v1698_v19, %v1695_v30  ;;  %v1534_v30 = vld [vmem:[#allocation9 + $0x70] sm:$0xff]  ;;  %v1535_v19 = vld [vmem:[#allocation9 + $0x78] sm:$0xff] }
 0xa8d   :  { %4021 = vmatprep.subr.bf16.mxu1 %v4020_v51  ;;  %v4036_v51 = vpack.c.bf16 %v1705_v37, %v1702_v48  ;;  %v4018_v48 = vpack.c.bf16 %v1535_v19, %v1534_v30  ;;  %v1411_v37 = vld [vmem:[%s5306_s11] sm:$0x3]  ;;  %v1694_v30 = vld [vmem:[#allocation5 + $0x208] sm:$0xff] }
 0xa8e   :  { %1351 = vadd.xlane.f32.xlu0 %v1349_v7 }
 0xa92   :  { %1353 = vadd.xlane.f32.xlu0 %v1350_v8 }
 0xb1b   :  { %v1352_v3 = vpop.xlane.xlu0 %1351 }
 0xb1c   :  { %v1355_v4 = vmul.f32 0.0078125, %v1352_v3  ;;  %v1719_v3 = vld [vmem:[#allocation5 + $0x2d0] sm:$0xff] }
 0xb1e   :  { %v1357_v5 = vadd.f32 1e-12, %v1355_v4  ;;  %v1722_v4 = vld [vmem:[#allocation5 + $0x2e8] sm:$0xff] }
 0xb1f   :  { %v1354_v7 = vpop.xlane.xlu0 %1353 }
 0xb20   :  { %4331 = vrsqrt.f32 %v1357_v5  ;;  %v1356_v8 = vmul.f32 0.0078125, %v1354_v7  ;;  %v4050_v5 = vpack.c.bf16 %v1722_v4, %v1719_v3  ;;  %v4985_v7 = vld [vmem:[%s5297_s2] sm:$0xff] }
 0xb22   :  { %v1358_v11 = vadd.f32 1e-12, %v1356_v8  ;;  %v4992_v8 = vld [vmem:[%s5297_s2 + $0x8] sm:$0xff] }
 0xb24   :  { %4333 = vrsqrt.f32 %v1358_v11  ;;  %v1542_v11 = vld [vmem:[#allocation9 + $0xb0] sm:$0xff] }
 0xb2a   :  { %v4332_v12 = vpop.eup %4331 }
 0xb2b   :  { %v1361_v16 = vmul.f32 %v4332_v12, %v4898_v59  ;;  %v1693_v59 = vld [vmem:[#allocation5 + $0x200] sm:$0xff]  ;;  %v1543_v12 = vld [vmem:[#allocation9 + $0xb8] sm:$0xff] }
 0xb2c   :  { %v4028_v44 = vpack.c.bf16 %v1693_v59, %v1690_v39  ;;  %v1531_v39 = vld [vmem:[#allocation9 + $0x58] sm:$0xff] }
 0xb2d   :  { %v1369_v25 = vmul.f32 %v3283_v15, %v1361_v16  ;;  %v1526_v16 = vld [vmem:[#allocation9 + $0x30] sm:$0xff]  ;;  %v4010_v59 = vpack.c.bf16 %v1531_v39, %v1530_v38 }
 0xb2e   :  { %v4334_v27 = vpop.eup %4333  ;;  %v4002_v20 = vpack.c.bf16 %v1527_v18, %v1526_v16 }
 0xb2f   :  { %v4973_v31 = vadd.f32 %v3284_v21, %v1369_v25  ;;  %v1362_v34 = vmul.f32 %v4334_v27, %v4900_v6  ;;  %v4030_v6 = vpack.c.bf16 %v1692_v43, %v1689_v9  ;;  %v1528_v25 = vld [vmem:[#allocation9 + $0x40] sm:$0xff]  ;;  %v1529_v27 = vld [vmem:[#allocation9 + $0x48] sm:$0xff] }
 0xb30   :  { %v1532_v9 = vld [vmem:[#allocation9 + $0x60] sm:$0xff]  ;;  %v1533_v43 = vld [vmem:[#allocation9 + $0x68] sm:$0xff] }
 0xb31   :  { %1488 = vmatmul.mubr.f32.vlgmr.msra.gmra.mrb[14].mxu1 %v4973_v31  ;;  %v1370_v41 = vmul.f32 %v3283_v15, %v1362_v34  ;;  %v4000_v15 = vpack.c.bf16 %v1543_v12, %v1542_v11  ;;  %v1547_v34 = vld [vmem:[#allocation9 + $0xd8] sm:$0xff]  ;;  %v4014_v45 = vpack.c.bf16 %v1533_v43, %v1532_v9  ;;  %v1682_v9 = vld [vmem:[#allocation5 + $0x1a8] sm:$0xff]  ;;  %v1685_v43 = vld [vmem:[#allocation5 + $0x1c0] sm:$0xff] }
 0xb32   :  { %4023 = vmatpush1.bf16.msra.mxu1 %v4022_v29  ;;  %1493 = vmatprep.mubr.f32.mxu1 %v4528_v0  ;;  %v4006_v29 = vpack.c.bf16 %v1529_v27, %v1528_v25 }
 0xb33   :  { %4025 = vmatprep.subr.bf16.mxu1 %v4024_v32  ;;  %v4978_v40 = vadd.f32 %v3284_v21, %v1370_v41  ;;  %4001 = vmatprep.subr.bf16.mxu0 %v4000_v15  ;;  %v1544_v21 = vld [vmem:[#allocation9 + $0xc0] sm:$0xff]  ;;  %v1546_v32 = vld [vmem:[#allocation9 + $0xd0] sm:$0xff] }
 0xb34   :  { %4003 = vmatpush3.bf16.msra.mxu0 %v4002_v20  ;;  %v4004_v24 = vpack.c.bf16 %v1545_v23, %v1544_v21  ;;  %v4008_v36 = vpack.c.bf16 %v1547_v34, %v1546_v32  ;;  %v1548_v41 = vld [vmem:[#allocation9 + $0xe0] sm:$0xff]  ;;  %v5003_v23 = vld [vmem:[%s5300_s5 + $0x3] sm:$0x7] }
 0xb35   :  { %1494 = vmatmul.mubr.f32.gmra.mrb[16].mxu1 %v4978_v40  ;;  %v1735_v32 = vrot.slane %v5003_v23, %v4715_v17 }
 0xb36   :  { %4027 = vmatpush1.bf16.msra.mxu1 %v4026_v42  ;;  %1807 = vmatprep.mubr.f32.mxu1 %v4528_v0  ;;  %v1549_v42 = vld [vmem:[#allocation9 + $0xe8] sm:$0xff] }
 0xb37   :  { %4029 = vmatprep.subr.bf16.mxu1 %v4028_v44  ;;  %4005 = vmatprep.subr.bf16.mxu0 %v4004_v24  ;;  %v4012_v44 = vpack.c.bf16 %v1549_v42, %v1548_v41  ;;  %v1731_v24 = vrot.slane %v5003_v23, %v4708_v14 }
 0xb38   :  { %4007 = vmatpush3.bf16.msra.mxu0 %v4006_v29 }
 0xb39   :  { %4009 = vmatprep.subr.bf16.mxu0 %v4008_v36 }
 0xb3a   :  { %4031 = vmatpush1.bf16.msra.mxu1 %v4030_v6  ;;  %v1551_v6 = vld [vmem:[#allocation9 + $0xf8] sm:$0xff] }
 0xb3b   :  { %4033 = vmatprep.subr.bf16.mxu1 %v4032_v47  ;;  %v4016_v47 = vpack.c.bf16 %v1551_v6, %v1550_v46  ;;  %v1688_v46 = vld [vmem:[#allocation5 + $0x1d8] sm:$0xff] }
 0xb3c   :  { %4011 = vmatpush3.bf16.msra.mxu0 %v4010_v59  ;;  %v4056_v6 = vpack.c.bf16 %v1688_v46, %v1685_v43  ;;  %v1739_v43 = vrot.slane %v5003_v23, %v188_v22 }
 0xb3d   :  { %4013 = vmatprep.subr.bf16.mxu0 %v4012_v44  ;;  %v1679_v44 = vld [vmem:[#allocation5 + $0x190] sm:$0xff] }
 0xb3e   :  { %4035 = vmatpush1.bf16.msra.mxu1 %v4034_v50  ;;  %v1416_v50 = vrot.slane %v1411_v37, %v4708_v14 }
 0xb3f   :  { %4037 = vmatprep.subr.bf16.mxu1 %v4036_v51  ;;  %v1420_v51 = vrot.slane %v1411_v37, %v4715_v17  ;;  %v1700_v37 = vld [vmem:[#allocation5 + $0x238] sm:$0xff] }
 0xb40   :  { %4015 = vmatpush3.bf16.msra.mxu0 %v4014_v45  ;;  %v4052_v45 = vpack.c.bf16 %v1682_v9, %v1679_v44 }
 0xb41   :  { %4017 = vmatprep.subr.bf16.mxu0 %v4016_v47  ;;  %v1691_v47 = vld [vmem:[#allocation5 + $0x1f0] sm:$0xff] }
 0xb42   :  { %4039 = vmatpush1.bf16.msra.mxu1 %v4038_v26  ;;  %v4060_v19 = vpack.c.bf16 %v1694_v30, %v1691_v47 }
 0xb43   :  { %4041 = vmatprep.subr.bf16.mxu1 %v4040_v55 }
 0xb44   :  { %4019 = vmatpush3.bf16.msra.mxu0 %v4018_v48  ;;  %v1697_v48 = vld [vmem:[#allocation5 + $0x220] sm:$0xff] }
 0xb45   :  { %4053 = vmatprep.subr.bf16.mxu0 %v4052_v45 }
 0xb46   :  { %4043 = vmatpush1.bf16.msra.mxu1 %v4042_v33 }
 0xb47   :  { %4045 = vmatprep.subr.bf16.mxu1 %v4044_v35 }
 0xb4a   :  { %4047 = vmatpush1.bf16.msra.mxu1 %v4046_v1 }
 0xb4b   :  { %4049 = vmatprep.subr.bf16.mxu1 %v4048_v2 }
 0xb4e   :  { %4051 = vmatpush1.bf16.msra.mxu1 %v4050_v5 }
 0xb51   :  { %1808 = vmatmul.mubr.f32.vlgmr.msra.gmra.mrb[18].mxu1 %v4985_v7 }
 0xb52   :  { %1813 = vmatprep.mubr.f32.mxu1 %v4528_v0 }
 0xb55   :  { %1814 = vmatmul.mubr.f32.gmra.mrb[20].mxu1 %v4992_v8 }
 0xc04   :  { %v1489_v52 = vpop.f32.mrb[14].mxu1 }
 0xc05   :  { %v1490_v53 = vadd.f32 %v1489_v52, %v1416_v50  ;;  %v1491_v54 = vpop.f32.mrb[15].mxu1  ;;  %v1706_v52 = vld [vmem:[#allocation5 + $0x268] sm:$0xff] }
 0xc06   :  { %v1492_v10 = vadd.f32 %v1491_v54, %v1420_v51  ;;  %v1709_v54 = vld [vmem:[#allocation5 + $0x280] sm:$0xff] }
 0xc07   :  { %v1504_v26 = vmul.f32 0.70710677, %v1490_v53  ;;  %v1500_v2 = vmul.f32 0.5, %v1490_v53 }
 0xc08   :  { %v1505_v55 = vmul.f32 0.70710677, %v1492_v10  ;;  %v1495_v56 = vpop.f32.mrb[16].mxu1  ;;  %v1501_v63 = vmul.f32 0.5, %v1492_v10  ;;  %v1712_v10 = vld [vmem:[#allocation5 + $0x298] sm:$0xff] }
 0xc09   :  { %4335 = verf.f32 %v1504_v26  ;;  %v1496_v57 = vadd.f32 %v1495_v56, %v1416_v50  ;;  %v1497_v58 = vpop.f32.mrb[17].mxu1  ;;  %v4064_v50 = vpack.c.bf16 %v1700_v37, %v1697_v48  ;;  %v4072_v26 = vpack.c.bf16 %v1712_v10, %v1709_v54  ;;  %v1718_v56 = vld [vmem:[#allocation5 + $0x2c8] sm:$0xff] }
 0xc0a   :  { %4337 = verf.f32 %v1505_v55  ;;  %v1498_v49 = vadd.f32 %v1497_v58, %v1420_v51  ;;  %v1703_v51 = vld [vmem:[#allocation5 + $0x250] sm:$0xff]  ;;  %v1721_v58 = vld [vmem:[#allocation5 + $0x2e0] sm:$0xff] }
 0xc0b   :  { %v1506_v33 = vmul.f32 0.70710677, %v1496_v57  ;;  %v1502_v18 = vmul.f32 0.5, %v1496_v57  ;;  %v4068_v53 = vpack.c.bf16 %v1706_v52, %v1703_v51  ;;  %v1715_v55 = vld [vmem:[#allocation5 + $0x2b0] sm:$0xff] }
 0xc0c   :  { %v1507_v35 = vmul.f32 0.70710677, %v1498_v49  ;;  %v1503_v15 = vmul.f32 0.5, %v1498_v49  ;;  %v4076_v57 = vpack.c.bf16 %v1718_v56, %v1715_v55  ;;  %v1724_v49 = vld [vmem:[#allocation5 + $0x2f8] sm:$0xff] }
 0xc0d   :  { %4339 = verf.f32 %v1506_v33  ;;  %v4080_v33 = vpack.c.bf16 %v1724_v49, %v1721_v58 }
 0xc0e   :  { %4341 = verf.f32 %v1507_v35 }
 0xc13   :  { %v4336_v60 = vpop.eup %4335 }
 0xc14   :  { %v4338_v61 = vpop.eup %4337  ;;  %v1512_v62 = vadd.f32 1.0, %v4336_v60  ;;  %v5028_v60 = vld [vmem:[%s5308_s13] ss:$0 sm:$0xff] }
 0xc15   :  { %v1513_v1 = vadd.f32 1.0, %v4338_v61 }
 0xc16   :  { %v1516_v11 = vmul.f32 %v1512_v62, %v1500_v2 }
 0xc17   :  { %v4340_v3 = vpop.eup %4339  ;;  %v1517_v4 = vmul.f32 %v1513_v1, %v1501_v63 }
 0xc18   :  { %v4342_v5 = vpop.eup %4341  ;;  %v1514_v12 = vadd.f32 1.0, %v4340_v3 }
 0xc19   :  { %v1515_v16 = vadd.f32 1.0, %v4342_v5  ;;  %1623 = vmatprep.mubr.f32.mxu0 %v1517_v4 }
 0xc1a   :  { %1624 = vmatmul.mubr.f32.vlgmr.msra.gmra.mrb[10].mxu0 %v1516_v11  ;;  %v1518_v21 = vmul.f32 %v1514_v12, %v1502_v18  ;;  %v5044_v18 = vld [vmem:[%s5298_s3] sm:$0xff] }
 0xc1b   :  { %v1519_v20 = vmul.f32 %v1515_v16, %v1503_v15  ;;  %4055 = vmatpush3.bf16.msra.mxu0 %v4052_v45  ;;  %v5038_v15 = vld [vmem:[%s5298_s3 + $0x8] sm:$0xff] }
 0xc1c   :  { %4057 = vmatprep.subr.bf16.mxu0 %v4056_v6 }
 0xc1d   :  { %1628 = vmatprep.mubr.f32.mxu0 %v1519_v20 }
 0xc1e   :  { %1629 = vmatmul.mubr.f32.gmra.mrb[12].mxu0 %v1518_v21 }
 0xc1f   :  { %3726 = vmatprep.mubr.f32.mxu0 %v4985_v7  ;;  %4059 = vmatpush3.bf16.msra.mxu0 %v4056_v6 }
 0xc20   :  { %4061 = vmatprep.subr.bf16.mxu0 %v4060_v19 }
 0xc23   :  { %4063 = vmatpush3.bf16.msra.mxu0 %v4060_v19 }
 0xc24   :  { %v1809_v25 = vpop.f32.mrb[18].mxu1  ;;  %4065 = vmatprep.subr.bf16.mxu0 %v4064_v50 }
 0xc25   :  { %v5008_v27 = vadd.f32 %v1809_v25, %v1731_v24  ;;  %v1811_v29 = vpop.f32.mrb[19].mxu1 }
 0xc26   :  { %v1812_v38 = vadd.f32 %v1811_v29, %v1735_v32 }
 0xc27   :  { %3733 = vmatprep.mubr.msk.f32.mxu1 %vm357_vm0, %v5008_v27  ;;  %4067 = vmatpush3.bf16.msra.mxu0 %v4064_v50 }
 0xc28   :  { %v1815_v34 = vpop.f32.mrb[20].mxu1  ;;  %4069 = vmatprep.subr.bf16.mxu0 %v4068_v53 }
 0xc29   :  { %v1817_v36 = vpop.f32.mrb[21].mxu1  ;;  %v5020_v42 = vadd.f32 %v1815_v34, %v1731_v24 }
 0xc2a   :  { %v1818_v39 = vadd.f32 %v1817_v36, %v1735_v32 }
 0xc2b   :  { %4071 = vmatpush3.bf16.msra.mxu0 %v4068_v53 }
 0xc2c   :  { %v4084_v59 = vpack.c.bf16 %v1818_v39, %v1812_v38  ;;  %v5014_v41 = vpack.i.bf16 %v1818_v39, %v1812_v38  ;;  %4073 = vmatprep.subr.bf16.mxu0 %v4072_v26 }
 0xc2e   :  { %4086 = vmatprep.subr.msk.bf16.mxu1 %vm4725_vm1, %v4084_v59 }
 0xc2f   :  { %4089 = vmatpush3.bf16.xpose.msk.msra.mxu1 %vm4725_vm1, %v4084_v59  ;;  %4075 = vmatpush3.bf16.msra.mxu0 %v4072_v26 }
 0xc30   :  { %4077 = vmatprep.subr.bf16.mxu0 %v4076_v57 }
 0xc33   :  { %4079 = vmatpush3.bf16.msra.mxu0 %v4076_v57 }
 0xc34   :  { %4081 = vmatprep.subr.bf16.mxu0 %v4080_v33 }
 0xc36   :  { %3734 = vmatmul.mubr.msk.f32.vlgmr.msra.gmra.mrb[22].mxu1 %vm357_vm0, %v5020_v42 }
 0xc37   :  { %4083 = vmatpush3.bf16.msra.mxu0 %v4080_v33 }
 0xc3a   :  { %3727 = vmatmul.mubr.f32.vlgmr.msra.gmra.mrb[14].mxu0 %v4992_v8 }
 0xced   :  { %v3456_v35 = vpop.f32.mrb[10].mxu0 }
 0xcee   :  { %v3457_v61 = vpop.f32.mrb[11].mxu0 }
 0xcef   :  { %v3458_v62 = vadd.f32 %v3457_v61, %v3456_v35 }
 0xcf1   :  { %v5031_v63 = vadd.f32 %v3458_v62, %v5028_v60  ;;  %v3459_v1 = vpop.f32.mrb[12].mxu0 }
 0xcf2   :  { %v3460_v2 = vpop.f32.mrb[13].mxu0 }
 0xcf3   :  { %v5033_v3 = vadd.f32 %v3460_v2, %v3459_v1 }
 0xd09   :  { %v3735_v4 = vpop.f32.mrb[22].mxu1 }
 0xd0a   :  { %v1995_v5 = vmul.f32 0.17677669, %v3735_v4  ;;  %v1985_v11 = vpop.f32.mrb[23].mxu1 }
 0xd0b   :  { %v1994_v12 = vmul.f32 0.17677669, %v1985_v11 }
 0xd0c   :  { %v1997_v16 = vadd.f32 %v5038_v15, %v1995_v5 }
 0xd0d   :  { %v1996_v20 = vadd.f32 %v5044_v18, %v1994_v12  ;;  %v3728_v45 = vpop.f32.mrb[14].mxu0 }
 0xd0e   :  { %v2001_v21 = vsel %vm449_vm2, %v1997_v16, -inf  ;;  %v1886_v46 = vpop.f32.mrb[15].mxu0  ;;  %v1892_v6 = vadd.f32 %v3728_v45, %v1739_v43 }
 0xd0f   :  { %2002 = vmax.xlane.f32.xlu1 %v2001_v21  ;;  %v1998_v24 = vsel %vm449_vm2, %v1996_v20, -inf  ;;  %v1887_v47 = vadd.f32 %v1886_v46, %v1739_v43 }
 0xd10   :  { %1999 = vmax.xlane.f32.xlu0 %v1998_v24 }
 0xd11   :  { %v4090_v30 = vpack.c.bf16 %v1892_v6, %v1887_v47  ;;  %v5056_v19 = vpack.i.bf16 %v1892_v6, %v1887_v47 }
 0xd13   :  { %4091 = vmatprep.subr.bf16.mxu1 %v4090_v30 }
 0xd14   :  { %4093 = vmatpush3.bf16.msra.mxu1 %v4090_v30 }
 0xd9c   :  { %v2003_v25 = vpop.xlane.xlu1 %2002 }
 0xd9d   :  { %v2005_v29 = vsub.f32 %v1997_v16, %v2003_v25  ;;  %v2000_v32 = vpop.xlane.xlu0 %1999 }
 0xd9e   :  { %v2004_v34 = vsub.f32 %v1996_v20, %v2000_v32 }
 0xd9f   :  { %v2008_v36 = vmul.f32 1.442695, %v2005_v29 }
 0xda0   :  { %v2006_v38 = vmul.f32 1.442695, %v2004_v34 }
 0xda1   :  { %4343 = vpow2.f32 %v2008_v36 }
 0xda2   :  { %4345 = vpow2.f32 %v2006_v38 }
 0xdab   :  { %v4344_v39 = vpop.eup %4343 }
 0xdac   :  { %v4346_v59 = vpop.eup %4345  ;;  %v2013_v44 = vsel %vm449_vm2, %v4344_v39, 0.0 }
 0xdad   :  { %2014 = vadd.xlane.f32.xlu1 %v2013_v44  ;;  %v2010_v9 = vsel %vm449_vm2, %v4346_v59, 0.0 }
 0xdae   :  { %2011 = vadd.xlane.f32.xlu0 %v2010_v9 }
 0xdbe   :  { %2111 = vrot.lane.b32.xlu1 %v5008_v27, %s4530_s14 }
 0xdc2   :  { %2113 = vrot.lane.b32.xlu1 %v5020_v42, %s4530_s14 }
 0xdc4   :  { %4270 = vrot.lane.b32.xlu0 %v5014_v41, %s4530_s14 }
 0xe3a   :  { %v2015_v13 = vpop.xlane.xlu1 %2014 }
 0xe3b   :  { %4347 = vrcp.f32 %v2015_v13  ;;  %v2012_v22 = vpop.xlane.xlu0 %2011 }
 0xe3c   :  { %4349 = vrcp.f32 %v2012_v22 }
 0xe3e   :  { %v2112_v10 = vpop.permute.xlu1 %2111 }
 0xe3f   :  { %v4271_v23 = vpop.permute.xlu0 %4270 }
 0xe40   :  { %v4273_v48 = vunpack.i.h.bf16 %v4271_v23  ;;  %v4272_v37 = vunpack.i.l.bf16 %v4271_v23 }
 0xe42   :  { %v4094_v50 = vpack.c.bf16 %v4273_v48, %v4272_v37  ;;  %v2114_v26 = vpop.permute.xlu1 %2113 }
 0xe44   :  { %4096 = vmatprep.subr.msk.bf16.mxu1 %vm4725_vm1, %v4094_v50 }
 0xe45   :  { %v4348_v51 = vpop.eup %4347 }
 0xe46   :  { %v4350_v52 = vpop.eup %4349  ;;  %v2019_v54 = vmul.f32 %v4348_v51, %v4344_v39 }
 0xe47   :  { %v2017_v53 = vmul.f32 %v4350_v52, %v4346_v59 }
 0xe49   :  { %3740 = vmatprep.mubr.msk.f32.mxu1 %vm449_vm2, %v2017_v53 }
 0xe4a   :  { %3741 = vmatmul.mubr.msk.f32.vlgmr.msra.gmra.mrb[24].mxu1 %vm449_vm2, %v2019_v54 }
 0xe4b   :  { %4099 = vmatpush3.bf16.xpose.msk.msra.mxu1 %vm4725_vm1, %v4094_v50  ;;  %3747 = vmatprep.mubr.msk.f32.mxu1 %vm357_vm0, %v2112_v10 }
 0xe52   :  { %3748 = vmatmul.mubr.msk.f32.vlgmr.msra.gmra.mrb[26].mxu1 %vm357_vm0, %v2114_v26 }
 0xf1d   :  { %v3742_v55 = vpop.f32.mrb[24].mxu1 }
 0xf1e   :  { %2102 = vst.msk [vmem:[#allocation3 + $0x8] sm:$0xff] %vm357_vm0, %v3742_v55  ;;  %v2092_v56 = vpop.f32.mrb[25].mxu1 }
 0xf1f   :  { %2101 = vst.msk [vmem:[#allocation3] sm:$0xff] %vm357_vm0, %v2092_v56 }
 0xf25   :  { %v3749_v57 = vpop.f32.mrb[26].mxu1 }
 0xf26   :  { %v2205_v58 = vmul.f32 0.17677669, %v3749_v57  ;;  %v2195_v49 = vpop.f32.mrb[27].mxu1 }
 0xf27   :  { %v2204_v33 = vmul.f32 0.17677669, %v2195_v49 }
 0xf28   :  { %v2207_v35 = vadd.f32 %v5038_v15, %v2205_v58 }
 0xf29   :  { %v2206_v61 = vadd.f32 %v5044_v18, %v2204_v33 }
 0xf2a   :  { %v2211_v62 = vsel %vm449_vm2, %v2207_v35, -inf }
 0xf2b   :  { %2212 = vmax.xlane.f32.xlu0 %v2211_v62  ;;  %v2208_v1 = vsel %vm449_vm2, %v2206_v61, -inf }
 0xf2c   :  { %2209 = vmax.xlane.f32.xlu1 %v2208_v1 }
 0xf3d   :  { %4275 = vrot.lane.b32.xlu1 %v5056_v19, %s4530_s14 }
 0xf41   :  { %4285 = vrot.lane.b32.xlu1 %v5014_v41, %s4531_s19 }
 0xf45   :  { %2337 = vrot.lane.b32.xlu1 %v5008_v27, %s4529_s1 }
 0xf49   :  { %2339 = vrot.lane.b32.xlu1 %v5020_v42, %s4529_s1 }
 0xf4d   :  { %2565 = vrot.lane.b32.xlu1 %v5020_v42, %s4531_s19 }
 0xfb8   :  { %v2213_v2 = vpop.xlane.xlu0 %2212 }
 0xfb9   :  { %v2215_v4 = vsub.f32 %v2207_v35, %v2213_v2  ;;  %v2210_v5 = vpop.xlane.xlu1 %2209 }
 0xfba   :  { %v2214_v11 = vsub.f32 %v2206_v61, %v2210_v5 }
 0xfbb   :  { %v2218_v12 = vmul.f32 1.442695, %v2215_v4 }
 0xfbc   :  { %v2216_v16 = vmul.f32 1.442695, %v2214_v11 }
 0xfbd   :  { %4351 = vpow2.f32 %v2218_v12  ;;  %v4276_v20 = vpop.permute.xlu1 %4275 }
 0xfbe   :  { %v4278_v21 = vunpack.i.h.bf16 %v4276_v20  ;;  %v4277_v24 = vunpack.i.l.bf16 %v4276_v20  ;;  %4353 = vpow2.f32 %v2216_v16 }
 0xfc0   :  { %v4100_v25 = vpack.c.bf16 %v4278_v21, %v4277_v24 }
 0xfc1   :  { %v4286_v43 = vpop.permute.xlu1 %4285 }
 0xfc2   :  { %4101 = vmatprep.subr.bf16.mxu1 %v4100_v25  ;;  %v4288_v6 = vunpack.i.h.bf16 %v4286_v43  ;;  %v4287_v47 = vunpack.i.l.bf16 %v4286_v43 }
 0xfc3   :  { %4103 = vmatpush3.bf16.msra.mxu1 %v4100_v25 }
 0xfc5   :  { %v2338_v13 = vpop.permute.xlu1 %2337 }
 0xfc7   :  { %v4352_v29 = vpop.eup %4351 }
 0xfc8   :  { %v2223_v32 = vsel %vm449_vm2, %v4352_v29, 0.0  ;;  %v4354_v34 = vpop.eup %4353 }
 0xfc9   :  { %2224 = vadd.xlane.f32.xlu0 %v2223_v32  ;;  %v2220_v42 = vsel %vm449_vm2, %v4354_v34, 0.0  ;;  %v2340_v22 = vpop.permute.xlu1 %2339 }
 0xfcd   :  { %2221 = vadd.xlane.f32.xlu0 %v2220_v42  ;;  %v2566_v48 = vpop.permute.xlu1 %2565 }
 0xfe3   :  { %4280 = vrot.lane.b32.xlu0 %v5014_v41, %s4529_s1 }
 0xfe7   :  { %2563 = vrot.lane.b32.xlu0 %v5008_v27, %s4531_s19  ;;  %v4114_v27 = vpack.c.bf16 %v4288_v6, %v4287_v47 }
0x1056   :  { %v2225_v36 = vpop.xlane.xlu0 %2224 }
0x1057   :  { %4355 = vrcp.f32 %v2225_v36 }
0x105a   :  { %v2222_v38 = vpop.xlane.xlu0 %2221 }
0x105b   :  { %4357 = vrcp.f32 %v2222_v38 }
0x105e   :  { %v4281_v39 = vpop.permute.xlu0 %4280 }
0x105f   :  { %v4283_v59 = vunpack.i.h.bf16 %v4281_v39  ;;  %v4282_v44 = vunpack.i.l.bf16 %v4281_v39 }
0x1061   :  { %v4104_v9 = vpack.c.bf16 %v4283_v59, %v4282_v44  ;;  %v4356_v45 = vpop.eup %4355 }
0x1062   :  { %v2229_v30 = vmul.f32 %v4356_v45, %v4352_v29  ;;  %v2564_v23 = vpop.permute.xlu0 %2563 }
0x1063   :  { %4106 = vmatprep.subr.msk.bf16.mxu1 %vm4725_vm1, %v4104_v9 }
0x1065   :  { %v4358_v46 = vpop.eup %4357 }
0x1066   :  { %v2227_v41 = vmul.f32 %v4358_v46, %v4354_v34 }
0x1068   :  { %3754 = vmatprep.mubr.msk.f32.mxu1 %vm449_vm2, %v2227_v41 }
0x1069   :  { %3755 = vmatmul.mubr.msk.f32.vlgmr.msra.gmra.mrb[28].mxu1 %vm449_vm2, %v2229_v30 }
0x106a   :  { %4109 = vmatpush3.bf16.xpose.msk.msra.mxu1 %vm4725_vm1, %v4104_v9  ;;  %3761 = vmatprep.mubr.msk.f32.mxu1 %vm357_vm0, %v2338_v13 }
0x106b   :  { %4116 = vmatprep.subr.msk.bf16.mxu1 %vm4725_vm1, %v4114_v27 }
0x1071   :  { %3762 = vmatmul.mubr.msk.f32.vlgmr.msra.gmra.mrb[30].mxu1 %vm357_vm0, %v2340_v22 }
0x1072   :  { %4119 = vmatpush3.bf16.xpose.msk.msra.mxu1 %vm4725_vm1, %v4114_v27  ;;  %3775 = vmatprep.mubr.msk.f32.mxu1 %vm357_vm0, %v2564_v23 }
0x1079   :  { %3776 = vmatmul.mubr.msk.f32.vlgmr.msra.gmra.mrb[32].mxu1 %vm357_vm0, %v2566_v48 }
0x107a   :  { %3037 = vmatprep.mubr.f32.mxu1 %v4528_v0 }
0x113c   :  { %v3756_v37 = vpop.f32.mrb[28].mxu1 }
0x113d   :  { %v2310_v50 = vpop.f32.mrb[29].mxu1 }
0x1144   :  { %v3763_v51 = vpop.f32.mrb[30].mxu1 }
0x1145   :  { %v2431_v52 = vmul.f32 0.17677669, %v3763_v51  ;;  %v2421_v53 = vpop.f32.mrb[31].mxu1 }
0x1146   :  { %v2430_v54 = vmul.f32 0.17677669, %v2421_v53 }
0x1147   :  { %v2433_v10 = vadd.f32 %v5038_v15, %v2431_v52 }
0x1148   :  { %v2432_v26 = vadd.f32 %v5044_v18, %v2430_v54 }
0x1149   :  { %v2437_v28 = vsel %vm449_vm2, %v2433_v10, -inf }
0x114a   :  { %2438 = vmax.xlane.f32.xlu1 %v2437_v28  ;;  %v2434_v55 = vsel %vm449_vm2, %v2432_v26, -inf  ;;  %v2786_v28 = vld [vmem:[#allocation7 + $0x90] sm:$0xff] }
0x114b   :  { %2435 = vmax.xlane.f32.xlu0 %v2434_v55 }
0x114c   :  { %v3777_v56 = vpop.f32.mrb[32].mxu1 }
0x114d   :  { %v2647_v57 = vpop.f32.mrb[33].mxu1  ;;  %v2657_v58 = vmul.f32 0.17677669, %v3777_v56  ;;  %v2787_v56 = vld [vmem:[#allocation7 + $0x98] sm:$0xff] }
0x114e   :  { %v2656_v49 = vmul.f32 0.17677669, %v2647_v57  ;;  %v4128_v57 = vpack.c.bf16 %v2787_v56, %v2786_v28 }
0x114f   :  { %v2659_v61 = vadd.f32 %v5038_v15, %v2657_v58  ;;  %v2788_v58 = vld [vmem:[#allocation7 + $0xa0] sm:$0xff] }
0x1150   :  { %v2658_v33 = vadd.f32 %v5044_v18, %v2656_v49  ;;  %v2789_v49 = vld [vmem:[#allocation7 + $0xa8] sm:$0xff] }
0x1151   :  { %v2663_v62 = vsel %vm449_vm2, %v2659_v61, -inf }
0x1152   :  { %v2660_v35 = vsel %vm449_vm2, %v2658_v33, -inf }
0x1153   :  { %2661 = vmax.xlane.f32.xlu0 %v2660_v35  ;;  %v2790_v35 = vld [vmem:[#allocation7 + $0xb0] sm:$0xff] }
0x1157   :  { %2664 = vmax.xlane.f32.xlu0 %v2663_v62 }
0x11d7   :  { %v2439_v1 = vpop.xlane.xlu1 %2438 }
0x11d8   :  { %v2441_v2 = vsub.f32 %v2433_v10, %v2439_v1  ;;  %v2436_v4 = vpop.xlane.xlu0 %2435  ;;  %v2784_v10 = vld [vmem:[#allocation7 + $0x80] sm:$0xff] }
0x11d9   :  { %v2440_v5 = vsub.f32 %v2432_v26, %v2436_v4  ;;  %v2785_v26 = vld [vmem:[#allocation7 + $0x88] sm:$0xff]  ;;  %v2792_v1 = vld [vmem:[#allocation7 + $0xc0] sm:$0xff] }
0x11da   :  { %v2444_v11 = vmul.f32 1.442695, %v2441_v2  ;;  %v4124_v55 = vpack.c.bf16 %v2785_v26, %v2784_v10  ;;  %v2793_v2 = vld [vmem:[#allocation7 + $0xc8] sm:$0xff]  ;;  %v3329_v10 = vld [vmem:[%s5305_s10 + $0x150] sm:$0xff] }
0x11db   :  { %v2442_v12 = vmul.f32 1.442695, %v2440_v5  ;;  %v4140_v4 = vpack.c.bf16 %v2793_v2, %v2792_v1  ;;  %v2794_v5 = vld [vmem:[#allocation7 + $0xd0] sm:$0xff]  ;;  %v3334_v1 = vld [vmem:[%s5305_s10 + $0x178] sm:$0xff] }
0x11dc   :  { %4359 = vpow2.f32 %v2444_v11  ;;  %v2795_v11 = vld [vmem:[#allocation7 + $0xd8] sm:$0xff] }
0x11dd   :  { %4361 = vpow2.f32 %v2442_v12  ;;  %v4144_v12 = vpack.c.bf16 %v2795_v11, %v2794_v5  ;;  %v3336_v5 = vld [vmem:[%s5305_s10 + $0x188] sm:$0xff]  ;;  %v3338_v11 = vld [vmem:[%s5305_s10 + $0x198] sm:$0xff] }
0x11e0   :  { %v2662_v16 = vpop.xlane.xlu0 %2661 }
0x11e1   :  { %v2666_v20 = vsub.f32 %v2658_v33, %v2662_v16  ;;  %v4132_v33 = vpack.c.bf16 %v2789_v49, %v2788_v58  ;;  %v2796_v16 = vld [vmem:[#allocation7 + $0xe0] sm:$0xff] }
0x11e3   :  { %v2668_v21 = vmul.f32 1.442695, %v2666_v20  ;;  %v2797_v20 = vld [vmem:[#allocation7 + $0xe8] sm:$0xff] }
0x11e4   :  { %v2665_v18 = vpop.xlane.xlu0 %2664 }
0x11e5   :  { %4363 = vpow2.f32 %v2668_v21  ;;  %v2667_v24 = vsub.f32 %v2659_v61, %v2665_v18  ;;  %v2791_v61 = vld [vmem:[#allocation7 + $0xb8] sm:$0xff]  ;;  %v4148_v21 = vpack.c.bf16 %v2797_v20, %v2796_v16  ;;  %v2798_v18 = vld [vmem:[#allocation7 + $0xf0] sm:$0xff]  ;;  %v3337_v20 = vld [vmem:[%s5305_s10 + $0x190] sm:$0xff] }
0x11e6   :  { %v4360_v25 = vpop.eup %4359  ;;  %v4136_v62 = vpack.c.bf16 %v2791_v61, %v2790_v35  ;;  %v5196_v61 = vadd.f32 %v5031_v63, %v4973_v31  ;;  %v3333_v31 = vld [vmem:[%s5305_s10 + $0x170] sm:$0xff]  ;;  %v3335_v16 = vld [vmem:[%s5305_s10 + $0x180] sm:$0xff] }
0x11e7   :  { %v4362_v15 = vpop.eup %4361  ;;  %v2670_v29 = vmul.f32 1.442695, %v2667_v24  ;;  %v2449_v32 = vsel %vm449_vm2, %v4360_v25, 0.0  ;;  %v2799_v24 = vld [vmem:[#allocation7 + $0xf8] sm:$0xff] }
0x11e8   :  { %2450 = vadd.xlane.f32.xlu1 %v2449_v32  ;;  %v2446_v34 = vsel %vm449_vm2, %v4362_v15, 0.0 }
0x11e9   :  { %4365 = vpow2.f32 %v2670_v29  ;;  %2447 = vadd.xlane.f32.xlu0 %v2446_v34 }
0x11ef   :  { %v4364_v42 = vpop.eup %4363 }
0x11f0   :  { %v2672_v36 = vsel %vm449_vm2, %v4364_v42, 0.0 }
0x11f1   :  { %2673 = vadd.xlane.f32.xlu0 %v2672_v36 }
0x11f3   :  { %v4366_v38 = vpop.eup %4365 }
0x11f4   :  { %v2675_v39 = vsel %vm449_vm2, %v4366_v38, 0.0 }
0x11f5   :  { %2676 = vadd.xlane.f32.xlu1 %v2675_v39 }
0x1206   :  { %4295 = vrot.lane.b32.xlu1 %v5056_v19, %s4531_s19 }
0x1207   :  { %4290 = vrot.lane.b32.xlu0 %v5056_v19, %s4529_s1 }
0x120a   :  { %2321 = vrot.lane.b32.xlu1 %v2310_v50, %s4531_s19 }
0x120e   :  { %2323 = vrot.lane.b32.xlu1 %v3756_v37, %s4531_s19 }
0x1275   :  { %v2451_v44 = vpop.xlane.xlu1 %2450 }
0x1276   :  { %v2448_v59 = vpop.xlane.xlu0 %2447 }
0x1277   :  { %4367 = vrcp.f32 %v2448_v59 }
0x1278   :  { %4369 = vrcp.f32 %v2451_v44 }
0x127e   :  { %v2674_v9 = vpop.xlane.xlu0 %2673 }
0x127f   :  { %4371 = vrcp.f32 %v2674_v9  ;;  %v3314_v9 = vld [vmem:[%s5302_s7 + $0x1] ss:$0 sm:$0xff] }
0x1281   :  { %v4368_v43 = vpop.eup %4367 }
0x1282   :  { %v2677_v45 = vpop.xlane.xlu1 %2676  ;;  %v4291_v46 = vpop.permute.xlu0 %4290  ;;  %v2453_v6 = vmul.f32 %v4368_v43, %v4362_v15 }
0x1283   :  { %4373 = vrcp.f32 %v2677_v45  ;;  %v4293_v47 = vunpack.i.h.bf16 %v4291_v46  ;;  %v4292_v41 = vunpack.i.l.bf16 %v4291_v46  ;;  %v4370_v30 = vpop.eup %4369 }
0x1284   :  { %3768 = vmatprep.mubr.msk.f32.mxu0 %vm449_vm2, %v2453_v6  ;;  %v2455_v48 = vmul.f32 %v4370_v30, %v4360_v25  ;;  %v4152_v25 = vpack.c.bf16 %v2799_v24, %v2798_v18  ;;  %v3340_v18 = vld [vmem:[%s5305_s10 + $0x1a8] sm:$0xff]  ;;  %v3342_v24 = vld [vmem:[%s5305_s10 + $0x1b8] sm:$0xff] }
0x1285   :  { %v4110_v19 = vpack.c.bf16 %v4293_v47, %v4292_v41  ;;  %v1631_v47 = vadd.f32 %v5033_v3, %v5028_v60  ;;  %v3324_v60 = vld [vmem:[%s5305_s10 + $0x128] sm:$0xff]  ;;  %v3326_v3 = vld [vmem:[%s5305_s10 + $0x138] sm:$0xff] }
0x1286   :  { %v4296_v27 = vpop.permute.xlu1 %4295 }
0x1287   :  { %v4298_v13 = vunpack.i.h.bf16 %v4296_v27  ;;  %v4297_v22 = vunpack.i.l.bf16 %v4296_v27  ;;  %4111 = vmatprep.subr.bf16.mxu0 %v4110_v19  ;;  %v5147_v30 = vadd.f32 %v1631_v47, %v4978_v40  ;;  %v3320_v27 = vld [vmem:[%s5305_s10 + $0x108] sm:$0xff]  ;;  %v3321_v40 = vld [vmem:[%s5305_s10 + $0x110] sm:$0xff] }
0x1288   :  { %4113 = vmatpush3.bf16.msra.mxu0 %v4110_v19  ;;  %v3087_v47 = vld [vmem:[#allocation9 + $0x180] sm:$0xff] }
0x1289   :  { %v4372_v23 = vpop.eup %4371  ;;  %v4120_v37 = vpack.c.bf16 %v4298_v13, %v4297_v22  ;;  %v3322_v13 = vld [vmem:[%s5305_s10 + $0x118] sm:$0xff] }
0x128a   :  { %v2322_v50 = vpop.permute.xlu1 %2321  ;;  %v2679_v51 = vmul.f32 %v4372_v23, %v4364_v42  ;;  %v4160_v23 = vpack.c.bf16 %v3326_v3, %v3324_v60  ;;  %v3073_v3 = vld [vmem:[#allocation9 + $0x110] sm:$0xff] }
0x128b   :  { %2327 = vst.msk [vmem:[#allocation3] sm:$0xff] %vm779_vm3, %v2322_v50  ;;  %3769 = vmatmul.mubr.msk.f32.vlgmr.msra.gmra.mrb[16].mxu0 %vm449_vm2, %v2455_v48  ;;  %4121 = vmatprep.subr.bf16.mxu0 %v4120_v37  ;;  %v3323_v48 = vld [vmem:[%s5305_s10 + $0x120] sm:$0xff]  ;;  %v3328_v50 = vld [vmem:[%s5305_s10 + $0x148] sm:$0xff] }
0x128c   :  { %4123 = vmatpush3.bf16.msra.mxu0 %v4120_v37  ;;  %3782 = vmatprep.mubr.msk.f32.mxu0 %vm449_vm2, %v2679_v51  ;;  %v3325_v37 = vld [vmem:[%s5305_s10 + $0x130] sm:$0xff]  ;;  %v3330_v51 = vld [vmem:[%s5305_s10 + $0x158] sm:$0xff] }
0x128d   :  { %v4374_v52 = vpop.eup %4373  ;;  %4125 = vmatprep.subr.bf16.mxu0 %v4124_v55 }
0x128e   :  { %v2681_v53 = vmul.f32 %v4374_v52, %v4366_v38  ;;  %v2324_v54 = vpop.permute.xlu1 %2323  ;;  %v4162_v52 = vpack.c.bf16 %v3325_v37, %v3323_v48  ;;  %v3092_v48 = vld [vmem:[#allocation9 + $0x1a8] sm:$0xff] }
0x128f   :  { %2328 = vst.msk [vmem:[#allocation3 + $0x8] sm:$0xff] %vm779_vm3, %v2324_v54  ;;  %v3327_v54 = vld [vmem:[%s5305_s10 + $0x140] sm:$0xff] }
0x1290   :  { %3783 = vmatmul.mubr.msk.f32.vlgmr.msra.gmra.mrb[18].mxu0 %vm449_vm2, %v2681_v53  ;;  %v4164_v53 = vpack.c.bf16 %v3330_v51, %v3328_v50  ;;  %v4166_v26 = vpack.c.bf16 %v3329_v10, %v3327_v54  ;;  %v3075_v51 = vld [vmem:[#allocation9 + $0x120] sm:$0xff] }
0x1291   :  { %4127 = vmatpush3.bf16.msra.mxu0 %v4124_v55 }
0x1292   :  { %4129 = vmatprep.subr.bf16.mxu0 %v4128_v57 }
0x1295   :  { %4131 = vmatpush3.bf16.msra.mxu0 %v4128_v57 }
0x1296   :  { %4133 = vmatprep.subr.bf16.mxu0 %v4132_v33 }
0x1299   :  { %4135 = vmatpush3.bf16.msra.mxu0 %v4132_v33 }
0x129a   :  { %4137 = vmatprep.subr.bf16.mxu0 %v4136_v62 }
0x129d   :  { %4139 = vmatpush3.bf16.msra.mxu0 %v4136_v62  ;;  %v3332_v62 = vld [vmem:[%s5305_s10 + $0x168] sm:$0xff] }
0x129e   :  { %4141 = vmatprep.subr.bf16.mxu0 %v4140_v4  ;;  %v4168_v2 = vpack.c.bf16 %v3334_v1, %v3332_v62  ;;  %v3318_v62 = vld [vmem:[%s5304_s9 + $0x1] ss:$0 sm:$0xff] }
0x12a1   :  { %4143 = vmatpush3.bf16.msra.mxu0 %v4140_v4  ;;  %v3331_v4 = vld [vmem:[%s5305_s10 + $0x160] sm:$0xff] }
0x12a2   :  { %4145 = vmatprep.subr.bf16.mxu0 %v4144_v12  ;;  %v4170_v63 = vpack.c.bf16 %v3333_v31, %v3331_v4 }
0x12a5   :  { %4147 = vmatpush3.bf16.msra.mxu0 %v4144_v12  ;;  %v4172_v12 = vpack.c.bf16 %v3338_v11, %v3336_v5  ;;  %v3094_v11 = vld [vmem:[#allocation9 + $0x1b8] sm:$0xff] }
0x12a6   :  { %4149 = vmatprep.subr.bf16.mxu0 %v4148_v21 }
0x12a9   :  { %4151 = vmatpush3.bf16.msra.mxu0 %v4148_v21  ;;  %v4174_v21 = vpack.c.bf16 %v3337_v20, %v3335_v16  ;;  %v3077_v16 = vld [vmem:[#allocation9 + $0x130] sm:$0xff]  ;;  %v3078_v20 = vld [vmem:[#allocation9 + $0x138] sm:$0xff] }
0x12aa   :  { %4153 = vmatprep.subr.bf16.mxu0 %v4152_v25 }
0x12ad   :  { %4155 = vmatpush3.bf16.msra.mxu0 %v4152_v25  ;;  %v4176_v25 = vpack.c.bf16 %v3342_v24, %v3340_v18  ;;  %v3095_v18 = vld [vmem:[#allocation9 + $0x1c0] sm:$0xff]  ;;  %v3096_v24 = vld [vmem:[#allocation9 + $0x1c8] sm:$0xff] }
0x135e   :  { %v3770_v15 = vpop.f32.mrb[16].mxu0 }
0x135f   :  { %2549 = vrot.lane.b32.xlu1 %v3770_v15, %s4529_s1  ;;  %v2536_v29 = vpop.f32.mrb[17].mxu0  ;;  %v3339_v15 = vld [vmem:[%s5305_s10 + $0x1a0] sm:$0xff] }
0x1360   :  { %2547 = vrot.lane.b32.xlu0 %v2536_v29, %s4529_s1  ;;  %v3341_v29 = vld [vmem:[%s5305_s10 + $0x1b0] sm:$0xff] }
0x1363   :  { %v3784_v32 = vpop.f32.mrb[18].mxu0 }
0x1364   :  { %2775 = vrot.lane.b32.xlu1 %v3784_v32, %s4530_s14  ;;  %v2762_v34 = vpop.f32.mrb[19].mxu0  ;;  %v4178_v32 = vpack.c.bf16 %v3341_v29, %v3339_v15  ;;  %v3080_v15 = vld [vmem:[#allocation9 + $0x148] sm:$0xff] }
0x1365   :  { %2773 = vrot.lane.b32.xlu0 %v2762_v34, %s4530_s14  ;;  %v3344_v34 = vld [vmem:[%s5305_s10 + $0x1c8] sm:$0xff] }
0x13d1   :  { %v2550_v42 = vpop.permute.xlu1 %2549 }
0x13d2   :  { %2554 = vst.msk [vmem:[#allocation3 + $0x8] sm:$0xff] %vm1006_vm4, %v2550_v42  ;;  %v2548_v36 = vpop.permute.xlu0 %2547  ;;  %v3346_v42 = vld [vmem:[%s5305_s10 + $0x1d8] sm:$0xff] }
0x13d3   :  { %2553 = vst.msk [vmem:[#allocation3] sm:$0xff] %vm1006_vm4, %v2548_v36  ;;  %v3343_v36 = vld [vmem:[%s5305_s10 + $0x1c0] sm:$0xff] }
0x13d6   :  { %v2776_v38 = vpop.permute.xlu1 %2775 }
0x13d7   :  { %2780 = vst.msk [vmem:[#allocation3 + $0x8] sm:$0xff] %vm1233_vm5, %v2776_v38  ;;  %v2774_v39 = vpop.permute.xlu0 %2773  ;;  %v4180_v38 = vpack.c.bf16 %v3346_v42, %v3344_v34  ;;  %v3081_v42 = vld [vmem:[#allocation9 + $0x150] sm:$0xff] }
0x13d8   :  { %2779 = vst.msk [vmem:[#allocation3] sm:$0xff] %vm1233_vm5, %v2774_v39  ;;  %v3345_v39 = vld [vmem:[%s5305_s10 + $0x1d0] sm:$0xff] }
0x13de   :  { %v2782_v44 = vld [vmem:[#allocation3 + $0x8] sm:$0xff] }
0x13df   :  { %v2781_v59 = vld [vmem:[#allocation3] sm:$0xff] }
0x13e0   :  { %3817 = vmatprep.mubr.f32.mxu0 %v2781_v59  ;;  %v3348_v59 = vld [vmem:[%s5305_s10 + $0x1e8] sm:$0xff] }
0x13e1   :  { %3818 = vmatmul.mubr.f32.vlgmr.msra.gmra.mrb[20].mxu0 %v2782_v44  ;;  %v3350_v44 = vld [vmem:[%s5305_s10 + $0x1f8] sm:$0xff] }
0x14b4   :  { %v3819_v43 = vpop.f32.mrb[20].mxu0 }
0x14b5   :  { %v2880_v45 = vadd.f32 %v3819_v43, %v3314_v9  ;;  %v2874_v46 = vpop.f32.mrb[21].mxu0  ;;  %v4184_v43 = vpack.c.bf16 %v3350_v44, %v3348_v59  ;;  %v3100_v59 = vld [vmem:[#allocation9 + $0x1e8] sm:$0xff] }
0x14b6   :  { %v2875_v6 = vadd.f32 %v3314_v9, %v2874_v46  ;;  %v4182_v9 = vpack.c.bf16 %v3345_v39, %v3343_v36  ;;  %v3349_v46 = vld [vmem:[%s5305_s10 + $0x1f0] sm:$0xff]  ;;  %v3082_v36 = vld [vmem:[#allocation9 + $0x158] sm:$0xff] }
0x14b7   :  { %v2884_v41 = vadd.f32 %v2880_v45, %v4992_v8  ;;  %v3319_v8 = vld [vmem:[%s5305_s10 + $0x100] sm:$0xff]  ;;  %v3099_v39 = vld [vmem:[#allocation9 + $0x1e0] sm:$0xff] }
0x14b8   :  { %v2883_v19 = vadd.f32 %v2875_v6, %v4985_v7  ;;  %v4156_v7 = vpack.c.bf16 %v3322_v13, %v3320_v27  ;;  %v4158_v22 = vpack.c.bf16 %v3321_v40, %v3319_v8  ;;  %v3347_v45 = vld [vmem:[%s5305_s10 + $0x1e0] sm:$0xff]  ;;  %v3072_v13 = vld [vmem:[#allocation9 + $0x108] sm:$0xff]  ;;  %v4212_v44 = vpack.c.bf16 %v3100_v59, %v3099_v39 }
0x14b9   :  { %2891 = vadd.xlane.f32.xlu1 %v2884_v41  ;;  %v4186_v6 = vpack.c.bf16 %v3349_v46, %v3347_v45  ;;  %v3089_v8 = vld [vmem:[#allocation9 + $0x190] sm:$0xff] }
0x14ba   :  { %2889 = vadd.xlane.f32.xlu0 %v2883_v19  ;;  %4157 = vmatprep.subr.bf16.mxu1 %v4156_v7  ;;  %v3090_v7 = vld [vmem:[#allocation9 + $0x198] sm:$0xff]  ;;  %v3101_v46 = vld [vmem:[#allocation9 + $0x1f0] sm:$0xff] }
0x14bb   :  { %4159 = vmatpush1.bf16.msra.mxu1 %v4158_v22  ;;  %v4192_v60 = vpack.c.bf16 %v3090_v7, %v3089_v8  ;;  %v3074_v22 = vld [vmem:[#allocation9 + $0x118] sm:$0xff] }
0x14bc   :  { %4161 = vmatprep.subr.bf16.mxu1 %v4160_v23  ;;  %v3091_v23 = vld [vmem:[#allocation9 + $0x1a0] sm:$0xff]  ;;  %v4194_v37 = vpack.c.bf16 %v3074_v22, %v3073_v3 }
0x14bd   :  { %1640 = vadd.xlane.f32.xlu1 %v5147_v30  ;;  %v4196_v50 = vpack.c.bf16 %v3092_v48, %v3091_v23 }
0x14bf   :  { %4163 = vmatpush1.bf16.msra.mxu1 %v4162_v52  ;;  %v3076_v52 = vld [vmem:[#allocation9 + $0x128] sm:$0xff] }
0x14c0   :  { %4165 = vmatprep.subr.bf16.mxu1 %v4164_v53  ;;  %v4198_v53 = vpack.c.bf16 %v3076_v52, %v3075_v51 }
0x14c3   :  { %4167 = vmatpush1.bf16.msra.mxu1 %v4166_v26 }
0x14c4   :  { %4169 = vmatprep.subr.bf16.mxu1 %v4168_v2 }
0x14c7   :  { %4171 = vmatpush1.bf16.msra.mxu1 %v4170_v63 }
0x14c8   :  { %4173 = vmatprep.subr.bf16.mxu1 %v4172_v12 }
0x14cb   :  { %4175 = vmatpush1.bf16.msra.mxu1 %v4174_v21  ;;  %v4202_v21 = vpack.c.bf16 %v3078_v20, %v3077_v16 }
0x14cc   :  { %4177 = vmatprep.subr.bf16.mxu1 %v4176_v25  ;;  %v3079_v25 = vld [vmem:[#allocation9 + $0x140] sm:$0xff] }
0x14cd   :  { %v4206_v29 = vpack.c.bf16 %v3080_v15, %v3079_v25 }
0x14cf   :  { %4179 = vmatpush1.bf16.msra.mxu1 %v4178_v32  ;;  %v3098_v32 = vld [vmem:[#allocation9 + $0x1d8] sm:$0xff] }
0x14d0   :  { %4181 = vmatprep.subr.bf16.mxu1 %v4180_v38  ;;  %v4210_v38 = vpack.c.bf16 %v3082_v36, %v3081_v42 }
0x14d3   :  { %4183 = vmatpush1.bf16.msra.mxu1 %v4182_v9  ;;  %v3083_v9 = vld [vmem:[#allocation9 + $0x160] sm:$0xff] }
0x14d4   :  { %4185 = vmatprep.subr.bf16.mxu1 %v4184_v43  ;;  %v3084_v43 = vld [vmem:[#allocation9 + $0x168] sm:$0xff] }
0x14d5   :  { %v4214_v45 = vpack.c.bf16 %v3084_v43, %v3083_v9 }
0x14d7   :  { %4187 = vmatpush1.bf16.msra.mxu1 %v4186_v6  ;;  %v3102_v6 = vld [vmem:[#allocation9 + $0x1f8] sm:$0xff] }
0x1546   :  { %v2892_v28 = vpop.xlane.xlu1 %2891 }
0x1547   :  { %v2890_v55 = vpop.xlane.xlu0 %2889  ;;  %v2894_v56 = vmul.f32 0.0078125, %v2892_v28 }
0x1548   :  { %v2893_v57 = vmul.f32 0.0078125, %v2890_v55 }
0x1549   :  { %v5188_v49 = vsub.f32 %v2884_v41, %v2894_v56  ;;  %v3088_v41 = vld [vmem:[#allocation9 + $0x188] sm:$0xff] }
0x154a   :  { %v5186_v58 = vsub.f32 %v2883_v19, %v2893_v57  ;;  %v3071_v19 = vld [vmem:[#allocation9 + $0x100] sm:$0xff]  ;;  %v4188_v27 = vpack.c.bf16 %v3088_v41, %v3087_v47  ;;  %v4216_v47 = vpack.c.bf16 %v3102_v6, %v3101_v46  ;;  %v3085_v41 = vld [vmem:[#allocation9 + $0x170] sm:$0xff] }
0x154b   :  { %v2898_v35 = vmul.f32 %v5188_v49, %v5188_v49  ;;  %v4190_v40 = vpack.c.bf16 %v3072_v13, %v3071_v19  ;;  %v3086_v19 = vld [vmem:[#allocation9 + $0x178] sm:$0xff]  ;;  %v3351_v13 = vld [vmem:[%s5306_s11 + $0x2] sm:$0x3] }
0x154c   :  { %v2897_v33 = vmul.f32 %v5186_v58, %v5186_v58  ;;  %4189 = vmatprep.subr.bf16.mxu0 %v4188_v27  ;;  %v4218_v27 = vpack.c.bf16 %v3086_v19, %v3085_v41  ;;  %v2966_v8 = vrot.slane %v3351_v13, %v4708_v14  ;;  %v2970_v7 = vrot.slane %v3351_v13, %v4715_v17 }
0x154d   :  { %4191 = vmatpush3.bf16.msra.mxu0 %v4190_v40 }
0x154e   :  { %2899 = vadd.xlane.f32.xlu0 %v2897_v33  ;;  %4193 = vmatprep.subr.bf16.mxu0 %v4192_v60  ;;  %v3317_v33 = vld [vmem:[%s5303_s8 + $0x1] ss:$0 sm:$0xff] }
0x1551   :  { %4195 = vmatpush3.bf16.msra.mxu0 %v4194_v37 }
0x1552   :  { %2901 = vadd.xlane.f32.xlu0 %v2898_v35  ;;  %4197 = vmatprep.subr.bf16.mxu0 %v4196_v50 }
0x1555   :  { %4199 = vmatpush3.bf16.msra.mxu0 %v4198_v53 }
0x1556   :  { %1638 = vadd.xlane.f32.xlu0 %v5196_v61 }
0x15db   :  { %v2900_v54 = vpop.xlane.xlu0 %2899 }
0x15dc   :  { %v2903_v10 = vmul.f32 0.0078125, %v2900_v54 }
0x15de   :  { %v2905_v26 = vadd.f32 1e-12, %v2903_v10 }
0x15df   :  { %v2902_v28 = vpop.xlane.xlu0 %2901 }
0x15e0   :  { %4375 = vrsqrt.f32 %v2905_v26  ;;  %v2904_v55 = vmul.f32 0.0078125, %v2902_v28 }
0x15e2   :  { %v2906_v56 = vadd.f32 1e-12, %v2904_v55 }
0x15e4   :  { %4377 = vrsqrt.f32 %v2906_v56 }
0x15ea   :  { %v4376_v57 = vpop.eup %4375 }
0x15eb   :  { %v2909_v35 = vmul.f32 %v4376_v57, %v5186_v58  ;;  %v3093_v58 = vld [vmem:[#allocation9 + $0x1b0] sm:$0xff] }
0x15ec   :  { %v4200_v12 = vpack.c.bf16 %v3094_v11, %v3093_v58  ;;  %v3232_v11 = vstv %s3231_s24 }
0x15ed   :  { %v2917_v1 = vmul.f32 %v3317_v33, %v2909_v35 }
0x15ee   :  { %v4378_v2 = vpop.eup %4377  ;;  %4201 = vmatprep.subr.bf16.mxu0 %v4200_v12  ;;  %v3233_v12 = vmul.f32 1.442695, %v3232_v11 }
0x15ef   :  { %v5266_v4 = vadd.f32 %v3318_v62, %v2917_v1  ;;  %v2910_v31 = vmul.f32 %v4378_v2, %v5188_v49  ;;  %4203 = vmatpush3.bf16.msra.mxu0 %v4202_v21  ;;  %v4204_v49 = vpack.c.bf16 %v3096_v24, %v3095_v18  ;;  %v1639_v18 = vpop.xlane.xlu0 %1638 }
0x15f0   :  { %v1642_v15 = vmul.f32 0.0078125, %v1639_v18 }
0x15f1   :  { %3038 = vmatmul.mubr.f32.vlgmr.msra.gmra.mrb[34].mxu1 %v5266_v4  ;;  %v2918_v63 = vmul.f32 %v3317_v33, %v2910_v31  ;;  %4205 = vmatprep.subr.bf16.mxu0 %v4204_v49  ;;  %v3353_v49 = vld [vmem:[%s5308_s13 + $0x1] ss:$0 sm:$0xff] }
0x15f2   :  { %3043 = vmatprep.mubr.f32.mxu1 %v4528_v0  ;;  %v3097_v0 = vld [vmem:[#allocation9 + $0x1d0] sm:$0xff] }
0x15f3   :  { %v5271_v5 = vadd.f32 %v3318_v62, %v2918_v63  ;;  %4207 = vmatpush3.bf16.msra.mxu0 %v4206_v29  ;;  %v4208_v34 = vpack.c.bf16 %v3098_v32, %v3097_v0  ;;  %v1641_v0 = vpop.xlane.xlu1 %1640 }
0x15f4   :  { %v1643_v36 = vmul.f32 0.0078125, %v1641_v0 }
0x15f5   :  { %3044 = vmatmul.mubr.f32.gmra.mrb[36].mxu1 %v5271_v5  ;;  %4209 = vmatprep.subr.bf16.mxu0 %v4208_v34 }
0x15f6   :  { %v1645_v9 = vsub.f32 %v5147_v30, %v1643_v36 }
0x15f7   :  { %4211 = vmatpush3.bf16.msra.mxu0 %v4210_v38  ;;  %v1644_v38 = vsub.f32 %v5196_v61, %v1642_v15 }
0x15f8   :  { %4213 = vmatprep.subr.bf16.mxu0 %v4212_v44  ;;  %v1647_v46 = vmul.f32 %v1645_v9, %v1645_v9 }
0x15f9   :  { %v1646_v43 = vmul.f32 %v1644_v38, %v1644_v38 }
0x15fb   :  { %4215 = vmatpush3.bf16.msra.mxu0 %v4214_v45 }
0x15fc   :  { %4217 = vmatprep.subr.bf16.mxu0 %v4216_v47 }
0x15ff   :  { %4219 = vmatpush3.bf16.msra.mxu0 %v4218_v27 }
0x16c4   :  { %v3039_v40 = vpop.f32.mrb[34].mxu1 }
0x16c5   :  { %v3040_v60 = vadd.f32 %v3039_v40, %v2966_v8  ;;  %v3041_v3 = vpop.f32.mrb[35].mxu1 }
0x16c6   :  { %v3042_v22 = vadd.f32 %v3041_v3, %v2970_v7 }
0x16c7   :  { %v3054_v23 = vmul.f32 0.70710677, %v3040_v60  ;;  %v3050_v55 = vmul.f32 0.5, %v3040_v60 }
0x16c8   :  { %v3055_v48 = vmul.f32 0.70710677, %v3042_v22  ;;  %v3045_v37 = vpop.f32.mrb[36].mxu1  ;;  %v3051_v17 = vmul.f32 0.5, %v3042_v22 }
0x16c9   :  { %4379 = verf.f32 %v3054_v23  ;;  %v3046_v50 = vadd.f32 %v3045_v37, %v2966_v8  ;;  %v3047_v51 = vpop.f32.mrb[37].mxu1 }
0x16ca   :  { %4381 = verf.f32 %v3055_v48  ;;  %v3048_v52 = vadd.f32 %v3047_v51, %v2970_v7 }
0x16cb   :  { %v3056_v53 = vmul.f32 0.70710677, %v3046_v50  ;;  %v3052_v31 = vmul.f32 0.5, %v3046_v50 }
0x16cc   :  { %v3057_v54 = vmul.f32 0.70710677, %v3048_v52  ;;  %v3053_v1 = vmul.f32 0.5, %v3048_v52 }
0x16cd   :  { %4383 = verf.f32 %v3056_v53 }
0x16ce   :  { %4385 = verf.f32 %v3057_v54  ;;  %v3286_v54 = vld [vmem:[#allocation10] ss:$0 sm:$0xff] }
0x16cf   :  { %4387 = vpow2.f32 %v3233_v12 }
0x16d3   :  { %v4380_v10 = vpop.eup %4379 }
0x16d4   :  { %v4382_v14 = vpop.eup %4381  ;;  %v3062_v26 = vadd.f32 1.0, %v4380_v10 }
0x16d5   :  { %v3063_v28 = vadd.f32 1.0, %v4382_v14 }
0x16d6   :  { %v3066_v35 = vmul.f32 %v3062_v26, %v3050_v55 }
0x16d7   :  { %v4384_v56 = vpop.eup %4383  ;;  %v3067_v57 = vmul.f32 %v3063_v28, %v3051_v17  ;;  %v3287_v17 = vld [vmem:[#allocation12] ss:$0 sm:$0xff]  ;;  %v3354_v28 = vld [vmem:[#allocation10 + $0x1] ss:$0 sm:$0xff] }
0x16d8   :  { %v4386_v33 = vpop.eup %4385  ;;  %v3064_v62 = vadd.f32 1.0, %v4384_v56  ;;  %v3355_v56 = vld [vmem:[#allocation12 + $0x1] ss:$0 sm:$0xff] }
0x16d9   :  { %v3065_v2 = vadd.f32 1.0, %v4386_v33  ;;  %3175 = vmatprep.mubr.f32.mxu0 %v3067_v57  ;;  %v4388_v16 = vpop.eup %4387 }
0x16da   :  { %3176 = vmatmul.mubr.f32.vlgmr.msra.gmra.mrb[22].mxu0 %v3066_v35  ;;  %v3068_v58 = vmul.f32 %v3064_v62, %v3052_v31  ;;  %4220 = vpush %v4388_v16 }
0x16db   :  { %v3069_v63 = vmul.f32 %v3065_v2, %v3053_v1 }
0x16dd   :  { %3180 = vmatprep.mubr.f32.mxu0 %v3069_v63 }
0x16de   :  { %3181 = vmatmul.mubr.f32.gmra.mrb[24].mxu0 %v3068_v58 }
0x170b   :  { %s4221_s29 = spop %4220 }
0x170c   :  { %s3236_s15 = sadd.f32 1.0, %s4221_s29 }
0x170e   :  { %v3237_v20 = vstv %s3236_s15 }
0x170f   :  { %4389 = vrcp.f32 %v3237_v20 }
0x1719   :  { %v4390_v21 = vpop.eup %4389 }
0x171a   :  { %4222 = vpush %v4390_v21 }
0x174b   :  { %s4223_s13 = spop %4222 }
0x174c   :  { %s3243_s1 = ssub.f32 1.0, %s4223_s13  ;;  %v3240_v1 = vstv %s4223_s13 }
0x174e   :  { %v3244_v2 = vstv %s3243_s1 }
0x17ad   :  { %v3562_v24 = vpop.f32.mrb[22].mxu0 }
0x17ae   :  { %v3563_v25 = vpop.f32.mrb[23].mxu0 }
0x17af   :  { %v3564_v29 = vadd.f32 %v3563_v25, %v3562_v24 }
0x17b1   :  { %v3178_v32 = vadd.f32 %v3564_v29, %v3353_v49  ;;  %v3565_v34 = vpop.f32.mrb[24].mxu0 }
0x17b2   :  { %v3566_v42 = vpop.f32.mrb[25].mxu0 }
0x17b3   :  { %v3567_v39 = vadd.f32 %v3566_v42, %v3565_v34  ;;  %v3186_v59 = vadd.f32 %v3178_v32, %v5266_v4 }
0x17b5   :  { %v3183_v44 = vadd.f32 %v3567_v39, %v3353_v49  ;;  %3192 = vadd.xlane.f32.xlu0 %v3186_v59 }
0x17b7   :  { %v3187_v45 = vadd.f32 %v3183_v44, %v5271_v5 }
0x17b9   :  { %1648 = vadd.xlane.f32.xlu0 %v1646_v43  ;;  %3194 = vadd.xlane.f32.xlu1 %v3187_v45 }
0x17bd   :  { %1650 = vadd.xlane.f32.xlu1 %v1647_v46 }
0x1842   :  { %v3193_v6 = vpop.xlane.xlu0 %3192 }
0x1843   :  { %v3196_v47 = vmul.f32 0.0078125, %v3193_v6 }
0x1845   :  { %v3198_v41 = vsub.f32 %v3186_v59, %v3196_v47 }
0x1846   :  { %v3195_v19 = vpop.xlane.xlu1 %3194  ;;  %v1649_v8 = vpop.xlane.xlu0 %1648 }
0x1847   :  { %v3197_v27 = vmul.f32 0.0078125, %v3195_v19  ;;  %v3200_v61 = vmul.f32 %v3198_v41, %v3198_v41  ;;  %v1652_v7 = vmul.f32 0.0078125, %v1649_v8 }
0x1849   :  { %v3199_v13 = vsub.f32 %v3187_v45, %v3197_v27  ;;  %3202 = vadd.xlane.f32.xlu0 %v3200_v61  ;;  %v1654_v40 = vadd.f32 1e-12, %v1652_v7 }
0x184a   :  { %v1651_v30 = vpop.xlane.xlu1 %1650 }
0x184b   :  { %v3201_v4 = vmul.f32 %v3199_v13, %v3199_v13  ;;  %v1653_v60 = vmul.f32 0.0078125, %v1651_v30  ;;  %4391 = vrsqrt.f32 %v1654_v40 }
0x184d   :  { %3204 = vadd.xlane.f32.xlu1 %v3201_v4  ;;  %v1655_v5 = vadd.f32 1e-12, %v1653_v60 }
0x184f   :  { %4393 = vrsqrt.f32 %v1655_v5 }
0x1855   :  { %v4392_v50 = vpop.eup %4391 }
0x1856   :  { %v1658_v52 = vmul.f32 %v4392_v50, %v1644_v38 }
0x1858   :  { %v1666_v14 = vmul.f32 %v3286_v54, %v1658_v52 }
0x1859   :  { %v4394_v53 = vpop.eup %4393 }
0x185a   :  { %v1659_v10 = vmul.f32 %v4394_v53, %v1645_v9  ;;  %v1674_v33 = vadd.f32 %v3287_v17, %v1666_v14 }
0x185c   :  { %v1667_v57 = vmul.f32 %v3286_v54, %v1659_v10  ;;  %v3241_v11 = vmul.f32 %v3240_v1, %v1674_v33 }
0x185e   :  { %v1675_v58 = vadd.f32 %v3287_v17, %v1667_v57 }
0x1860   :  { %v3242_v18 = vmul.f32 %v3240_v1, %v1675_v58 }
0x18d6   :  { %v3203_v3 = vpop.xlane.xlu0 %3202 }
0x18d7   :  { %v3206_v22 = vmul.f32 0.0078125, %v3203_v3 }
0x18d9   :  { %v3208_v23 = vadd.f32 1e-12, %v3206_v22 }
0x18da   :  { %v3205_v48 = vpop.xlane.xlu1 %3204 }
0x18db   :  { %4395 = vrsqrt.f32 %v3208_v23  ;;  %v3207_v37 = vmul.f32 0.0078125, %v3205_v48 }
0x18dd   :  { %v3209_v51 = vadd.f32 1e-12, %v3207_v37 }
0x18df   :  { %4397 = vrsqrt.f32 %v3209_v51 }
0x18e5   :  { %v4396_v26 = vpop.eup %4395 }
0x18e6   :  { %v3212_v55 = vmul.f32 %v4396_v26, %v3198_v41 }
0x18e8   :  { %v3220_v35 = vmul.f32 %v3354_v28, %v3212_v55 }
0x18e9   :  { %v4398_v62 = vpop.eup %4397 }
0x18ea   :  { %v3228_v31 = vadd.f32 %v3355_v56, %v3220_v35  ;;  %v3213_v63 = vmul.f32 %v4398_v62, %v3199_v13 }
0x18ec   :  { %v3245_v12 = vmul.f32 %v3244_v2, %v3228_v31  ;;  %v3221_v16 = vmul.f32 %v3354_v28, %v3213_v63 }
0x18ee   :  { %v3247_v20 = vadd.f32 %v3245_v12, %v3241_v11  ;;  %v3229_v21 = vadd.f32 %v3355_v56, %v3221_v16 }
0x18f0   :  { %3249 = vst [vmem:[%s5311_s16] sm:$0xff] %v3247_v20  ;;  %v3246_v24 = vmul.f32 %v3244_v2, %v3229_v21 }
0x18f2   :  { %v3248_v49 = vadd.f32 %v3246_v24, %v3242_v18 }
0x18f4   :  { %3250 = vst [vmem:[%s5311_s16 + $0x8] sm:$0xff] %v3248_v49 }
0x18f5   :  { %3255 = vsyncpa [#allocation6], 1 }
0x18f6   :  { %3256 = vsyncpa [#allocation8], 1 }
0x18f7   :  { %3257 = vsyncpa [#allocation11], 1 }

</bundles_post_ra>
